<compile_context>
chip_gen: v7x
topology: tpu7x:2x2x1
jax: 0.10.0
libtpu: 0.0.40
codegen_flags: <defaults>
</compile_context>

<pallas_src>
import functools

import jax
import jax.numpy as jnp
from jax import lax
from jax.experimental import pallas as pl
from jax.experimental.pallas import tpu as pltpu


def _stem_block_kernel(x_ref, w1_ref, w2_ref, wsc_ref, vec_ref, o_ref,
                       *, H, W, C_IN, C_OUT, C_SE):
    HW = H * W
    x = x_ref[0].astype(jnp.float32)                           # (C_IN, HW)

    # Column-validity masks for the 3x3 halo (only dx = +-1 need masking; row over/under-
    # flow is absorbed by the zero-extension below).  Hoisted: shared by both 3x3 convs.
    col = lax.broadcasted_iota(jnp.int32, (1, HW), 1) % W
    mask_l = col >= 1            # positions whose (w-1) neighbour is in range
    mask_r = col <= W - 2        # positions whose (w+1) neighbour is in range

    def _conv3x3(a, w_ref, bias, c_in):
        # 3x3 conv, stride 1, pad 1, done as 9*c_in rank-1 broadcast FMAs on the VPU.
        # w_ref: (C_OUT, 9*c_in), column index = (3*ky + kx) * c_in + ci.
        c = a.shape[0]
        z = jnp.zeros((c, W + 1), jnp.float32)
        ap = jnp.concatenate([z, a, z], axis=1)                # zero-extended, in registers
        acc = jnp.zeros((C_OUT, HW), jnp.float32)
        idx = 0
        for dy in (-1, 0, 1):
            for dx in (-1, 0, 1):
                off = dy * W + dx
                sk = ap[:, W + 1 + off: W + 1 + off + HW]      # (c_in, HW) shifted view
                if dx == -1:
                    sk = jnp.where(mask_l, sk, 0.0)
                elif dx == 1:
                    sk = jnp.where(mask_r, sk, 0.0)
                for ci in range(c_in):
                    acc = acc + w_ref[:, idx:idx + 1] * sk[ci:ci + 1, :]
                    idx += 1
        return acc + bias

    # Packed small vectors: [b1 | b2 | bsc | W_se1^T | W_se2]
    b1 = vec_ref[:, 0:1]
    b2 = vec_ref[:, 1:2]
    bsc = vec_ref[:, 2:3]
    wse1_t = vec_ref[:, 3:3 + C_SE]                            # (C_OUT, C_SE) = W_se1.T
    wse2 = vec_ref[:, 3 + C_SE:3 + 2 * C_SE]                   # (C_OUT, C_SE)

    # ---- c1: conv3x3 + folded BN + ReLU, then conv3x3 (+bias, no BN/act) ----
    t = jnp.maximum(_conv3x3(x, w1_ref, b1, C_IN), 0.0)        # (C_OUT, HW)
    x1 = _conv3x3(t, w2_ref, b2, C_OUT)                        # (C_OUT, HW)

    # ---- c2: 1x1 conv + folded BN (rank-1 VPU FMAs, no MXU) ----
    s_acc = jnp.zeros((C_OUT, HW), jnp.float32)
    for ci in range(C_IN):
        s_acc = s_acc + wsc_ref[:, ci:ci + 1] * x[ci:ci + 1, :]
    s_acc = s_acc + bsc

    z = x1 + s_acc                                             # (C_OUT, HW)

    # ---- Squeeze-Excitation: GAP -> FC -> ReLU -> FC -> sigmoid -> scale ----
    pooled = jnp.sum(z, axis=1, keepdims=True) * (1.0 / HW)    # (C_OUT, 1)  lane reduce
    h = jnp.sum(wse1_t * pooled, axis=0, keepdims=True)        # (1, C_SE)   sublane reduce
    h = jnp.maximum(h, 0.0)
    gate = jnp.sum(wse2 * h, axis=1, keepdims=True)            # (C_OUT, 1)
    gate = 1.0 / (1.0 + jnp.exp(-gate))

    o_ref[0] = (z * gate).astype(o_ref.dtype)                  # lane-dense (C_OUT, 256) store


def stem_block_pallas(x_nchw, params, eps=1e-5):
    """x_nchw: (N, C_IN, H, W) float32 -> (N, C_OUT, H, W). Stride==1 Stem_Block."""
    N, C_IN, H, W = x_nchw.shape
    C_OUT = params["w1"].shape[0]
    C_SE = params["wse1"].shape[0]
    HW = H * W

    # ---- fold eval-mode BatchNorm into conv weights / biases (plain-JAX glue) ----
    s1 = params["g1"] / jnp.sqrt(params["v1"] + eps)
    w1f = jnp.transpose(params["w1"], (0, 2, 3, 1)).reshape(C_OUT, 9 * C_IN) * s1[:, None]
    b1f = ((params["b1"] - params["m1"]) * s1 + params["be1"])[:, None]

    w2f = jnp.transpose(params["w2"], (0, 2, 3, 1)).reshape(C_OUT, 9 * C_OUT)
    b2f = params["b2"][:, None]

    ssc = params["gsc"] / jnp.sqrt(params["vsc"] + eps)
    wscf = params["wsc"].reshape(C_OUT, C_IN) * ssc[:, None]
    bscf = ((params["bsc"] - params["msc"]) * ssc + params["besc"])[:, None]

    # biases + SE weights packed into one small (C_OUT, 3 + 2*C_SE) array
    vec = jnp.concatenate([b1f, b2f, bscf, params["wse1"].T, params["wse2"]],
                          axis=1).astype(jnp.float32)

    x3 = x_nchw.reshape(N, C_IN, HW).astype(jnp.float32)       # free reshape, NCHW-native

    kernel = functools.partial(_stem_block_kernel,
                               H=H, W=W, C_IN=C_IN, C_OUT=C_OUT, C_SE=C_SE)

    out = pl.pallas_call(
        kernel,
        out_shape=jax.ShapeDtypeStruct((N, C_OUT, HW), jnp.float32),
        grid_spec=pltpu.PrefetchScalarGridSpec(
            num_scalar_prefetch=0,
            grid=(N,),
            in_specs=[
                pl.BlockSpec((1, C_IN, HW), lambda n: (n, 0, 0)),
                pl.BlockSpec((C_OUT, 9 * C_IN), lambda n: (0, 0)),
                pl.BlockSpec((C_OUT, 9 * C_OUT), lambda n: (0, 0)),
                pl.BlockSpec((C_OUT, C_IN), lambda n: (0, 0)),
                pl.BlockSpec((C_OUT, 3 + 2 * C_SE), lambda n: (0, 0)),
            ],
            out_specs=pl.BlockSpec((1, C_OUT, HW), lambda n: (n, 0, 0)),
        ),
        compiler_params=pltpu.CompilerParams(
            dimension_semantics=("parallel",)),
    )(x3, w1f.astype(jnp.float32), w2f.astype(jnp.float32),
      wscf.astype(jnp.float32), vec)

    return out.reshape(N, C_OUT, H, W)


def stem_block_ref(x, params, eps=1e-5):
    """Pure-JAX reference mirroring the PyTorch module (eval-mode BN), NCHW in/out."""
    def conv(t, w, stride, pad):
        return lax.conv_general_dilated(
            t, w, window_strides=(stride, stride), padding=((pad, pad), (pad, pad)),
            dimension_numbers=("NCHW", "OIHW", "NCHW"))

    def bn(t, g, b, m, v):
        s = g / jnp.sqrt(v + eps)
        return (t - m[None, :, None, None]) * s[None, :, None, None] + b[None, :, None, None]

    y = conv(x, params["w1"], 1, 1) + params["b1"][None, :, None, None]
    y = bn(y, params["g1"], params["be1"], params["m1"], params["v1"])
    y = jnp.maximum(y, 0.0)
    y = conv(y, params["w2"], 1, 1) + params["b2"][None, :, None, None]

    s = conv(x, params["wsc"], 1, 0) + params["bsc"][None, :, None, None]
    s = bn(s, params["gsc"], params["besc"], params["msc"], params["vsc"])

    z = y + s
    pooled = jnp.mean(z, axis=(2, 3))                           # (N, C_OUT)
    h = jnp.maximum(pooled @ params["wse1"].T, 0.0)             # (N, C_SE)
    g = 1.0 / (1.0 + jnp.exp(-(h @ params["wse2"].T)))          # (N, C_OUT)
    return z * g[:, :, None, None]


def make_params(key, c_in, c_out, r=8):
    c_se = c_out // r
    ks = jax.random.split(key, 16)

    def nrm(k, shape, scale):
        return scale * jax.random.normal(k, shape, jnp.float32)

    return {
        # c1[0]: Conv3x3(in->out) + bias, then BN
        "w1": nrm(ks[0], (c_out, c_in, 3, 3), 0.2),
        "b1": nrm(ks[1], (c_out,), 0.1),
        "g1": 1.0 + 0.1 * jax.random.normal(ks[2], (c_out,), jnp.float32),
        "be1": nrm(ks[3], (c_out,), 0.1),
        "m1": nrm(ks[4], (c_out,), 0.1),
        "v1": 1.0 + 0.1 * jnp.abs(jax.random.normal(ks[5], (c_out,), jnp.float32)),
        # c1[3]: Conv3x3(out->out) + bias (no BN / activation)
        "w2": nrm(ks[6], (c_out, c_out, 3, 3), 0.2),
        "b2": nrm(ks[7], (c_out,), 0.1),
        # c2: Conv1x1(in->out) + bias, then BN
        "wsc": nrm(ks[8], (c_out, c_in, 1, 1), 0.2),
        "bsc": nrm(ks[9], (c_out,), 0.1),
        "gsc": 1.0 + 0.1 * jax.random.normal(ks[10], (c_out,), jnp.float32),
        "besc": nrm(ks[11], (c_out,), 0.1),
        "msc": nrm(ks[12], (c_out,), 0.1),
        "vsc": 1.0 + 0.1 * jnp.abs(jax.random.normal(ks[13], (c_out,), jnp.float32)),
        # Squeeze_Excitation: Linear(out, out//r, bias=False), Linear(out//r, out, bias=False)
        "wse1": nrm(ks[14], (c_se, c_out), 0.3),
        "wse2": nrm(ks[15], (c_out, c_se), 0.3),
    }


if __name__ == "__main__":
    # Stem_Block(in_c=4, out_c=16, stride=1); SE reduction r=8 -> hidden width 2.
    N, C_IN, H, W = 2, 4, 16, 16
    C_OUT = 16

    key = jax.random.PRNGKey(0)
    kx_, kp_ = jax.random.split(key)
    x = jax.random.normal(kx_, (N, C_IN, H, W), jnp.float32)
    params = make_params(kp_, C_IN, C_OUT)

    out = stem_block_pallas(x, params)
    out = jax.block_until_ready(out)

    ref = stem_block_ref(x, params)
    assert out.shape == (N, C_OUT, H, W)
    max_err = float(jnp.max(jnp.abs(out - ref)))
    assert jnp.allclose(out, ref, atol=1e-4, rtol=1e-4), max_err

    print("KERNEL_OK")
</pallas_src>

<mosaic_0001>
module attributes {stable_mosaic.version = 11 : i64} {
  func.func @_stem_block_kernel(%arg0: i32, %arg1: memref<1x4x256xf32, #tpu.memory_space<vmem>>, %arg2: memref<16x36xf32, #tpu.memory_space<vmem>>, %arg3: memref<16x144xf32, #tpu.memory_space<vmem>>, %arg4: memref<16x4xf32, #tpu.memory_space<vmem>>, %arg5: memref<16x7xf32, #tpu.memory_space<vmem>>, %arg6: memref<1x16x256xf32, #tpu.memory_space<vmem>>) attributes {dimension_semantics = [#tpu.dimension_semantics<parallel>], iteration_bounds = array<i64: 2>, scalar_prefetch = 0 : i64, scratch_operands = 0 : i64, tpu.core_type = #tpu.core_type<tc>, window_params = [{transform_indices = @transform_0, window_bounds = array<i64: 1, 4, 256>}, {pipeline_mode = #tpu.pipeline_mode<synchronous>, transform_indices = @transform_1, window_bounds = array<i64: 16, 36>}, {pipeline_mode = #tpu.pipeline_mode<synchronous>, transform_indices = @transform_2, window_bounds = array<i64: 16, 144>}, {pipeline_mode = #tpu.pipeline_mode<synchronous>, transform_indices = @transform_3, window_bounds = array<i64: 16, 4>}, {pipeline_mode = #tpu.pipeline_mode<synchronous>, transform_indices = @transform_4, window_bounds = array<i64: 16, 7>}, {transform_indices = @transform_5, window_bounds = array<i64: 1, 16, 256>}]} {
    %c0 = arith.constant 0 : index
    %c0_0 = arith.constant 0 : index
    %c0_1 = arith.constant 0 : index
    %0 = vector.load %arg1[%c0, %c0_0, %c0_1] : memref<1x4x256xf32, #tpu.memory_space<vmem>>, vector<1x4x256xf32>
    %1 = vector.shape_cast %0 : vector<1x4x256xf32> to vector<4x256xf32>
    %2 = tpu.iota {dimensions = array<i32: 1>} : vector<1x256xi32>
    %c16_i32 = arith.constant 16 : i32
    %c0_i32 = arith.constant 0 : i32
    %3 = arith.cmpi eq, %c16_i32, %c0_i32 : i32
    %c1_i32 = arith.constant 1 : i32
    %4 = arith.select %3, %c1_i32, %c16_i32 : i32
    %5 = vector.broadcast %4 : i32 to vector<1x256xi32>
    %6 = arith.remsi %2, %5 : vector<1x256xi32>
    %c0_i32_2 = arith.constant 0 : i32
    %7 = vector.broadcast %c0_i32_2 : i32 to vector<1x256xi32>
    %8 = arith.cmpi ne, %6, %7 : vector<1x256xi32>
    %c0_i32_3 = arith.constant 0 : i32
    %9 = vector.broadcast %c0_i32_3 : i32 to vector<1x256xi32>
    %10 = arith.cmpi slt, %6, %9 : vector<1x256xi32>
    %c0_i32_4 = arith.constant 0 : i32
    %11 = arith.cmpi slt, %4, %c0_i32_4 : i32
    %12 = vector.broadcast %11 : i1 to vector<1x256xi1>
    %13 = vector.broadcast %12 : vector<1x256xi1> to vector<1x256xi1>
    %14 = arith.xori %10, %13 : vector<1x256xi1>
    %15 = arith.andi %14, %8 : vector<1x256xi1>
    %16 = vector.broadcast %4 : i32 to vector<1x256xi32>
    %17 = arith.addi %6, %16 : vector<1x256xi32>
    %18 = arith.select %15, %17, %6 : vector<1x256xi1>, vector<1x256xi32>
    %c1_i32_5 = arith.constant 1 : i32
    %19 = vector.broadcast %c1_i32_5 : i32 to vector<1x256xi32>
    %20 = arith.cmpi sge, %18, %19 : vector<1x256xi32>
    %c14_i32 = arith.constant 14 : i32
    %21 = vector.broadcast %c14_i32 : i32 to vector<1x256xi32>
    %22 = arith.cmpi sle, %18, %21 : vector<1x256xi32>
    %c0_6 = arith.constant 0 : index
    %c0_7 = arith.constant 0 : index
    %23 = vector.load %arg5[%c0_6, %c0_7] : memref<16x7xf32, #tpu.memory_space<vmem>>, vector<16x1xf32>
    %c0_8 = arith.constant 0 : index
    %c1 = arith.constant 1 : index
    %24 = vector.load %arg5[%c0_8, %c1] : memref<16x7xf32, #tpu.memory_space<vmem>>, vector<16x1xf32>
    %c0_9 = arith.constant 0 : index
    %c2 = arith.constant 2 : index
    %25 = vector.load %arg5[%c0_9, %c2] : memref<16x7xf32, #tpu.memory_space<vmem>>, vector<16x1xf32>
    %c0_10 = arith.constant 0 : index
    %c3 = arith.constant 3 : index
    %26 = vector.load %arg5[%c0_10, %c3] : memref<16x7xf32, #tpu.memory_space<vmem>>, vector<16x2xf32>
    %c0_11 = arith.constant 0 : index
    %c5 = arith.constant 5 : index
    %27 = vector.load %arg5[%c0_11, %c5] : memref<16x7xf32, #tpu.memory_space<vmem>>, vector<16x2xf32>
    %cst = arith.constant 0.000000e+00 : f32
    %28 = vector.broadcast %cst : f32 to vector<4x17xf32>
    %29 = tpu.concatenate %28, %1, %28 in 1 : vector<4x17xf32>, vector<4x256xf32>, vector<4x17xf32> -> vector<4x290xf32>
    %cst_12 = arith.constant 0.000000e+00 : f32
    %30 = vector.broadcast %cst_12 : f32 to vector<16x256xf32>
    %31 = vector.extract_strided_slice %29 {offsets = [0, 0], sizes = [4, 256], strides = [1, 1]} : vector<4x290xf32> to vector<4x256xf32>
    %cst_13 = arith.constant 0.000000e+00 : f32
    %32 = vector.shape_cast %20 : vector<1x256xi1> to vector<1x256xi1>
    %33 = vector.broadcast %32 : vector<1x256xi1> to vector<4x256xi1>
    %34 = vector.broadcast %cst_13 : f32 to vector<4x256xf32>
    %35 = arith.select %33, %31, %34 : vector<4x256xi1>, vector<4x256xf32>
    %c0_14 = arith.constant 0 : index
    %c0_15 = arith.constant 0 : index
    %36 = vector.load %arg2[%c0_14, %c0_15] : memref<16x36xf32, #tpu.memory_space<vmem>>, vector<16x1xf32>
    %37 = vector.extract_strided_slice %35 {offsets = [0, 0], sizes = [1, 256], strides = [1, 1]} : vector<4x256xf32> to vector<1x256xf32>
    %38 = vector.broadcast %36 : vector<16x1xf32> to vector<16x256xf32>
    %39 = vector.broadcast %37 : vector<1x256xf32> to vector<16x256xf32>
    %40 = arith.mulf %38, %39 : vector<16x256xf32>
    %41 = arith.addf %30, %40 : vector<16x256xf32>
    %c0_16 = arith.constant 0 : index
    %c1_17 = arith.constant 1 : index
    %42 = vector.load %arg2[%c0_16, %c1_17] : memref<16x36xf32, #tpu.memory_space<vmem>>, vector<16x1xf32>
    %43 = vector.extract_strided_slice %35 {offsets = [1, 0], sizes = [1, 256], strides = [1, 1]} : vector<4x256xf32> to vector<1x256xf32>
    %44 = vector.broadcast %42 : vector<16x1xf32> to vector<16x256xf32>
    %45 = vector.broadcast %43 : vector<1x256xf32> to vector<16x256xf32>
    %46 = arith.mulf %44, %45 : vector<16x256xf32>
    %47 = arith.addf %41, %46 : vector<16x256xf32>
    %c0_18 = arith.constant 0 : index
    %c2_19 = arith.constant 2 : index
    %48 = vector.load %arg2[%c0_18, %c2_19] : memref<16x36xf32, #tpu.memory_space<vmem>>, vector<16x1xf32>
    %49 = vector.extract_strided_slice %35 {offsets = [2, 0], sizes = [1, 256], strides = [1, 1]} : vector<4x256xf32> to vector<1x256xf32>
    %50 = vector.broadcast %48 : vector<16x1xf32> to vector<16x256xf32>
    %51 = vector.broadcast %49 : vector<1x256xf32> to vector<16x256xf32>
    %52 = arith.mulf %50, %51 : vector<16x256xf32>
    %53 = arith.addf %47, %52 : vector<16x256xf32>
    %c0_20 = arith.constant 0 : index
    %c3_21 = arith.constant 3 : index
    %54 = vector.load %arg2[%c0_20, %c3_21] : memref<16x36xf32, #tpu.memory_space<vmem>>, vector<16x1xf32>
    %55 = vector.extract_strided_slice %35 {offsets = [3, 0], sizes = [1, 256], strides = [1, 1]} : vector<4x256xf32> to vector<1x256xf32>
    %56 = vector.broadcast %54 : vector<16x1xf32> to vector<16x256xf32>
    %57 = vector.broadcast %55 : vector<1x256xf32> to vector<16x256xf32>
    %58 = arith.mulf %56, %57 : vector<16x256xf32>
    %59 = arith.addf %53, %58 : vector<16x256xf32>
    %60 = vector.extract_strided_slice %29 {offsets = [0, 1], sizes = [4, 256], strides = [1, 1]} : vector<4x290xf32> to vector<4x256xf32>
    %c0_22 = arith.constant 0 : index
    %c4 = arith.constant 4 : index
    %61 = vector.load %arg2[%c0_22, %c4] : memref<16x36xf32, #tpu.memory_space<vmem>>, vector<16x1xf32>
    %62 = vector.extract_strided_slice %60 {offsets = [0, 0], sizes = [1, 256], strides = [1, 1]} : vector<4x256xf32> to vector<1x256xf32>
    %63 = vector.broadcast %61 : vector<16x1xf32> to vector<16x256xf32>
    %64 = vector.broadcast %62 : vector<1x256xf32> to vector<16x256xf32>
    %65 = arith.mulf %63, %64 : vector<16x256xf32>
    %66 = arith.addf %59, %65 : vector<16x256xf32>
    %c0_23 = arith.constant 0 : index
    %c5_24 = arith.constant 5 : index
    %67 = vector.load %arg2[%c0_23, %c5_24] : memref<16x36xf32, #tpu.memory_space<vmem>>, vector<16x1xf32>
    %68 = vector.extract_strided_slice %60 {offsets = [1, 0], sizes = [1, 256], strides = [1, 1]} : vector<4x256xf32> to vector<1x256xf32>
    %69 = vector.broadcast %67 : vector<16x1xf32> to vector<16x256xf32>
    %70 = vector.broadcast %68 : vector<1x256xf32> to vector<16x256xf32>
    %71 = arith.mulf %69, %70 : vector<16x256xf32>
    %72 = arith.addf %66, %71 : vector<16x256xf32>
    %c0_25 = arith.constant 0 : index
    %c6 = arith.constant 6 : index
    %73 = vector.load %arg2[%c0_25, %c6] : memref<16x36xf32, #tpu.memory_space<vmem>>, vector<16x1xf32>
    %74 = vector.extract_strided_slice %60 {offsets = [2, 0], sizes = [1, 256], strides = [1, 1]} : vector<4x256xf32> to vector<1x256xf32>
    %75 = vector.broadcast %73 : vector<16x1xf32> to vector<16x256xf32>
    %76 = vector.broadcast %74 : vector<1x256xf32> to vector<16x256xf32>
    %77 = arith.mulf %75, %76 : vector<16x256xf32>
    %78 = arith.addf %72, %77 : vector<16x256xf32>
    %c0_26 = arith.constant 0 : index
    %c7 = arith.constant 7 : index
    %79 = vector.load %arg2[%c0_26, %c7] : memref<16x36xf32, #tpu.memory_space<vmem>>, vector<16x1xf32>
    %80 = vector.extract_strided_slice %60 {offsets = [3, 0], sizes = [1, 256], strides = [1, 1]} : vector<4x256xf32> to vector<1x256xf32>
    %81 = vector.broadcast %79 : vector<16x1xf32> to vector<16x256xf32>
    %82 = vector.broadcast %80 : vector<1x256xf32> to vector<16x256xf32>
    %83 = arith.mulf %81, %82 : vector<16x256xf32>
    %84 = arith.addf %78, %83 : vector<16x256xf32>
    %85 = vector.extract_strided_slice %29 {offsets = [0, 2], sizes = [4, 256], strides = [1, 1]} : vector<4x290xf32> to vector<4x256xf32>
    %cst_27 = arith.constant 0.000000e+00 : f32
    %86 = vector.shape_cast %22 : vector<1x256xi1> to vector<1x256xi1>
    %87 = vector.broadcast %86 : vector<1x256xi1> to vector<4x256xi1>
    %88 = vector.broadcast %cst_27 : f32 to vector<4x256xf32>
    %89 = arith.select %87, %85, %88 : vector<4x256xi1>, vector<4x256xf32>
    %c0_28 = arith.constant 0 : index
    %c8 = arith.constant 8 : index
    %90 = vector.load %arg2[%c0_28, %c8] : memref<16x36xf32, #tpu.memory_space<vmem>>, vector<16x1xf32>
    %91 = vector.extract_strided_slice %89 {offsets = [0, 0], sizes = [1, 256], strides = [1, 1]} : vector<4x256xf32> to vector<1x256xf32>
    %92 = vector.broadcast %90 : vector<16x1xf32> to vector<16x256xf32>
    %93 = vector.broadcast %91 : vector<1x256xf32> to vector<16x256xf32>
    %94 = arith.mulf %92, %93 : vector<16x256xf32>
    %95 = arith.addf %84, %94 : vector<16x256xf32>
    %c0_29 = arith.constant 0 : index
    %c9 = arith.constant 9 : index
    %96 = vector.load %arg2[%c0_29, %c9] : memref<16x36xf32, #tpu.memory_space<vmem>>, vector<16x1xf32>
    %97 = vector.extract_strided_slice %89 {offsets = [1, 0], sizes = [1, 256], strides = [1, 1]} : vector<4x256xf32> to vector<1x256xf32>
    %98 = vector.broadcast %96 : vector<16x1xf32> to vector<16x256xf32>
    %99 = vector.broadcast %97 : vector<1x256xf32> to vector<16x256xf32>
    %100 = arith.mulf %98, %99 : vector<16x256xf32>
    %101 = arith.addf %95, %100 : vector<16x256xf32>
    %c0_30 = arith.constant 0 : index
    %c10 = arith.constant 10 : index
    %102 = vector.load %arg2[%c0_30, %c10] : memref<16x36xf32, #tpu.memory_space<vmem>>, vector<16x1xf32>
    %103 = vector.extract_strided_slice %89 {offsets = [2, 0], sizes = [1, 256], strides = [1, 1]} : vector<4x256xf32> to vector<1x256xf32>
    %104 = vector.broadcast %102 : vector<16x1xf32> to vector<16x256xf32>
    %105 = vector.broadcast %103 : vector<1x256xf32> to vector<16x256xf32>
    %106 = arith.mulf %104, %105 : vector<16x256xf32>
    %107 = arith.addf %101, %106 : vector<16x256xf32>
    %c0_31 = arith.constant 0 : index
    %c11 = arith.constant 11 : index
    %108 = vector.load %arg2[%c0_31, %c11] : memref<16x36xf32, #tpu.memory_space<vmem>>, vector<16x1xf32>
    %109 = vector.extract_strided_slice %89 {offsets = [3, 0], sizes = [1, 256], strides = [1, 1]} : vector<4x256xf32> to vector<1x256xf32>
    %110 = vector.broadcast %108 : vector<16x1xf32> to vector<16x256xf32>
    %111 = vector.broadcast %109 : vector<1x256xf32> to vector<16x256xf32>
    %112 = arith.mulf %110, %111 : vector<16x256xf32>
    %113 = arith.addf %107, %112 : vector<16x256xf32>
    %114 = vector.extract_strided_slice %29 {offsets = [0, 16], sizes = [4, 256], strides = [1, 1]} : vector<4x290xf32> to vector<4x256xf32>
    %cst_32 = arith.constant 0.000000e+00 : f32
    %115 = vector.shape_cast %20 : vector<1x256xi1> to vector<1x256xi1>
    %116 = vector.broadcast %115 : vector<1x256xi1> to vector<4x256xi1>
    %117 = vector.broadcast %cst_32 : f32 to vector<4x256xf32>
    %118 = arith.select %116, %114, %117 : vector<4x256xi1>, vector<4x256xf32>
    %c0_33 = arith.constant 0 : index
    %c12 = arith.constant 12 : index
    %119 = vector.load %arg2[%c0_33, %c12] : memref<16x36xf32, #tpu.memory_space<vmem>>, vector<16x1xf32>
    %120 = vector.extract_strided_slice %118 {offsets = [0, 0], sizes = [1, 256], strides = [1, 1]} : vector<4x256xf32> to vector<1x256xf32>
    %121 = vector.broadcast %119 : vector<16x1xf32> to vector<16x256xf32>
    %122 = vector.broadcast %120 : vector<1x256xf32> to vector<16x256xf32>
    %123 = arith.mulf %121, %122 : vector<16x256xf32>
    %124 = arith.addf %113, %123 : vector<16x256xf32>
    %c0_34 = arith.constant 0 : index
    %c13 = arith.constant 13 : index
    %125 = vector.load %arg2[%c0_34, %c13] : memref<16x36xf32, #tpu.memory_space<vmem>>, vector<16x1xf32>
    %126 = vector.extract_strided_slice %118 {offsets = [1, 0], sizes = [1, 256], strides = [1, 1]} : vector<4x256xf32> to vector<1x256xf32>
    %127 = vector.broadcast %125 : vector<16x1xf32> to vector<16x256xf32>
    %128 = vector.broadcast %126 : vector<1x256xf32> to vector<16x256xf32>
    %129 = arith.mulf %127, %128 : vector<16x256xf32>
    %130 = arith.addf %124, %129 : vector<16x256xf32>
    %c0_35 = arith.constant 0 : index
    %c14 = arith.constant 14 : index
    %131 = vector.load %arg2[%c0_35, %c14] : memref<16x36xf32, #tpu.memory_space<vmem>>, vector<16x1xf32>
    %132 = vector.extract_strided_slice %118 {offsets = [2, 0], sizes = [1, 256], strides = [1, 1]} : vector<4x256xf32> to vector<1x256xf32>
    %133 = vector.broadcast %131 : vector<16x1xf32> to vector<16x256xf32>
    %134 = vector.broadcast %132 : vector<1x256xf32> to vector<16x256xf32>
    %135 = arith.mulf %133, %134 : vector<16x256xf32>
    %136 = arith.addf %130, %135 : vector<16x256xf32>
    %c0_36 = arith.constant 0 : index
    %c15 = arith.constant 15 : index
    %137 = vector.load %arg2[%c0_36, %c15] : memref<16x36xf32, #tpu.memory_space<vmem>>, vector<16x1xf32>
    %138 = vector.extract_strided_slice %118 {offsets = [3, 0], sizes = [1, 256], strides = [1, 1]} : vector<4x256xf32> to vector<1x256xf32>
    %139 = vector.broadcast %137 : vector<16x1xf32> to vector<16x256xf32>
    %140 = vector.broadcast %138 : vector<1x256xf32> to vector<16x256xf32>
    %141 = arith.mulf %139, %140 : vector<16x256xf32>
    %142 = arith.addf %136, %141 : vector<16x256xf32>
    %143 = vector.extract_strided_slice %29 {offsets = [0, 17], sizes = [4, 256], strides = [1, 1]} : vector<4x290xf32> to vector<4x256xf32>
    %c0_37 = arith.constant 0 : index
    %c16 = arith.constant 16 : index
    %144 = vector.load %arg2[%c0_37, %c16] : memref<16x36xf32, #tpu.memory_space<vmem>>, vector<16x1xf32>
    %145 = vector.extract_strided_slice %143 {offsets = [0, 0], sizes = [1, 256], strides = [1, 1]} : vector<4x256xf32> to vector<1x256xf32>
    %146 = vector.broadcast %144 : vector<16x1xf32> to vector<16x256xf32>
    %147 = vector.broadcast %145 : vector<1x256xf32> to vector<16x256xf32>
    %148 = arith.mulf %146, %147 : vector<16x256xf32>
    %149 = arith.addf %142, %148 : vector<16x256xf32>
    %c0_38 = arith.constant 0 : index
    %c17 = arith.constant 17 : index
    %150 = vector.load %arg2[%c0_38, %c17] : memref<16x36xf32, #tpu.memory_space<vmem>>, vector<16x1xf32>
    %151 = vector.extract_strided_slice %143 {offsets = [1, 0], sizes = [1, 256], strides = [1, 1]} : vector<4x256xf32> to vector<1x256xf32>
    %152 = vector.broadcast %150 : vector<16x1xf32> to vector<16x256xf32>
    %153 = vector.broadcast %151 : vector<1x256xf32> to vector<16x256xf32>
    %154 = arith.mulf %152, %153 : vector<16x256xf32>
    %155 = arith.addf %149, %154 : vector<16x256xf32>
    %c0_39 = arith.constant 0 : index
    %c18 = arith.constant 18 : index
    %156 = vector.load %arg2[%c0_39, %c18] : memref<16x36xf32, #tpu.memory_space<vmem>>, vector<16x1xf32>
    %157 = vector.extract_strided_slice %143 {offsets = [2, 0], sizes = [1, 256], strides = [1, 1]} : vector<4x256xf32> to vector<1x256xf32>
    %158 = vector.broadcast %156 : vector<16x1xf32> to vector<16x256xf32>
    %159 = vector.broadcast %157 : vector<1x256xf32> to vector<16x256xf32>
    %160 = arith.mulf %158, %159 : vector<16x256xf32>
    %161 = arith.addf %155, %160 : vector<16x256xf32>
    %c0_40 = arith.constant 0 : index
    %c19 = arith.constant 19 : index
    %162 = vector.load %arg2[%c0_40, %c19] : memref<16x36xf32, #tpu.memory_space<vmem>>, vector<16x1xf32>
    %163 = vector.extract_strided_slice %143 {offsets = [3, 0], sizes = [1, 256], strides = [1, 1]} : vector<4x256xf32> to vector<1x256xf32>
    %164 = vector.broadcast %162 : vector<16x1xf32> to vector<16x256xf32>
    %165 = vector.broadcast %163 : vector<1x256xf32> to vector<16x256xf32>
    %166 = arith.mulf %164, %165 : vector<16x256xf32>
    %167 = arith.addf %161, %166 : vector<16x256xf32>
    %168 = vector.extract_strided_slice %29 {offsets = [0, 18], sizes = [4, 256], strides = [1, 1]} : vector<4x290xf32> to vector<4x256xf32>
    %cst_41 = arith.constant 0.000000e+00 : f32
    %169 = vector.shape_cast %22 : vector<1x256xi1> to vector<1x256xi1>
    %170 = vector.broadcast %169 : vector<1x256xi1> to vector<4x256xi1>
    %171 = vector.broadcast %cst_41 : f32 to vector<4x256xf32>
    %172 = arith.select %170, %168, %171 : vector<4x256xi1>, vector<4x256xf32>
    %c0_42 = arith.constant 0 : index
    %c20 = arith.constant 20 : index
    %173 = vector.load %arg2[%c0_42, %c20] : memref<16x36xf32, #tpu.memory_space<vmem>>, vector<16x1xf32>
    %174 = vector.extract_strided_slice %172 {offsets = [0, 0], sizes = [1, 256], strides = [1, 1]} : vector<4x256xf32> to vector<1x256xf32>
    %175 = vector.broadcast %173 : vector<16x1xf32> to vector<16x256xf32>
    %176 = vector.broadcast %174 : vector<1x256xf32> to vector<16x256xf32>
    %177 = arith.mulf %175, %176 : vector<16x256xf32>
    %178 = arith.addf %167, %177 : vector<16x256xf32>
    %c0_43 = arith.constant 0 : index
    %c21 = arith.constant 21 : index
    %179 = vector.load %arg2[%c0_43, %c21] : memref<16x36xf32, #tpu.memory_space<vmem>>, vector<16x1xf32>
    %180 = vector.extract_strided_slice %172 {offsets = [1, 0], sizes = [1, 256], strides = [1, 1]} : vector<4x256xf32> to vector<1x256xf32>
    %181 = vector.broadcast %179 : vector<16x1xf32> to vector<16x256xf32>
    %182 = vector.broadcast %180 : vector<1x256xf32> to vector<16x256xf32>
    %183 = arith.mulf %181, %182 : vector<16x256xf32>
    %184 = arith.addf %178, %183 : vector<16x256xf32>
    %c0_44 = arith.constant 0 : index
    %c22 = arith.constant 22 : index
    %185 = vector.load %arg2[%c0_44, %c22] : memref<16x36xf32, #tpu.memory_space<vmem>>, vector<16x1xf32>
    %186 = vector.extract_strided_slice %172 {offsets = [2, 0], sizes = [1, 256], strides = [1, 1]} : vector<4x256xf32> to vector<1x256xf32>
    %187 = vector.broadcast %185 : vector<16x1xf32> to vector<16x256xf32>
    %188 = vector.broadcast %186 : vector<1x256xf32> to vector<16x256xf32>
    %189 = arith.mulf %187, %188 : vector<16x256xf32>
    %190 = arith.addf %184, %189 : vector<16x256xf32>
    %c0_45 = arith.constant 0 : index
    %c23 = arith.constant 23 : index
    %191 = vector.load %arg2[%c0_45, %c23] : memref<16x36xf32, #tpu.memory_space<vmem>>, vector<16x1xf32>
    %192 = vector.extract_strided_slice %172 {offsets = [3, 0], sizes = [1, 256], strides = [1, 1]} : vector<4x256xf32> to vector<1x256xf32>
    %193 = vector.broadcast %191 : vector<16x1xf32> to vector<16x256xf32>
    %194 = vector.broadcast %192 : vector<1x256xf32> to vector<16x256xf32>
    %195 = arith.mulf %193, %194 : vector<16x256xf32>
    %196 = arith.addf %190, %195 : vector<16x256xf32>
    %197 = vector.extract_strided_slice %29 {offsets = [0, 32], sizes = [4, 256], strides = [1, 1]} : vector<4x290xf32> to vector<4x256xf32>
    %cst_46 = arith.constant 0.000000e+00 : f32
    %198 = vector.shape_cast %20 : vector<1x256xi1> to vector<1x256xi1>
    %199 = vector.broadcast %198 : vector<1x256xi1> to vector<4x256xi1>
    %200 = vector.broadcast %cst_46 : f32 to vector<4x256xf32>
    %201 = arith.select %199, %197, %200 : vector<4x256xi1>, vector<4x256xf32>
    %c0_47 = arith.constant 0 : index
    %c24 = arith.constant 24 : index
    %202 = vector.load %arg2[%c0_47, %c24] : memref<16x36xf32, #tpu.memory_space<vmem>>, vector<16x1xf32>
    %203 = vector.extract_strided_slice %201 {offsets = [0, 0], sizes = [1, 256], strides = [1, 1]} : vector<4x256xf32> to vector<1x256xf32>
    %204 = vector.broadcast %202 : vector<16x1xf32> to vector<16x256xf32>
    %205 = vector.broadcast %203 : vector<1x256xf32> to vector<16x256xf32>
    %206 = arith.mulf %204, %205 : vector<16x256xf32>
    %207 = arith.addf %196, %206 : vector<16x256xf32>
    %c0_48 = arith.constant 0 : index
    %c25 = arith.constant 25 : index
    %208 = vector.load %arg2[%c0_48, %c25] : memref<16x36xf32, #tpu.memory_space<vmem>>, vector<16x1xf32>
    %209 = vector.extract_strided_slice %201 {offsets = [1, 0], sizes = [1, 256], strides = [1, 1]} : vector<4x256xf32> to vector<1x256xf32>
    %210 = vector.broadcast %208 : vector<16x1xf32> to vector<16x256xf32>
    %211 = vector.broadcast %209 : vector<1x256xf32> to vector<16x256xf32>
    %212 = arith.mulf %210, %211 : vector<16x256xf32>
    %213 = arith.addf %207, %212 : vector<16x256xf32>
    %c0_49 = arith.constant 0 : index
    %c26 = arith.constant 26 : index
    %214 = vector.load %arg2[%c0_49, %c26] : memref<16x36xf32, #tpu.memory_space<vmem>>, vector<16x1xf32>
    %215 = vector.extract_strided_slice %201 {offsets = [2, 0], sizes = [1, 256], strides = [1, 1]} : vector<4x256xf32> to vector<1x256xf32>
    %216 = vector.broadcast %214 : vector<16x1xf32> to vector<16x256xf32>
    %217 = vector.broadcast %215 : vector<1x256xf32> to vector<16x256xf32>
    %218 = arith.mulf %216, %217 : vector<16x256xf32>
    %219 = arith.addf %213, %218 : vector<16x256xf32>
    %c0_50 = arith.constant 0 : index
    %c27 = arith.constant 27 : index
    %220 = vector.load %arg2[%c0_50, %c27] : memref<16x36xf32, #tpu.memory_space<vmem>>, vector<16x1xf32>
    %221 = vector.extract_strided_slice %201 {offsets = [3, 0], sizes = [1, 256], strides = [1, 1]} : vector<4x256xf32> to vector<1x256xf32>
    %222 = vector.broadcast %220 : vector<16x1xf32> to vector<16x256xf32>
    %223 = vector.broadcast %221 : vector<1x256xf32> to vector<16x256xf32>
    %224 = arith.mulf %222, %223 : vector<16x256xf32>
    %225 = arith.addf %219, %224 : vector<16x256xf32>
    %226 = vector.extract_strided_slice %29 {offsets = [0, 33], sizes = [4, 256], strides = [1, 1]} : vector<4x290xf32> to vector<4x256xf32>
    %c0_51 = arith.constant 0 : index
    %c28 = arith.constant 28 : index
    %227 = vector.load %arg2[%c0_51, %c28] : memref<16x36xf32, #tpu.memory_space<vmem>>, vector<16x1xf32>
    %228 = vector.extract_strided_slice %226 {offsets = [0, 0], sizes = [1, 256], strides = [1, 1]} : vector<4x256xf32> to vector<1x256xf32>
    %229 = vector.broadcast %227 : vector<16x1xf32> to vector<16x256xf32>
    %230 = vector.broadcast %228 : vector<1x256xf32> to vector<16x256xf32>
    %231 = arith.mulf %229, %230 : vector<16x256xf32>
    %232 = arith.addf %225, %231 : vector<16x256xf32>
    %c0_52 = arith.constant 0 : index
    %c29 = arith.constant 29 : index
    %233 = vector.load %arg2[%c0_52, %c29] : memref<16x36xf32, #tpu.memory_space<vmem>>, vector<16x1xf32>
    %234 = vector.extract_strided_slice %226 {offsets = [1, 0], sizes = [1, 256], strides = [1, 1]} : vector<4x256xf32> to vector<1x256xf32>
    %235 = vector.broadcast %233 : vector<16x1xf32> to vector<16x256xf32>
    %236 = vector.broadcast %234 : vector<1x256xf32> to vector<16x256xf32>
    %237 = arith.mulf %235, %236 : vector<16x256xf32>
    %238 = arith.addf %232, %237 : vector<16x256xf32>
    %c0_53 = arith.constant 0 : index
    %c30 = arith.constant 30 : index
    %239 = vector.load %arg2[%c0_53, %c30] : memref<16x36xf32, #tpu.memory_space<vmem>>, vector<16x1xf32>
    %240 = vector.extract_strided_slice %226 {offsets = [2, 0], sizes = [1, 256], strides = [1, 1]} : vector<4x256xf32> to vector<1x256xf32>
    %241 = vector.broadcast %239 : vector<16x1xf32> to vector<16x256xf32>
    %242 = vector.broadcast %240 : vector<1x256xf32> to vector<16x256xf32>
    %243 = arith.mulf %241, %242 : vector<16x256xf32>
    %244 = arith.addf %238, %243 : vector<16x256xf32>
    %c0_54 = arith.constant 0 : index
    %c31 = arith.constant 31 : index
    %245 = vector.load %arg2[%c0_54, %c31] : memref<16x36xf32, #tpu.memory_space<vmem>>, vector<16x1xf32>
    %246 = vector.extract_strided_slice %226 {offsets = [3, 0], sizes = [1, 256], strides = [1, 1]} : vector<4x256xf32> to vector<1x256xf32>
    %247 = vector.broadcast %245 : vector<16x1xf32> to vector<16x256xf32>
    %248 = vector.broadcast %246 : vector<1x256xf32> to vector<16x256xf32>
    %249 = arith.mulf %247, %248 : vector<16x256xf32>
    %250 = arith.addf %244, %249 : vector<16x256xf32>
    %251 = vector.extract_strided_slice %29 {offsets = [0, 34], sizes = [4, 256], strides = [1, 1]} : vector<4x290xf32> to vector<4x256xf32>
    %cst_55 = arith.constant 0.000000e+00 : f32
    %252 = vector.shape_cast %22 : vector<1x256xi1> to vector<1x256xi1>
    %253 = vector.broadcast %252 : vector<1x256xi1> to vector<4x256xi1>
    %254 = vector.broadcast %cst_55 : f32 to vector<4x256xf32>
    %255 = arith.select %253, %251, %254 : vector<4x256xi1>, vector<4x256xf32>
    %c0_56 = arith.constant 0 : index
    %c32 = arith.constant 32 : index
    %256 = vector.load %arg2[%c0_56, %c32] : memref<16x36xf32, #tpu.memory_space<vmem>>, vector<16x1xf32>
    %257 = vector.extract_strided_slice %255 {offsets = [0, 0], sizes = [1, 256], strides = [1, 1]} : vector<4x256xf32> to vector<1x256xf32>
    %258 = vector.broadcast %256 : vector<16x1xf32> to vector<16x256xf32>
    %259 = vector.broadcast %257 : vector<1x256xf32> to vector<16x256xf32>
    %260 = arith.mulf %258, %259 : vector<16x256xf32>
    %261 = arith.addf %250, %260 : vector<16x256xf32>
    %c0_57 = arith.constant 0 : index
    %c33 = arith.constant 33 : index
    %262 = vector.load %arg2[%c0_57, %c33] : memref<16x36xf32, #tpu.memory_space<vmem>>, vector<16x1xf32>
    %263 = vector.extract_strided_slice %255 {offsets = [1, 0], sizes = [1, 256], strides = [1, 1]} : vector<4x256xf32> to vector<1x256xf32>
    %264 = vector.broadcast %262 : vector<16x1xf32> to vector<16x256xf32>
    %265 = vector.broadcast %263 : vector<1x256xf32> to vector<16x256xf32>
    %266 = arith.mulf %264, %265 : vector<16x256xf32>
    %267 = arith.addf %261, %266 : vector<16x256xf32>
    %c0_58 = arith.constant 0 : index
    %c34 = arith.constant 34 : index
    %268 = vector.load %arg2[%c0_58, %c34] : memref<16x36xf32, #tpu.memory_space<vmem>>, vector<16x1xf32>
    %269 = vector.extract_strided_slice %255 {offsets = [2, 0], sizes = [1, 256], strides = [1, 1]} : vector<4x256xf32> to vector<1x256xf32>
    %270 = vector.broadcast %268 : vector<16x1xf32> to vector<16x256xf32>
    %271 = vector.broadcast %269 : vector<1x256xf32> to vector<16x256xf32>
    %272 = arith.mulf %270, %271 : vector<16x256xf32>
    %273 = arith.addf %267, %272 : vector<16x256xf32>
    %c0_59 = arith.constant 0 : index
    %c35 = arith.constant 35 : index
    %274 = vector.load %arg2[%c0_59, %c35] : memref<16x36xf32, #tpu.memory_space<vmem>>, vector<16x1xf32>
    %275 = vector.extract_strided_slice %255 {offsets = [3, 0], sizes = [1, 256], strides = [1, 1]} : vector<4x256xf32> to vector<1x256xf32>
    %276 = vector.broadcast %274 : vector<16x1xf32> to vector<16x256xf32>
    %277 = vector.broadcast %275 : vector<1x256xf32> to vector<16x256xf32>
    %278 = arith.mulf %276, %277 : vector<16x256xf32>
    %279 = arith.addf %273, %278 : vector<16x256xf32>
    %280 = vector.broadcast %23 : vector<16x1xf32> to vector<16x256xf32>
    %281 = arith.addf %279, %280 : vector<16x256xf32>
    %cst_60 = arith.constant 0.000000e+00 : f32
    %282 = vector.broadcast %cst_60 : f32 to vector<16x256xf32>
    %283 = arith.maximumf %281, %282 : vector<16x256xf32>
    %cst_61 = arith.constant 0.000000e+00 : f32
    %284 = vector.broadcast %cst_61 : f32 to vector<16x17xf32>
    %285 = tpu.concatenate %284, %283, %284 in 1 : vector<16x17xf32>, vector<16x256xf32>, vector<16x17xf32> -> vector<16x290xf32>
    %cst_62 = arith.constant 0.000000e+00 : f32
    %286 = vector.broadcast %cst_62 : f32 to vector<16x256xf32>
    %287 = vector.extract_strided_slice %285 {offsets = [0, 0], sizes = [16, 256], strides = [1, 1]} : vector<16x290xf32> to vector<16x256xf32>
    %cst_63 = arith.constant 0.000000e+00 : f32
    %288 = vector.shape_cast %20 : vector<1x256xi1> to vector<1x256xi1>
    %289 = vector.broadcast %288 : vector<1x256xi1> to vector<16x256xi1>
    %290 = vector.broadcast %cst_63 : f32 to vector<16x256xf32>
    %291 = arith.select %289, %287, %290 : vector<16x256xi1>, vector<16x256xf32>
    %c0_64 = arith.constant 0 : index
    %c0_65 = arith.constant 0 : index
    %292 = vector.load %arg3[%c0_64, %c0_65] : memref<16x144xf32, #tpu.memory_space<vmem>>, vector<16x1xf32>
    %293 = vector.extract_strided_slice %291 {offsets = [0, 0], sizes = [1, 256], strides = [1, 1]} : vector<16x256xf32> to vector<1x256xf32>
    %294 = vector.broadcast %292 : vector<16x1xf32> to vector<16x256xf32>
    %295 = vector.broadcast %293 : vector<1x256xf32> to vector<16x256xf32>
    %296 = arith.mulf %294, %295 : vector<16x256xf32>
    %297 = arith.addf %286, %296 : vector<16x256xf32>
    %c0_66 = arith.constant 0 : index
    %c1_67 = arith.constant 1 : index
    %298 = vector.load %arg3[%c0_66, %c1_67] : memref<16x144xf32, #tpu.memory_space<vmem>>, vector<16x1xf32>
    %299 = vector.extract_strided_slice %291 {offsets = [1, 0], sizes = [1, 256], strides = [1, 1]} : vector<16x256xf32> to vector<1x256xf32>
    %300 = vector.broadcast %298 : vector<16x1xf32> to vector<16x256xf32>
    %301 = vector.broadcast %299 : vector<1x256xf32> to vector<16x256xf32>
    %302 = arith.mulf %300, %301 : vector<16x256xf32>
    %303 = arith.addf %297, %302 : vector<16x256xf32>
    %c0_68 = arith.constant 0 : index
    %c2_69 = arith.constant 2 : index
    %304 = vector.load %arg3[%c0_68, %c2_69] : memref<16x144xf32, #tpu.memory_space<vmem>>, vector<16x1xf32>
    %305 = vector.extract_strided_slice %291 {offsets = [2, 0], sizes = [1, 256], strides = [1, 1]} : vector<16x256xf32> to vector<1x256xf32>
    %306 = vector.broadcast %304 : vector<16x1xf32> to vector<16x256xf32>
    %307 = vector.broadcast %305 : vector<1x256xf32> to vector<16x256xf32>
    %308 = arith.mulf %306, %307 : vector<16x256xf32>
    %309 = arith.addf %303, %308 : vector<16x256xf32>
    %c0_70 = arith.constant 0 : index
    %c3_71 = arith.constant 3 : index
    %310 = vector.load %arg3[%c0_70, %c3_71] : memref<16x144xf32, #tpu.memory_space<vmem>>, vector<16x1xf32>
    %311 = vector.extract_strided_slice %291 {offsets = [3, 0], sizes = [1, 256], strides = [1, 1]} : vector<16x256xf32> to vector<1x256xf32>
    %312 = vector.broadcast %310 : vector<16x1xf32> to vector<16x256xf32>
    %313 = vector.broadcast %311 : vector<1x256xf32> to vector<16x256xf32>
    %314 = arith.mulf %312, %313 : vector<16x256xf32>
    %315 = arith.addf %309, %314 : vector<16x256xf32>
    %c0_72 = arith.constant 0 : index
    %c4_73 = arith.constant 4 : index
    %316 = vector.load %arg3[%c0_72, %c4_73] : memref<16x144xf32, #tpu.memory_space<vmem>>, vector<16x1xf32>
    %317 = vector.extract_strided_slice %291 {offsets = [4, 0], sizes = [1, 256], strides = [1, 1]} : vector<16x256xf32> to vector<1x256xf32>
    %318 = vector.broadcast %316 : vector<16x1xf32> to vector<16x256xf32>
    %319 = vector.broadcast %317 : vector<1x256xf32> to vector<16x256xf32>
    %320 = arith.mulf %318, %319 : vector<16x256xf32>
    %321 = arith.addf %315, %320 : vector<16x256xf32>
    %c0_74 = arith.constant 0 : index
    %c5_75 = arith.constant 5 : index
    %322 = vector.load %arg3[%c0_74, %c5_75] : memref<16x144xf32, #tpu.memory_space<vmem>>, vector<16x1xf32>
    %323 = vector.extract_strided_slice %291 {offsets = [5, 0], sizes = [1, 256], strides = [1, 1]} : vector<16x256xf32> to vector<1x256xf32>
    %324 = vector.broadcast %322 : vector<16x1xf32> to vector<16x256xf32>
    %325 = vector.broadcast %323 : vector<1x256xf32> to vector<16x256xf32>
    %326 = arith.mulf %324, %325 : vector<16x256xf32>
    %327 = arith.addf %321, %326 : vector<16x256xf32>
    %c0_76 = arith.constant 0 : index
    %c6_77 = arith.constant 6 : index
    %328 = vector.load %arg3[%c0_76, %c6_77] : memref<16x144xf32, #tpu.memory_space<vmem>>, vector<16x1xf32>
    %329 = vector.extract_strided_slice %291 {offsets = [6, 0], sizes = [1, 256], strides = [1, 1]} : vector<16x256xf32> to vector<1x256xf32>
    %330 = vector.broadcast %328 : vector<16x1xf32> to vector<16x256xf32>
    %331 = vector.broadcast %329 : vector<1x256xf32> to vector<16x256xf32>
    %332 = arith.mulf %330, %331 : vector<16x256xf32>
    %333 = arith.addf %327, %332 : vector<16x256xf32>
    %c0_78 = arith.constant 0 : index
    %c7_79 = arith.constant 7 : index
    %334 = vector.load %arg3[%c0_78, %c7_79] : memref<16x144xf32, #tpu.memory_space<vmem>>, vector<16x1xf32>
    %335 = vector.extract_strided_slice %291 {offsets = [7, 0], sizes = [1, 256], strides = [1, 1]} : vector<16x256xf32> to vector<1x256xf32>
    %336 = vector.broadcast %334 : vector<16x1xf32> to vector<16x256xf32>
    %337 = vector.broadcast %335 : vector<1x256xf32> to vector<16x256xf32>
    %338 = arith.mulf %336, %337 : vector<16x256xf32>
    %339 = arith.addf %333, %338 : vector<16x256xf32>
    %c0_80 = arith.constant 0 : index
    %c8_81 = arith.constant 8 : index
    %340 = vector.load %arg3[%c0_80, %c8_81] : memref<16x144xf32, #tpu.memory_space<vmem>>, vector<16x1xf32>
    %341 = vector.extract_strided_slice %291 {offsets = [8, 0], sizes = [1, 256], strides = [1, 1]} : vector<16x256xf32> to vector<1x256xf32>
    %342 = vector.broadcast %340 : vector<16x1xf32> to vector<16x256xf32>
    %343 = vector.broadcast %341 : vector<1x256xf32> to vector<16x256xf32>
    %344 = arith.mulf %342, %343 : vector<16x256xf32>
    %345 = arith.addf %339, %344 : vector<16x256xf32>
    %c0_82 = arith.constant 0 : index
    %c9_83 = arith.constant 9 : index
    %346 = vector.load %arg3[%c0_82, %c9_83] : memref<16x144xf32, #tpu.memory_space<vmem>>, vector<16x1xf32>
    %347 = vector.extract_strided_slice %291 {offsets = [9, 0], sizes = [1, 256], strides = [1, 1]} : vector<16x256xf32> to vector<1x256xf32>
    %348 = vector.broadcast %346 : vector<16x1xf32> to vector<16x256xf32>
    %349 = vector.broadcast %347 : vector<1x256xf32> to vector<16x256xf32>
    %350 = arith.mulf %348, %349 : vector<16x256xf32>
    %351 = arith.addf %345, %350 : vector<16x256xf32>
    %c0_84 = arith.constant 0 : index
    %c10_85 = arith.constant 10 : index
    %352 = vector.load %arg3[%c0_84, %c10_85] : memref<16x144xf32, #tpu.memory_space<vmem>>, vector<16x1xf32>
    %353 = vector.extract_strided_slice %291 {offsets = [10, 0], sizes = [1, 256], strides = [1, 1]} : vector<16x256xf32> to vector<1x256xf32>
    %354 = vector.broadcast %352 : vector<16x1xf32> to vector<16x256xf32>
    %355 = vector.broadcast %353 : vector<1x256xf32> to vector<16x256xf32>
    %356 = arith.mulf %354, %355 : vector<16x256xf32>
    %357 = arith.addf %351, %356 : vector<16x256xf32>
    %c0_86 = arith.constant 0 : index
    %c11_87 = arith.constant 11 : index
    %358 = vector.load %arg3[%c0_86, %c11_87] : memref<16x144xf32, #tpu.memory_space<vmem>>, vector<16x1xf32>
    %359 = vector.extract_strided_slice %291 {offsets = [11, 0], sizes = [1, 256], strides = [1, 1]} : vector<16x256xf32> to vector<1x256xf32>
    %360 = vector.broadcast %358 : vector<16x1xf32> to vector<16x256xf32>
    %361 = vector.broadcast %359 : vector<1x256xf32> to vector<16x256xf32>
    %362 = arith.mulf %360, %361 : vector<16x256xf32>
    %363 = arith.addf %357, %362 : vector<16x256xf32>
    %c0_88 = arith.constant 0 : index
    %c12_89 = arith.constant 12 : index
    %364 = vector.load %arg3[%c0_88, %c12_89] : memref<16x144xf32, #tpu.memory_space<vmem>>, vector<16x1xf32>
    %365 = vector.extract_strided_slice %291 {offsets = [12, 0], sizes = [1, 256], strides = [1, 1]} : vector<16x256xf32> to vector<1x256xf32>
    %366 = vector.broadcast %364 : vector<16x1xf32> to vector<16x256xf32>
    %367 = vector.broadcast %365 : vector<1x256xf32> to vector<16x256xf32>
    %368 = arith.mulf %366, %367 : vector<16x256xf32>
    %369 = arith.addf %363, %368 : vector<16x256xf32>
    %c0_90 = arith.constant 0 : index
    %c13_91 = arith.constant 13 : index
    %370 = vector.load %arg3[%c0_90, %c13_91] : memref<16x144xf32, #tpu.memory_space<vmem>>, vector<16x1xf32>
    %371 = vector.extract_strided_slice %291 {offsets = [13, 0], sizes = [1, 256], strides = [1, 1]} : vector<16x256xf32> to vector<1x256xf32>
    %372 = vector.broadcast %370 : vector<16x1xf32> to vector<16x256xf32>
    %373 = vector.broadcast %371 : vector<1x256xf32> to vector<16x256xf32>
    %374 = arith.mulf %372, %373 : vector<16x256xf32>
    %375 = arith.addf %369, %374 : vector<16x256xf32>
    %c0_92 = arith.constant 0 : index
    %c14_93 = arith.constant 14 : index
    %376 = vector.load %arg3[%c0_92, %c14_93] : memref<16x144xf32, #tpu.memory_space<vmem>>, vector<16x1xf32>
    %377 = vector.extract_strided_slice %291 {offsets = [14, 0], sizes = [1, 256], strides = [1, 1]} : vector<16x256xf32> to vector<1x256xf32>
    %378 = vector.broadcast %376 : vector<16x1xf32> to vector<16x256xf32>
    %379 = vector.broadcast %377 : vector<1x256xf32> to vector<16x256xf32>
    %380 = arith.mulf %378, %379 : vector<16x256xf32>
    %381 = arith.addf %375, %380 : vector<16x256xf32>
    %c0_94 = arith.constant 0 : index
    %c15_95 = arith.constant 15 : index
    %382 = vector.load %arg3[%c0_94, %c15_95] : memref<16x144xf32, #tpu.memory_space<vmem>>, vector<16x1xf32>
    %383 = vector.extract_strided_slice %291 {offsets = [15, 0], sizes = [1, 256], strides = [1, 1]} : vector<16x256xf32> to vector<1x256xf32>
    %384 = vector.broadcast %382 : vector<16x1xf32> to vector<16x256xf32>
    %385 = vector.broadcast %383 : vector<1x256xf32> to vector<16x256xf32>
    %386 = arith.mulf %384, %385 : vector<16x256xf32>
    %387 = arith.addf %381, %386 : vector<16x256xf32>
    %388 = vector.extract_strided_slice %285 {offsets = [0, 1], sizes = [16, 256], strides = [1, 1]} : vector<16x290xf32> to vector<16x256xf32>
    %c0_96 = arith.constant 0 : index
    %c16_97 = arith.constant 16 : index
    %389 = vector.load %arg3[%c0_96, %c16_97] : memref<16x144xf32, #tpu.memory_space<vmem>>, vector<16x1xf32>
    %390 = vector.extract_strided_slice %388 {offsets = [0, 0], sizes = [1, 256], strides = [1, 1]} : vector<16x256xf32> to vector<1x256xf32>
    %391 = vector.broadcast %389 : vector<16x1xf32> to vector<16x256xf32>
    %392 = vector.broadcast %390 : vector<1x256xf32> to vector<16x256xf32>
    %393 = arith.mulf %391, %392 : vector<16x256xf32>
    %394 = arith.addf %387, %393 : vector<16x256xf32>
    %c0_98 = arith.constant 0 : index
    %c17_99 = arith.constant 17 : index
    %395 = vector.load %arg3[%c0_98, %c17_99] : memref<16x144xf32, #tpu.memory_space<vmem>>, vector<16x1xf32>
    %396 = vector.extract_strided_slice %388 {offsets = [1, 0], sizes = [1, 256], strides = [1, 1]} : vector<16x256xf32> to vector<1x256xf32>
    %397 = vector.broadcast %395 : vector<16x1xf32> to vector<16x256xf32>
    %398 = vector.broadcast %396 : vector<1x256xf32> to vector<16x256xf32>
    %399 = arith.mulf %397, %398 : vector<16x256xf32>
    %400 = arith.addf %394, %399 : vector<16x256xf32>
    %c0_100 = arith.constant 0 : index
    %c18_101 = arith.constant 18 : index
    %401 = vector.load %arg3[%c0_100, %c18_101] : memref<16x144xf32, #tpu.memory_space<vmem>>, vector<16x1xf32>
    %402 = vector.extract_strided_slice %388 {offsets = [2, 0], sizes = [1, 256], strides = [1, 1]} : vector<16x256xf32> to vector<1x256xf32>
    %403 = vector.broadcast %401 : vector<16x1xf32> to vector<16x256xf32>
    %404 = vector.broadcast %402 : vector<1x256xf32> to vector<16x256xf32>
    %405 = arith.mulf %403, %404 : vector<16x256xf32>
    %406 = arith.addf %400, %405 : vector<16x256xf32>
    %c0_102 = arith.constant 0 : index
    %c19_103 = arith.constant 19 : index
    %407 = vector.load %arg3[%c0_102, %c19_103] : memref<16x144xf32, #tpu.memory_space<vmem>>, vector<16x1xf32>
    %408 = vector.extract_strided_slice %388 {offsets = [3, 0], sizes = [1, 256], strides = [1, 1]} : vector<16x256xf32> to vector<1x256xf32>
    %409 = vector.broadcast %407 : vector<16x1xf32> to vector<16x256xf32>
    %410 = vector.broadcast %408 : vector<1x256xf32> to vector<16x256xf32>
    %411 = arith.mulf %409, %410 : vector<16x256xf32>
    %412 = arith.addf %406, %411 : vector<16x256xf32>
    %c0_104 = arith.constant 0 : index
    %c20_105 = arith.constant 20 : index
    %413 = vector.load %arg3[%c0_104, %c20_105] : memref<16x144xf32, #tpu.memory_space<vmem>>, vector<16x1xf32>
    %414 = vector.extract_strided_slice %388 {offsets = [4, 0], sizes = [1, 256], strides = [1, 1]} : vector<16x256xf32> to vector<1x256xf32>
    %415 = vector.broadcast %413 : vector<16x1xf32> to vector<16x256xf32>
    %416 = vector.broadcast %414 : vector<1x256xf32> to vector<16x256xf32>
    %417 = arith.mulf %415, %416 : vector<16x256xf32>
    %418 = arith.addf %412, %417 : vector<16x256xf32>
    %c0_106 = arith.constant 0 : index
    %c21_107 = arith.constant 21 : index
    %419 = vector.load %arg3[%c0_106, %c21_107] : memref<16x144xf32, #tpu.memory_space<vmem>>, vector<16x1xf32>
    %420 = vector.extract_strided_slice %388 {offsets = [5, 0], sizes = [1, 256], strides = [1, 1]} : vector<16x256xf32> to vector<1x256xf32>
    %421 = vector.broadcast %419 : vector<16x1xf32> to vector<16x256xf32>
    %422 = vector.broadcast %420 : vector<1x256xf32> to vector<16x256xf32>
    %423 = arith.mulf %421, %422 : vector<16x256xf32>
    %424 = arith.addf %418, %423 : vector<16x256xf32>
    %c0_108 = arith.constant 0 : index
    %c22_109 = arith.constant 22 : index
    %425 = vector.load %arg3[%c0_108, %c22_109] : memref<16x144xf32, #tpu.memory_space<vmem>>, vector<16x1xf32>
    %426 = vector.extract_strided_slice %388 {offsets = [6, 0], sizes = [1, 256], strides = [1, 1]} : vector<16x256xf32> to vector<1x256xf32>
    %427 = vector.broadcast %425 : vector<16x1xf32> to vector<16x256xf32>
    %428 = vector.broadcast %426 : vector<1x256xf32> to vector<16x256xf32>
    %429 = arith.mulf %427, %428 : vector<16x256xf32>
    %430 = arith.addf %424, %429 : vector<16x256xf32>
    %c0_110 = arith.constant 0 : index
    %c23_111 = arith.constant 23 : index
    %431 = vector.load %arg3[%c0_110, %c23_111] : memref<16x144xf32, #tpu.memory_space<vmem>>, vector<16x1xf32>
    %432 = vector.extract_strided_slice %388 {offsets = [7, 0], sizes = [1, 256], strides = [1, 1]} : vector<16x256xf32> to vector<1x256xf32>
    %433 = vector.broadcast %431 : vector<16x1xf32> to vector<16x256xf32>
    %434 = vector.broadcast %432 : vector<1x256xf32> to vector<16x256xf32>
    %435 = arith.mulf %433, %434 : vector<16x256xf32>
    %436 = arith.addf %430, %435 : vector<16x256xf32>
    %c0_112 = arith.constant 0 : index
    %c24_113 = arith.constant 24 : index
    %437 = vector.load %arg3[%c0_112, %c24_113] : memref<16x144xf32, #tpu.memory_space<vmem>>, vector<16x1xf32>
    %438 = vector.extract_strided_slice %388 {offsets = [8, 0], sizes = [1, 256], strides = [1, 1]} : vector<16x256xf32> to vector<1x256xf32>
    %439 = vector.broadcast %437 : vector<16x1xf32> to vector<16x256xf32>
    %440 = vector.broadcast %438 : vector<1x256xf32> to vector<16x256xf32>
    %441 = arith.mulf %439, %440 : vector<16x256xf32>
    %442 = arith.addf %436, %441 : vector<16x256xf32>
    %c0_114 = arith.constant 0 : index
    %c25_115 = arith.constant 25 : index
    %443 = vector.load %arg3[%c0_114, %c25_115] : memref<16x144xf32, #tpu.memory_space<vmem>>, vector<16x1xf32>
    %444 = vector.extract_strided_slice %388 {offsets = [9, 0], sizes = [1, 256], strides = [1, 1]} : vector<16x256xf32> to vector<1x256xf32>
    %445 = vector.broadcast %443 : vector<16x1xf32> to vector<16x256xf32>
    %446 = vector.broadcast %444 : vector<1x256xf32> to vector<16x256xf32>
    %447 = arith.mulf %445, %446 : vector<16x256xf32>
    %448 = arith.addf %442, %447 : vector<16x256xf32>
    %c0_116 = arith.constant 0 : index
    %c26_117 = arith.constant 26 : index
    %449 = vector.load %arg3[%c0_116, %c26_117] : memref<16x144xf32, #tpu.memory_space<vmem>>, vector<16x1xf32>
    %450 = vector.extract_strided_slice %388 {offsets = [10, 0], sizes = [1, 256], strides = [1, 1]} : vector<16x256xf32> to vector<1x256xf32>
    %451 = vector.broadcast %449 : vector<16x1xf32> to vector<16x256xf32>
    %452 = vector.broadcast %450 : vector<1x256xf32> to vector<16x256xf32>
    %453 = arith.mulf %451, %452 : vector<16x256xf32>
    %454 = arith.addf %448, %453 : vector<16x256xf32>
    %c0_118 = arith.constant 0 : index
    %c27_119 = arith.constant 27 : index
    %455 = vector.load %arg3[%c0_118, %c27_119] : memref<16x144xf32, #tpu.memory_space<vmem>>, vector<16x1xf32>
    %456 = vector.extract_strided_slice %388 {offsets = [11, 0], sizes = [1, 256], strides = [1, 1]} : vector<16x256xf32> to vector<1x256xf32>
    %457 = vector.broadcast %455 : vector<16x1xf32> to vector<16x256xf32>
    %458 = vector.broadcast %456 : vector<1x256xf32> to vector<16x256xf32>
    %459 = arith.mulf %457, %458 : vector<16x256xf32>
    %460 = arith.addf %454, %459 : vector<16x256xf32>
    %c0_120 = arith.constant 0 : index
    %c28_121 = arith.constant 28 : index
    %461 = vector.load %arg3[%c0_120, %c28_121] : memref<16x144xf32, #tpu.memory_space<vmem>>, vector<16x1xf32>
    %462 = vector.extract_strided_slice %388 {offsets = [12, 0], sizes = [1, 256], strides = [1, 1]} : vector<16x256xf32> to vector<1x256xf32>
    %463 = vector.broadcast %461 : vector<16x1xf32> to vector<16x256xf32>
    %464 = vector.broadcast %462 : vector<1x256xf32> to vector<16x256xf32>
    %465 = arith.mulf %463, %464 : vector<16x256xf32>
    %466 = arith.addf %460, %465 : vector<16x256xf32>
    %c0_122 = arith.constant 0 : index
    %c29_123 = arith.constant 29 : index
    %467 = vector.load %arg3[%c0_122, %c29_123] : memref<16x144xf32, #tpu.memory_space<vmem>>, vector<16x1xf32>
    %468 = vector.extract_strided_slice %388 {offsets = [13, 0], sizes = [1, 256], strides = [1, 1]} : vector<16x256xf32> to vector<1x256xf32>
    %469 = vector.broadcast %467 : vector<16x1xf32> to vector<16x256xf32>
    %470 = vector.broadcast %468 : vector<1x256xf32> to vector<16x256xf32>
    %471 = arith.mulf %469, %470 : vector<16x256xf32>
    %472 = arith.addf %466, %471 : vector<16x256xf32>
    %c0_124 = arith.constant 0 : index
    %c30_125 = arith.constant 30 : index
    %473 = vector.load %arg3[%c0_124, %c30_125] : memref<16x144xf32, #tpu.memory_space<vmem>>, vector<16x1xf32>
    %474 = vector.extract_strided_slice %388 {offsets = [14, 0], sizes = [1, 256], strides = [1, 1]} : vector<16x256xf32> to vector<1x256xf32>
    %475 = vector.broadcast %473 : vector<16x1xf32> to vector<16x256xf32>
    %476 = vector.broadcast %474 : vector<1x256xf32> to vector<16x256xf32>
    %477 = arith.mulf %475, %476 : vector<16x256xf32>
    %478 = arith.addf %472, %477 : vector<16x256xf32>
    %c0_126 = arith.constant 0 : index
    %c31_127 = arith.constant 31 : index
    %479 = vector.load %arg3[%c0_126, %c31_127] : memref<16x144xf32, #tpu.memory_space<vmem>>, vector<16x1xf32>
    %480 = vector.extract_strided_slice %388 {offsets = [15, 0], sizes = [1, 256], strides = [1, 1]} : vector<16x256xf32> to vector<1x256xf32>
    %481 = vector.broadcast %479 : vector<16x1xf32> to vector<16x256xf32>
    %482 = vector.broadcast %480 : vector<1x256xf32> to vector<16x256xf32>
    %483 = arith.mulf %481, %482 : vector<16x256xf32>
    %484 = arith.addf %478, %483 : vector<16x256xf32>
    %485 = vector.extract_strided_slice %285 {offsets = [0, 2], sizes = [16, 256], strides = [1, 1]} : vector<16x290xf32> to vector<16x256xf32>
    %cst_128 = arith.constant 0.000000e+00 : f32
    %486 = vector.shape_cast %22 : vector<1x256xi1> to vector<1x256xi1>
    %487 = vector.broadcast %486 : vector<1x256xi1> to vector<16x256xi1>
    %488 = vector.broadcast %cst_128 : f32 to vector<16x256xf32>
    %489 = arith.select %487, %485, %488 : vector<16x256xi1>, vector<16x256xf32>
    %c0_129 = arith.constant 0 : index
    %c32_130 = arith.constant 32 : index
    %490 = vector.load %arg3[%c0_129, %c32_130] : memref<16x144xf32, #tpu.memory_space<vmem>>, vector<16x1xf32>
    %491 = vector.extract_strided_slice %489 {offsets = [0, 0], sizes = [1, 256], strides = [1, 1]} : vector<16x256xf32> to vector<1x256xf32>
    %492 = vector.broadcast %490 : vector<16x1xf32> to vector<16x256xf32>
    %493 = vector.broadcast %491 : vector<1x256xf32> to vector<16x256xf32>
    %494 = arith.mulf %492, %493 : vector<16x256xf32>
    %495 = arith.addf %484, %494 : vector<16x256xf32>
    %c0_131 = arith.constant 0 : index
    %c33_132 = arith.constant 33 : index
    %496 = vector.load %arg3[%c0_131, %c33_132] : memref<16x144xf32, #tpu.memory_space<vmem>>, vector<16x1xf32>
    %497 = vector.extract_strided_slice %489 {offsets = [1, 0], sizes = [1, 256], strides = [1, 1]} : vector<16x256xf32> to vector<1x256xf32>
    %498 = vector.broadcast %496 : vector<16x1xf32> to vector<16x256xf32>
    %499 = vector.broadcast %497 : vector<1x256xf32> to vector<16x256xf32>
    %500 = arith.mulf %498, %499 : vector<16x256xf32>
    %501 = arith.addf %495, %500 : vector<16x256xf32>
    %c0_133 = arith.constant 0 : index
    %c34_134 = arith.constant 34 : index
    %502 = vector.load %arg3[%c0_133, %c34_134] : memref<16x144xf32, #tpu.memory_space<vmem>>, vector<16x1xf32>
    %503 = vector.extract_strided_slice %489 {offsets = [2, 0], sizes = [1, 256], strides = [1, 1]} : vector<16x256xf32> to vector<1x256xf32>
    %504 = vector.broadcast %502 : vector<16x1xf32> to vector<16x256xf32>
    %505 = vector.broadcast %503 : vector<1x256xf32> to vector<16x256xf32>
    %506 = arith.mulf %504, %505 : vector<16x256xf32>
    %507 = arith.addf %501, %506 : vector<16x256xf32>
    %c0_135 = arith.constant 0 : index
    %c35_136 = arith.constant 35 : index
    %508 = vector.load %arg3[%c0_135, %c35_136] : memref<16x144xf32, #tpu.memory_space<vmem>>, vector<16x1xf32>
    %509 = vector.extract_strided_slice %489 {offsets = [3, 0], sizes = [1, 256], strides = [1, 1]} : vector<16x256xf32> to vector<1x256xf32>
    %510 = vector.broadcast %508 : vector<16x1xf32> to vector<16x256xf32>
    %511 = vector.broadcast %509 : vector<1x256xf32> to vector<16x256xf32>
    %512 = arith.mulf %510, %511 : vector<16x256xf32>
    %513 = arith.addf %507, %512 : vector<16x256xf32>
    %c0_137 = arith.constant 0 : index
    %c36 = arith.constant 36 : index
    %514 = vector.load %arg3[%c0_137, %c36] : memref<16x144xf32, #tpu.memory_space<vmem>>, vector<16x1xf32>
    %515 = vector.extract_strided_slice %489 {offsets = [4, 0], sizes = [1, 256], strides = [1, 1]} : vector<16x256xf32> to vector<1x256xf32>
    %516 = vector.broadcast %514 : vector<16x1xf32> to vector<16x256xf32>
    %517 = vector.broadcast %515 : vector<1x256xf32> to vector<16x256xf32>
    %518 = arith.mulf %516, %517 : vector<16x256xf32>
    %519 = arith.addf %513, %518 : vector<16x256xf32>
    %c0_138 = arith.constant 0 : index
    %c37 = arith.constant 37 : index
    %520 = vector.load %arg3[%c0_138, %c37] : memref<16x144xf32, #tpu.memory_space<vmem>>, vector<16x1xf32>
    %521 = vector.extract_strided_slice %489 {offsets = [5, 0], sizes = [1, 256], strides = [1, 1]} : vector<16x256xf32> to vector<1x256xf32>
    %522 = vector.broadcast %520 : vector<16x1xf32> to vector<16x256xf32>
    %523 = vector.broadcast %521 : vector<1x256xf32> to vector<16x256xf32>
    %524 = arith.mulf %522, %523 : vector<16x256xf32>
    %525 = arith.addf %519, %524 : vector<16x256xf32>
    %c0_139 = arith.constant 0 : index
    %c38 = arith.constant 38 : index
    %526 = vector.load %arg3[%c0_139, %c38] : memref<16x144xf32, #tpu.memory_space<vmem>>, vector<16x1xf32>
    %527 = vector.extract_strided_slice %489 {offsets = [6, 0], sizes = [1, 256], strides = [1, 1]} : vector<16x256xf32> to vector<1x256xf32>
    %528 = vector.broadcast %526 : vector<16x1xf32> to vector<16x256xf32>
    %529 = vector.broadcast %527 : vector<1x256xf32> to vector<16x256xf32>
    %530 = arith.mulf %528, %529 : vector<16x256xf32>
    %531 = arith.addf %525, %530 : vector<16x256xf32>
    %c0_140 = arith.constant 0 : index
    %c39 = arith.constant 39 : index
    %532 = vector.load %arg3[%c0_140, %c39] : memref<16x144xf32, #tpu.memory_space<vmem>>, vector<16x1xf32>
    %533 = vector.extract_strided_slice %489 {offsets = [7, 0], sizes = [1, 256], strides = [1, 1]} : vector<16x256xf32> to vector<1x256xf32>
    %534 = vector.broadcast %532 : vector<16x1xf32> to vector<16x256xf32>
    %535 = vector.broadcast %533 : vector<1x256xf32> to vector<16x256xf32>
    %536 = arith.mulf %534, %535 : vector<16x256xf32>
    %537 = arith.addf %531, %536 : vector<16x256xf32>
    %c0_141 = arith.constant 0 : index
    %c40 = arith.constant 40 : index
    %538 = vector.load %arg3[%c0_141, %c40] : memref<16x144xf32, #tpu.memory_space<vmem>>, vector<16x1xf32>
    %539 = vector.extract_strided_slice %489 {offsets = [8, 0], sizes = [1, 256], strides = [1, 1]} : vector<16x256xf32> to vector<1x256xf32>
    %540 = vector.broadcast %538 : vector<16x1xf32> to vector<16x256xf32>
    %541 = vector.broadcast %539 : vector<1x256xf32> to vector<16x256xf32>
    %542 = arith.mulf %540, %541 : vector<16x256xf32>
    %543 = arith.addf %537, %542 : vector<16x256xf32>
    %c0_142 = arith.constant 0 : index
    %c41 = arith.constant 41 : index
    %544 = vector.load %arg3[%c0_142, %c41] : memref<16x144xf32, #tpu.memory_space<vmem>>, vector<16x1xf32>
    %545 = vector.extract_strided_slice %489 {offsets = [9, 0], sizes = [1, 256], strides = [1, 1]} : vector<16x256xf32> to vector<1x256xf32>
    %546 = vector.broadcast %544 : vector<16x1xf32> to vector<16x256xf32>
    %547 = vector.broadcast %545 : vector<1x256xf32> to vector<16x256xf32>
    %548 = arith.mulf %546, %547 : vector<16x256xf32>
    %549 = arith.addf %543, %548 : vector<16x256xf32>
    %c0_143 = arith.constant 0 : index
    %c42 = arith.constant 42 : index
    %550 = vector.load %arg3[%c0_143, %c42] : memref<16x144xf32, #tpu.memory_space<vmem>>, vector<16x1xf32>
    %551 = vector.extract_strided_slice %489 {offsets = [10, 0], sizes = [1, 256], strides = [1, 1]} : vector<16x256xf32> to vector<1x256xf32>
    %552 = vector.broadcast %550 : vector<16x1xf32> to vector<16x256xf32>
    %553 = vector.broadcast %551 : vector<1x256xf32> to vector<16x256xf32>
    %554 = arith.mulf %552, %553 : vector<16x256xf32>
    %555 = arith.addf %549, %554 : vector<16x256xf32>
    %c0_144 = arith.constant 0 : index
    %c43 = arith.constant 43 : index
    %556 = vector.load %arg3[%c0_144, %c43] : memref<16x144xf32, #tpu.memory_space<vmem>>, vector<16x1xf32>
    %557 = vector.extract_strided_slice %489 {offsets = [11, 0], sizes = [1, 256], strides = [1, 1]} : vector<16x256xf32> to vector<1x256xf32>
    %558 = vector.broadcast %556 : vector<16x1xf32> to vector<16x256xf32>
    %559 = vector.broadcast %557 : vector<1x256xf32> to vector<16x256xf32>
    %560 = arith.mulf %558, %559 : vector<16x256xf32>
    %561 = arith.addf %555, %560 : vector<16x256xf32>
    %c0_145 = arith.constant 0 : index
    %c44 = arith.constant 44 : index
    %562 = vector.load %arg3[%c0_145, %c44] : memref<16x144xf32, #tpu.memory_space<vmem>>, vector<16x1xf32>
    %563 = vector.extract_strided_slice %489 {offsets = [12, 0], sizes = [1, 256], strides = [1, 1]} : vector<16x256xf32> to vector<1x256xf32>
    %564 = vector.broadcast %562 : vector<16x1xf32> to vector<16x256xf32>
    %565 = vector.broadcast %563 : vector<1x256xf32> to vector<16x256xf32>
    %566 = arith.mulf %564, %565 : vector<16x256xf32>
    %567 = arith.addf %561, %566 : vector<16x256xf32>
    %c0_146 = arith.constant 0 : index
    %c45 = arith.constant 45 : index
    %568 = vector.load %arg3[%c0_146, %c45] : memref<16x144xf32, #tpu.memory_space<vmem>>, vector<16x1xf32>
    %569 = vector.extract_strided_slice %489 {offsets = [13, 0], sizes = [1, 256], strides = [1, 1]} : vector<16x256xf32> to vector<1x256xf32>
    %570 = vector.broadcast %568 : vector<16x1xf32> to vector<16x256xf32>
    %571 = vector.broadcast %569 : vector<1x256xf32> to vector<16x256xf32>
    %572 = arith.mulf %570, %571 : vector<16x256xf32>
    %573 = arith.addf %567, %572 : vector<16x256xf32>
    %c0_147 = arith.constant 0 : index
    %c46 = arith.constant 46 : index
    %574 = vector.load %arg3[%c0_147, %c46] : memref<16x144xf32, #tpu.memory_space<vmem>>, vector<16x1xf32>
    %575 = vector.extract_strided_slice %489 {offsets = [14, 0], sizes = [1, 256], strides = [1, 1]} : vector<16x256xf32> to vector<1x256xf32>
    %576 = vector.broadcast %574 : vector<16x1xf32> to vector<16x256xf32>
    %577 = vector.broadcast %575 : vector<1x256xf32> to vector<16x256xf32>
    %578 = arith.mulf %576, %577 : vector<16x256xf32>
    %579 = arith.addf %573, %578 : vector<16x256xf32>
    %c0_148 = arith.constant 0 : index
    %c47 = arith.constant 47 : index
    %580 = vector.load %arg3[%c0_148, %c47] : memref<16x144xf32, #tpu.memory_space<vmem>>, vector<16x1xf32>
    %581 = vector.extract_strided_slice %489 {offsets = [15, 0], sizes = [1, 256], strides = [1, 1]} : vector<16x256xf32> to vector<1x256xf32>
    %582 = vector.broadcast %580 : vector<16x1xf32> to vector<16x256xf32>
    %583 = vector.broadcast %581 : vector<1x256xf32> to vector<16x256xf32>
    %584 = arith.mulf %582, %583 : vector<16x256xf32>
    %585 = arith.addf %579, %584 : vector<16x256xf32>
    %586 = vector.extract_strided_slice %285 {offsets = [0, 16], sizes = [16, 256], strides = [1, 1]} : vector<16x290xf32> to vector<16x256xf32>
    %cst_149 = arith.constant 0.000000e+00 : f32
    %587 = vector.shape_cast %20 : vector<1x256xi1> to vector<1x256xi1>
    %588 = vector.broadcast %587 : vector<1x256xi1> to vector<16x256xi1>
    %589 = vector.broadcast %cst_149 : f32 to vector<16x256xf32>
    %590 = arith.select %588, %586, %589 : vector<16x256xi1>, vector<16x256xf32>
    %c0_150 = arith.constant 0 : index
    %c48 = arith.constant 48 : index
    %591 = vector.load %arg3[%c0_150, %c48] : memref<16x144xf32, #tpu.memory_space<vmem>>, vector<16x1xf32>
    %592 = vector.extract_strided_slice %590 {offsets = [0, 0], sizes = [1, 256], strides = [1, 1]} : vector<16x256xf32> to vector<1x256xf32>
    %593 = vector.broadcast %591 : vector<16x1xf32> to vector<16x256xf32>
    %594 = vector.broadcast %592 : vector<1x256xf32> to vector<16x256xf32>
    %595 = arith.mulf %593, %594 : vector<16x256xf32>
    %596 = arith.addf %585, %595 : vector<16x256xf32>
    %c0_151 = arith.constant 0 : index
    %c49 = arith.constant 49 : index
    %597 = vector.load %arg3[%c0_151, %c49] : memref<16x144xf32, #tpu.memory_space<vmem>>, vector<16x1xf32>
    %598 = vector.extract_strided_slice %590 {offsets = [1, 0], sizes = [1, 256], strides = [1, 1]} : vector<16x256xf32> to vector<1x256xf32>
    %599 = vector.broadcast %597 : vector<16x1xf32> to vector<16x256xf32>
    %600 = vector.broadcast %598 : vector<1x256xf32> to vector<16x256xf32>
    %601 = arith.mulf %599, %600 : vector<16x256xf32>
    %602 = arith.addf %596, %601 : vector<16x256xf32>
    %c0_152 = arith.constant 0 : index
    %c50 = arith.constant 50 : index
    %603 = vector.load %arg3[%c0_152, %c50] : memref<16x144xf32, #tpu.memory_space<vmem>>, vector<16x1xf32>
    %604 = vector.extract_strided_slice %590 {offsets = [2, 0], sizes = [1, 256], strides = [1, 1]} : vector<16x256xf32> to vector<1x256xf32>
    %605 = vector.broadcast %603 : vector<16x1xf32> to vector<16x256xf32>
    %606 = vector.broadcast %604 : vector<1x256xf32> to vector<16x256xf32>
    %607 = arith.mulf %605, %606 : vector<16x256xf32>
    %608 = arith.addf %602, %607 : vector<16x256xf32>
    %c0_153 = arith.constant 0 : index
    %c51 = arith.constant 51 : index
    %609 = vector.load %arg3[%c0_153, %c51] : memref<16x144xf32, #tpu.memory_space<vmem>>, vector<16x1xf32>
    %610 = vector.extract_strided_slice %590 {offsets = [3, 0], sizes = [1, 256], strides = [1, 1]} : vector<16x256xf32> to vector<1x256xf32>
    %611 = vector.broadcast %609 : vector<16x1xf32> to vector<16x256xf32>
    %612 = vector.broadcast %610 : vector<1x256xf32> to vector<16x256xf32>
    %613 = arith.mulf %611, %612 : vector<16x256xf32>
    %614 = arith.addf %608, %613 : vector<16x256xf32>
    %c0_154 = arith.constant 0 : index
    %c52 = arith.constant 52 : index
    %615 = vector.load %arg3[%c0_154, %c52] : memref<16x144xf32, #tpu.memory_space<vmem>>, vector<16x1xf32>
    %616 = vector.extract_strided_slice %590 {offsets = [4, 0], sizes = [1, 256], strides = [1, 1]} : vector<16x256xf32> to vector<1x256xf32>
    %617 = vector.broadcast %615 : vector<16x1xf32> to vector<16x256xf32>
    %618 = vector.broadcast %616 : vector<1x256xf32> to vector<16x256xf32>
    %619 = arith.mulf %617, %618 : vector<16x256xf32>
    %620 = arith.addf %614, %619 : vector<16x256xf32>
    %c0_155 = arith.constant 0 : index
    %c53 = arith.constant 53 : index
    %621 = vector.load %arg3[%c0_155, %c53] : memref<16x144xf32, #tpu.memory_space<vmem>>, vector<16x1xf32>
    %622 = vector.extract_strided_slice %590 {offsets = [5, 0], sizes = [1, 256], strides = [1, 1]} : vector<16x256xf32> to vector<1x256xf32>
    %623 = vector.broadcast %621 : vector<16x1xf32> to vector<16x256xf32>
    %624 = vector.broadcast %622 : vector<1x256xf32> to vector<16x256xf32>
    %625 = arith.mulf %623, %624 : vector<16x256xf32>
    %626 = arith.addf %620, %625 : vector<16x256xf32>
    %c0_156 = arith.constant 0 : index
    %c54 = arith.constant 54 : index
    %627 = vector.load %arg3[%c0_156, %c54] : memref<16x144xf32, #tpu.memory_space<vmem>>, vector<16x1xf32>
    %628 = vector.extract_strided_slice %590 {offsets = [6, 0], sizes = [1, 256], strides = [1, 1]} : vector<16x256xf32> to vector<1x256xf32>
    %629 = vector.broadcast %627 : vector<16x1xf32> to vector<16x256xf32>
    %630 = vector.broadcast %628 : vector<1x256xf32> to vector<16x256xf32>
    %631 = arith.mulf %629, %630 : vector<16x256xf32>
    %632 = arith.addf %626, %631 : vector<16x256xf32>
    %c0_157 = arith.constant 0 : index
    %c55 = arith.constant 55 : index
    %633 = vector.load %arg3[%c0_157, %c55] : memref<16x144xf32, #tpu.memory_space<vmem>>, vector<16x1xf32>
    %634 = vector.extract_strided_slice %590 {offsets = [7, 0], sizes = [1, 256], strides = [1, 1]} : vector<16x256xf32> to vector<1x256xf32>
    %635 = vector.broadcast %633 : vector<16x1xf32> to vector<16x256xf32>
    %636 = vector.broadcast %634 : vector<1x256xf32> to vector<16x256xf32>
    %637 = arith.mulf %635, %636 : vector<16x256xf32>
    %638 = arith.addf %632, %637 : vector<16x256xf32>
    %c0_158 = arith.constant 0 : index
    %c56 = arith.constant 56 : index
    %639 = vector.load %arg3[%c0_158, %c56] : memref<16x144xf32, #tpu.memory_space<vmem>>, vector<16x1xf32>
    %640 = vector.extract_strided_slice %590 {offsets = [8, 0], sizes = [1, 256], strides = [1, 1]} : vector<16x256xf32> to vector<1x256xf32>
    %641 = vector.broadcast %639 : vector<16x1xf32> to vector<16x256xf32>
    %642 = vector.broadcast %640 : vector<1x256xf32> to vector<16x256xf32>
    %643 = arith.mulf %641, %642 : vector<16x256xf32>
    %644 = arith.addf %638, %643 : vector<16x256xf32>
    %c0_159 = arith.constant 0 : index
    %c57 = arith.constant 57 : index
    %645 = vector.load %arg3[%c0_159, %c57] : memref<16x144xf32, #tpu.memory_space<vmem>>, vector<16x1xf32>
    %646 = vector.extract_strided_slice %590 {offsets = [9, 0], sizes = [1, 256], strides = [1, 1]} : vector<16x256xf32> to vector<1x256xf32>
    %647 = vector.broadcast %645 : vector<16x1xf32> to vector<16x256xf32>
    %648 = vector.broadcast %646 : vector<1x256xf32> to vector<16x256xf32>
    %649 = arith.mulf %647, %648 : vector<16x256xf32>
    %650 = arith.addf %644, %649 : vector<16x256xf32>
    %c0_160 = arith.constant 0 : index
    %c58 = arith.constant 58 : index
    %651 = vector.load %arg3[%c0_160, %c58] : memref<16x144xf32, #tpu.memory_space<vmem>>, vector<16x1xf32>
    %652 = vector.extract_strided_slice %590 {offsets = [10, 0], sizes = [1, 256], strides = [1, 1]} : vector<16x256xf32> to vector<1x256xf32>
    %653 = vector.broadcast %651 : vector<16x1xf32> to vector<16x256xf32>
    %654 = vector.broadcast %652 : vector<1x256xf32> to vector<16x256xf32>
    %655 = arith.mulf %653, %654 : vector<16x256xf32>
    %656 = arith.addf %650, %655 : vector<16x256xf32>
    %c0_161 = arith.constant 0 : index
    %c59 = arith.constant 59 : index
    %657 = vector.load %arg3[%c0_161, %c59] : memref<16x144xf32, #tpu.memory_space<vmem>>, vector<16x1xf32>
    %658 = vector.extract_strided_slice %590 {offsets = [11, 0], sizes = [1, 256], strides = [1, 1]} : vector<16x256xf32> to vector<1x256xf32>
    %659 = vector.broadcast %657 : vector<16x1xf32> to vector<16x256xf32>
    %660 = vector.broadcast %658 : vector<1x256xf32> to vector<16x256xf32>
    %661 = arith.mulf %659, %660 : vector<16x256xf32>
    %662 = arith.addf %656, %661 : vector<16x256xf32>
    %c0_162 = arith.constant 0 : index
    %c60 = arith.constant 60 : index
    %663 = vector.load %arg3[%c0_162, %c60] : memref<16x144xf32, #tpu.memory_space<vmem>>, vector<16x1xf32>
    %664 = vector.extract_strided_slice %590 {offsets = [12, 0], sizes = [1, 256], strides = [1, 1]} : vector<16x256xf32> to vector<1x256xf32>
    %665 = vector.broadcast %663 : vector<16x1xf32> to vector<16x256xf32>
    %666 = vector.broadcast %664 : vector<1x256xf32> to vector<16x256xf32>
    %667 = arith.mulf %665, %666 : vector<16x256xf32>
    %668 = arith.addf %662, %667 : vector<16x256xf32>
    %c0_163 = arith.constant 0 : index
    %c61 = arith.constant 61 : index
    %669 = vector.load %arg3[%c0_163, %c61] : memref<16x144xf32, #tpu.memory_space<vmem>>, vector<16x1xf32>
    %670 = vector.extract_strided_slice %590 {offsets = [13, 0], sizes = [1, 256], strides = [1, 1]} : vector<16x256xf32> to vector<1x256xf32>
    %671 = vector.broadcast %669 : vector<16x1xf32> to vector<16x256xf32>
    %672 = vector.broadcast %670 : vector<1x256xf32> to vector<16x256xf32>
    %673 = arith.mulf %671, %672 : vector<16x256xf32>
    %674 = arith.addf %668, %673 : vector<16x256xf32>
    %c0_164 = arith.constant 0 : index
    %c62 = arith.constant 62 : index
    %675 = vector.load %arg3[%c0_164, %c62] : memref<16x144xf32, #tpu.memory_space<vmem>>, vector<16x1xf32>
    %676 = vector.extract_strided_slice %590 {offsets = [14, 0], sizes = [1, 256], strides = [1, 1]} : vector<16x256xf32> to vector<1x256xf32>
    %677 = vector.broadcast %675 : vector<16x1xf32> to vector<16x256xf32>
    %678 = vector.broadcast %676 : vector<1x256xf32> to vector<16x256xf32>
    %679 = arith.mulf %677, %678 : vector<16x256xf32>
    %680 = arith.addf %674, %679 : vector<16x256xf32>
    %c0_165 = arith.constant 0 : index
    %c63 = arith.constant 63 : index
    %681 = vector.load %arg3[%c0_165, %c63] : memref<16x144xf32, #tpu.memory_space<vmem>>, vector<16x1xf32>
    %682 = vector.extract_strided_slice %590 {offsets = [15, 0], sizes = [1, 256], strides = [1, 1]} : vector<16x256xf32> to vector<1x256xf32>
    %683 = vector.broadcast %681 : vector<16x1xf32> to vector<16x256xf32>
    %684 = vector.broadcast %682 : vector<1x256xf32> to vector<16x256xf32>
    %685 = arith.mulf %683, %684 : vector<16x256xf32>
    %686 = arith.addf %680, %685 : vector<16x256xf32>
    %687 = vector.extract_strided_slice %285 {offsets = [0, 17], sizes = [16, 256], strides = [1, 1]} : vector<16x290xf32> to vector<16x256xf32>
    %c0_166 = arith.constant 0 : index
    %c64 = arith.constant 64 : index
    %688 = vector.load %arg3[%c0_166, %c64] : memref<16x144xf32, #tpu.memory_space<vmem>>, vector<16x1xf32>
    %689 = vector.extract_strided_slice %687 {offsets = [0, 0], sizes = [1, 256], strides = [1, 1]} : vector<16x256xf32> to vector<1x256xf32>
    %690 = vector.broadcast %688 : vector<16x1xf32> to vector<16x256xf32>
    %691 = vector.broadcast %689 : vector<1x256xf32> to vector<16x256xf32>
    %692 = arith.mulf %690, %691 : vector<16x256xf32>
    %693 = arith.addf %686, %692 : vector<16x256xf32>
    %c0_167 = arith.constant 0 : index
    %c65 = arith.constant 65 : index
    %694 = vector.load %arg3[%c0_167, %c65] : memref<16x144xf32, #tpu.memory_space<vmem>>, vector<16x1xf32>
    %695 = vector.extract_strided_slice %687 {offsets = [1, 0], sizes = [1, 256], strides = [1, 1]} : vector<16x256xf32> to vector<1x256xf32>
    %696 = vector.broadcast %694 : vector<16x1xf32> to vector<16x256xf32>
    %697 = vector.broadcast %695 : vector<1x256xf32> to vector<16x256xf32>
    %698 = arith.mulf %696, %697 : vector<16x256xf32>
    %699 = arith.addf %693, %698 : vector<16x256xf32>
    %c0_168 = arith.constant 0 : index
    %c66 = arith.constant 66 : index
    %700 = vector.load %arg3[%c0_168, %c66] : memref<16x144xf32, #tpu.memory_space<vmem>>, vector<16x1xf32>
    %701 = vector.extract_strided_slice %687 {offsets = [2, 0], sizes = [1, 256], strides = [1, 1]} : vector<16x256xf32> to vector<1x256xf32>
    %702 = vector.broadcast %700 : vector<16x1xf32> to vector<16x256xf32>
    %703 = vector.broadcast %701 : vector<1x256xf32> to vector<16x256xf32>
    %704 = arith.mulf %702, %703 : vector<16x256xf32>
    %705 = arith.addf %699, %704 : vector<16x256xf32>
    %c0_169 = arith.constant 0 : index
    %c67 = arith.constant 67 : index
    %706 = vector.load %arg3[%c0_169, %c67] : memref<16x144xf32, #tpu.memory_space<vmem>>, vector<16x1xf32>
    %707 = vector.extract_strided_slice %687 {offsets = [3, 0], sizes = [1, 256], strides = [1, 1]} : vector<16x256xf32> to vector<1x256xf32>
    %708 = vector.broadcast %706 : vector<16x1xf32> to vector<16x256xf32>
    %709 = vector.broadcast %707 : vector<1x256xf32> to vector<16x256xf32>
    %710 = arith.mulf %708, %709 : vector<16x256xf32>
    %711 = arith.addf %705, %710 : vector<16x256xf32>
    %c0_170 = arith.constant 0 : index
    %c68 = arith.constant 68 : index
    %712 = vector.load %arg3[%c0_170, %c68] : memref<16x144xf32, #tpu.memory_space<vmem>>, vector<16x1xf32>
    %713 = vector.extract_strided_slice %687 {offsets = [4, 0], sizes = [1, 256], strides = [1, 1]} : vector<16x256xf32> to vector<1x256xf32>
    %714 = vector.broadcast %712 : vector<16x1xf32> to vector<16x256xf32>
    %715 = vector.broadcast %713 : vector<1x256xf32> to vector<16x256xf32>
    %716 = arith.mulf %714, %715 : vector<16x256xf32>
    %717 = arith.addf %711, %716 : vector<16x256xf32>
    %c0_171 = arith.constant 0 : index
    %c69 = arith.constant 69 : index
    %718 = vector.load %arg3[%c0_171, %c69] : memref<16x144xf32, #tpu.memory_space<vmem>>, vector<16x1xf32>
    %719 = vector.extract_strided_slice %687 {offsets = [5, 0], sizes = [1, 256], strides = [1, 1]} : vector<16x256xf32> to vector<1x256xf32>
    %720 = vector.broadcast %718 : vector<16x1xf32> to vector<16x256xf32>
    %721 = vector.broadcast %719 : vector<1x256xf32> to vector<16x256xf32>
    %722 = arith.mulf %720, %721 : vector<16x256xf32>
    %723 = arith.addf %717, %722 : vector<16x256xf32>
    %c0_172 = arith.constant 0 : index
    %c70 = arith.constant 70 : index
    %724 = vector.load %arg3[%c0_172, %c70] : memref<16x144xf32, #tpu.memory_space<vmem>>, vector<16x1xf32>
    %725 = vector.extract_strided_slice %687 {offsets = [6, 0], sizes = [1, 256], strides = [1, 1]} : vector<16x256xf32> to vector<1x256xf32>
    %726 = vector.broadcast %724 : vector<16x1xf32> to vector<16x256xf32>
    %727 = vector.broadcast %725 : vector<1x256xf32> to vector<16x256xf32>
    %728 = arith.mulf %726, %727 : vector<16x256xf32>
    %729 = arith.addf %723, %728 : vector<16x256xf32>
    %c0_173 = arith.constant 0 : index
    %c71 = arith.constant 71 : index
    %730 = vector.load %arg3[%c0_173, %c71] : memref<16x144xf32, #tpu.memory_space<vmem>>, vector<16x1xf32>
    %731 = vector.extract_strided_slice %687 {offsets = [7, 0], sizes = [1, 256], strides = [1, 1]} : vector<16x256xf32> to vector<1x256xf32>
    %732 = vector.broadcast %730 : vector<16x1xf32> to vector<16x256xf32>
    %733 = vector.broadcast %731 : vector<1x256xf32> to vector<16x256xf32>
    %734 = arith.mulf %732, %733 : vector<16x256xf32>
    %735 = arith.addf %729, %734 : vector<16x256xf32>
    %c0_174 = arith.constant 0 : index
    %c72 = arith.constant 72 : index
    %736 = vector.load %arg3[%c0_174, %c72] : memref<16x144xf32, #tpu.memory_space<vmem>>, vector<16x1xf32>
    %737 = vector.extract_strided_slice %687 {offsets = [8, 0], sizes = [1, 256], strides = [1, 1]} : vector<16x256xf32> to vector<1x256xf32>
    %738 = vector.broadcast %736 : vector<16x1xf32> to vector<16x256xf32>
    %739 = vector.broadcast %737 : vector<1x256xf32> to vector<16x256xf32>
    %740 = arith.mulf %738, %739 : vector<16x256xf32>
    %741 = arith.addf %735, %740 : vector<16x256xf32>
    %c0_175 = arith.constant 0 : index
    %c73 = arith.constant 73 : index
    %742 = vector.load %arg3[%c0_175, %c73] : memref<16x144xf32, #tpu.memory_space<vmem>>, vector<16x1xf32>
    %743 = vector.extract_strided_slice %687 {offsets = [9, 0], sizes = [1, 256], strides = [1, 1]} : vector<16x256xf32> to vector<1x256xf32>
    %744 = vector.broadcast %742 : vector<16x1xf32> to vector<16x256xf32>
    %745 = vector.broadcast %743 : vector<1x256xf32> to vector<16x256xf32>
    %746 = arith.mulf %744, %745 : vector<16x256xf32>
    %747 = arith.addf %741, %746 : vector<16x256xf32>
    %c0_176 = arith.constant 0 : index
    %c74 = arith.constant 74 : index
    %748 = vector.load %arg3[%c0_176, %c74] : memref<16x144xf32, #tpu.memory_space<vmem>>, vector<16x1xf32>
    %749 = vector.extract_strided_slice %687 {offsets = [10, 0], sizes = [1, 256], strides = [1, 1]} : vector<16x256xf32> to vector<1x256xf32>
    %750 = vector.broadcast %748 : vector<16x1xf32> to vector<16x256xf32>
    %751 = vector.broadcast %749 : vector<1x256xf32> to vector<16x256xf32>
    %752 = arith.mulf %750, %751 : vector<16x256xf32>
    %753 = arith.addf %747, %752 : vector<16x256xf32>
    %c0_177 = arith.constant 0 : index
    %c75 = arith.constant 75 : index
    %754 = vector.load %arg3[%c0_177, %c75] : memref<16x144xf32, #tpu.memory_space<vmem>>, vector<16x1xf32>
    %755 = vector.extract_strided_slice %687 {offsets = [11, 0], sizes = [1, 256], strides = [1, 1]} : vector<16x256xf32> to vector<1x256xf32>
    %756 = vector.broadcast %754 : vector<16x1xf32> to vector<16x256xf32>
    %757 = vector.broadcast %755 : vector<1x256xf32> to vector<16x256xf32>
    %758 = arith.mulf %756, %757 : vector<16x256xf32>
    %759 = arith.addf %753, %758 : vector<16x256xf32>
    %c0_178 = arith.constant 0 : index
    %c76 = arith.constant 76 : index
    %760 = vector.load %arg3[%c0_178, %c76] : memref<16x144xf32, #tpu.memory_space<vmem>>, vector<16x1xf32>
    %761 = vector.extract_strided_slice %687 {offsets = [12, 0], sizes = [1, 256], strides = [1, 1]} : vector<16x256xf32> to vector<1x256xf32>
    %762 = vector.broadcast %760 : vector<16x1xf32> to vector<16x256xf32>
    %763 = vector.broadcast %761 : vector<1x256xf32> to vector<16x256xf32>
    %764 = arith.mulf %762, %763 : vector<16x256xf32>
    %765 = arith.addf %759, %764 : vector<16x256xf32>
    %c0_179 = arith.constant 0 : index
    %c77 = arith.constant 77 : index
    %766 = vector.load %arg3[%c0_179, %c77] : memref<16x144xf32, #tpu.memory_space<vmem>>, vector<16x1xf32>
    %767 = vector.extract_strided_slice %687 {offsets = [13, 0], sizes = [1, 256], strides = [1, 1]} : vector<16x256xf32> to vector<1x256xf32>
    %768 = vector.broadcast %766 : vector<16x1xf32> to vector<16x256xf32>
    %769 = vector.broadcast %767 : vector<1x256xf32> to vector<16x256xf32>
    %770 = arith.mulf %768, %769 : vector<16x256xf32>
    %771 = arith.addf %765, %770 : vector<16x256xf32>
    %c0_180 = arith.constant 0 : index
    %c78 = arith.constant 78 : index
    %772 = vector.load %arg3[%c0_180, %c78] : memref<16x144xf32, #tpu.memory_space<vmem>>, vector<16x1xf32>
    %773 = vector.extract_strided_slice %687 {offsets = [14, 0], sizes = [1, 256], strides = [1, 1]} : vector<16x256xf32> to vector<1x256xf32>
    %774 = vector.broadcast %772 : vector<16x1xf32> to vector<16x256xf32>
    %775 = vector.broadcast %773 : vector<1x256xf32> to vector<16x256xf32>
    %776 = arith.mulf %774, %775 : vector<16x256xf32>
    %777 = arith.addf %771, %776 : vector<16x256xf32>
    %c0_181 = arith.constant 0 : index
    %c79 = arith.constant 79 : index
    %778 = vector.load %arg3[%c0_181, %c79] : memref<16x144xf32, #tpu.memory_space<vmem>>, vector<16x1xf32>
    %779 = vector.extract_strided_slice %687 {offsets = [15, 0], sizes = [1, 256], strides = [1, 1]} : vector<16x256xf32> to vector<1x256xf32>
    %780 = vector.broadcast %778 : vector<16x1xf32> to vector<16x256xf32>
    %781 = vector.broadcast %779 : vector<1x256xf32> to vector<16x256xf32>
    %782 = arith.mulf %780, %781 : vector<16x256xf32>
    %783 = arith.addf %777, %782 : vector<16x256xf32>
    %784 = vector.extract_strided_slice %285 {offsets = [0, 18], sizes = [16, 256], strides = [1, 1]} : vector<16x290xf32> to vector<16x256xf32>
    %cst_182 = arith.constant 0.000000e+00 : f32
    %785 = vector.shape_cast %22 : vector<1x256xi1> to vector<1x256xi1>
    %786 = vector.broadcast %785 : vector<1x256xi1> to vector<16x256xi1>
    %787 = vector.broadcast %cst_182 : f32 to vector<16x256xf32>
    %788 = arith.select %786, %784, %787 : vector<16x256xi1>, vector<16x256xf32>
    %c0_183 = arith.constant 0 : index
    %c80 = arith.constant 80 : index
    %789 = vector.load %arg3[%c0_183, %c80] : memref<16x144xf32, #tpu.memory_space<vmem>>, vector<16x1xf32>
    %790 = vector.extract_strided_slice %788 {offsets = [0, 0], sizes = [1, 256], strides = [1, 1]} : vector<16x256xf32> to vector<1x256xf32>
    %791 = vector.broadcast %789 : vector<16x1xf32> to vector<16x256xf32>
    %792 = vector.broadcast %790 : vector<1x256xf32> to vector<16x256xf32>
    %793 = arith.mulf %791, %792 : vector<16x256xf32>
    %794 = arith.addf %783, %793 : vector<16x256xf32>
    %c0_184 = arith.constant 0 : index
    %c81 = arith.constant 81 : index
    %795 = vector.load %arg3[%c0_184, %c81] : memref<16x144xf32, #tpu.memory_space<vmem>>, vector<16x1xf32>
    %796 = vector.extract_strided_slice %788 {offsets = [1, 0], sizes = [1, 256], strides = [1, 1]} : vector<16x256xf32> to vector<1x256xf32>
    %797 = vector.broadcast %795 : vector<16x1xf32> to vector<16x256xf32>
    %798 = vector.broadcast %796 : vector<1x256xf32> to vector<16x256xf32>
    %799 = arith.mulf %797, %798 : vector<16x256xf32>
    %800 = arith.addf %794, %799 : vector<16x256xf32>
    %c0_185 = arith.constant 0 : index
    %c82 = arith.constant 82 : index
    %801 = vector.load %arg3[%c0_185, %c82] : memref<16x144xf32, #tpu.memory_space<vmem>>, vector<16x1xf32>
    %802 = vector.extract_strided_slice %788 {offsets = [2, 0], sizes = [1, 256], strides = [1, 1]} : vector<16x256xf32> to vector<1x256xf32>
    %803 = vector.broadcast %801 : vector<16x1xf32> to vector<16x256xf32>
    %804 = vector.broadcast %802 : vector<1x256xf32> to vector<16x256xf32>
    %805 = arith.mulf %803, %804 : vector<16x256xf32>
    %806 = arith.addf %800, %805 : vector<16x256xf32>
    %c0_186 = arith.constant 0 : index
    %c83 = arith.constant 83 : index
    %807 = vector.load %arg3[%c0_186, %c83] : memref<16x144xf32, #tpu.memory_space<vmem>>, vector<16x1xf32>
    %808 = vector.extract_strided_slice %788 {offsets = [3, 0], sizes = [1, 256], strides = [1, 1]} : vector<16x256xf32> to vector<1x256xf32>
    %809 = vector.broadcast %807 : vector<16x1xf32> to vector<16x256xf32>
    %810 = vector.broadcast %808 : vector<1x256xf32> to vector<16x256xf32>
    %811 = arith.mulf %809, %810 : vector<16x256xf32>
    %812 = arith.addf %806, %811 : vector<16x256xf32>
    %c0_187 = arith.constant 0 : index
    %c84 = arith.constant 84 : index
    %813 = vector.load %arg3[%c0_187, %c84] : memref<16x144xf32, #tpu.memory_space<vmem>>, vector<16x1xf32>
    %814 = vector.extract_strided_slice %788 {offsets = [4, 0], sizes = [1, 256], strides = [1, 1]} : vector<16x256xf32> to vector<1x256xf32>
    %815 = vector.broadcast %813 : vector<16x1xf32> to vector<16x256xf32>
    %816 = vector.broadcast %814 : vector<1x256xf32> to vector<16x256xf32>
    %817 = arith.mulf %815, %816 : vector<16x256xf32>
    %818 = arith.addf %812, %817 : vector<16x256xf32>
    %c0_188 = arith.constant 0 : index
    %c85 = arith.constant 85 : index
    %819 = vector.load %arg3[%c0_188, %c85] : memref<16x144xf32, #tpu.memory_space<vmem>>, vector<16x1xf32>
    %820 = vector.extract_strided_slice %788 {offsets = [5, 0], sizes = [1, 256], strides = [1, 1]} : vector<16x256xf32> to vector<1x256xf32>
    %821 = vector.broadcast %819 : vector<16x1xf32> to vector<16x256xf32>
    %822 = vector.broadcast %820 : vector<1x256xf32> to vector<16x256xf32>
    %823 = arith.mulf %821, %822 : vector<16x256xf32>
    %824 = arith.addf %818, %823 : vector<16x256xf32>
    %c0_189 = arith.constant 0 : index
    %c86 = arith.constant 86 : index
    %825 = vector.load %arg3[%c0_189, %c86] : memref<16x144xf32, #tpu.memory_space<vmem>>, vector<16x1xf32>
    %826 = vector.extract_strided_slice %788 {offsets = [6, 0], sizes = [1, 256], strides = [1, 1]} : vector<16x256xf32> to vector<1x256xf32>
    %827 = vector.broadcast %825 : vector<16x1xf32> to vector<16x256xf32>
    %828 = vector.broadcast %826 : vector<1x256xf32> to vector<16x256xf32>
    %829 = arith.mulf %827, %828 : vector<16x256xf32>
    %830 = arith.addf %824, %829 : vector<16x256xf32>
    %c0_190 = arith.constant 0 : index
    %c87 = arith.constant 87 : index
    %831 = vector.load %arg3[%c0_190, %c87] : memref<16x144xf32, #tpu.memory_space<vmem>>, vector<16x1xf32>
    %832 = vector.extract_strided_slice %788 {offsets = [7, 0], sizes = [1, 256], strides = [1, 1]} : vector<16x256xf32> to vector<1x256xf32>
    %833 = vector.broadcast %831 : vector<16x1xf32> to vector<16x256xf32>
    %834 = vector.broadcast %832 : vector<1x256xf32> to vector<16x256xf32>
    %835 = arith.mulf %833, %834 : vector<16x256xf32>
    %836 = arith.addf %830, %835 : vector<16x256xf32>
    %c0_191 = arith.constant 0 : index
    %c88 = arith.constant 88 : index
    %837 = vector.load %arg3[%c0_191, %c88] : memref<16x144xf32, #tpu.memory_space<vmem>>, vector<16x1xf32>
    %838 = vector.extract_strided_slice %788 {offsets = [8, 0], sizes = [1, 256], strides = [1, 1]} : vector<16x256xf32> to vector<1x256xf32>
    %839 = vector.broadcast %837 : vector<16x1xf32> to vector<16x256xf32>
    %840 = vector.broadcast %838 : vector<1x256xf32> to vector<16x256xf32>
    %841 = arith.mulf %839, %840 : vector<16x256xf32>
    %842 = arith.addf %836, %841 : vector<16x256xf32>
    %c0_192 = arith.constant 0 : index
    %c89 = arith.constant 89 : index
    %843 = vector.load %arg3[%c0_192, %c89] : memref<16x144xf32, #tpu.memory_space<vmem>>, vector<16x1xf32>
    %844 = vector.extract_strided_slice %788 {offsets = [9, 0], sizes = [1, 256], strides = [1, 1]} : vector<16x256xf32> to vector<1x256xf32>
    %845 = vector.broadcast %843 : vector<16x1xf32> to vector<16x256xf32>
    %846 = vector.broadcast %844 : vector<1x256xf32> to vector<16x256xf32>
    %847 = arith.mulf %845, %846 : vector<16x256xf32>
    %848 = arith.addf %842, %847 : vector<16x256xf32>
    %c0_193 = arith.constant 0 : index
    %c90 = arith.constant 90 : index
    %849 = vector.load %arg3[%c0_193, %c90] : memref<16x144xf32, #tpu.memory_space<vmem>>, vector<16x1xf32>
    %850 = vector.extract_strided_slice %788 {offsets = [10, 0], sizes = [1, 256], strides = [1, 1]} : vector<16x256xf32> to vector<1x256xf32>
    %851 = vector.broadcast %849 : vector<16x1xf32> to vector<16x256xf32>
    %852 = vector.broadcast %850 : vector<1x256xf32> to vector<16x256xf32>
    %853 = arith.mulf %851, %852 : vector<16x256xf32>
    %854 = arith.addf %848, %853 : vector<16x256xf32>
    %c0_194 = arith.constant 0 : index
    %c91 = arith.constant 91 : index
    %855 = vector.load %arg3[%c0_194, %c91] : memref<16x144xf32, #tpu.memory_space<vmem>>, vector<16x1xf32>
    %856 = vector.extract_strided_slice %788 {offsets = [11, 0], sizes = [1, 256], strides = [1, 1]} : vector<16x256xf32> to vector<1x256xf32>
    %857 = vector.broadcast %855 : vector<16x1xf32> to vector<16x256xf32>
    %858 = vector.broadcast %856 : vector<1x256xf32> to vector<16x256xf32>
    %859 = arith.mulf %857, %858 : vector<16x256xf32>
    %860 = arith.addf %854, %859 : vector<16x256xf32>
    %c0_195 = arith.constant 0 : index
    %c92 = arith.constant 92 : index
    %861 = vector.load %arg3[%c0_195, %c92] : memref<16x144xf32, #tpu.memory_space<vmem>>, vector<16x1xf32>
    %862 = vector.extract_strided_slice %788 {offsets = [12, 0], sizes = [1, 256], strides = [1, 1]} : vector<16x256xf32> to vector<1x256xf32>
    %863 = vector.broadcast %861 : vector<16x1xf32> to vector<16x256xf32>
    %864 = vector.broadcast %862 : vector<1x256xf32> to vector<16x256xf32>
    %865 = arith.mulf %863, %864 : vector<16x256xf32>
    %866 = arith.addf %860, %865 : vector<16x256xf32>
    %c0_196 = arith.constant 0 : index
    %c93 = arith.constant 93 : index
    %867 = vector.load %arg3[%c0_196, %c93] : memref<16x144xf32, #tpu.memory_space<vmem>>, vector<16x1xf32>
    %868 = vector.extract_strided_slice %788 {offsets = [13, 0], sizes = [1, 256], strides = [1, 1]} : vector<16x256xf32> to vector<1x256xf32>
    %869 = vector.broadcast %867 : vector<16x1xf32> to vector<16x256xf32>
    %870 = vector.broadcast %868 : vector<1x256xf32> to vector<16x256xf32>
    %871 = arith.mulf %869, %870 : vector<16x256xf32>
    %872 = arith.addf %866, %871 : vector<16x256xf32>
    %c0_197 = arith.constant 0 : index
    %c94 = arith.constant 94 : index
    %873 = vector.load %arg3[%c0_197, %c94] : memref<16x144xf32, #tpu.memory_space<vmem>>, vector<16x1xf32>
    %874 = vector.extract_strided_slice %788 {offsets = [14, 0], sizes = [1, 256], strides = [1, 1]} : vector<16x256xf32> to vector<1x256xf32>
    %875 = vector.broadcast %873 : vector<16x1xf32> to vector<16x256xf32>
    %876 = vector.broadcast %874 : vector<1x256xf32> to vector<16x256xf32>
    %877 = arith.mulf %875, %876 : vector<16x256xf32>
    %878 = arith.addf %872, %877 : vector<16x256xf32>
    %c0_198 = arith.constant 0 : index
    %c95 = arith.constant 95 : index
    %879 = vector.load %arg3[%c0_198, %c95] : memref<16x144xf32, #tpu.memory_space<vmem>>, vector<16x1xf32>
    %880 = vector.extract_strided_slice %788 {offsets = [15, 0], sizes = [1, 256], strides = [1, 1]} : vector<16x256xf32> to vector<1x256xf32>
    %881 = vector.broadcast %879 : vector<16x1xf32> to vector<16x256xf32>
    %882 = vector.broadcast %880 : vector<1x256xf32> to vector<16x256xf32>
    %883 = arith.mulf %881, %882 : vector<16x256xf32>
    %884 = arith.addf %878, %883 : vector<16x256xf32>
    %885 = vector.extract_strided_slice %285 {offsets = [0, 32], sizes = [16, 256], strides = [1, 1]} : vector<16x290xf32> to vector<16x256xf32>
    %cst_199 = arith.constant 0.000000e+00 : f32
    %886 = vector.shape_cast %20 : vector<1x256xi1> to vector<1x256xi1>
    %887 = vector.broadcast %886 : vector<1x256xi1> to vector<16x256xi1>
    %888 = vector.broadcast %cst_199 : f32 to vector<16x256xf32>
    %889 = arith.select %887, %885, %888 : vector<16x256xi1>, vector<16x256xf32>
    %c0_200 = arith.constant 0 : index
    %c96 = arith.constant 96 : index
    %890 = vector.load %arg3[%c0_200, %c96] : memref<16x144xf32, #tpu.memory_space<vmem>>, vector<16x1xf32>
    %891 = vector.extract_strided_slice %889 {offsets = [0, 0], sizes = [1, 256], strides = [1, 1]} : vector<16x256xf32> to vector<1x256xf32>
    %892 = vector.broadcast %890 : vector<16x1xf32> to vector<16x256xf32>
    %893 = vector.broadcast %891 : vector<1x256xf32> to vector<16x256xf32>
    %894 = arith.mulf %892, %893 : vector<16x256xf32>
    %895 = arith.addf %884, %894 : vector<16x256xf32>
    %c0_201 = arith.constant 0 : index
    %c97 = arith.constant 97 : index
    %896 = vector.load %arg3[%c0_201, %c97] : memref<16x144xf32, #tpu.memory_space<vmem>>, vector<16x1xf32>
    %897 = vector.extract_strided_slice %889 {offsets = [1, 0], sizes = [1, 256], strides = [1, 1]} : vector<16x256xf32> to vector<1x256xf32>
    %898 = vector.broadcast %896 : vector<16x1xf32> to vector<16x256xf32>
    %899 = vector.broadcast %897 : vector<1x256xf32> to vector<16x256xf32>
    %900 = arith.mulf %898, %899 : vector<16x256xf32>
    %901 = arith.addf %895, %900 : vector<16x256xf32>
    %c0_202 = arith.constant 0 : index
    %c98 = arith.constant 98 : index
    %902 = vector.load %arg3[%c0_202, %c98] : memref<16x144xf32, #tpu.memory_space<vmem>>, vector<16x1xf32>
    %903 = vector.extract_strided_slice %889 {offsets = [2, 0], sizes = [1, 256], strides = [1, 1]} : vector<16x256xf32> to vector<1x256xf32>
    %904 = vector.broadcast %902 : vector<16x1xf32> to vector<16x256xf32>
    %905 = vector.broadcast %903 : vector<1x256xf32> to vector<16x256xf32>
    %906 = arith.mulf %904, %905 : vector<16x256xf32>
    %907 = arith.addf %901, %906 : vector<16x256xf32>
    %c0_203 = arith.constant 0 : index
    %c99 = arith.constant 99 : index
    %908 = vector.load %arg3[%c0_203, %c99] : memref<16x144xf32, #tpu.memory_space<vmem>>, vector<16x1xf32>
    %909 = vector.extract_strided_slice %889 {offsets = [3, 0], sizes = [1, 256], strides = [1, 1]} : vector<16x256xf32> to vector<1x256xf32>
    %910 = vector.broadcast %908 : vector<16x1xf32> to vector<16x256xf32>
    %911 = vector.broadcast %909 : vector<1x256xf32> to vector<16x256xf32>
    %912 = arith.mulf %910, %911 : vector<16x256xf32>
    %913 = arith.addf %907, %912 : vector<16x256xf32>
    %c0_204 = arith.constant 0 : index
    %c100 = arith.constant 100 : index
    %914 = vector.load %arg3[%c0_204, %c100] : memref<16x144xf32, #tpu.memory_space<vmem>>, vector<16x1xf32>
    %915 = vector.extract_strided_slice %889 {offsets = [4, 0], sizes = [1, 256], strides = [1, 1]} : vector<16x256xf32> to vector<1x256xf32>
    %916 = vector.broadcast %914 : vector<16x1xf32> to vector<16x256xf32>
    %917 = vector.broadcast %915 : vector<1x256xf32> to vector<16x256xf32>
    %918 = arith.mulf %916, %917 : vector<16x256xf32>
    %919 = arith.addf %913, %918 : vector<16x256xf32>
    %c0_205 = arith.constant 0 : index
    %c101 = arith.constant 101 : index
    %920 = vector.load %arg3[%c0_205, %c101] : memref<16x144xf32, #tpu.memory_space<vmem>>, vector<16x1xf32>
    %921 = vector.extract_strided_slice %889 {offsets = [5, 0], sizes = [1, 256], strides = [1, 1]} : vector<16x256xf32> to vector<1x256xf32>
    %922 = vector.broadcast %920 : vector<16x1xf32> to vector<16x256xf32>
    %923 = vector.broadcast %921 : vector<1x256xf32> to vector<16x256xf32>
    %924 = arith.mulf %922, %923 : vector<16x256xf32>
    %925 = arith.addf %919, %924 : vector<16x256xf32>
    %c0_206 = arith.constant 0 : index
    %c102 = arith.constant 102 : index
    %926 = vector.load %arg3[%c0_206, %c102] : memref<16x144xf32, #tpu.memory_space<vmem>>, vector<16x1xf32>
    %927 = vector.extract_strided_slice %889 {offsets = [6, 0], sizes = [1, 256], strides = [1, 1]} : vector<16x256xf32> to vector<1x256xf32>
    %928 = vector.broadcast %926 : vector<16x1xf32> to vector<16x256xf32>
    %929 = vector.broadcast %927 : vector<1x256xf32> to vector<16x256xf32>
    %930 = arith.mulf %928, %929 : vector<16x256xf32>
    %931 = arith.addf %925, %930 : vector<16x256xf32>
    %c0_207 = arith.constant 0 : index
    %c103 = arith.constant 103 : index
    %932 = vector.load %arg3[%c0_207, %c103] : memref<16x144xf32, #tpu.memory_space<vmem>>, vector<16x1xf32>
    %933 = vector.extract_strided_slice %889 {offsets = [7, 0], sizes = [1, 256], strides = [1, 1]} : vector<16x256xf32> to vector<1x256xf32>
    %934 = vector.broadcast %932 : vector<16x1xf32> to vector<16x256xf32>
    %935 = vector.broadcast %933 : vector<1x256xf32> to vector<16x256xf32>
    %936 = arith.mulf %934, %935 : vector<16x256xf32>
    %937 = arith.addf %931, %936 : vector<16x256xf32>
    %c0_208 = arith.constant 0 : index
    %c104 = arith.constant 104 : index
    %938 = vector.load %arg3[%c0_208, %c104] : memref<16x144xf32, #tpu.memory_space<vmem>>, vector<16x1xf32>
    %939 = vector.extract_strided_slice %889 {offsets = [8, 0], sizes = [1, 256], strides = [1, 1]} : vector<16x256xf32> to vector<1x256xf32>
    %940 = vector.broadcast %938 : vector<16x1xf32> to vector<16x256xf32>
    %941 = vector.broadcast %939 : vector<1x256xf32> to vector<16x256xf32>
    %942 = arith.mulf %940, %941 : vector<16x256xf32>
    %943 = arith.addf %937, %942 : vector<16x256xf32>
    %c0_209 = arith.constant 0 : index
    %c105 = arith.constant 105 : index
    %944 = vector.load %arg3[%c0_209, %c105] : memref<16x144xf32, #tpu.memory_space<vmem>>, vector<16x1xf32>
    %945 = vector.extract_strided_slice %889 {offsets = [9, 0], sizes = [1, 256], strides = [1, 1]} : vector<16x256xf32> to vector<1x256xf32>
    %946 = vector.broadcast %944 : vector<16x1xf32> to vector<16x256xf32>
    %947 = vector.broadcast %945 : vector<1x256xf32> to vector<16x256xf32>
    %948 = arith.mulf %946, %947 : vector<16x256xf32>
    %949 = arith.addf %943, %948 : vector<16x256xf32>
    %c0_210 = arith.constant 0 : index
    %c106 = arith.constant 106 : index
    %950 = vector.load %arg3[%c0_210, %c106] : memref<16x144xf32, #tpu.memory_space<vmem>>, vector<16x1xf32>
    %951 = vector.extract_strided_slice %889 {offsets = [10, 0], sizes = [1, 256], strides = [1, 1]} : vector<16x256xf32> to vector<1x256xf32>
    %952 = vector.broadcast %950 : vector<16x1xf32> to vector<16x256xf32>
    %953 = vector.broadcast %951 : vector<1x256xf32> to vector<16x256xf32>
    %954 = arith.mulf %952, %953 : vector<16x256xf32>
    %955 = arith.addf %949, %954 : vector<16x256xf32>
    %c0_211 = arith.constant 0 : index
    %c107 = arith.constant 107 : index
    %956 = vector.load %arg3[%c0_211, %c107] : memref<16x144xf32, #tpu.memory_space<vmem>>, vector<16x1xf32>
    %957 = vector.extract_strided_slice %889 {offsets = [11, 0], sizes = [1, 256], strides = [1, 1]} : vector<16x256xf32> to vector<1x256xf32>
    %958 = vector.broadcast %956 : vector<16x1xf32> to vector<16x256xf32>
    %959 = vector.broadcast %957 : vector<1x256xf32> to vector<16x256xf32>
    %960 = arith.mulf %958, %959 : vector<16x256xf32>
    %961 = arith.addf %955, %960 : vector<16x256xf32>
    %c0_212 = arith.constant 0 : index
    %c108 = arith.constant 108 : index
    %962 = vector.load %arg3[%c0_212, %c108] : memref<16x144xf32, #tpu.memory_space<vmem>>, vector<16x1xf32>
    %963 = vector.extract_strided_slice %889 {offsets = [12, 0], sizes = [1, 256], strides = [1, 1]} : vector<16x256xf32> to vector<1x256xf32>
    %964 = vector.broadcast %962 : vector<16x1xf32> to vector<16x256xf32>
    %965 = vector.broadcast %963 : vector<1x256xf32> to vector<16x256xf32>
    %966 = arith.mulf %964, %965 : vector<16x256xf32>
    %967 = arith.addf %961, %966 : vector<16x256xf32>
    %c0_213 = arith.constant 0 : index
    %c109 = arith.constant 109 : index
    %968 = vector.load %arg3[%c0_213, %c109] : memref<16x144xf32, #tpu.memory_space<vmem>>, vector<16x1xf32>
    %969 = vector.extract_strided_slice %889 {offsets = [13, 0], sizes = [1, 256], strides = [1, 1]} : vector<16x256xf32> to vector<1x256xf32>
    %970 = vector.broadcast %968 : vector<16x1xf32> to vector<16x256xf32>
    %971 = vector.broadcast %969 : vector<1x256xf32> to vector<16x256xf32>
    %972 = arith.mulf %970, %971 : vector<16x256xf32>
    %973 = arith.addf %967, %972 : vector<16x256xf32>
    %c0_214 = arith.constant 0 : index
    %c110 = arith.constant 110 : index
    %974 = vector.load %arg3[%c0_214, %c110] : memref<16x144xf32, #tpu.memory_space<vmem>>, vector<16x1xf32>
    %975 = vector.extract_strided_slice %889 {offsets = [14, 0], sizes = [1, 256], strides = [1, 1]} : vector<16x256xf32> to vector<1x256xf32>
    %976 = vector.broadcast %974 : vector<16x1xf32> to vector<16x256xf32>
    %977 = vector.broadcast %975 : vector<1x256xf32> to vector<16x256xf32>
    %978 = arith.mulf %976, %977 : vector<16x256xf32>
    %979 = arith.addf %973, %978 : vector<16x256xf32>
    %c0_215 = arith.constant 0 : index
    %c111 = arith.constant 111 : index
    %980 = vector.load %arg3[%c0_215, %c111] : memref<16x144xf32, #tpu.memory_space<vmem>>, vector<16x1xf32>
    %981 = vector.extract_strided_slice %889 {offsets = [15, 0], sizes = [1, 256], strides = [1, 1]} : vector<16x256xf32> to vector<1x256xf32>
    %982 = vector.broadcast %980 : vector<16x1xf32> to vector<16x256xf32>
    %983 = vector.broadcast %981 : vector<1x256xf32> to vector<16x256xf32>
    %984 = arith.mulf %982, %983 : vector<16x256xf32>
    %985 = arith.addf %979, %984 : vector<16x256xf32>
    %986 = vector.extract_strided_slice %285 {offsets = [0, 33], sizes = [16, 256], strides = [1, 1]} : vector<16x290xf32> to vector<16x256xf32>
    %c0_216 = arith.constant 0 : index
    %c112 = arith.constant 112 : index
    %987 = vector.load %arg3[%c0_216, %c112] : memref<16x144xf32, #tpu.memory_space<vmem>>, vector<16x1xf32>
    %988 = vector.extract_strided_slice %986 {offsets = [0, 0], sizes = [1, 256], strides = [1, 1]} : vector<16x256xf32> to vector<1x256xf32>
    %989 = vector.broadcast %987 : vector<16x1xf32> to vector<16x256xf32>
    %990 = vector.broadcast %988 : vector<1x256xf32> to vector<16x256xf32>
    %991 = arith.mulf %989, %990 : vector<16x256xf32>
    %992 = arith.addf %985, %991 : vector<16x256xf32>
    %c0_217 = arith.constant 0 : index
    %c113 = arith.constant 113 : index
    %993 = vector.load %arg3[%c0_217, %c113] : memref<16x144xf32, #tpu.memory_space<vmem>>, vector<16x1xf32>
    %994 = vector.extract_strided_slice %986 {offsets = [1, 0], sizes = [1, 256], strides = [1, 1]} : vector<16x256xf32> to vector<1x256xf32>
    %995 = vector.broadcast %993 : vector<16x1xf32> to vector<16x256xf32>
    %996 = vector.broadcast %994 : vector<1x256xf32> to vector<16x256xf32>
    %997 = arith.mulf %995, %996 : vector<16x256xf32>
    %998 = arith.addf %992, %997 : vector<16x256xf32>
    %c0_218 = arith.constant 0 : index
    %c114 = arith.constant 114 : index
    %999 = vector.load %arg3[%c0_218, %c114] : memref<16x144xf32, #tpu.memory_space<vmem>>, vector<16x1xf32>
    %1000 = vector.extract_strided_slice %986 {offsets = [2, 0], sizes = [1, 256], strides = [1, 1]} : vector<16x256xf32> to vector<1x256xf32>
    %1001 = vector.broadcast %999 : vector<16x1xf32> to vector<16x256xf32>
    %1002 = vector.broadcast %1000 : vector<1x256xf32> to vector<16x256xf32>
    %1003 = arith.mulf %1001, %1002 : vector<16x256xf32>
    %1004 = arith.addf %998, %1003 : vector<16x256xf32>
    %c0_219 = arith.constant 0 : index
    %c115 = arith.constant 115 : index
    %1005 = vector.load %arg3[%c0_219, %c115] : memref<16x144xf32, #tpu.memory_space<vmem>>, vector<16x1xf32>
    %1006 = vector.extract_strided_slice %986 {offsets = [3, 0], sizes = [1, 256], strides = [1, 1]} : vector<16x256xf32> to vector<1x256xf32>
    %1007 = vector.broadcast %1005 : vector<16x1xf32> to vector<16x256xf32>
    %1008 = vector.broadcast %1006 : vector<1x256xf32> to vector<16x256xf32>
    %1009 = arith.mulf %1007, %1008 : vector<16x256xf32>
    %1010 = arith.addf %1004, %1009 : vector<16x256xf32>
    %c0_220 = arith.constant 0 : index
    %c116 = arith.constant 116 : index
    %1011 = vector.load %arg3[%c0_220, %c116] : memref<16x144xf32, #tpu.memory_space<vmem>>, vector<16x1xf32>
    %1012 = vector.extract_strided_slice %986 {offsets = [4, 0], sizes = [1, 256], strides = [1, 1]} : vector<16x256xf32> to vector<1x256xf32>
    %1013 = vector.broadcast %1011 : vector<16x1xf32> to vector<16x256xf32>
    %1014 = vector.broadcast %1012 : vector<1x256xf32> to vector<16x256xf32>
    %1015 = arith.mulf %1013, %1014 : vector<16x256xf32>
    %1016 = arith.addf %1010, %1015 : vector<16x256xf32>
    %c0_221 = arith.constant 0 : index
    %c117 = arith.constant 117 : index
    %1017 = vector.load %arg3[%c0_221, %c117] : memref<16x144xf32, #tpu.memory_space<vmem>>, vector<16x1xf32>
    %1018 = vector.extract_strided_slice %986 {offsets = [5, 0], sizes = [1, 256], strides = [1, 1]} : vector<16x256xf32> to vector<1x256xf32>
    %1019 = vector.broadcast %1017 : vector<16x1xf32> to vector<16x256xf32>
    %1020 = vector.broadcast %1018 : vector<1x256xf32> to vector<16x256xf32>
    %1021 = arith.mulf %1019, %1020 : vector<16x256xf32>
    %1022 = arith.addf %1016, %1021 : vector<16x256xf32>
    %c0_222 = arith.constant 0 : index
    %c118 = arith.constant 118 : index
    %1023 = vector.load %arg3[%c0_222, %c118] : memref<16x144xf32, #tpu.memory_space<vmem>>, vector<16x1xf32>
    %1024 = vector.extract_strided_slice %986 {offsets = [6, 0], sizes = [1, 256], strides = [1, 1]} : vector<16x256xf32> to vector<1x256xf32>
    %1025 = vector.broadcast %1023 : vector<16x1xf32> to vector<16x256xf32>
    %1026 = vector.broadcast %1024 : vector<1x256xf32> to vector<16x256xf32>
    %1027 = arith.mulf %1025, %1026 : vector<16x256xf32>
    %1028 = arith.addf %1022, %1027 : vector<16x256xf32>
    %c0_223 = arith.constant 0 : index
    %c119 = arith.constant 119 : index
    %1029 = vector.load %arg3[%c0_223, %c119] : memref<16x144xf32, #tpu.memory_space<vmem>>, vector<16x1xf32>
    %1030 = vector.extract_strided_slice %986 {offsets = [7, 0], sizes = [1, 256], strides = [1, 1]} : vector<16x256xf32> to vector<1x256xf32>
    %1031 = vector.broadcast %1029 : vector<16x1xf32> to vector<16x256xf32>
    %1032 = vector.broadcast %1030 : vector<1x256xf32> to vector<16x256xf32>
    %1033 = arith.mulf %1031, %1032 : vector<16x256xf32>
    %1034 = arith.addf %1028, %1033 : vector<16x256xf32>
    %c0_224 = arith.constant 0 : index
    %c120 = arith.constant 120 : index
    %1035 = vector.load %arg3[%c0_224, %c120] : memref<16x144xf32, #tpu.memory_space<vmem>>, vector<16x1xf32>
    %1036 = vector.extract_strided_slice %986 {offsets = [8, 0], sizes = [1, 256], strides = [1, 1]} : vector<16x256xf32> to vector<1x256xf32>
    %1037 = vector.broadcast %1035 : vector<16x1xf32> to vector<16x256xf32>
    %1038 = vector.broadcast %1036 : vector<1x256xf32> to vector<16x256xf32>
    %1039 = arith.mulf %1037, %1038 : vector<16x256xf32>
    %1040 = arith.addf %1034, %1039 : vector<16x256xf32>
    %c0_225 = arith.constant 0 : index
    %c121 = arith.constant 121 : index
    %1041 = vector.load %arg3[%c0_225, %c121] : memref<16x144xf32, #tpu.memory_space<vmem>>, vector<16x1xf32>
    %1042 = vector.extract_strided_slice %986 {offsets = [9, 0], sizes = [1, 256], strides = [1, 1]} : vector<16x256xf32> to vector<1x256xf32>
    %1043 = vector.broadcast %1041 : vector<16x1xf32> to vector<16x256xf32>
    %1044 = vector.broadcast %1042 : vector<1x256xf32> to vector<16x256xf32>
    %1045 = arith.mulf %1043, %1044 : vector<16x256xf32>
    %1046 = arith.addf %1040, %1045 : vector<16x256xf32>
    %c0_226 = arith.constant 0 : index
    %c122 = arith.constant 122 : index
    %1047 = vector.load %arg3[%c0_226, %c122] : memref<16x144xf32, #tpu.memory_space<vmem>>, vector<16x1xf32>
    %1048 = vector.extract_strided_slice %986 {offsets = [10, 0], sizes = [1, 256], strides = [1, 1]} : vector<16x256xf32> to vector<1x256xf32>
    %1049 = vector.broadcast %1047 : vector<16x1xf32> to vector<16x256xf32>
    %1050 = vector.broadcast %1048 : vector<1x256xf32> to vector<16x256xf32>
    %1051 = arith.mulf %1049, %1050 : vector<16x256xf32>
    %1052 = arith.addf %1046, %1051 : vector<16x256xf32>
    %c0_227 = arith.constant 0 : index
    %c123 = arith.constant 123 : index
    %1053 = vector.load %arg3[%c0_227, %c123] : memref<16x144xf32, #tpu.memory_space<vmem>>, vector<16x1xf32>
    %1054 = vector.extract_strided_slice %986 {offsets = [11, 0], sizes = [1, 256], strides = [1, 1]} : vector<16x256xf32> to vector<1x256xf32>
    %1055 = vector.broadcast %1053 : vector<16x1xf32> to vector<16x256xf32>
    %1056 = vector.broadcast %1054 : vector<1x256xf32> to vector<16x256xf32>
    %1057 = arith.mulf %1055, %1056 : vector<16x256xf32>
    %1058 = arith.addf %1052, %1057 : vector<16x256xf32>
    %c0_228 = arith.constant 0 : index
    %c124 = arith.constant 124 : index
    %1059 = vector.load %arg3[%c0_228, %c124] : memref<16x144xf32, #tpu.memory_space<vmem>>, vector<16x1xf32>
    %1060 = vector.extract_strided_slice %986 {offsets = [12, 0], sizes = [1, 256], strides = [1, 1]} : vector<16x256xf32> to vector<1x256xf32>
    %1061 = vector.broadcast %1059 : vector<16x1xf32> to vector<16x256xf32>
    %1062 = vector.broadcast %1060 : vector<1x256xf32> to vector<16x256xf32>
    %1063 = arith.mulf %1061, %1062 : vector<16x256xf32>
    %1064 = arith.addf %1058, %1063 : vector<16x256xf32>
    %c0_229 = arith.constant 0 : index
    %c125 = arith.constant 125 : index
    %1065 = vector.load %arg3[%c0_229, %c125] : memref<16x144xf32, #tpu.memory_space<vmem>>, vector<16x1xf32>
    %1066 = vector.extract_strided_slice %986 {offsets = [13, 0], sizes = [1, 256], strides = [1, 1]} : vector<16x256xf32> to vector<1x256xf32>
    %1067 = vector.broadcast %1065 : vector<16x1xf32> to vector<16x256xf32>
    %1068 = vector.broadcast %1066 : vector<1x256xf32> to vector<16x256xf32>
    %1069 = arith.mulf %1067, %1068 : vector<16x256xf32>
    %1070 = arith.addf %1064, %1069 : vector<16x256xf32>
    %c0_230 = arith.constant 0 : index
    %c126 = arith.constant 126 : index
    %1071 = vector.load %arg3[%c0_230, %c126] : memref<16x144xf32, #tpu.memory_space<vmem>>, vector<16x1xf32>
    %1072 = vector.extract_strided_slice %986 {offsets = [14, 0], sizes = [1, 256], strides = [1, 1]} : vector<16x256xf32> to vector<1x256xf32>
    %1073 = vector.broadcast %1071 : vector<16x1xf32> to vector<16x256xf32>
    %1074 = vector.broadcast %1072 : vector<1x256xf32> to vector<16x256xf32>
    %1075 = arith.mulf %1073, %1074 : vector<16x256xf32>
    %1076 = arith.addf %1070, %1075 : vector<16x256xf32>
    %c0_231 = arith.constant 0 : index
    %c127 = arith.constant 127 : index
    %1077 = vector.load %arg3[%c0_231, %c127] : memref<16x144xf32, #tpu.memory_space<vmem>>, vector<16x1xf32>
    %1078 = vector.extract_strided_slice %986 {offsets = [15, 0], sizes = [1, 256], strides = [1, 1]} : vector<16x256xf32> to vector<1x256xf32>
    %1079 = vector.broadcast %1077 : vector<16x1xf32> to vector<16x256xf32>
    %1080 = vector.broadcast %1078 : vector<1x256xf32> to vector<16x256xf32>
    %1081 = arith.mulf %1079, %1080 : vector<16x256xf32>
    %1082 = arith.addf %1076, %1081 : vector<16x256xf32>
    %1083 = vector.extract_strided_slice %285 {offsets = [0, 34], sizes = [16, 256], strides = [1, 1]} : vector<16x290xf32> to vector<16x256xf32>
    %cst_232 = arith.constant 0.000000e+00 : f32
    %1084 = vector.shape_cast %22 : vector<1x256xi1> to vector<1x256xi1>
    %1085 = vector.broadcast %1084 : vector<1x256xi1> to vector<16x256xi1>
    %1086 = vector.broadcast %cst_232 : f32 to vector<16x256xf32>
    %1087 = arith.select %1085, %1083, %1086 : vector<16x256xi1>, vector<16x256xf32>
    %c0_233 = arith.constant 0 : index
    %c128 = arith.constant 128 : index
    %1088 = vector.load %arg3[%c0_233, %c128] : memref<16x144xf32, #tpu.memory_space<vmem>>, vector<16x1xf32>
    %1089 = vector.extract_strided_slice %1087 {offsets = [0, 0], sizes = [1, 256], strides = [1, 1]} : vector<16x256xf32> to vector<1x256xf32>
    %1090 = vector.broadcast %1088 : vector<16x1xf32> to vector<16x256xf32>
    %1091 = vector.broadcast %1089 : vector<1x256xf32> to vector<16x256xf32>
    %1092 = arith.mulf %1090, %1091 : vector<16x256xf32>
    %1093 = arith.addf %1082, %1092 : vector<16x256xf32>
    %c0_234 = arith.constant 0 : index
    %c129 = arith.constant 129 : index
    %1094 = vector.load %arg3[%c0_234, %c129] : memref<16x144xf32, #tpu.memory_space<vmem>>, vector<16x1xf32>
    %1095 = vector.extract_strided_slice %1087 {offsets = [1, 0], sizes = [1, 256], strides = [1, 1]} : vector<16x256xf32> to vector<1x256xf32>
    %1096 = vector.broadcast %1094 : vector<16x1xf32> to vector<16x256xf32>
    %1097 = vector.broadcast %1095 : vector<1x256xf32> to vector<16x256xf32>
    %1098 = arith.mulf %1096, %1097 : vector<16x256xf32>
    %1099 = arith.addf %1093, %1098 : vector<16x256xf32>
    %c0_235 = arith.constant 0 : index
    %c130 = arith.constant 130 : index
    %1100 = vector.load %arg3[%c0_235, %c130] : memref<16x144xf32, #tpu.memory_space<vmem>>, vector<16x1xf32>
    %1101 = vector.extract_strided_slice %1087 {offsets = [2, 0], sizes = [1, 256], strides = [1, 1]} : vector<16x256xf32> to vector<1x256xf32>
    %1102 = vector.broadcast %1100 : vector<16x1xf32> to vector<16x256xf32>
    %1103 = vector.broadcast %1101 : vector<1x256xf32> to vector<16x256xf32>
    %1104 = arith.mulf %1102, %1103 : vector<16x256xf32>
    %1105 = arith.addf %1099, %1104 : vector<16x256xf32>
    %c0_236 = arith.constant 0 : index
    %c131 = arith.constant 131 : index
    %1106 = vector.load %arg3[%c0_236, %c131] : memref<16x144xf32, #tpu.memory_space<vmem>>, vector<16x1xf32>
    %1107 = vector.extract_strided_slice %1087 {offsets = [3, 0], sizes = [1, 256], strides = [1, 1]} : vector<16x256xf32> to vector<1x256xf32>
    %1108 = vector.broadcast %1106 : vector<16x1xf32> to vector<16x256xf32>
    %1109 = vector.broadcast %1107 : vector<1x256xf32> to vector<16x256xf32>
    %1110 = arith.mulf %1108, %1109 : vector<16x256xf32>
    %1111 = arith.addf %1105, %1110 : vector<16x256xf32>
    %c0_237 = arith.constant 0 : index
    %c132 = arith.constant 132 : index
    %1112 = vector.load %arg3[%c0_237, %c132] : memref<16x144xf32, #tpu.memory_space<vmem>>, vector<16x1xf32>
    %1113 = vector.extract_strided_slice %1087 {offsets = [4, 0], sizes = [1, 256], strides = [1, 1]} : vector<16x256xf32> to vector<1x256xf32>
    %1114 = vector.broadcast %1112 : vector<16x1xf32> to vector<16x256xf32>
    %1115 = vector.broadcast %1113 : vector<1x256xf32> to vector<16x256xf32>
    %1116 = arith.mulf %1114, %1115 : vector<16x256xf32>
    %1117 = arith.addf %1111, %1116 : vector<16x256xf32>
    %c0_238 = arith.constant 0 : index
    %c133 = arith.constant 133 : index
    %1118 = vector.load %arg3[%c0_238, %c133] : memref<16x144xf32, #tpu.memory_space<vmem>>, vector<16x1xf32>
    %1119 = vector.extract_strided_slice %1087 {offsets = [5, 0], sizes = [1, 256], strides = [1, 1]} : vector<16x256xf32> to vector<1x256xf32>
    %1120 = vector.broadcast %1118 : vector<16x1xf32> to vector<16x256xf32>
    %1121 = vector.broadcast %1119 : vector<1x256xf32> to vector<16x256xf32>
    %1122 = arith.mulf %1120, %1121 : vector<16x256xf32>
    %1123 = arith.addf %1117, %1122 : vector<16x256xf32>
    %c0_239 = arith.constant 0 : index
    %c134 = arith.constant 134 : index
    %1124 = vector.load %arg3[%c0_239, %c134] : memref<16x144xf32, #tpu.memory_space<vmem>>, vector<16x1xf32>
    %1125 = vector.extract_strided_slice %1087 {offsets = [6, 0], sizes = [1, 256], strides = [1, 1]} : vector<16x256xf32> to vector<1x256xf32>
    %1126 = vector.broadcast %1124 : vector<16x1xf32> to vector<16x256xf32>
    %1127 = vector.broadcast %1125 : vector<1x256xf32> to vector<16x256xf32>
    %1128 = arith.mulf %1126, %1127 : vector<16x256xf32>
    %1129 = arith.addf %1123, %1128 : vector<16x256xf32>
    %c0_240 = arith.constant 0 : index
    %c135 = arith.constant 135 : index
    %1130 = vector.load %arg3[%c0_240, %c135] : memref<16x144xf32, #tpu.memory_space<vmem>>, vector<16x1xf32>
    %1131 = vector.extract_strided_slice %1087 {offsets = [7, 0], sizes = [1, 256], strides = [1, 1]} : vector<16x256xf32> to vector<1x256xf32>
    %1132 = vector.broadcast %1130 : vector<16x1xf32> to vector<16x256xf32>
    %1133 = vector.broadcast %1131 : vector<1x256xf32> to vector<16x256xf32>
    %1134 = arith.mulf %1132, %1133 : vector<16x256xf32>
    %1135 = arith.addf %1129, %1134 : vector<16x256xf32>
    %c0_241 = arith.constant 0 : index
    %c136 = arith.constant 136 : index
    %1136 = vector.load %arg3[%c0_241, %c136] : memref<16x144xf32, #tpu.memory_space<vmem>>, vector<16x1xf32>
    %1137 = vector.extract_strided_slice %1087 {offsets = [8, 0], sizes = [1, 256], strides = [1, 1]} : vector<16x256xf32> to vector<1x256xf32>
    %1138 = vector.broadcast %1136 : vector<16x1xf32> to vector<16x256xf32>
    %1139 = vector.broadcast %1137 : vector<1x256xf32> to vector<16x256xf32>
    %1140 = arith.mulf %1138, %1139 : vector<16x256xf32>
    %1141 = arith.addf %1135, %1140 : vector<16x256xf32>
    %c0_242 = arith.constant 0 : index
    %c137 = arith.constant 137 : index
    %1142 = vector.load %arg3[%c0_242, %c137] : memref<16x144xf32, #tpu.memory_space<vmem>>, vector<16x1xf32>
    %1143 = vector.extract_strided_slice %1087 {offsets = [9, 0], sizes = [1, 256], strides = [1, 1]} : vector<16x256xf32> to vector<1x256xf32>
    %1144 = vector.broadcast %1142 : vector<16x1xf32> to vector<16x256xf32>
    %1145 = vector.broadcast %1143 : vector<1x256xf32> to vector<16x256xf32>
    %1146 = arith.mulf %1144, %1145 : vector<16x256xf32>
    %1147 = arith.addf %1141, %1146 : vector<16x256xf32>
    %c0_243 = arith.constant 0 : index
    %c138 = arith.constant 138 : index
    %1148 = vector.load %arg3[%c0_243, %c138] : memref<16x144xf32, #tpu.memory_space<vmem>>, vector<16x1xf32>
    %1149 = vector.extract_strided_slice %1087 {offsets = [10, 0], sizes = [1, 256], strides = [1, 1]} : vector<16x256xf32> to vector<1x256xf32>
    %1150 = vector.broadcast %1148 : vector<16x1xf32> to vector<16x256xf32>
    %1151 = vector.broadcast %1149 : vector<1x256xf32> to vector<16x256xf32>
    %1152 = arith.mulf %1150, %1151 : vector<16x256xf32>
    %1153 = arith.addf %1147, %1152 : vector<16x256xf32>
    %c0_244 = arith.constant 0 : index
    %c139 = arith.constant 139 : index
    %1154 = vector.load %arg3[%c0_244, %c139] : memref<16x144xf32, #tpu.memory_space<vmem>>, vector<16x1xf32>
    %1155 = vector.extract_strided_slice %1087 {offsets = [11, 0], sizes = [1, 256], strides = [1, 1]} : vector<16x256xf32> to vector<1x256xf32>
    %1156 = vector.broadcast %1154 : vector<16x1xf32> to vector<16x256xf32>
    %1157 = vector.broadcast %1155 : vector<1x256xf32> to vector<16x256xf32>
    %1158 = arith.mulf %1156, %1157 : vector<16x256xf32>
    %1159 = arith.addf %1153, %1158 : vector<16x256xf32>
    %c0_245 = arith.constant 0 : index
    %c140 = arith.constant 140 : index
    %1160 = vector.load %arg3[%c0_245, %c140] : memref<16x144xf32, #tpu.memory_space<vmem>>, vector<16x1xf32>
    %1161 = vector.extract_strided_slice %1087 {offsets = [12, 0], sizes = [1, 256], strides = [1, 1]} : vector<16x256xf32> to vector<1x256xf32>
    %1162 = vector.broadcast %1160 : vector<16x1xf32> to vector<16x256xf32>
    %1163 = vector.broadcast %1161 : vector<1x256xf32> to vector<16x256xf32>
    %1164 = arith.mulf %1162, %1163 : vector<16x256xf32>
    %1165 = arith.addf %1159, %1164 : vector<16x256xf32>
    %c0_246 = arith.constant 0 : index
    %c141 = arith.constant 141 : index
    %1166 = vector.load %arg3[%c0_246, %c141] : memref<16x144xf32, #tpu.memory_space<vmem>>, vector<16x1xf32>
    %1167 = vector.extract_strided_slice %1087 {offsets = [13, 0], sizes = [1, 256], strides = [1, 1]} : vector<16x256xf32> to vector<1x256xf32>
    %1168 = vector.broadcast %1166 : vector<16x1xf32> to vector<16x256xf32>
    %1169 = vector.broadcast %1167 : vector<1x256xf32> to vector<16x256xf32>
    %1170 = arith.mulf %1168, %1169 : vector<16x256xf32>
    %1171 = arith.addf %1165, %1170 : vector<16x256xf32>
    %c0_247 = arith.constant 0 : index
    %c142 = arith.constant 142 : index
    %1172 = vector.load %arg3[%c0_247, %c142] : memref<16x144xf32, #tpu.memory_space<vmem>>, vector<16x1xf32>
    %1173 = vector.extract_strided_slice %1087 {offsets = [14, 0], sizes = [1, 256], strides = [1, 1]} : vector<16x256xf32> to vector<1x256xf32>
    %1174 = vector.broadcast %1172 : vector<16x1xf32> to vector<16x256xf32>
    %1175 = vector.broadcast %1173 : vector<1x256xf32> to vector<16x256xf32>
    %1176 = arith.mulf %1174, %1175 : vector<16x256xf32>
    %1177 = arith.addf %1171, %1176 : vector<16x256xf32>
    %c0_248 = arith.constant 0 : index
    %c143 = arith.constant 143 : index
    %1178 = vector.load %arg3[%c0_248, %c143] : memref<16x144xf32, #tpu.memory_space<vmem>>, vector<16x1xf32>
    %1179 = vector.extract_strided_slice %1087 {offsets = [15, 0], sizes = [1, 256], strides = [1, 1]} : vector<16x256xf32> to vector<1x256xf32>
    %1180 = vector.broadcast %1178 : vector<16x1xf32> to vector<16x256xf32>
    %1181 = vector.broadcast %1179 : vector<1x256xf32> to vector<16x256xf32>
    %1182 = arith.mulf %1180, %1181 : vector<16x256xf32>
    %1183 = arith.addf %1177, %1182 : vector<16x256xf32>
    %1184 = vector.broadcast %24 : vector<16x1xf32> to vector<16x256xf32>
    %1185 = arith.addf %1183, %1184 : vector<16x256xf32>
    %cst_249 = arith.constant 0.000000e+00 : f32
    %1186 = vector.broadcast %cst_249 : f32 to vector<16x256xf32>
    %c0_250 = arith.constant 0 : index
    %c0_251 = arith.constant 0 : index
    %1187 = vector.load %arg4[%c0_250, %c0_251] : memref<16x4xf32, #tpu.memory_space<vmem>>, vector<16x1xf32>
    %1188 = vector.extract_strided_slice %1 {offsets = [0, 0], sizes = [1, 256], strides = [1, 1]} : vector<4x256xf32> to vector<1x256xf32>
    %1189 = vector.broadcast %1187 : vector<16x1xf32> to vector<16x256xf32>
    %1190 = vector.broadcast %1188 : vector<1x256xf32> to vector<16x256xf32>
    %1191 = arith.mulf %1189, %1190 : vector<16x256xf32>
    %1192 = arith.addf %1186, %1191 : vector<16x256xf32>
    %c0_252 = arith.constant 0 : index
    %c1_253 = arith.constant 1 : index
    %1193 = vector.load %arg4[%c0_252, %c1_253] : memref<16x4xf32, #tpu.memory_space<vmem>>, vector<16x1xf32>
    %1194 = vector.extract_strided_slice %1 {offsets = [1, 0], sizes = [1, 256], strides = [1, 1]} : vector<4x256xf32> to vector<1x256xf32>
    %1195 = vector.broadcast %1193 : vector<16x1xf32> to vector<16x256xf32>
    %1196 = vector.broadcast %1194 : vector<1x256xf32> to vector<16x256xf32>
    %1197 = arith.mulf %1195, %1196 : vector<16x256xf32>
    %1198 = arith.addf %1192, %1197 : vector<16x256xf32>
    %c0_254 = arith.constant 0 : index
    %c2_255 = arith.constant 2 : index
    %1199 = vector.load %arg4[%c0_254, %c2_255] : memref<16x4xf32, #tpu.memory_space<vmem>>, vector<16x1xf32>
    %1200 = vector.extract_strided_slice %1 {offsets = [2, 0], sizes = [1, 256], strides = [1, 1]} : vector<4x256xf32> to vector<1x256xf32>
    %1201 = vector.broadcast %1199 : vector<16x1xf32> to vector<16x256xf32>
    %1202 = vector.broadcast %1200 : vector<1x256xf32> to vector<16x256xf32>
    %1203 = arith.mulf %1201, %1202 : vector<16x256xf32>
    %1204 = arith.addf %1198, %1203 : vector<16x256xf32>
    %c0_256 = arith.constant 0 : index
    %c3_257 = arith.constant 3 : index
    %1205 = vector.load %arg4[%c0_256, %c3_257] : memref<16x4xf32, #tpu.memory_space<vmem>>, vector<16x1xf32>
    %1206 = vector.extract_strided_slice %1 {offsets = [3, 0], sizes = [1, 256], strides = [1, 1]} : vector<4x256xf32> to vector<1x256xf32>
    %1207 = vector.broadcast %1205 : vector<16x1xf32> to vector<16x256xf32>
    %1208 = vector.broadcast %1206 : vector<1x256xf32> to vector<16x256xf32>
    %1209 = arith.mulf %1207, %1208 : vector<16x256xf32>
    %1210 = arith.addf %1204, %1209 : vector<16x256xf32>
    %1211 = vector.broadcast %25 : vector<16x1xf32> to vector<16x256xf32>
    %1212 = arith.addf %1210, %1211 : vector<16x256xf32>
    %1213 = arith.addf %1185, %1212 : vector<16x256xf32>
    %cst_258 = arith.constant dense<0.000000e+00> : vector<16xf32>
    %1214 = vector.multi_reduction <add>, %1213, %cst_258 [1] : vector<16x256xf32> to vector<16xf32>
    %1215 = vector.shape_cast %1214 : vector<16xf32> to vector<16x1xf32>
    %cst_259 = arith.constant 3.906250e-03 : f32
    %1216 = vector.broadcast %cst_259 : f32 to vector<16x1xf32>
    %1217 = arith.mulf %1215, %1216 : vector<16x1xf32>
    %1218 = vector.broadcast %1217 : vector<16x1xf32> to vector<16x2xf32>
    %1219 = arith.mulf %26, %1218 : vector<16x2xf32>
    %cst_260 = arith.constant dense<0.000000e+00> : vector<2xf32>
    %1220 = vector.multi_reduction <add>, %1219, %cst_260 [0] : vector<16x2xf32> to vector<2xf32>
    %1221 = vector.shape_cast %1220 : vector<2xf32> to vector<1x2xf32>
    %cst_261 = arith.constant 0.000000e+00 : f32
    %1222 = vector.broadcast %cst_261 : f32 to vector<1x2xf32>
    %1223 = arith.maximumf %1221, %1222 : vector<1x2xf32>
    %1224 = vector.broadcast %1223 : vector<1x2xf32> to vector<16x2xf32>
    %1225 = arith.mulf %27, %1224 : vector<16x2xf32>
    %cst_262 = arith.constant dense<0.000000e+00> : vector<16xf32>
    %1226 = vector.multi_reduction <add>, %1225, %cst_262 [1] : vector<16x2xf32> to vector<16xf32>
    %1227 = vector.shape_cast %1226 : vector<16xf32> to vector<16x1xf32>
    %cst_263 = arith.constant 0.000000e+00 : f32
    %1228 = vector.broadcast %cst_263 : f32 to vector<16x1xf32>
    %1229 = arith.subf %1228, %1227 : vector<16x1xf32>
    %1230 = math.exp %1229 : vector<16x1xf32>
    %cst_264 = arith.constant 1.000000e+00 : f32
    %1231 = vector.broadcast %cst_264 : f32 to vector<16x1xf32>
    %1232 = arith.addf %1231, %1230 : vector<16x1xf32>
    %cst_265 = arith.constant 1.000000e+00 : f32
    %1233 = vector.broadcast %cst_265 : f32 to vector<16x1xf32>
    %1234 = arith.divf %1233, %1232 : vector<16x1xf32>
    %1235 = vector.broadcast %1234 : vector<16x1xf32> to vector<16x256xf32>
    %1236 = arith.mulf %1213, %1235 : vector<16x256xf32>
    %c0_266 = arith.constant 0 : index
    %c0_267 = arith.constant 0 : index
    %c0_268 = arith.constant 0 : index
    %1237 = vector.load %arg6[%c0_266, %c0_267, %c0_268] : memref<1x16x256xf32, #tpu.memory_space<vmem>>, vector<1x16x256xf32>
    %1238 = vector.shape_cast %1237 : vector<1x16x256xf32> to vector<16x256xf32>
    %1239 = vector.shape_cast %1236 : vector<16x256xf32> to vector<1x16x256xf32>
    tpu.vector_store %arg6[%c0_266, %c0_267, %c0_268], %1239 {strides = array<i32>} : memref<1x16x256xf32, #tpu.memory_space<vmem>>, vector<1x16x256xf32>,
    return
  }
  func.func @transform_0(%arg0: i32) -> (i32, i32, i32) {
    %c0_i32 = arith.constant 0 : i32
    %c0_i32_0 = arith.constant 0 : i32
    %c0_i32_1 = arith.constant 0 : i32
    return %arg0, %c0_i32, %c0_i32_0 : i32, i32, i32
  }
  func.func @transform_1(%arg0: i32) -> (i32, i32) {
    %c0_i32 = arith.constant 0 : i32
    %c0_i32_0 = arith.constant 0 : i32
    %c0_i32_1 = arith.constant 0 : i32
    return %c0_i32, %c0_i32_0 : i32, i32
  }
  func.func @transform_2(%arg0: i32) -> (i32, i32) {
    %c0_i32 = arith.constant 0 : i32
    %c0_i32_0 = arith.constant 0 : i32
    %c0_i32_1 = arith.constant 0 : i32
    return %c0_i32, %c0_i32_0 : i32, i32
  }
  func.func @transform_3(%arg0: i32) -> (i32, i32) {
    %c0_i32 = arith.constant 0 : i32
    %c0_i32_0 = arith.constant 0 : i32
    %c0_i32_1 = arith.constant 0 : i32
    return %c0_i32, %c0_i32_0 : i32, i32
  }
  func.func @transform_4(%arg0: i32) -> (i32, i32) {
    %c0_i32 = arith.constant 0 : i32
    %c0_i32_0 = arith.constant 0 : i32
    %c0_i32_1 = arith.constant 0 : i32
    return %c0_i32, %c0_i32_0 : i32, i32
  }
  func.func @transform_5(%arg0: i32) -> (i32, i32, i32) {
    %c0_i32 = arith.constant 0 : i32
    %c0_i32_0 = arith.constant 0 : i32
    %c0_i32_1 = arith.constant 0 : i32
    return %arg0, %c0_i32, %c0_i32_0 : i32, i32, i32
  }
}

</mosaic_0001>

<bundles_post_ra>
// kernel: tpu_custom_call.1
= control target key start
LH: loop header
LB: loop body
LE: loop exit
PB: predicated region body
PF: predicated region fallthrough
CT: control target
= control target key end

     0   :  { %10 = vsyncpa [#allocation3], 0  ;;  %s12405_s0 = inlined_call_operand.vmem [shape: f32[2,4,256], index: 0, kind: input, shape index: {}]   ;;  %s12406_s1 = inlined_call_operand.hbm [shape: f32[16,36], index: 1, kind: input, shape index: {}]   ;;  %s12407_s2 = inlined_call_operand.vmem [shape: f32[16,144], index: 2, kind: input, shape index: {}]   ;;  %s12408_s3 = inlined_call_operand.vmem [shape: f32[16,4], index: 3, kind: input, shape index: {}]   ;;  %s12409_s4 = inlined_call_operand.vmem [shape: f32[16,7], index: 4, kind: input, shape index: {}]   ;;  %s12410_s5 = inlined_call_operand.hbm [shape: f32[2,16,256], index: 5, kind: output, shape index: {}]  }
   0x1   :  { %11 = vsyncpa [#allocation4], 0 }
   0x2   :  { %13 = vsyncpa [#allocation4 + $0x1], 0  ;;  %s7450_s18 = smov 0   ;;  %s7452_s19 = smov 0  }
   0x3   :  { %s7454_s20 = smov 0   ;;  %s7456_s21 = smov 0  }
   0x4 LB: > { %s7471_s22 = sadd.s32 4294967295, %s7273_s21   ;;  %s6625_s23 = sadd.s32 4294967294, %s7273_s21   ;;  %s7273_s21 = sphi %s7456_s21, %s14037_s21   ;;  %s7269_s20 = sphi %s7454_s20, %s14036_s20   ;;  %s7265_s19 = sphi %s7452_s19, %s14035_s19   ;;  %s7261_s18 = sphi %s7450_s18, %s14034_s18  }
   0x5   : > { %s7475_s24 = sadd.s32 1, %s7273_s21   ;;  %s136_s25 = sadd.s32 1, %s7269_s20 }
   0x6   : > { %s133_s26 = ssub.s32 %s7273_s21, %s7475_s24  ;;  %p146_p0 = scmp.ne.s32.totalorder %s7269_s20, %s7265_s19 }
   0x7   : > { %p134_p1 = scmp.eq.s32.totalorder %s133_s26, 0  ;;  %p147_p2 = scmp.eq.s32.totalorder %s7471_s22, 1 }
   0x8   : > { %p152_p3 = scmp.ne.s32.totalorder %s7265_s19, %s7261_s18  ;;  %p153_p4 = scmp.eq.s32.totalorder %s6625_s23, 1 }
   0x9   : > { %s7486_s27 = scalar_select %p134_p1, %s7269_s20, %s136_s25  }
   0xa   : > { %p7488_p5 = por %p147_p2, %p146_p0  ;;  %p7492_p6 = por %p153_p4, %p152_p3 }
   0xb   : > { %p6626_p7 = scmp.ge.s32.totalorder %s7273_s21, 1  ;;  %p160_p8 = scmp.lt.s32.totalorder %s7273_s21, 3 }
   0xc   : > { %s12898_s28 = scalar_select %p7488_p5, 1, 0 }
   0xd   : > { %s12899_s29 = scalar_select %p7492_p6, 1, 0 }
   0xe   : > { %p12411_p9 = scmp.eq.s32.totalorder %s7471_s22, 0  ;;  %p7499_p10 = pnand %p6626_p7, %p160_p8 }
   0xf   : > { %s7275_s6 = smov [#allocation2]   ;;  %s7179_s11 = scalar_lea.hbm %s12406_s1, 256 }
  0x10   : > { %s12900_s30 = scalar_select %p7499_p10, 1, 0 }
  0x11   : > { %s172_s7 = sshll.u32 %s7275_s6, 4  ;;  %p6647_p11 = pneg %p7499_p10  ;;  %s173_s7 = int_to_ptr.vmem [resolvable:$true] %s172_s7 }
  0x12   : > { %p7180_p13 = scmp.ne.s32.totalorder %s12406_s1, %s7179_s11  ;;  %p7186_p3 = scmp.lt.u32.totalorder %s7179_s11, %s12406_s1 }
  0x13   : > { %p7507_p12 = pnand %p12411_p9, %p6647_p11 }
  0x15   : > { %p7181_p0 = pneg %p7507_p12 }
  0x17   : > { %p7182_p1 = pnand %p7181_p0, %p7180_p13 }
  0x19   : > { %p7183_p2 = pneg %p7182_p1 }
  0x1b   : > { %p7188_p4 = pnand %p7186_p3, %p7183_p2 }
  0x1d   : > { %7191 = shalt.err (!%p7188_p4)
}
  0x1e   : > { %s7192_s16 = scalar_lea.vmem %s173_s7, 256  ;;  %p7200_p9 = scmp.lt.s32.totalorder %s173_s7, %s173_s7 }
  0x1f   : > { %p7193_p7 = scmp.ne.s32.totalorder %s173_s7, %s7192_s16  ;;  %p7201_p6 = scmp.lt.s32.totalorder %s7192_s16, %s7192_s16 }
  0x21   : > { %p7195_p8 = pnand %p7193_p7, %p7181_p0  ;;  %p7202_p5 = por %p7201_p6, %p7200_p9 }
  0x23   : > { %p7196_p11 = pneg %p7195_p8 }
  0x25   : > { %p7203_p10 = pnand %p7202_p5, %p7196_p11 }
  0x27   : > { %7206 = shalt.err (!%p7203_p10)
}
  0x28   : > { %s7276_s17 = smov 128   ;;  %s7277_s23 = smov 8  }
  0x29   : > { %6650 = dma.hbm_to_vmem [thread:$0]  (!%p7507_p12), %s12406_s1, 256, %s173_s7, [#allocation3], %s7276_s17, %s7276_s17, %s7277_s23  }
  0x2a   : > { %p12902_p13 = scmp.ne.s32.totalorder %s12900_s30, 0 }
  0x2c   : > { %205 = sbr.rel (%p12902_p13) target bundleno = 8242 (0x2032), region = 40 }
  0x33   : > { %p12903_p1 = scmp.eq.s32.totalorder %s7471_s22, 0 }
  0x35   : > { %7252 = dma.done.wait (%p12903_p1), [#allocation3], 256   ;;  %p12904_p0 = pmov %p12903_p1 }
  0x36   : > { %p233_p5 = scmp.lt.s32.totalorder %s7471_s22, 1  ;;  %v12449_v0 = vmov 0   ;;  %v12446_v1 = vmov 1   ;;  %v7542_v2 = vld [vmem:[#allocation2] sm:$0xff]  ;;  %s7280_s10 = smov 17   ;;  %v7547_v4 = vld [vmem:[#allocation2 + $0x8] sm:$0xff]  ;;  %v12448_v26 = vlaneseq }
  0x37   : > { %7254 = vsyncadd (%p12904_p0), [#allocation3], 4294967040  ;;  %6834 = vset.pattern.permute.xlu1 %v12449_v0  ;;  %6835 = vset.pattern.permute.xlu0 %v12446_v1  ;;  %v12444_v6 = vmov 2   ;;  %v12442_v7 = vmov 4   ;;  %v12438_v8 = vmov 3   ;;  %v12440_v9 = vmov 5  }
  0x38   : > { %s234_s6 = scalar_select %p233_p5, %s7471_s22, 1  ;;  %295 = vperm.xlu1 %6834, %v7542_v2   ;;  %v12428_v10 = vmov 6   ;;  %v12436_v11 = vmov 7   ;;  %v12434_v12 = vmov 8   ;;  %v12432_v13 = vmov 10  }
  0x39   : > { %v12430_v14 = vmov 11   ;;  %v12418_v15 = vmov 9   ;;  %v12416_v16 = vmov 12   ;;  %v12424_v17 = vmov 14   ;;  %s7294_s11 = smov 112   ;;  %s7295_s12 = smov 126  }
  0x3a   : > { %s6639_s7 = sshll.u32 %s234_s6, 3  ;;  %v12426_v18 = vmov 13   ;;  %vm278_vm0 = vcmask 138240   ;;  %v7631_v29 = vshrl.u32 %v12448_v26, 7  ;;  %s7296_s13 = smov 127   ;;  %vm628_vm4 = vcmask 1031168  }
  0x3b   : > { %s7540_s9 = scalar_lea.vmem %s12405_s0, %s6639_s7  ;;  %s7300_s14 = smov 111   ;;  %vm435_vm5 = vcmask 1039360   ;;  %vm737_vm7 = vcmask 916480   ;;  %vm872_vm8 = vcmask 908288   ;;  %vm1023_vm9 = vcmask 900096  }
  0x3c   : > { %v238_v3 = vld [vmem:[%s7540_s9] sm:$0xff]  ;;  %300 = vperm.xlu1 %6834, %v7547_v4   ;;  %12905 = vst [vmem:[#allocation8_spill] sm:$0xff] %v7631_v29  ;;  %v7634_v30 = vsub.s32 0, %v7631_v29  ;;  %v7663_v42 = vsub.s32 1, %v7631_v29  ;;  %v7688_v55 = vsub.s32 2, %v7631_v29  ;;  %s7304_s15 = smov 110  }
  0x3d   : > { %274 = vrot.lane.b32.xlu0 %v238_v3, %s7280_s10  ;;  %v273_v5 = vcombine.high %v238_v3, %v238_v3  ;;  %s7308_s16 = smov 96   ;;  %s7315_s17 = smov 95   ;;  %vm1132_vm10 = vcmask 785408   ;;  %vm1267_vm11 = vcmask 777216   ;;  %vm1418_vm12 = vcmask 769024  }
  0x3e   : > { %12906 = vst [vmem:[#allocation9_spill] sm:$0xff] %v7634_v30  ;;  %12907 = vst [vmem:[#allocation10_spill] sm:$0xff] %v7663_v42  ;;  %s7319_s23 = smov 94   ;;  %vm6485_vm13 = vcmask 39960   ;;  %vm6510_vm14 = vcmask 15360   ;;  %s6640_s26 = sshll.u32 %s7471_s22, 9 }
  0x3f   : > { %12908 = vst [vmem:[#allocation11_spill] sm:$0xff] %v7688_v55  ;;  %s12358_s7 = scalar_lea.hbm %s12410_s5, %s6640_s26  ;;  %p14032_p9 = scmp.ne.s32.totalorder %s12898_s28, 0 }
  0x40   : > { %6836 = vset.pattern.permute.xlu1 %v12446_v1 }
  0x41   : > { %276 = vrot.lane.b32.xlu0 %v273_v5, %s7280_s10  ;;  %324 = vperm.xlu1 %6836, %v7547_v4  }
  0x45   : > { %320 = vperm.xlu0 %6835, %v7542_v2   ;;  %6837 = vset.pattern.permute.xlu1 %v12444_v6 }
  0x46   : > { %344 = vperm.xlu1 %6837, %v7542_v2  }
  0x49   : > { %6838 = vset.pattern.permute.xlu0 %v12444_v6 }
  0x4a   : > { %348 = vperm.xlu0 %6838, %v7547_v4   ;;  %6839 = vset.pattern.permute.xlu1 %v12438_v8 }
  0x4b   : > { %368 = vperm.xlu1 %6839, %v7542_v2  }
  0x4e   : > { %6840 = vset.pattern.permute.xlu0 %v12442_v7 }
  0x4f   : > { %392 = vperm.xlu0 %6840, %v7542_v2   ;;  %372 = vperm.xlu1 %6839, %v7547_v4  }
  0x53   : > { %6843 = vset.pattern.permute.xlu0 %v12440_v9  ;;  %6841 = vset.pattern.permute.xlu1 %v12442_v7 }
  0x54   : > { %453 = vperm.xlu0 %6843, %v7547_v4   ;;  %396 = vperm.xlu1 %6841, %v7547_v4  }
  0x58   : > { %6844 = vset.pattern.permute.xlu0 %v12428_v10  ;;  %6842 = vset.pattern.permute.xlu1 %v12440_v9 }
  0x59   : > { %505 = vperm.xlu0 %6844, %v7542_v2   ;;  %449 = vperm.xlu1 %6842, %v7542_v2  }
  0x5d   : > { %6847 = vset.pattern.permute.xlu0 %v12436_v11  ;;  %6845 = vset.pattern.permute.xlu1 %v12428_v10 }
  0x5e   : > { %565 = vperm.xlu0 %6847, %v7547_v4   ;;  %509 = vperm.xlu1 %6845, %v7547_v4  }
  0x62   : > { %6849 = vset.pattern.permute.xlu0 %v12434_v12  ;;  %6846 = vset.pattern.permute.xlu1 %v12436_v11 }
  0x63   : > { %640 = vperm.xlu0 %6849, %v7547_v4   ;;  %561 = vperm.xlu1 %6846, %v7542_v2  }
  0x67   : > { %6851 = vset.pattern.permute.xlu0 %v12432_v13  ;;  %6848 = vset.pattern.permute.xlu1 %v12434_v12 }
  0x68   : > { %684 = vperm.xlu0 %6851, %v7542_v2   ;;  %636 = vperm.xlu1 %6848, %v7542_v2  }
  0x6c   : > { %6854 = vset.pattern.permute.xlu0 %v12430_v14  ;;  %6850 = vset.pattern.permute.xlu1 %v12418_v15 }
  0x6d   : > { %712 = vperm.xlu0 %6854, %v7547_v4   ;;  %660 = vperm.xlu1 %6850, %v7542_v2  }
  0x71   : > { %6856 = vset.pattern.permute.xlu0 %v12416_v16  ;;  %664 = vperm.xlu1 %6850, %v7547_v4  }
  0x72   : > { %749 = vperm.xlu0 %6856, %v7547_v4  }
  0x75   : > { %6852 = vset.pattern.permute.xlu1 %v12432_v13 }
  0x76   : > { %688 = vperm.xlu1 %6852, %v7547_v4   ;;  %6858 = vset.pattern.permute.xlu0 %v12424_v17 }
  0x7a   : > { %6853 = vset.pattern.permute.xlu1 %v12430_v14 }
  0x7b   : > { %708 = vperm.xlu1 %6853, %v7542_v2  }
  0x7f   : > { %6855 = vset.pattern.permute.xlu1 %v12416_v16 }
  0x80   : > { %745 = vperm.xlu1 %6855, %v7542_v2  }
  0x84   : > { %6857 = vset.pattern.permute.xlu1 %v12426_v18 }
  0x85   : > { %769 = vperm.xlu1 %6857, %v7542_v2  }
  0x89   : > { %773 = vperm.xlu1 %6857, %v7547_v4  }
  0x8d   : > { %6859 = vset.pattern.permute.xlu1 %v12424_v17 }
  0xaf   : > { %v275_v19 = vpop.permute.xlu0 %274 }
  0xb0   : > { %v7602_v20 = vsel %vm278_vm0, 0.0, %v275_v19 }
  0xb1   : > { %731 = vrot.lane.b32.xlu1 %v7602_v20, %s7294_s11  ;;  %622 = vrot.lane.b32.xlu0 %v7602_v20, %s7295_s12  ;;  %v7646_v34 = vrot.slane %v7602_v20, %v7634_v30  ;;  %v7671_v46 = vrot.slane %v7602_v20, %v7663_v42  ;;  %v7705_v63 = vrot.slane %v7602_v20, %v7688_v55 }
  0xb3   : > { %v277_v21 = vpop.permute.xlu0 %276 }
  0xb4   : > { %v7609_v22 = vsel %vm278_vm0, %v275_v19, %v277_v21  ;;  %v7612_v23 = vsel %vm278_vm0, %v277_v21, 0.0  ;;  %v7717_v21 = vsub.s32 3, %v7631_v29 }
  0xb5   : > { %626 = vrot.lane.b32.xlu0 %v7612_v23, %s7295_s12  ;;  %624 = vrot.lane.b32.xlu1 %v7609_v22, %s7295_s12  ;;  %v7642_v33 = vrot.slane %v7609_v22, %v7634_v30  ;;  %v7656_v39 = vrot.slane %v7612_v23, %v7634_v30  ;;  %v7678_v50 = vrot.slane %v7612_v23, %v7663_v42 }
  0xb6   : > { %v7683_v52 = vrot.slane %v7609_v22, %v7663_v42  ;;  %v7697_v59 = vrot.slane %v7609_v22, %v7688_v55  ;;  %v7713_v19 = vrot.slane %v7612_v23, %v7688_v55  ;;  %12909 = vst [vmem:[#allocation12_spill] sm:$0xff] %v7717_v21 }
  0xb7   : > { %v7622_v24 = vpop.permute.xlu1 %295 }
  0xb9   : > { %735 = vrot.lane.b32.xlu0 %v7612_v23, %s7294_s11  ;;  %733 = vrot.lane.b32.xlu1 %v7609_v22, %s7294_s11 }
  0xbb   : > { %v7624_v25 = vpop.permute.xlu1 %300 }
  0xc0   : > { %v7628_v28 = vpop.permute.xlu1 %324 }
  0xc4   : > { %v7626_v27 = vpop.permute.xlu0 %320 }
  0xc5   : > { %v7638_v32 = vpop.permute.xlu1 %344 }
  0xc9   : > { %v7636_v31 = vpop.permute.xlu0 %348 }
  0xca   : > { %v7648_v36 = vpop.permute.xlu1 %368 }
  0xce   : > { %v393_v35 = vpop.permute.xlu0 %392  ;;  %v7658_v40 = vpop.permute.xlu1 %372 }
  0xcf   : > { %v412_v37 = vmul.f32 %v7642_v33, %v393_v35  ;;  %v411_v38 = vmul.f32 %v7646_v34, %v393_v35  ;;  %v413_v41 = vmul.f32 %v7656_v39, %v393_v35 }
  0xd1   : > { %425 = vrot.lane.b32.xlu0 %v412_v37, %s7296_s13  ;;  %423 = vrot.lane.b32.xlu1 %v411_v38, %s7296_s13 }
  0xd3   : > { %v397_v43 = vpop.permute.xlu1 %396  ;;  %v454_v51 = vpop.permute.xlu0 %453 }
  0xd4   : > { %v414_v44 = vmul.f32 %v7646_v34, %v397_v43  ;;  %v415_v45 = vmul.f32 %v7642_v33, %v397_v43  ;;  %v416_v48 = vmul.f32 %v7656_v39, %v397_v43  ;;  %v472_v56 = vmul.f32 %v7683_v52, %v454_v51 }
  0xd5   : > { %427 = vrot.lane.b32.xlu1 %v413_v41, %s7296_s13  ;;  %v471_v58 = vmul.f32 %v7671_v46, %v454_v51  ;;  %v473_v62 = vmul.f32 %v7678_v50, %v454_v51  ;;  %v7724_v41 = vrot.slane %v7612_v23, %v7717_v21 }
  0xd6   : > { %429 = vrot.lane.b32.xlu0 %v414_v44, %s7296_s13 }
  0xd8   : > { %v450_v47 = vpop.permute.xlu1 %449  ;;  %v506_v57 = vpop.permute.xlu0 %505 }
  0xd9   : > { %431 = vrot.lane.b32.xlu1 %v415_v45, %s7296_s13  ;;  %v468_v49 = vmul.f32 %v7671_v46, %v450_v47  ;;  %v470_v53 = vmul.f32 %v7678_v50, %v450_v47  ;;  %v469_v54 = vmul.f32 %v7683_v52, %v450_v47  ;;  %v525_v60 = vmul.f32 %v7697_v59, %v506_v57 }
  0xda   : > { %433 = vrot.lane.b32.xlu0 %v416_v48, %s7296_s13  ;;  %v524_v5 = vmul.f32 %v7705_v63, %v506_v57  ;;  %v526_v38 = vmul.f32 %v7713_v19, %v506_v57  ;;  %v7732_v47 = vrot.slane %v7609_v22, %v7717_v21  ;;  %v7737_v48 = vrot.slane %v7602_v20, %v7717_v21 }
  0xdd   : > { %480 = vrot.lane.b32.xlu1 %v468_v49, %s7296_s13  ;;  %v510_v61 = vpop.permute.xlu1 %509  ;;  %v566_v44 = vpop.permute.xlu0 %565 }
  0xde   : > { %484 = vrot.lane.b32.xlu0 %v470_v53, %s7296_s13  ;;  %v527_v3 = vmul.f32 %v7705_v63, %v510_v61  ;;  %v529_v35 = vmul.f32 %v7713_v19, %v510_v61  ;;  %v528_v45 = vmul.f32 %v7697_v59, %v510_v61  ;;  %v584_v49 = vmul.f32 %v7732_v47, %v566_v44 }
  0xe1   : > { %482 = vrot.lane.b32.xlu1 %v469_v54, %s7296_s13  ;;  %v583_v54 = vmul.f32 %v7737_v48, %v566_v44 }
  0xe2   : > { %488 = vrot.lane.b32.xlu0 %v472_v56, %s7296_s13  ;;  %v562_v37 = vpop.permute.xlu1 %561  ;;  %v12414_v56 = vmov 15  }
  0xe3   : > { %v582_v43 = vmul.f32 %v7724_v41, %v562_v37  ;;  %v580_v51 = vmul.f32 %v7737_v48, %v562_v37  ;;  %v581_v53 = vmul.f32 %v7732_v47, %v562_v37 }
  0xe5   : > { %486 = vrot.lane.b32.xlu1 %v471_v58, %s7296_s13  ;;  %v585_v58 = vmul.f32 %v7724_v41, %v566_v44 }
  0xe6   : > { %538 = vrot.lane.b32.xlu0 %v525_v60, %s7296_s13 }
  0xe7   : > { %v7748_v57 = vpop.permute.xlu1 %636 }
  0xe8   : > { %12910 = vst [vmem:[#allocation13_spill] sm:$0xff] %v7748_v57 }
  0xe9   : > { %490 = vrot.lane.b32.xlu1 %v473_v62, %s7296_s13  ;;  %v12422_v62 = vmov 16  }
  0xea   : > { %542 = vrot.lane.b32.xlu0 %v527_v3, %s7296_s13 }
  0xec   : > { %v7754_v60 = vpop.permute.xlu1 %660 }
  0xed   : > { %536 = vrot.lane.b32.xlu1 %v524_v5, %s7296_s13  ;;  %12911 = vst [vmem:[#allocation14_spill] sm:$0xff] %v7754_v60 }
  0xee   : > { %546 = vrot.lane.b32.xlu0 %v529_v35, %s7296_s13  ;;  %v12420_v35 = vmov 17  }
  0xf0   : > { %v7757_v61 = vpop.permute.xlu1 %664 }
  0xf1   : > { %540 = vrot.lane.b32.xlu1 %v526_v38, %s7296_s13  ;;  %12912 = vst [vmem:[#allocation15_spill] sm:$0xff] %v7757_v61 }
  0xf2   : > { %596 = vrot.lane.b32.xlu0 %v582_v43, %s7296_s13 }
  0xf5   : > { %544 = vrot.lane.b32.xlu1 %v528_v45, %s7296_s13  ;;  %v7762_v3 = vpop.permute.xlu1 %688 }
  0xf6   : > { %600 = vrot.lane.b32.xlu0 %v584_v49, %s7296_s13  ;;  %12913 = vst [vmem:[#allocation16_spill] sm:$0xff] %v7762_v3 }
  0xf9   : > { %592 = vrot.lane.b32.xlu1 %v580_v51, %s7296_s13 }
  0xfa   : > { %793 = vperm.xlu0 %6858, %v7542_v2   ;;  %v7766_v5 = vpop.permute.xlu1 %708 }
  0xfb   : > { %12914 = vst [vmem:[#allocation17_spill] sm:$0xff] %v7766_v5 }
  0xfd   : > { %594 = vrot.lane.b32.xlu1 %v581_v53, %s7296_s13 }
  0xfe   : > { %6861 = vset.pattern.permute.xlu0 %v12414_v56 }
  0xff   : > { %821 = vperm.xlu0 %6861, %v7547_v4   ;;  %v7770_v37 = vpop.permute.xlu1 %745 }
 0x100   : > { %12915 = vst [vmem:[#allocation18_spill] sm:$0xff] %v7770_v37 }
 0x101   : > { %598 = vrot.lane.b32.xlu1 %v583_v54, %s7296_s13 }
 0x103   : > { %6863 = vset.pattern.permute.xlu0 %v12420_v35 }
 0x104   : > { %v7772_v38 = vpop.permute.xlu1 %769 }
 0x105   : > { %602 = vrot.lane.b32.xlu1 %v585_v58, %s7296_s13  ;;  %12916 = vst [vmem:[#allocation19_spill] sm:$0xff] %v7772_v38 }
 0x108   : > { %v7774_v43 = vpop.permute.xlu1 %773 }
 0x109   : > { %797 = vperm.xlu1 %6859, %v7547_v4   ;;  %12917 = vst [vmem:[#allocation20_spill] sm:$0xff] %v7774_v43 }
 0x10d   : > { %6860 = vset.pattern.permute.xlu1 %v12414_v56 }
 0x10e   : > { %817 = vperm.xlu1 %6860, %v7542_v2  }
 0x112   : > { %6862 = vset.pattern.permute.xlu1 %v12422_v62 }
 0x113   : > { %841 = vperm.xlu1 %6862, %v7542_v2  }
 0x117   : > { %845 = vperm.xlu1 %6862, %v7547_v4  }
 0x11b   : > { %6864 = vset.pattern.permute.xlu1 %v12420_v35 }
 0x123   : > { %v7776_v44 = vpop.permute.xlu1 %731 }
 0x124   : > { %12918 = vst [vmem:[#allocation21_spill] sm:$0xff] %v7776_v44 }
 0x127   : > { %v7778_v45 = vpop.permute.xlu1 %624 }
 0x12b   : > { %v7780_v49 = vpop.permute.xlu1 %733 }
 0x12c   : > { %12919 = vst [vmem:[#allocation22_spill] sm:$0xff] %v7780_v49 }
 0x143   : > { %v7782_v51 = vpop.permute.xlu1 %423 }
 0x147   : > { %v7784_v53 = vpop.permute.xlu1 %427 }
 0x14b   : > { %v7786_v54 = vpop.permute.xlu1 %431 }
 0x14f   : > { %v7788_v58 = vpop.permute.xlu1 %480 }
 0x153   : > { %v7790_v56 = vpop.permute.xlu1 %482 }
 0x157   : > { %v7792_v16 = vpop.permute.xlu1 %486 }
 0x15b   : > { %v7794_v15 = vpop.permute.xlu1 %490 }
 0x15f   : > { %v7796_v35 = vpop.permute.xlu1 %536 }
 0x163   : > { %v7798_v62 = vpop.permute.xlu1 %540 }
 0x167   : > { %v7800_v17 = vpop.permute.xlu1 %544 }
 0x16b   : > { %v7802_v18 = vpop.permute.xlu1 %592 }
 0x16f   : > { %v7804_v10 = vpop.permute.xlu1 %594 }
 0x173   : > { %v7806_v14 = vpop.permute.xlu1 %598 }
 0x174   : > { %12920 = vst [vmem:[#allocation23_spill] sm:$0xff] %v7806_v14 }
 0x177   : > { %v7808_v13 = vpop.permute.xlu1 %602 }
 0x178   : > { %12921 = vst [vmem:[#allocation24_spill] sm:$0xff] %v7808_v13 }
 0x188   : > { %v7810_v12 = vpop.permute.xlu1 %797 }
 0x189   : > { %12922 = vst [vmem:[#allocation25_spill] sm:$0xff] %v7810_v12 }
 0x18d   : > { %v7812_v11 = vpop.permute.xlu1 %817 }
 0x18e   : > { %12923 = vst [vmem:[#allocation26_spill] sm:$0xff] %v7812_v11 }
 0x192   : > { %v842_v8 = vpop.permute.xlu1 %841 }
 0x193   : > { %v849_v9 = vmul.f32 %v842_v8, %v7642_v33  ;;  %v848_v7 = vmul.f32 %v842_v8, %v7646_v34  ;;  %v850_v1 = vmul.f32 %v842_v8, %v7656_v39 }
 0x195   : > { %862 = vrot.lane.b32.xlu1 %v849_v9, %s7300_s14  ;;  %860 = vrot.lane.b32.xlu0 %v848_v7, %s7300_s14  ;;  %v7828_v7 = vpop.permute.xlu0 %640  ;;  %v12458_v9 = vmov 18  }
 0x196   : > { %v846_v6 = vpop.permute.xlu1 %845  ;;  %12924 = vst [vmem:[#allocation27_spill] sm:$0xff] %v7828_v7 }
 0x197   : > { %v851_v26 = vmul.f32 %v846_v6, %v7646_v34  ;;  %v852_v0 = vmul.f32 %v846_v6, %v7642_v33  ;;  %v853_v29 = vmul.f32 %v846_v6, %v7656_v39 }
 0x199   : > { %864 = vrot.lane.b32.xlu0 %v850_v1, %s7300_s14  ;;  %866 = vrot.lane.b32.xlu1 %v851_v26, %s7300_s14  ;;  %v7830_v8 = vpop.permute.xlu0 %684 }
 0x19a   : > { %12925 = vst [vmem:[#allocation28_spill] sm:$0xff] %v7830_v8 }
 0x19d   : > { %868 = vrot.lane.b32.xlu0 %v852_v0, %s7300_s14  ;;  %870 = vrot.lane.b32.xlu1 %v853_v29, %s7300_s14  ;;  %v7834_v1 = vpop.permute.xlu0 %712 }
 0x19e   : > { %12926 = vst [vmem:[#allocation29_spill] sm:$0xff] %v7834_v1 }
 0x1a1   : > { %886 = vperm.xlu0 %6863, %v7542_v2   ;;  %890 = vperm.xlu1 %6864, %v7547_v4   ;;  %v7836_v6 = vpop.permute.xlu0 %749 }
 0x1a2   : > { %12927 = vst [vmem:[#allocation30_spill] sm:$0xff] %v7836_v6 }
 0x1a5   : > { %6866 = vset.pattern.permute.xlu0 %v12458_v9  ;;  %6865 = vset.pattern.permute.xlu1 %v12458_v9  ;;  %v7838_v0 = vpop.permute.xlu0 %622 }
 0x1a9   : > { %v7840_v26 = vpop.permute.xlu0 %626 }
 0x1ad   : > { %v7842_v29 = vpop.permute.xlu0 %735 }
 0x1ae   : > { %12928 = vst [vmem:[#allocation31_spill] sm:$0xff] %v7842_v29 }
 0x1b1   : > { %v7844_v11 = vpop.permute.xlu0 %425 }
 0x1b5   : > { %v7846_v12 = vpop.permute.xlu0 %429 }
 0x1b9   : > { %v7848_v43 = vpop.permute.xlu0 %433 }
 0x1bd   : > { %v7850_v38 = vpop.permute.xlu0 %484 }
 0x1c1   : > { %v7852_v37 = vpop.permute.xlu0 %488 }
 0x1c5   : > { %v7854_v9 = vpop.permute.xlu0 %538 }
 0x1c9   : > { %v7856_v1 = vpop.permute.xlu0 %542 }
 0x1cd   : > { %v7858_v6 = vpop.permute.xlu0 %546 }
 0x1d1   : > { %v7860_v5 = vpop.permute.xlu0 %596 }
 0x1d2   : > { %12929 = vst [vmem:[#allocation32_spill] sm:$0xff] %v7860_v5 }
 0x1d5   : > { %v7862_v3 = vpop.permute.xlu0 %600 }
 0x1d9   : > { %v7864_v8 = vpop.permute.xlu0 %793 }
 0x1da   : > { %12930 = vst [vmem:[#allocation33_spill] sm:$0xff] %v7864_v8 }
 0x1dd   : > { %v7866_v29 = vpop.permute.xlu0 %821 }
 0x1de   : > { %12931 = vst [vmem:[#allocation34_spill] sm:$0xff] %v7866_v29 }
 0x207   : > { %v7868_v44 = vpop.permute.xlu0 %860  ;;  %v7870_v49 = vpop.permute.xlu1 %862 }
 0x208   : > { %12932 = vst [vmem:[#allocation35_spill] sm:$0xff] %v7868_v44  ;;  %12933 = vst [vmem:[#allocation36_spill] sm:$0xff] %v7870_v49 }
 0x20b   : > { %v7872_v61 = vpop.permute.xlu0 %864  ;;  %v7874_v60 = vpop.permute.xlu1 %866 }
 0x20c   : > { %12934 = vst [vmem:[#allocation37_spill] sm:$0xff] %v7872_v61  ;;  %12935 = vst [vmem:[#allocation38_spill] sm:$0xff] %v7874_v60 }
 0x20f   : > { %v7876_v7 = vpop.permute.xlu0 %868  ;;  %v7878_v57 = vpop.permute.xlu1 %870 }
 0x210   : > { %12936 = vst [vmem:[#allocation39_spill] sm:$0xff] %v7876_v7  ;;  %12937 = vst [vmem:[#allocation40_spill] sm:$0xff] %v7878_v57 }
 0x220   : > { %v887_v13 = vpop.permute.xlu0 %886  ;;  %v891_v8 = vpop.permute.xlu1 %890 }
 0x221   : > { %v894_v5 = vmul.f32 %v887_v13, %v7683_v52  ;;  %v893_v14 = vmul.f32 %v887_v13, %v7671_v46  ;;  %v896_v44 = vmul.f32 %v891_v8, %v7671_v46  ;;  %v895_v61 = vmul.f32 %v887_v13, %v7678_v50 }
 0x222   : > { %v898_v57 = vmul.f32 %v891_v8, %v7678_v50  ;;  %v897_v60 = vmul.f32 %v891_v8, %v7683_v52 }
 0x223   : > { %907 = vrot.lane.b32.xlu0 %v894_v5, %s7300_s14  ;;  %905 = vrot.lane.b32.xlu1 %v893_v14, %s7300_s14  ;;  %v12474_v14 = vmov 19  }
 0x227   : > { %911 = vrot.lane.b32.xlu0 %v896_v44, %s7300_s14  ;;  %909 = vrot.lane.b32.xlu1 %v895_v61, %s7300_s14 }
 0x22b   : > { %915 = vrot.lane.b32.xlu0 %v898_v57, %s7300_s14  ;;  %913 = vrot.lane.b32.xlu1 %v897_v60, %s7300_s14 }
 0x22f   : > { %934 = vperm.xlu0 %6866, %v7547_v4   ;;  %930 = vperm.xlu1 %6865, %v7542_v2  }
 0x233   : > { %6867 = vset.pattern.permute.xlu0 %v12474_v14  ;;  %6868 = vset.pattern.permute.xlu1 %v12474_v14 }
 0x295   : > { %v7896_v13 = vpop.permute.xlu1 %905  ;;  %v7898_v61 = vpop.permute.xlu0 %907 }
 0x296   : > { %12938 = vst [vmem:[#allocation41_spill] sm:$0xff] %v7896_v13  ;;  %12939 = vst [vmem:[#allocation42_spill] sm:$0xff] %v7898_v61 }
 0x299   : > { %v7900_v5 = vpop.permute.xlu1 %909  ;;  %v7902_v44 = vpop.permute.xlu0 %911 }
 0x29a   : > { %12940 = vst [vmem:[#allocation43_spill] sm:$0xff] %v7900_v5  ;;  %12941 = vst [vmem:[#allocation44_spill] sm:$0xff] %v7902_v44 }
 0x29d   : > { %v7904_v57 = vpop.permute.xlu1 %913  ;;  %v7906_v60 = vpop.permute.xlu0 %915 }
 0x29e   : > { %12942 = vst [vmem:[#allocation45_spill] sm:$0xff] %v7904_v57  ;;  %12943 = vst [vmem:[#allocation46_spill] sm:$0xff] %v7906_v60 }
 0x2ae   : > { %v931_v8 = vpop.permute.xlu1 %930  ;;  %v935_v29 = vpop.permute.xlu0 %934 }
 0x2af   : > { %v939_v7 = vmul.f32 %v931_v8, %v7713_v19  ;;  %v937_v49 = vmul.f32 %v931_v8, %v7705_v63  ;;  %v941_v14 = vmul.f32 %v935_v29, %v7697_v59  ;;  %v938_v5 = vmul.f32 %v931_v8, %v7697_v59 }
 0x2b0   : > { %v940_v60 = vmul.f32 %v935_v29, %v7705_v63  ;;  %v942_v44 = vmul.f32 %v935_v29, %v7713_v19 }
 0x2b1   : > { %953 = vrot.lane.b32.xlu0 %v939_v7, %s7300_s14  ;;  %949 = vrot.lane.b32.xlu1 %v937_v49, %s7300_s14  ;;  %v12477_v49 = vmov 20  }
 0x2b5   : > { %957 = vrot.lane.b32.xlu0 %v941_v14, %s7300_s14  ;;  %951 = vrot.lane.b32.xlu1 %v938_v5, %s7300_s14 }
 0x2b9   : > { %974 = vperm.xlu0 %6867, %v7542_v2   ;;  %955 = vrot.lane.b32.xlu1 %v940_v60, %s7300_s14 }
 0x2bd   : > { %959 = vrot.lane.b32.xlu1 %v942_v44, %s7300_s14  ;;  %6869 = vset.pattern.permute.xlu0 %v12477_v49 }
 0x2c1   : > { %978 = vperm.xlu1 %6868, %v7547_v4  }
 0x2c5   : > { %6870 = vset.pattern.permute.xlu1 %v12477_v49 }
 0x323   : > { %v7924_v7 = vpop.permute.xlu1 %949  ;;  %v7926_v14 = vpop.permute.xlu0 %953 }
 0x324   : > { %12944 = vst [vmem:[#allocation47_spill] sm:$0xff] %v7924_v7  ;;  %12945 = vst [vmem:[#allocation48_spill] sm:$0xff] %v7926_v14 }
 0x327   : > { %v7928_v5 = vpop.permute.xlu1 %951  ;;  %v7930_v8 = vpop.permute.xlu0 %957 }
 0x328   : > { %12946 = vst [vmem:[#allocation49_spill] sm:$0xff] %v7928_v5  ;;  %12947 = vst [vmem:[#allocation50_spill] sm:$0xff] %v7930_v8 }
 0x32b   : > { %v7932_v60 = vpop.permute.xlu1 %955 }
 0x32c   : > { %12948 = vst [vmem:[#allocation51_spill] sm:$0xff] %v7932_v60 }
 0x32f   : > { %v7938_v49 = vpop.permute.xlu1 %959 }
 0x330   : > { %12949 = vst [vmem:[#allocation52_spill] sm:$0xff] %v7938_v49 }
 0x338   : > { %v975_v29 = vpop.permute.xlu0 %974 }
 0x339   : > { %v981_v44 = vmul.f32 %v975_v29, %v7737_v48  ;;  %v982_v57 = vmul.f32 %v975_v29, %v7732_v47  ;;  %v983_v7 = vmul.f32 %v975_v29, %v7724_v41  ;;  %v12495_v29 = vmov 28  }
 0x33b   : > { %995 = vrot.lane.b32.xlu0 %v982_v57, %s7300_s14  ;;  %993 = vrot.lane.b32.xlu1 %v981_v44, %s7300_s14  ;;  %v12493_v57 = vmov 21   ;;  %v12485_v44 = vmov 26  }
 0x33f   : > { %997 = vrot.lane.b32.xlu1 %v983_v7, %s7300_s14  ;;  %v12489_v7 = vmov 22  }
 0x340   : > { %v979_v14 = vpop.permute.xlu1 %978 }
 0x341   : > { %v985_v8 = vmul.f32 %v979_v14, %v7732_v47  ;;  %v984_v60 = vmul.f32 %v979_v14, %v7737_v48  ;;  %v986_v5 = vmul.f32 %v979_v14, %v7724_v41  ;;  %v12487_v14 = vmov 23  }
 0x343   : > { %1001 = vrot.lane.b32.xlu1 %v985_v8, %s7300_s14  ;;  %999 = vrot.lane.b32.xlu0 %v984_v60, %s7300_s14  ;;  %v12483_v8 = vmov 25   ;;  %v12491_v60 = vmov 27  }
 0x347   : > { %1017 = vrot.lane.b32.xlu1 %v7602_v20, %s7304_s15  ;;  %1003 = vrot.lane.b32.xlu0 %v986_v5, %s7300_s14  ;;  %v12481_v5 = vmov 24  }
 0x34b   : > { %1021 = vrot.lane.b32.xlu1 %v7612_v23, %s7304_s15  ;;  %1019 = vrot.lane.b32.xlu0 %v7609_v22, %s7304_s15 }
 0x34f   : > { %1035 = vperm.xlu1 %6870, %v7547_v4   ;;  %1031 = vperm.xlu0 %6869, %v7542_v2  }
 0x353   : > { %6871 = vset.pattern.permute.xlu1 %v12493_v57  ;;  %6872 = vset.pattern.permute.xlu0 %v12493_v57 }
 0x354   : > { %1055 = vperm.xlu1 %6871, %v7542_v2   ;;  %1059 = vperm.xlu0 %6872, %v7547_v4  }
 0x358   : > { %6873 = vset.pattern.permute.xlu1 %v12489_v7  ;;  %6874 = vset.pattern.permute.xlu0 %v12487_v14 }
 0x359   : > { %1079 = vperm.xlu1 %6873, %v7542_v2   ;;  %1103 = vperm.xlu0 %6874, %v7542_v2  }
 0x35d   : > { %1083 = vperm.xlu1 %6873, %v7547_v4   ;;  %1128 = vrot.lane.b32.xlu0 %v7609_v22, %s7308_s16 }
 0x35e   : > { %6876 = vset.pattern.permute.xlu0 %v12481_v5 }
 0x361   : > { %6875 = vset.pattern.permute.xlu1 %v12487_v14  ;;  %1140 = vperm.xlu0 %6876, %v7542_v2  }
 0x362   : > { %1107 = vperm.xlu1 %6875, %v7547_v4  }
 0x365   : > { %6879 = vset.pattern.permute.xlu0 %v12483_v8 }
 0x366   : > { %1126 = vrot.lane.b32.xlu1 %v7602_v20, %s7308_s16  ;;  %1168 = vperm.xlu0 %6879, %v7547_v4  }
 0x367   : > { %6877 = vset.pattern.permute.xlu1 %v12481_v5  ;;  %v12498_v5 = vmov 29  }
 0x36a   : > { %1130 = vrot.lane.b32.xlu1 %v7612_v23, %s7308_s16  ;;  %6881 = vset.pattern.permute.xlu0 %v12491_v60 }
 0x36b   : > { %1212 = vperm.xlu0 %6881, %v7542_v2  }
 0x36e   : > { %1144 = vperm.xlu1 %6877, %v7547_v4  }
 0x36f   : > { %6884 = vset.pattern.permute.xlu0 %v12495_v29 }
 0x370   : > { %1240 = vperm.xlu0 %6884, %v7547_v4  }
 0x372   : > { %6878 = vset.pattern.permute.xlu1 %v12483_v8 }
 0x373   : > { %1164 = vperm.xlu1 %6878, %v7542_v2  }
 0x374   : > { %6885 = vset.pattern.permute.xlu0 %v12498_v5 }
 0x377   : > { %6880 = vset.pattern.permute.xlu1 %v12485_v44 }
 0x378   : > { %1188 = vperm.xlu1 %6880, %v7542_v2  }
 0x37c   : > { %1192 = vperm.xlu1 %6880, %v7547_v4  }
 0x380   : > { %6882 = vset.pattern.permute.xlu1 %v12491_v60 }
 0x381   : > { %1216 = vperm.xlu1 %6882, %v7547_v4  }
 0x385   : > { %6883 = vset.pattern.permute.xlu1 %v12495_v29 }
 0x386   : > { %1236 = vperm.xlu1 %6883, %v7542_v2  }
 0x38a   : > { %6886 = vset.pattern.permute.xlu1 %v12498_v5 }
 0x3ad   : > { %v7994_v8 = vpop.permute.xlu1 %993  ;;  %v8004_v57 = vpop.permute.xlu0 %995 }
 0x3ae   : > { %12950 = vst [vmem:[#allocation53_spill] sm:$0xff] %v7994_v8  ;;  %12955 = vst [vmem:[#allocation58_spill] sm:$0xff] %v8004_v57 }
 0x3b1   : > { %v7996_v44 = vpop.permute.xlu1 %997 }
 0x3b2   : > { %12951 = vst [vmem:[#allocation54_spill] sm:$0xff] %v7996_v44 }
 0x3b5   : > { %v7998_v14 = vpop.permute.xlu1 %1001  ;;  %v8008_v49 = vpop.permute.xlu0 %999 }
 0x3b6   : > { %12952 = vst [vmem:[#allocation55_spill] sm:$0xff] %v7998_v14  ;;  %12957 = vst [vmem:[#allocation60_spill] sm:$0xff] %v8008_v49 }
 0x3b9   : > { %v8000_v7 = vpop.permute.xlu1 %1017  ;;  %v8012_v61 = vpop.permute.xlu0 %1003 }
 0x3ba   : > { %12953 = vst [vmem:[#allocation56_spill] sm:$0xff] %v8000_v7  ;;  %12959 = vst [vmem:[#allocation62_spill] sm:$0xff] %v8012_v61 }
 0x3bd   : > { %v8002_v60 = vpop.permute.xlu1 %1021  ;;  %v8016_v8 = vpop.permute.xlu0 %1019 }
 0x3be   : > { %12954 = vst [vmem:[#allocation57_spill] sm:$0xff] %v8002_v60  ;;  %12961 = vst [vmem:[#allocation64_spill] sm:$0xff] %v8016_v8 }
 0x3ce   : > { %v8006_v29 = vpop.permute.xlu1 %1035  ;;  %v8020_v14 = vpop.permute.xlu0 %1031 }
 0x3cf   : > { %12956 = vst [vmem:[#allocation59_spill] sm:$0xff] %v8006_v29  ;;  %12963 = vst [vmem:[#allocation66_spill] sm:$0xff] %v8020_v14 }
 0x3d3   : > { %v8010_v13 = vpop.permute.xlu1 %1055  ;;  %v8024_v60 = vpop.permute.xlu0 %1059 }
 0x3d4   : > { %12958 = vst [vmem:[#allocation61_spill] sm:$0xff] %v8010_v13  ;;  %12965 = vst [vmem:[#allocation68_spill] sm:$0xff] %v8024_v60 }
 0x3d8   : > { %v8014_v5 = vpop.permute.xlu1 %1079  ;;  %v8030_v49 = vpop.permute.xlu0 %1103 }
 0x3d9   : > { %12960 = vst [vmem:[#allocation63_spill] sm:$0xff] %v8014_v5  ;;  %12968 = vst [vmem:[#allocation71_spill] sm:$0xff] %v8030_v49 }
 0x3dc   : > { %v8018_v44 = vpop.permute.xlu1 %1083  ;;  %v8034_v61 = vpop.permute.xlu0 %1128 }
 0x3dd   : > { %12962 = vst [vmem:[#allocation65_spill] sm:$0xff] %v8018_v44  ;;  %12970 = vst [vmem:[#allocation73_spill] sm:$0xff] %v8034_v61 }
 0x3e0   : > { %v8038_v8 = vpop.permute.xlu0 %1140 }
 0x3e1   : > { %v8022_v7 = vpop.permute.xlu1 %1107 }
 0x3e2   : > { %12964 = vst [vmem:[#allocation67_spill] sm:$0xff] %v8022_v7 }
 0x3e5   : > { %v8026_v57 = vpop.permute.xlu1 %1126  ;;  %v8042_v14 = vpop.permute.xlu0 %1168 }
 0x3e6   : > { %12966 = vst [vmem:[#allocation69_spill] sm:$0xff] %v8026_v57  ;;  %12972 = vst [vmem:[#allocation75_spill] sm:$0xff] %v8042_v14 }
 0x3e9   : > { %v8028_v29 = vpop.permute.xlu1 %1130 }
 0x3ea   : > { %12967 = vst [vmem:[#allocation70_spill] sm:$0xff] %v8028_v29  ;;  %v8048_v57 = vpop.permute.xlu0 %1212 }
 0x3eb   : > { %12974 = vst [vmem:[#allocation77_spill] sm:$0xff] %v8048_v57 }
 0x3ed   : > { %v8032_v13 = vpop.permute.xlu1 %1144 }
 0x3ee   : > { %12969 = vst [vmem:[#allocation72_spill] sm:$0xff] %v8032_v13 }
 0x3ef   : > { %v1241_v61 = vpop.permute.xlu0 %1240 }
 0x3f0   : > { %v1246_v57 = vmul.f32 %v1241_v61, %v7646_v34 }
 0x3f2   : > { %v8036_v5 = vpop.permute.xlu1 %1164 }
 0x3f7   : > { %v8040_v44 = vpop.permute.xlu1 %1188 }
 0x3f8   : > { %12971 = vst [vmem:[#allocation74_spill] sm:$0xff] %v8040_v44  ;;  %v1247_v44 = vmul.f32 %v1241_v61, %v7642_v33 }
 0x3fb   : > { %v8044_v7 = vpop.permute.xlu1 %1192 }
 0x400   : > { %v8046_v60 = vpop.permute.xlu1 %1216 }
 0x401   : > { %12973 = vst [vmem:[#allocation76_spill] sm:$0xff] %v8046_v60  ;;  %v1248_v60 = vmul.f32 %v1241_v61, %v7656_v39 }
 0x405   : > { %v1237_v29 = vpop.permute.xlu1 %1236 }
 0x406   : > { %v1243_v49 = vmul.f32 %v1237_v29, %v7646_v34  ;;  %v1245_v13 = vmul.f32 %v1237_v29, %v7656_v39  ;;  %v1244_v14 = vmul.f32 %v1237_v29, %v7642_v33 }
 0x408   : > { %1259 = vrot.lane.b32.xlu0 %v1245_v13, %s7315_s17  ;;  %1255 = vrot.lane.b32.xlu1 %v1243_v49, %s7315_s17  ;;  %v12517_v13 = vmov 30  }
 0x40c   : > { %1263 = vrot.lane.b32.xlu0 %v1247_v44, %s7315_s17  ;;  %1257 = vrot.lane.b32.xlu1 %v1244_v14, %s7315_s17 }
 0x410   : > { %1281 = vperm.xlu0 %6885, %v7542_v2   ;;  %1261 = vrot.lane.b32.xlu1 %v1246_v57, %s7315_s17 }
 0x414   : > { %1265 = vrot.lane.b32.xlu1 %v1248_v60, %s7315_s17  ;;  %6888 = vset.pattern.permute.xlu0 %v12517_v13 }
 0x418   : > { %1285 = vperm.xlu1 %6886, %v7547_v4  }
 0x41c   : > { %6887 = vset.pattern.permute.xlu1 %v12517_v13 }
 0x47a   : > { %v8066_v33 = vpop.permute.xlu1 %1255  ;;  %v8068_v49 = vpop.permute.xlu0 %1259 }
 0x47b   : > { %12975 = vst [vmem:[#allocation78_spill] sm:$0xff] %v8066_v33  ;;  %12976 = vst [vmem:[#allocation79_spill] sm:$0xff] %v8068_v49 }
 0x47e   : > { %v8070_v34 = vpop.permute.xlu1 %1257  ;;  %v8072_v14 = vpop.permute.xlu0 %1263 }
 0x47f   : > { %12977 = vst [vmem:[#allocation80_spill] sm:$0xff] %v8070_v34  ;;  %12978 = vst [vmem:[#allocation81_spill] sm:$0xff] %v8072_v14 }
 0x482   : > { %v8074_v57 = vpop.permute.xlu1 %1261 }
 0x483   : > { %12979 = vst [vmem:[#allocation82_spill] sm:$0xff] %v8074_v57 }
 0x486   : > { %v8080_v29 = vpop.permute.xlu1 %1265 }
 0x487   : > { %12980 = vst [vmem:[#allocation83_spill] sm:$0xff] %v8080_v29 }
 0x48f   : > { %v1282_v39 = vpop.permute.xlu0 %1281 }
 0x490   : > { %v1288_v61 = vmul.f32 %v1282_v39, %v7671_v46  ;;  %v1289_v60 = vmul.f32 %v1282_v39, %v7683_v52  ;;  %v1290_v44 = vmul.f32 %v1282_v39, %v7678_v50  ;;  %v12520_v39 = vmov 31  }
 0x492   : > { %1302 = vrot.lane.b32.xlu0 %v1289_v60, %s7315_s17  ;;  %1300 = vrot.lane.b32.xlu1 %v1288_v61, %s7315_s17 }
 0x496   : > { %1304 = vrot.lane.b32.xlu1 %v1290_v44, %s7315_s17 }
 0x497   : > { %v1286_v13 = vpop.permute.xlu1 %1285 }
 0x498   : > { %v1291_v14 = vmul.f32 %v1286_v13, %v7671_v46  ;;  %v1292_v57 = vmul.f32 %v1286_v13, %v7683_v52  ;;  %v1293_v49 = vmul.f32 %v1286_v13, %v7678_v50 }
 0x49a   : > { %1308 = vrot.lane.b32.xlu1 %v1292_v57, %s7315_s17  ;;  %1306 = vrot.lane.b32.xlu0 %v1291_v14, %s7315_s17 }
 0x49e   : > { %1325 = vperm.xlu1 %6887, %v7542_v2   ;;  %1310 = vrot.lane.b32.xlu0 %v1293_v49, %s7315_s17 }
 0x4a2   : > { %1329 = vperm.xlu0 %6888, %v7547_v4   ;;  %6890 = vset.pattern.permute.xlu1 %v12520_v39 }
 0x4a6   : > { %6889 = vset.pattern.permute.xlu0 %v12520_v39 }
 0x504   : > { %v8094_v46 = vpop.permute.xlu1 %1300  ;;  %v8096_v52 = vpop.permute.xlu0 %1302 }
 0x505   : > { %12981 = vst [vmem:[#allocation84_spill] sm:$0xff] %v8094_v46  ;;  %12982 = vst [vmem:[#allocation85_spill] sm:$0xff] %v8096_v52 }
 0x508   : > { %v8098_v57 = vpop.permute.xlu1 %1304 }
 0x509   : > { %12983 = vst [vmem:[#allocation86_spill] sm:$0xff] %v8098_v57 }
 0x50c   : > { %v8100_v14 = vpop.permute.xlu0 %1306  ;;  %v8102_v50 = vpop.permute.xlu1 %1308 }
 0x50d   : > { %12984 = vst [vmem:[#allocation87_spill] sm:$0xff] %v8100_v14  ;;  %12985 = vst [vmem:[#allocation88_spill] sm:$0xff] %v8102_v50 }
 0x510   : > { %v8104_v13 = vpop.permute.xlu0 %1310 }
 0x511   : > { %12986 = vst [vmem:[#allocation89_spill] sm:$0xff] %v8104_v13 }
 0x51d   : > { %v1326_v49 = vpop.permute.xlu1 %1325 }
 0x51e   : > { %v1332_v61 = vmul.f32 %v1326_v49, %v7705_v63  ;;  %v1334_v60 = vmul.f32 %v1326_v49, %v7713_v19  ;;  %v1333_v39 = vmul.f32 %v1326_v49, %v7697_v59 }
 0x520   : > { %1348 = vrot.lane.b32.xlu0 %v1334_v60, %s7315_s17  ;;  %1344 = vrot.lane.b32.xlu1 %v1332_v61, %s7315_s17  ;;  %v12522_v61 = vmov 32  }
 0x521   : > { %v1330_v44 = vpop.permute.xlu0 %1329 }
 0x522   : > { %v1336_v57 = vmul.f32 %v1330_v44, %v7697_v59  ;;  %v1335_v13 = vmul.f32 %v1330_v44, %v7705_v63  ;;  %v1337_v14 = vmul.f32 %v1330_v44, %v7713_v19 }
 0x524   : > { %1352 = vrot.lane.b32.xlu0 %v1336_v57, %s7315_s17  ;;  %1346 = vrot.lane.b32.xlu1 %v1333_v39, %s7315_s17 }
 0x528   : > { %1369 = vperm.xlu0 %6889, %v7542_v2   ;;  %1350 = vrot.lane.b32.xlu1 %v1335_v13, %s7315_s17 }
 0x52c   : > { %1354 = vrot.lane.b32.xlu1 %v1337_v14, %s7315_s17  ;;  %6891 = vset.pattern.permute.xlu0 %v12522_v61 }
 0x530   : > { %1373 = vperm.xlu1 %6890, %v7547_v4  }
 0x534   : > { %6892 = vset.pattern.permute.xlu1 %v12522_v61 }
 0x592   : > { %v8122_v59 = vpop.permute.xlu1 %1344  ;;  %v8124_v39 = vpop.permute.xlu0 %1348 }
 0x593   : > { %12987 = vst [vmem:[#allocation90_spill] sm:$0xff] %v8122_v59  ;;  %12988 = vst [vmem:[#allocation91_spill] sm:$0xff] %v8124_v39 }
 0x596   : > { %v8126_v63 = vpop.permute.xlu1 %1346  ;;  %v8128_v57 = vpop.permute.xlu0 %1352 }
 0x597   : > { %12989 = vst [vmem:[#allocation92_spill] sm:$0xff] %v8126_v63  ;;  %12990 = vst [vmem:[#allocation93_spill] sm:$0xff] %v8128_v57 }
 0x59a   : > { %v8130_v13 = vpop.permute.xlu1 %1350 }
 0x59b   : > { %12991 = vst [vmem:[#allocation94_spill] sm:$0xff] %v8130_v13 }
 0x59e   : > { %v8136_v60 = vpop.permute.xlu1 %1354 }
 0x59f   : > { %12992 = vst [vmem:[#allocation95_spill] sm:$0xff] %v8136_v60 }
 0x5a7   : > { %v1370_v19 = vpop.permute.xlu0 %1369 }
 0x5a8   : > { %v1376_v14 = vmul.f32 %v1370_v19, %v7737_v48  ;;  %v1377_v49 = vmul.f32 %v1370_v19, %v7732_v47  ;;  %v1378_v44 = vmul.f32 %v1370_v19, %v7724_v41 }
 0x5aa   : > { %1390 = vrot.lane.b32.xlu0 %v1377_v49, %s7315_s17  ;;  %1388 = vrot.lane.b32.xlu1 %v1376_v14, %s7315_s17  ;;  %v12995_v49 = vmov 0 }
 0x5ae   : > { %1392 = vrot.lane.b32.xlu1 %v1378_v44, %s7315_s17  ;;  %v12998_v44 = vmov 0 }
 0x5af   : > { %v1374_v61 = vpop.permute.xlu1 %1373 }
 0x5b0   : > { %v1379_v57 = vmul.f32 %v1374_v61, %v7737_v48  ;;  %v1380_v13 = vmul.f32 %v1374_v61, %v7732_v47  ;;  %v1381_v39 = vmul.f32 %v1374_v61, %v7724_v41  ;;  %v12528_v47 = vmov 33   ;;  %v271_v48 = vld [vmem:[%s12409_s4 + $0x8] sm:$0xff] }
 0x5b1   : > { %v12525_v41 = vmov 34   ;;  %v12993_v61 = vmov 0  }
 0x5b2   : > { %1396 = vrot.lane.b32.xlu1 %v1380_v13, %s7315_s17  ;;  %1394 = vrot.lane.b32.xlu0 %v1379_v57, %s7315_s17 }
 0x5b6   : > { %1412 = vrot.lane.b32.xlu1 %v7602_v20, %s7319_s23  ;;  %1398 = vrot.lane.b32.xlu0 %v1381_v39, %s7315_s17  ;;  %v270_v39 = vld [vmem:[%s12409_s4] sm:$0xff] }
 0x5ba   : > { %1416 = vrot.lane.b32.xlu1 %v7612_v23, %s7319_s23  ;;  %1414 = vrot.lane.b32.xlu0 %v7609_v22, %s7319_s23  ;;  %v12526_v23 = vmov 35  }
 0x5be   : > { %1430 = vperm.xlu1 %6892, %v7547_v4   ;;  %1426 = vperm.xlu0 %6891, %v7542_v2  }
 0x5c2   : > { %6893 = vset.pattern.permute.xlu1 %v12528_v47  ;;  %6894 = vset.pattern.permute.xlu0 %v12528_v47 }
 0x5c3   : > { %1450 = vperm.xlu1 %6893, %v7542_v2   ;;  %1454 = vperm.xlu0 %6894, %v7547_v4  }
 0x5c7   : > { %6895 = vset.pattern.permute.xlu1 %v12525_v41  ;;  %6896 = vset.pattern.permute.xlu0 %v12526_v23 }
 0x5c8   : > { %1474 = vperm.xlu1 %6895, %v7542_v2   ;;  %1498 = vperm.xlu0 %6896, %v7542_v2   ;;  %v12994_v2 = vlaneseq }
 0x5ca   : > { %v240_v57 = vand.u32 127, %v12994_v2 }
 0x5cc   : > { %1478 = vperm.xlu1 %6895, %v7547_v4   ;;  %6899 = vset.pattern.permute.xlu0 %v12993_v61  ;;  %v241_v13 = vadd.s32 128, %v240_v57  ;;  %v246_v19 = vand.u32 15, %v240_v57  ;;  %v13001_v57 = vmov 0 }
 0x5cd   : > { %1528 = vperm.xlu0 %6899, %v271_v48  }
 0x5ce   : > { %v253_v14 = vand.u32 15, %v241_v13  ;;  %vm8174_vm1 = vcmp.ge.s32.totalorder %v246_v19, 1  ;;  %vm8190_vm3 = vcmp.le.s32.totalorder %v246_v19, 14 }
 0x5cf   : > { %v12996_v49 = vsel %vm8174_vm1, 4294967295, %v12995_v49  ;;  %v13002_v57 = vsel %vm8190_vm3, 4294967295, %v13001_v57 }
 0x5d0   : > { %6897 = vset.pattern.permute.xlu1 %v12526_v23  ;;  %12997 = vst [vmem:[#allocation96_spill] sm:$0xff] %v12996_v49  ;;  %vm8178_vm2 = vcmp.ge.s32.totalorder %v253_v14, 1  ;;  %13003 = vst [vmem:[#allocation98_spill] sm:$0xff] %v13002_v57  ;;  %vm8219_vm6 = vcmp.le.s32.totalorder %v253_v14, 14  ;;  %v7329_v49 = vmov 44  }
 0x5d1   : > { %1502 = vperm.xlu1 %6897, %v7547_v4   ;;  %v12999_v44 = vsel %vm8178_vm2, 4294967295, %v12998_v44  ;;  %v289_v4 = vsel %vm8174_vm1, %v7602_v20, 0.0  ;;  %v290_v48 = vsel %vm8178_vm2, %v7609_v22, 0.0 }
 0x5d2   : > { %13000 = vst [vmem:[#allocation97_spill] sm:$0xff] %v12999_v44  ;;  %v334_v2 = vrot.slane %v290_v48, %v7663_v42  ;;  %v306_v13 = vrot.slane %v289_v4, %v7634_v30  ;;  %v310_v41 = vrot.slane %v290_v48, %v7634_v30  ;;  %v354_v20 = vrot.slane %v289_v4, %v7688_v55 }
 0x5d3   : > { %v358_v22 = vrot.slane %v290_v48, %v7688_v55  ;;  %v382_v19 = vrot.slane %v290_v48, %v7717_v21 }
 0x5d4   : > { %v336_v47 = vmul.f32 %v334_v2, %v7626_v27  ;;  %v311_v60 = vmul.f32 %v306_v13, %v7622_v24  ;;  %v312_v59 = vmul.f32 %v310_v41, %v7622_v24  ;;  %v338_v50 = vmul.f32 %v334_v2, %v7628_v28 }
 0x5d5   : > { %6898 = vset.pattern.permute.xlu1 %v12993_v61  ;;  %v378_v61 = vrot.slane %v289_v4, %v7717_v21  ;;  %v313_v46 = vmul.f32 %v306_v13, %v7624_v25  ;;  %v314_v52 = vmul.f32 %v310_v41, %v7624_v25  ;;  %v360_v29 = vmul.f32 %v358_v22, %v7638_v32 }
 0x5d6   : > { %1523 = vperm.xlu1 %6898, %v270_v39   ;;  %v330_v39 = vrot.slane %v289_v4, %v7663_v42  ;;  %v361_v4 = vmul.f32 %v354_v20, %v7636_v31  ;;  %v362_v48 = vmul.f32 %v358_v22, %v7636_v31  ;;  %v340_v34 = vadd.f32 %v336_v47, %v312_v59  ;;  %v13007_v22 = vld [vmem:[#allocation23_spill] sm:$0xff] }
 0x5d7   : > { %v383_v24 = vmul.f32 %v378_v61, %v7648_v36  ;;  %v342_v41 = vadd.f32 %v338_v50, %v314_v52  ;;  %v385_v2 = vmul.f32 %v378_v61, %v7658_v40  ;;  %v13004_v31 = vmov 0 }
 0x5d8   : > { %v335_v23 = vmul.f32 %v330_v39, %v7626_v27  ;;  %v337_v63 = vmul.f32 %v330_v39, %v7628_v28  ;;  %v359_v27 = vmul.f32 %v354_v20, %v7638_v32  ;;  %v384_v39 = vmul.f32 %v382_v19, %v7648_v36 }
 0x5d9   : > { %v629_v28 = vsel %vm628_vm4, %v7838_v0, %v7778_v45  ;;  %v386_v32 = vmul.f32 %v382_v19, %v7658_v40  ;;  %v13005_v31 = vsel %vm8219_vm6, 4294967295, %v13004_v31  ;;  %v366_v47 = vadd.f32 %v362_v48, %v342_v41 }
 0x5da   : > { %v339_v33 = vadd.f32 %v335_v23, %v311_v60  ;;  %v341_v25 = vadd.f32 %v337_v63, %v313_v46  ;;  %v364_v23 = vadd.f32 %v360_v29, %v340_v34  ;;  %13006 = vst [vmem:[#allocation99_spill] sm:$0xff] %v13005_v31  ;;  %v8225_v36 = vsel %vm8190_vm3, %v629_v28, 0.0 }
 0x5db   : > { %v630_v0 = vsel %vm628_vm4, %v7778_v45, %v7840_v26  ;;  %v436_v40 = vsel %vm435_vm5, %v7782_v51, %v7844_v11  ;;  %v438_v34 = vsel %vm435_vm5, %v7846_v12, %v7786_v54  ;;  %v437_v29 = vsel %vm435_vm5, %v7844_v11, %v7784_v53 }
 0x5dc   : > { %v363_v60 = vadd.f32 %v359_v27, %v339_v33  ;;  %v365_v59 = vadd.f32 %v361_v4, %v341_v25  ;;  %v388_v33 = vadd.f32 %v384_v39, %v364_v23  ;;  %v390_v50 = vadd.f32 %v386_v32, %v366_v47  ;;  %v13008_v4 = vld [vmem:[#allocation32_spill] sm:$0xff] }
 0x5dd   : > { %v439_v45 = vsel %vm435_vm5, %v7786_v54, %v7848_v43  ;;  %v646_v26 = vrot.slane %v8225_v36, %v7634_v30  ;;  %v634_v51 = vsel %vm8219_vm6, %v630_v0, 0.0  ;;  %v492_v12 = vsel %vm435_vm5, %v7788_v58, %v7790_v56 }
 0x5de   : > { %v387_v46 = vadd.f32 %v383_v24, %v363_v60  ;;  %v389_v52 = vadd.f32 %v385_v2, %v365_v59  ;;  %v494_v11 = vsel %vm435_vm5, %v7792_v16, %v7852_v37  ;;  %v493_v43 = vsel %vm435_vm5, %v7790_v56, %v7850_v38  ;;  %v13010_v2 = vld [vmem:[#allocation13_spill] sm:$0xff]  ;;  %v13011_v60 = vld [vmem:[#allocation27_spill] sm:$0xff] }
 0x5df   : > { %v495_v54 = vsel %vm435_vm5, %v7852_v37, %v7794_v15  ;;  %v445_v61 = vadd.f32 %v437_v29, %v388_v33  ;;  %v447_v14 = vadd.f32 %v439_v45, %v390_v50  ;;  %v548_v58 = vsel %vm435_vm5, %v7796_v35, %v7854_v9 }
 0x5e0   : > { %v444_v53 = vadd.f32 %v436_v40, %v387_v46  ;;  %v446_v63 = vadd.f32 %v438_v34, %v389_v52  ;;  %v550_v16 = vsel %vm435_vm5, %v7856_v1, %v7800_v17  ;;  %v549_v56 = vsel %vm435_vm5, %v7854_v9, %v7798_v62  ;;  %v13009_v9 = vld [vmem:[#allocation24_spill] sm:$0xff]  ;;  %v13012_v34 = vld [vmem:[#allocation14_spill] sm:$0xff]  ;;  %v13013_v52 = vld [vmem:[#allocation15_spill] sm:$0xff] }
 0x5e1   : > { %v551_v15 = vsel %vm435_vm5, %v7800_v17, %v7858_v6  ;;  %v501_v37 = vadd.f32 %v493_v43, %v445_v61  ;;  %v503_v38 = vadd.f32 %v495_v54, %v447_v14  ;;  %v604_v35 = vsel %vm435_vm5, %v7802_v18, %v7804_v10  ;;  %v13016_v61 = vld [vmem:[#allocation31_spill] sm:$0xff] }
 0x5e2   : > { %v500_v13 = vadd.f32 %v492_v12, %v444_v53  ;;  %v502_v20 = vadd.f32 %v494_v11, %v446_v63  ;;  %v606_v1 = vsel %vm435_vm5, %v13007_v22, %v7862_v3  ;;  %v605_v62 = vsel %vm435_vm5, %v7804_v10, %v13008_v4  ;;  %v13014_v11 = vld [vmem:[#allocation22_spill] sm:$0xff]  ;;  %v13015_v53 = vld [vmem:[#allocation21_spill] sm:$0xff] }
 0x5e3   : > { %v607_v17 = vsel %vm435_vm5, %v7862_v3, %v13009_v9  ;;  %v650_v6 = vrot.slane %v634_v51, %v7634_v30  ;;  %v557_v48 = vadd.f32 %v549_v56, %v501_v37  ;;  %v559_v24 = vadd.f32 %v551_v15, %v503_v38  ;;  %v13018_v56 = vld [vmem:[#allocation16_spill] sm:$0xff] }
 0x5e4   : > { %v556_v19 = vadd.f32 %v548_v58, %v500_v13  ;;  %v558_v27 = vadd.f32 %v550_v16, %v502_v20  ;;  %v670_v41 = vrot.slane %v8225_v36, %v7663_v42  ;;  %v651_v32 = vmul.f32 %v646_v26, %v13010_v2  ;;  %v13017_v13 = vld [vmem:[#allocation28_spill] sm:$0xff] }
 0x5e5   : > { %v613_v28 = vadd.f32 %v605_v62, %v557_v48  ;;  %v615_v25 = vadd.f32 %v607_v17, %v559_v24  ;;  %v653_v23 = vmul.f32 %v646_v26, %v13011_v60  ;;  %v674_v10 = vrot.slane %v634_v51, %v7663_v42  ;;  %v13019_v17 = vld [vmem:[#allocation17_spill] sm:$0xff] }
 0x5e6   : > { %v612_v39 = vadd.f32 %v604_v35, %v556_v19  ;;  %v614_v18 = vadd.f32 %v606_v1, %v558_v27  ;;  %v652_v59 = vmul.f32 %v650_v6, %v13010_v2  ;;  %v654_v3 = vmul.f32 %v650_v6, %v13011_v60  ;;  %v13020_v48 = vld [vmem:[#allocation29_spill] sm:$0xff] }
 0x5e7   : > { %v694_v33 = vrot.slane %v8225_v36, %v7688_v55  ;;  %v675_v29 = vmul.f32 %v670_v41, %v13012_v34  ;;  %v677_v50 = vmul.f32 %v670_v41, %v13013_v52  ;;  %v676_v45 = vmul.f32 %v674_v10, %v13012_v34 }
 0x5e8   : > { %v655_v47 = vadd.f32 %v651_v32, %v612_v39  ;;  %v657_v0 = vadd.f32 %v653_v23, %v614_v18  ;;  %v656_v46 = vadd.f32 %v652_v59, %v613_v28  ;;  %v658_v40 = vadd.f32 %v654_v3, %v615_v25  ;;  %v13021_v32 = vld [vmem:[#allocation18_spill] sm:$0xff] }
 0x5e9   : > { %v698_v26 = vrot.slane %v634_v51, %v7688_v55  ;;  %v678_v12 = vmul.f32 %v674_v10, %v13013_v52  ;;  %v738_v63 = vsel %vm737_vm7, %v13015_v53, %v13014_v11  ;;  %v739_v14 = vsel %vm737_vm7, %v13014_v11, %v13016_v61  ;;  %v13022_v23 = vld [vmem:[#allocation30_spill] sm:$0xff]  ;;  %v13025_v11 = vld [vmem:[#allocation25_spill] sm:$0xff] }
 0x5ea   : > { %v679_v43 = vadd.f32 %v675_v29, %v655_v47  ;;  %v681_v54 = vadd.f32 %v677_v50, %v657_v0  ;;  %v680_v58 = vadd.f32 %v676_v45, %v656_v46  ;;  %v699_v20 = vmul.f32 %v694_v33, %v13017_v13  ;;  %v13023_v50 = vld [vmem:[#allocation19_spill] sm:$0xff] }
 0x5eb   : > { %v682_v16 = vadd.f32 %v678_v12, %v658_v40  ;;  %v701_v15 = vmul.f32 %v694_v33, %v13018_v56  ;;  %v718_v37 = vrot.slane %v8225_v36, %v7717_v21  ;;  %v700_v38 = vmul.f32 %v698_v26, %v13017_v13 }
 0x5ec   : > { %v702_v35 = vmul.f32 %v698_v26, %v13018_v56  ;;  %v722_v22 = vrot.slane %v634_v51, %v7717_v21  ;;  %v742_v1 = vsel %vm8174_vm1, %v738_v63, 0.0  ;;  %v743_v19 = vsel %vm8178_vm2, %v739_v14, 0.0  ;;  %v13024_v26 = vld [vmem:[#allocation20_spill] sm:$0xff]  ;;  %v13026_v14 = vld [vmem:[#allocation33_spill] sm:$0xff] }
 0x5ed   : > { %v703_v27 = vadd.f32 %v699_v20, %v679_v43  ;;  %v705_v4 = vadd.f32 %v701_v15, %v681_v54  ;;  %v704_v62 = vadd.f32 %v700_v38, %v680_v58  ;;  %v723_v6 = vmul.f32 %v718_v37, %v13019_v17 }
 0x5ee   : > { %v706_v9 = vadd.f32 %v702_v35, %v682_v16  ;;  %v725_v36 = vmul.f32 %v718_v37, %v13020_v48  ;;  %v755_v24 = vrot.slane %v742_v1, %v7634_v30  ;;  %v724_v39 = vmul.f32 %v722_v22, %v13019_v17  ;;  %v13027_v35 = vld [vmem:[#allocation26_spill] sm:$0xff] }
 0x5ef   : > { %v726_v51 = vmul.f32 %v722_v22, %v13020_v48  ;;  %v759_v18 = vrot.slane %v743_v19, %v7634_v30  ;;  %v727_v25 = vadd.f32 %v723_v6, %v703_v27  ;;  %v779_v59 = vrot.slane %v742_v1, %v7663_v42  ;;  %v13029_v48 = vld [vmem:[#allocation36_spill] sm:$0xff] }
 0x5f0   : > { %v729_v28 = vadd.f32 %v725_v36, %v705_v4  ;;  %v728_v2 = vadd.f32 %v724_v39, %v704_v62  ;;  %v760_v60 = vmul.f32 %v755_v24, %v13021_v32  ;;  %v762_v10 = vmul.f32 %v755_v24, %v13022_v23  ;;  %v13030_v36 = vld [vmem:[#allocation35_spill] sm:$0xff]  ;;  %v13031_v39 = vld [vmem:[#allocation37_spill] sm:$0xff] }
 0x5f1   : > { %v730_v41 = vadd.f32 %v726_v51, %v706_v9  ;;  %v761_v3 = vmul.f32 %v759_v18, %v13021_v32  ;;  %v763_v47 = vmul.f32 %v759_v18, %v13022_v23  ;;  %v783_v0 = vrot.slane %v743_v19, %v7663_v42  ;;  %v13028_v9 = vld [vmem:[#allocation34_spill] sm:$0xff] }
 0x5f2   : > { %v764_v46 = vadd.f32 %v760_v60, %v727_v25  ;;  %v803_v40 = vrot.slane %v742_v1, %v7688_v55  ;;  %v766_v33 = vadd.f32 %v762_v10, %v729_v28  ;;  %v807_v29 = vrot.slane %v743_v19, %v7688_v55  ;;  %v13032_v28 = vld [vmem:[#allocation39_spill] sm:$0xff]  ;;  %v13033_v25 = vld [vmem:[#allocation38_spill] sm:$0xff]  ;;  %v13034_v60 = vld [vmem:[#allocation40_spill] sm:$0xff] }
 0x5f3   : > { %v765_v34 = vadd.f32 %v761_v3, %v728_v2  ;;  %v767_v52 = vadd.f32 %v763_v47, %v730_v41  ;;  %v784_v45 = vmul.f32 %v779_v59, %v13023_v50  ;;  %v786_v12 = vmul.f32 %v779_v59, %v13024_v26  ;;  %v13035_v10 = vld [vmem:[#allocation42_spill] sm:$0xff]  ;;  %v13036_v59 = vld [vmem:[#allocation41_spill] sm:$0xff] }
 0x5f4   : > { %v810_v53 = vmul.f32 %v803_v40, %v13025_v11  ;;  %v785_v63 = vmul.f32 %v783_v0, %v13023_v50  ;;  %v787_v43 = vmul.f32 %v783_v0, %v13024_v26  ;;  %v811_v54 = vmul.f32 %v807_v29, %v13025_v11  ;;  %v13037_v0 = vld [vmem:[#allocation43_spill] sm:$0xff] }
 0x5f5   : > { %v788_v61 = vadd.f32 %v784_v45, %v764_v46  ;;  %v808_v58 = vmul.f32 %v803_v40, %v13026_v14  ;;  %v827_v16 = vrot.slane %v742_v1, %v7717_v21  ;;  %v790_v13 = vadd.f32 %v786_v12, %v766_v33  ;;  %v13038_v40 = vld [vmem:[#allocation45_spill] sm:$0xff]  ;;  %v13039_v33 = vld [vmem:[#allocation44_spill] sm:$0xff]  ;;  %v13042_v12 = vld [vmem:[#allocation46_spill] sm:$0xff] }
 0x5f6   : > { %v789_v20 = vadd.f32 %v785_v63, %v765_v34  ;;  %v809_v56 = vmul.f32 %v807_v29, %v13026_v14  ;;  %v831_v15 = vrot.slane %v743_v19, %v7717_v21  ;;  %v791_v37 = vadd.f32 %v787_v43, %v767_v52  ;;  %v13040_v29 = vld [vmem:[#allocation64_spill] sm:$0xff]  ;;  %v13044_v14 = vld [vmem:[#allocation49_spill] sm:$0xff] }
 0x5f7   : > { %v814_v38 = vadd.f32 %v810_v53, %v790_v13  ;;  %v832_v22 = vmul.f32 %v827_v16, %v13027_v35  ;;  %v812_v62 = vadd.f32 %v808_v58, %v788_v61  ;;  %v834_v17 = vmul.f32 %v827_v16, %v13028_v9  ;;  %v13041_v52 = vld [vmem:[#allocation56_spill] sm:$0xff]  ;;  %v13043_v53 = vld [vmem:[#allocation57_spill] sm:$0xff]  ;;  %v13045_v58 = vld [vmem:[#allocation47_spill] sm:$0xff] }
 0x5f8   : > { %v815_v27 = vadd.f32 %v811_v54, %v791_v37  ;;  %v833_v4 = vmul.f32 %v831_v15, %v13027_v35  ;;  %v813_v6 = vadd.f32 %v809_v56, %v789_v20  ;;  %v835_v1 = vmul.f32 %v831_v15, %v13028_v9  ;;  %v13046_v13 = vld [vmem:[#allocation48_spill] sm:$0xff]  ;;  %v13047_v37 = vld [vmem:[#allocation50_spill] sm:$0xff] }
 0x5f9   : > { %v873_v24 = vsel %vm872_vm8, %v13030_v36, %v13029_v48  ;;  %v836_v19 = vadd.f32 %v832_v22, %v812_v62  ;;  %v874_v51 = vsel %vm872_vm8, %v13029_v48, %v13031_v39  ;;  %v838_v18 = vadd.f32 %v834_v17, %v814_v38  ;;  %v13048_v38 = vld [vmem:[#allocation51_spill] sm:$0xff]  ;;  %v13050_v9 = vld [vmem:[#allocation58_spill] sm:$0xff]  ;;  %v13051_v17 = vld [vmem:[#allocation53_spill] sm:$0xff] }
 0x5fa   : > { %v875_v41 = vsel %vm872_vm8, %v13033_v25, %v13032_v28  ;;  %v837_v2 = vadd.f32 %v833_v4, %v813_v6  ;;  %v839_v32 = vadd.f32 %v835_v1, %v815_v27  ;;  %v876_v23 = vsel %vm872_vm8, %v13032_v28, %v13034_v60  ;;  %v13049_v4 = vld [vmem:[#allocation52_spill] sm:$0xff]  ;;  %v13053_v39 = vld [vmem:[#allocation55_spill] sm:$0xff]  ;;  %v13055_v25 = vld [vmem:[#allocation62_spill] sm:$0xff] }
 0x5fb   : > { %v917_v3 = vsel %vm872_vm8, %v13036_v59, %v13035_v10  ;;  %v881_v47 = vadd.f32 %v873_v24, %v836_v19  ;;  %v918_v46 = vsel %vm872_vm8, %v13035_v10, %v13037_v0  ;;  %v919_v34 = vsel %vm872_vm8, %v13039_v33, %v13038_v40  ;;  %v13052_v24 = vld [vmem:[#allocation54_spill] sm:$0xff] }
 0x5fc   : > { %v1024_v50 = vsel %vm1023_vm9, %v13041_v52, %v13040_v29  ;;  %v882_v45 = vadd.f32 %v874_v51, %v837_v2  ;;  %v883_v26 = vadd.f32 %v875_v41, %v838_v18  ;;  %v920_v11 = vsel %vm872_vm8, %v13038_v40, %v13042_v12  ;;  %v13054_v51 = vld [vmem:[#allocation60_spill] sm:$0xff]  ;;  %v13058_v52 = vld [vmem:[#allocation69_spill] sm:$0xff] }
 0x5fd   : > { %v1025_v63 = vsel %vm1023_vm9, %v13040_v29, %v13043_v53  ;;  %v884_v54 = vadd.f32 %v876_v23, %v839_v32  ;;  %v925_v61 = vadd.f32 %v917_v3, %v881_v47  ;;  %v961_v16 = vsel %vm872_vm8, %v13045_v58, %v13044_v14  ;;  %v13056_v47 = vld [vmem:[#allocation66_spill] sm:$0xff]  ;;  %v13057_v29 = vld [vmem:[#allocation73_spill] sm:$0xff] }
 0x5fe   : > { %v962_v20 = vsel %vm872_vm8, %v13044_v14, %v13046_v13  ;;  %v926_v56 = vadd.f32 %v918_v46, %v882_v45  ;;  %v927_v15 = vadd.f32 %v919_v34, %v883_v26  ;;  %v963_v35 = vsel %vm872_vm8, %v13048_v38, %v13047_v37  ;;  %v13059_v45 = vld [vmem:[#allocation59_spill] sm:$0xff] }
 0x5ff   : > { %v1028_v22 = vsel %vm8190_vm3, %v1024_v50, 0.0  ;;  %v928_v27 = vadd.f32 %v920_v11, %v884_v54  ;;  %v964_v62 = vsel %vm872_vm8, %v13047_v37, %v13049_v4  ;;  %v1005_v6 = vsel %vm872_vm8, %v13051_v17, %v13050_v9  ;;  %v13060_v11 = vld [vmem:[#allocation61_spill] sm:$0xff] }
 0x600   : > { %v1029_v1 = vsel %vm8219_vm6, %v1025_v63, 0.0  ;;  %v969_v48 = vadd.f32 %v961_v16, %v925_v61  ;;  %v970_v36 = vadd.f32 %v962_v20, %v926_v56  ;;  %v1006_v19 = vsel %vm872_vm8, %v13050_v9, %v13052_v24  ;;  %v13061_v63 = vld [vmem:[#allocation70_spill] sm:$0xff]  ;;  %v13062_v20 = vld [vmem:[#allocation68_spill] sm:$0xff] }
 0x601   : > { %v1007_v18 = vsel %vm872_vm8, %v13054_v51, %v13053_v39  ;;  %v971_v28 = vadd.f32 %v963_v35, %v927_v15  ;;  %v1008_v41 = vsel %vm872_vm8, %v13053_v39, %v13055_v25  ;;  %v1041_v2 = vrot.slane %v1028_v22, %v7634_v30  ;;  %v13063_v35 = vld [vmem:[#allocation63_spill] sm:$0xff] }
 0x602   : > { %v972_v32 = vadd.f32 %v964_v62, %v928_v27  ;;  %v1013_v60 = vadd.f32 %v1005_v6, %v969_v48  ;;  %v1045_v23 = vrot.slane %v1029_v1, %v7634_v30  ;;  %v1014_v59 = vadd.f32 %v1006_v19, %v970_v36  ;;  %v13064_v19 = vld [vmem:[#allocation65_spill] sm:$0xff] }
 0x603   : > { %v1015_v3 = vadd.f32 %v1007_v18, %v971_v28  ;;  %v1046_v0 = vmul.f32 %v1041_v2, %v13056_v47  ;;  %v1065_v46 = vrot.slane %v1028_v22, %v7663_v42  ;;  %v1069_v34 = vrot.slane %v1029_v1, %v7663_v42 }
 0x604   : > { %v1016_v40 = vadd.f32 %v1008_v41, %v972_v32  ;;  %v1047_v33 = vmul.f32 %v1045_v23, %v13056_v47  ;;  %v1133_v50 = vsel %vm1132_vm10, %v13058_v52, %v13057_v29  ;;  %v1048_v26 = vmul.f32 %v1041_v2, %v13059_v45 }
 0x605   : > { %v1049_v12 = vmul.f32 %v1045_v23, %v13059_v45  ;;  %v1070_v53 = vmul.f32 %v1065_v46, %v13060_v11  ;;  %v1134_v54 = vsel %vm1132_vm10, %v13057_v29, %v13061_v63  ;;  %v1071_v61 = vmul.f32 %v1069_v34, %v13060_v11 }
 0x606   : > { %v1113_v14 = vrot.slane %v1028_v22, %v7717_v21  ;;  %v1089_v58 = vrot.slane %v1028_v22, %v7688_v55  ;;  %v1093_v16 = vrot.slane %v1029_v1, %v7688_v55  ;;  %v1050_v13 = vadd.f32 %v1046_v0, %v1013_v60  ;;  %v13065_v60 = vld [vmem:[#allocation67_spill] sm:$0xff] }
 0x607   : > { %v1072_v56 = vmul.f32 %v1065_v46, %v13062_v20  ;;  %v1073_v15 = vmul.f32 %v1069_v34, %v13062_v20  ;;  %v1137_v37 = vsel %vm8174_vm1, %v1133_v50, 0.0  ;;  %v1051_v38 = vadd.f32 %v1047_v33, %v1014_v59  ;;  %v13067_v34 = vld [vmem:[#allocation72_spill] sm:$0xff] }
 0x608   : > { %v1094_v27 = vmul.f32 %v1089_v58, %v13063_v35  ;;  %v1095_v4 = vmul.f32 %v1093_v16, %v13063_v35  ;;  %v1138_v62 = vsel %vm8178_vm2, %v1134_v54, 0.0  ;;  %v1052_v17 = vadd.f32 %v1048_v26, %v1015_v3 }
 0x609   : > { %v1053_v6 = vadd.f32 %v1049_v12, %v1016_v40  ;;  %v1074_v48 = vadd.f32 %v1070_v53, %v1050_v13  ;;  %v1117_v36 = vrot.slane %v1029_v1, %v7717_v21  ;;  %v1075_v24 = vadd.f32 %v1071_v61, %v1051_v38  ;;  %v13066_v1 = vld [vmem:[#allocation71_spill] sm:$0xff]  ;;  %v13068_v38 = vld [vmem:[#allocation74_spill] sm:$0xff] }
 0x60a   : > { %v1096_v39 = vmul.f32 %v1089_v58, %v13064_v19  ;;  %v1097_v51 = vmul.f32 %v1093_v16, %v13064_v19  ;;  %v1150_v18 = vrot.slane %v1137_v37, %v7634_v30  ;;  %v1076_v28 = vadd.f32 %v1072_v56, %v1052_v17 }
 0x60b   : > { %v1077_v25 = vadd.f32 %v1073_v15, %v1053_v6  ;;  %v1154_v41 = vrot.slane %v1138_v62, %v7634_v30  ;;  %v1098_v2 = vadd.f32 %v1094_v27, %v1074_v48  ;;  %v1099_v32 = vadd.f32 %v1095_v4, %v1075_v24  ;;  %v13069_v6 = vld [vmem:[#allocation75_spill] sm:$0xff] }
 0x60c   : > { %v1120_v23 = vmul.f32 %v1113_v14, %v13065_v60  ;;  %v1121_v59 = vmul.f32 %v1117_v36, %v13065_v60  ;;  %v1118_v47 = vmul.f32 %v1113_v14, %v13066_v1  ;;  %v1119_v0 = vmul.f32 %v1117_v36, %v13066_v1 }
 0x60d   : > { %v1100_v46 = vadd.f32 %v1096_v39, %v1076_v28  ;;  %v1101_v40 = vadd.f32 %v1097_v51, %v1077_v25  ;;  %v1155_v33 = vmul.f32 %v1150_v18, %v8038_v8  ;;  %v1157_v29 = vmul.f32 %v1150_v18, %v13067_v34 }
 0x60e   : > { %v1174_v50 = vrot.slane %v1137_v37, %v7663_v42  ;;  %v1156_v45 = vmul.f32 %v1154_v41, %v8038_v8  ;;  %v1158_v26 = vmul.f32 %v1154_v41, %v13067_v34  ;;  %v1178_v12 = vrot.slane %v1138_v62, %v7663_v42  ;;  %v13074_v34 = vld [vmem:[#allocation79_spill] sm:$0xff] }
 0x60f   : > { %v1122_v11 = vadd.f32 %v1118_v47, %v1098_v2  ;;  %v1123_v53 = vadd.f32 %v1119_v0, %v1099_v32  ;;  %v1124_v63 = vadd.f32 %v1120_v23, %v1100_v46  ;;  %v1125_v54 = vadd.f32 %v1121_v59, %v1101_v40  ;;  %v13070_v2 = vld [vmem:[#allocation76_spill] sm:$0xff]  ;;  %v13071_v59 = vld [vmem:[#allocation77_spill] sm:$0xff]  ;;  %v13073_v40 = vld [vmem:[#allocation78_spill] sm:$0xff] }
 0x610   : > { %v1179_v61 = vmul.f32 %v1174_v50, %v8036_v5  ;;  %v1180_v14 = vmul.f32 %v1178_v12, %v8036_v5  ;;  %v1198_v58 = vrot.slane %v1137_v37, %v7688_v55  ;;  %v1202_v16 = vrot.slane %v1138_v62, %v7688_v55  ;;  %v13072_v46 = vld [vmem:[#allocation80_spill] sm:$0xff] }
 0x611   : > { %v1161_v13 = vadd.f32 %v1157_v29, %v1124_v63  ;;  %v1159_v20 = vadd.f32 %v1155_v33, %v1122_v11  ;;  %v1162_v8 = vadd.f32 %v1158_v26, %v1125_v54  ;;  %v1160_v15 = vadd.f32 %v1156_v45, %v1123_v53  ;;  %v13076_v11 = vld [vmem:[#allocation82_spill] sm:$0xff]  ;;  %v13077_v54 = vld [vmem:[#allocation83_spill] sm:$0xff] }
 0x612   : > { %v1203_v35 = vmul.f32 %v1198_v58, %v13068_v38  ;;  %v1204_v27 = vmul.f32 %v1202_v16, %v13068_v38  ;;  %v1222_v4 = vrot.slane %v1137_v37, %v7717_v21  ;;  %v1181_v48 = vmul.f32 %v1174_v50, %v13069_v6 }
 0x613   : > { %v1182_v5 = vmul.f32 %v1178_v12, %v13069_v6  ;;  %v1183_v36 = vadd.f32 %v1179_v61, %v1159_v20  ;;  %v1184_v24 = vadd.f32 %v1180_v14, %v1160_v15  ;;  %v1226_v19 = vrot.slane %v1138_v62, %v7717_v21  ;;  %v13075_v12 = vld [vmem:[#allocation81_spill] sm:$0xff] }
 0x614   : > { %v1205_v39 = vmul.f32 %v1198_v58, %v8044_v7  ;;  %v1206_v51 = vmul.f32 %v1202_v16, %v8044_v7  ;;  %v1185_v25 = vadd.f32 %v1181_v48, %v1161_v13  ;;  %v1229_v32 = vmul.f32 %v1222_v4, %v13070_v2  ;;  %v13078_v14 = vld [vmem:[#allocation85_spill] sm:$0xff]  ;;  %v13079_v58 = vld [vmem:[#allocation84_spill] sm:$0xff]  ;;  %v13080_v13 = vld [vmem:[#allocation86_spill] sm:$0xff] }
 0x615   : > { %v1207_v18 = vadd.f32 %v1203_v35, %v1183_v36  ;;  %v1208_v28 = vadd.f32 %v1204_v27, %v1184_v24  ;;  %v1186_v41 = vadd.f32 %v1182_v5, %v1162_v8  ;;  %v1230_v37 = vmul.f32 %v1226_v19, %v13070_v2  ;;  %v13081_v27 = vld [vmem:[#allocation88_spill] sm:$0xff]  ;;  %v13084_v24 = vld [vmem:[#allocation90_spill] sm:$0xff]  ;;  %v13086_v2 = vld [vmem:[#allocation93_spill] sm:$0xff] }
 0x616   : > { %v1227_v1 = vmul.f32 %v1222_v4, %v13071_v59  ;;  %v1228_v62 = vmul.f32 %v1226_v19, %v13071_v59  ;;  %v1209_v47 = vadd.f32 %v1205_v39, %v1185_v25  ;;  %v1268_v33 = vsel %vm1267_vm11, %v13073_v40, %v13072_v46  ;;  %v13082_v4 = vld [vmem:[#allocation87_spill] sm:$0xff]  ;;  %v13083_v36 = vld [vmem:[#allocation92_spill] sm:$0xff] }
 0x617   : > { %v1210_v0 = vadd.f32 %v1206_v51, %v1186_v41  ;;  %v1269_v29 = vsel %vm1267_vm11, %v13072_v46, %v13074_v34  ;;  %v1270_v53 = vsel %vm1267_vm11, %v13076_v11, %v13075_v12  ;;  %v1271_v61 = vsel %vm1267_vm11, %v13075_v12, %v13077_v54  ;;  %v13085_v39 = vld [vmem:[#allocation91_spill] sm:$0xff] }
 0x618   : > { %v1231_v7 = vadd.f32 %v1227_v1, %v1207_v18  ;;  %v1232_v45 = vadd.f32 %v1228_v62, %v1208_v28  ;;  %v1233_v26 = vadd.f32 %v1229_v32, %v1209_v47  ;;  %v1312_v16 = vsel %vm1267_vm11, %v13079_v58, %v13078_v14  ;;  %v13087_v32 = vld [vmem:[#allocation94_spill] sm:$0xff]  ;;  %v13088_v1 = vld [vmem:[#allocation89_spill] sm:$0xff] }
 0x619   : > { %v1234_v63 = vadd.f32 %v1230_v37, %v1210_v0  ;;  %v1313_v20 = vsel %vm1267_vm11, %v13078_v14, %v13080_v13  ;;  %v1314_v6 = vsel %vm1267_vm11, %v13082_v4, %v13081_v27  ;;  %v1356_v19 = vsel %vm1267_vm11, %v13084_v24, %v13083_v36 }
 0x61a   : > { %v1276_v38 = vadd.f32 %v1268_v33, %v1231_v7  ;;  %v1277_v35 = vadd.f32 %v1269_v29, %v1232_v45  ;;  %v1278_v5 = vadd.f32 %v1270_v53, %v1233_v26  ;;  %v1358_v37 = vsel %vm1267_vm11, %v13087_v32, %v13086_v2  ;;  %v13089_v45 = vld [vmem:[#allocation95_spill] sm:$0xff] }
 0x61b   : > { %v1279_v51 = vadd.f32 %v1271_v61, %v1234_v63  ;;  %v1315_v62 = vsel %vm1267_vm11, %v13081_v27, %v13088_v1  ;;  %v1359_v26 = vsel %vm1267_vm11, %v13086_v2, %v13089_v45 }
 0x61c   : > { %v8372_v43 = vpop.permute.xlu1 %1388  ;;  %v8431_v9 = vpop.permute.xlu0 %1390  ;;  %v1320_v18 = vadd.f32 %v1312_v16, %v1276_v38  ;;  %v1321_v28 = vadd.f32 %v1313_v20, %v1277_v35  ;;  %v1322_v41 = vadd.f32 %v1314_v6, %v1278_v5 }
 0x61d   : > { %v1323_v63 = vadd.f32 %v1315_v62, %v1279_v51 }
 0x61e   : > { %v1364_v47 = vadd.f32 %v1356_v19, %v1320_v18 }
 0x61f   : > { %v1367_v38 = vadd.f32 %v1359_v26, %v1323_v63  ;;  %v13094_v63 = vmov 3  }
 0x620   : > { %v8404_v10 = vpop.permute.xlu1 %1392 }
 0x621   : > { %v1401_v7 = vsel %vm1267_vm11, %v8431_v9, %v8404_v10 }
 0x624   : > { %v8433_v22 = vpop.permute.xlu1 %1396  ;;  %v8442_v3 = vpop.permute.xlu0 %1394 }
 0x625   : > { %v1402_v40 = vsel %vm1267_vm11, %v8442_v3, %v8433_v22 }
 0x628   : > { %v1413_v52 = vpop.permute.xlu1 %1412  ;;  %v8456_v56 = vpop.permute.xlu0 %1398 }
 0x62c   : > { %v1417_v17 = vpop.permute.xlu1 %1416  ;;  %v1415_v60 = vpop.permute.xlu0 %1414 }
 0x62d   : > { %v1419_v50 = vsel %vm1418_vm12, %v1413_v52, %v1415_v60  ;;  %v1420_v52 = vsel %vm1418_vm12, %v1415_v60, %v1417_v17  ;;  %v1357_v17 = vsel %vm1267_vm11, %v13083_v36, %v13085_v39  ;;  %v1400_v60 = vsel %vm1267_vm11, %v8372_v43, %v8431_v9 }
 0x62e   : > { %v1423_v48 = vsel %vm8190_vm3, %v1419_v50, 0.0  ;;  %v1424_v25 = vsel %vm8219_vm6, %v1420_v52, 0.0  ;;  %v1365_v0 = vadd.f32 %v1357_v17, %v1321_v28  ;;  %v1366_v50 = vadd.f32 %v1358_v37, %v1322_v41 }
 0x62f   : > { %v1436_v59 = vrot.slane %v1423_v48, %v7634_v30  ;;  %v1440_v33 = vrot.slane %v1424_v25, %v7634_v30  ;;  %v1460_v29 = vrot.slane %v1423_v48, %v7663_v42  ;;  %v1408_v12 = vadd.f32 %v1400_v60, %v1364_v47 }
 0x630   : > { %v1464_v9 = vrot.slane %v1424_v25, %v7663_v42  ;;  %v1484_v3 = vrot.slane %v1423_v48, %v7688_v55  ;;  %v1409_v54 = vadd.f32 %v1401_v7, %v1365_v0  ;;  %v1410_v61 = vadd.f32 %v1402_v40, %v1366_v50  ;;  %v8540_v50 = vld [vmem:[%s12407_s2] sm:$0xff] }
 0x631   : > { %v1488_v20 = vrot.slane %v1424_v25, %v7688_v55  ;;  %v1508_v39 = vrot.slane %v1423_v48, %v7717_v21  ;;  %v1512_v41 = vrot.slane %v1424_v25, %v7717_v21 }
 0x63d   : > { %v8468_v23 = vpop.permute.xlu1 %1430  ;;  %v1427_v8 = vpop.permute.xlu0 %1426 }
 0x63e   : > { %v1441_v43 = vmul.f32 %v1436_v59, %v1427_v8  ;;  %v1443_v11 = vmul.f32 %v1436_v59, %v8468_v23  ;;  %v1442_v10 = vmul.f32 %v1440_v33, %v1427_v8  ;;  %v1403_v8 = vsel %vm1267_vm11, %v8433_v22, %v8456_v56 }
 0x63f   : > { %v1444_v6 = vmul.f32 %v1440_v33, %v8468_v23 }
 0x640   : > { %v1445_v16 = vadd.f32 %v1441_v43, %v1408_v12  ;;  %v1447_v35 = vadd.f32 %v1443_v11, %v1410_v61  ;;  %v1446_v4 = vadd.f32 %v1442_v10, %v1409_v54  ;;  %v13090_v11 = vmov 1   ;;  %v8551_v10 = vld [vmem:[%s12407_s2 + $0x10] sm:$0xff] }
 0x641   : > { %v13095_v54 = vmov 7   ;;  %v13096_v61 = vmov 8  }
 0x642   : > { %v1451_v15 = vpop.permute.xlu1 %1450  ;;  %v1455_v34 = vpop.permute.xlu0 %1454 }
 0x643   : > { %v1465_v53 = vmul.f32 %v1460_v29, %v1451_v15  ;;  %v1467_v14 = vmul.f32 %v1460_v29, %v1455_v34  ;;  %v1466_v13 = vmul.f32 %v1464_v9, %v1451_v15  ;;  %v1411_v15 = vadd.f32 %v1403_v8, %v1367_v38 }
 0x644   : > { %v1468_v17 = vmul.f32 %v1464_v9, %v1455_v34  ;;  %v13091_v9 = vmov 2   ;;  %v13103_v38 = vmov 17   ;;  %v13104_v8 = vmov 9  }
 0x645   : > { %v1469_v5 = vadd.f32 %v1465_v53, %v1445_v16  ;;  %v1471_v19 = vadd.f32 %v1467_v14, %v1447_v35  ;;  %v1470_v51 = vadd.f32 %v1466_v13, %v1446_v4  ;;  %v1448_v56 = vadd.f32 %v1444_v6, %v1411_v15 }
 0x646   : > { %v13092_v53 = vmov 4   ;;  %v13097_v14 = vmov 10   ;;  %v13099_v16 = vmov 6   ;;  %v13100_v13 = vmov 13  }
 0x647   : > { %v1475_v46 = vpop.permute.xlu1 %1474  ;;  %v1499_v36 = vpop.permute.xlu0 %1498  ;;  %v1472_v1 = vadd.f32 %v1468_v17, %v1448_v56  ;;  %v13105_v35 = vmov 12  }
 0x648   : > { %v1489_v52 = vmul.f32 %v1484_v3, %v1475_v46  ;;  %v1490_v24 = vmul.f32 %v1488_v20, %v1475_v46  ;;  %v1513_v32 = vmul.f32 %v1508_v39, %v1499_v36  ;;  %v1514_v62 = vmul.f32 %v1512_v41, %v1499_v36 }
 0x64a   : > { %v1493_v18 = vadd.f32 %v1489_v52, %v1469_v5  ;;  %v1494_v37 = vadd.f32 %v1490_v24, %v1470_v51  ;;  %v13102_v52 = vmov 16  }
 0x64b   : > { %v1479_v58 = vpop.permute.xlu1 %1478 }
 0x64c   : > { %v1491_v27 = vmul.f32 %v1484_v3, %v1479_v58  ;;  %v1492_v60 = vmul.f32 %v1488_v20, %v1479_v58  ;;  %v1529_v23 = vpop.permute.xlu0 %1528  ;;  %v1517_v0 = vadd.f32 %v1513_v32, %v1493_v18  ;;  %v1518_v40 = vadd.f32 %v1514_v62, %v1494_v37 }
 0x64d   : > { %v13093_v3 = vmov 5   ;;  %v13098_v58 = vmov 11   ;;  %v13101_v20 = vmov 14  }
 0x64e   : > { %v1495_v2 = vadd.f32 %v1491_v27, %v1471_v19  ;;  %v1496_v46 = vadd.f32 %v1492_v60, %v1472_v1  ;;  %v13106_v27 = vmov 15  }
 0x650   : > { %v1503_v28 = vpop.permute.xlu1 %1502 }
 0x651   : > { %v1515_v22 = vmul.f32 %v1508_v39, %v1503_v28  ;;  %v1516_v47 = vmul.f32 %v1512_v41, %v1503_v28 }
 0x653   : > { %v1519_v59 = vadd.f32 %v1515_v22, %v1495_v2  ;;  %v1520_v34 = vadd.f32 %v1516_v47, %v1496_v46 }
 0x655   : > { %v1533_v48 = vadd.f32 %v1529_v23, %v1519_v59  ;;  %v1524_v7 = vpop.permute.xlu1 %1523  ;;  %v1534_v45 = vadd.f32 %v1529_v23, %v1520_v34 }
 0x656   : > { %v1531_v33 = vadd.f32 %v1524_v7, %v1517_v0  ;;  %v1532_v25 = vadd.f32 %v1524_v7, %v1518_v40 }
 0x657   : > { %v1537_v43 = vmax.f32 %v1533_v48, 0.0  ;;  %v1538_v12 = vmax.f32 %v1534_v45, 0.0 }
 0x658   : > { %v1535_v29 = vmax.f32 %v1531_v33, 0.0  ;;  %v1536_v26 = vmax.f32 %v1532_v25, 0.0 }
 0x659   : > { %1547 = vrot.lane.b32.xlu0 %v1537_v43, %s7280_s10 }
 0x65a   : > { %1543 = vrot.lane.b32.xlu1 %v1535_v29, %s7280_s10 }
 0x65d   : > { %1571 = vperm.xlu0 %6899, %v8540_v50  }
 0x65e   : > { %1545 = vrot.lane.b32.xlu1 %v1536_v26, %s7280_s10 }
 0x661   : > { %6900 = vset.pattern.permute.xlu0 %v13090_v11 }
 0x662   : > { %1596 = vperm.xlu0 %6900, %v8540_v50   ;;  %1549 = vrot.lane.b32.xlu1 %v1538_v12, %s7280_s10 }
 0x666   : > { %6903 = vset.pattern.permute.xlu0 %v13091_v9  ;;  %1576 = vperm.xlu1 %6898, %v8551_v10  }
 0x667   : > { %1624 = vperm.xlu0 %6903, %v8551_v10  }
 0x66a   : > { %6901 = vset.pattern.permute.xlu1 %v13090_v11 }
 0x66b   : > { %6905 = vset.pattern.permute.xlu0 %v13092_v53  ;;  %1600 = vperm.xlu1 %6901, %v8551_v10  }
 0x66c   : > { %1668 = vperm.xlu0 %6905, %v8540_v50  }
 0x66f   : > { %6902 = vset.pattern.permute.xlu1 %v13091_v9 }
 0x670   : > { %6908 = vset.pattern.permute.xlu0 %v13093_v3  ;;  %1620 = vperm.xlu1 %6902, %v8540_v50  }
 0x671   : > { %1696 = vperm.xlu0 %6908, %v8551_v10  }
 0x674   : > { %6904 = vset.pattern.permute.xlu1 %v13094_v63 }
 0x675   : > { %6910 = vset.pattern.permute.xlu0 %v13095_v54  ;;  %1644 = vperm.xlu1 %6904, %v8540_v50  }
 0x676   : > { %1740 = vperm.xlu0 %6910, %v8540_v50  }
 0x679   : > { %1648 = vperm.xlu1 %6904, %v8551_v10  }
 0x67a   : > { %6913 = vset.pattern.permute.xlu0 %v13096_v61 }
 0x67b   : > { %1768 = vperm.xlu0 %6913, %v8551_v10  }
 0x67d   : > { %6906 = vset.pattern.permute.xlu1 %v13092_v53 }
 0x67e   : > { %1672 = vperm.xlu1 %6906, %v8551_v10  }
 0x67f   : > { %6915 = vset.pattern.permute.xlu0 %v13097_v14 }
 0x680   : > { %1812 = vperm.xlu0 %6915, %v8540_v50  }
 0x682   : > { %6907 = vset.pattern.permute.xlu1 %v13093_v3 }
 0x683   : > { %1692 = vperm.xlu1 %6907, %v8540_v50  }
 0x684   : > { %6918 = vset.pattern.permute.xlu0 %v13098_v58 }
 0x685   : > { %1840 = vperm.xlu0 %6918, %v8551_v10  }
 0x687   : > { %6909 = vset.pattern.permute.xlu1 %v13099_v16 }
 0x688   : > { %1716 = vperm.xlu1 %6909, %v8540_v50  }
 0x689   : > { %6920 = vset.pattern.permute.xlu0 %v13100_v13 }
 0x68a   : > { %1884 = vperm.xlu0 %6920, %v8540_v50  }
 0x68c   : > { %1720 = vperm.xlu1 %6909, %v8551_v10  }
 0x68e   : > { %6923 = vset.pattern.permute.xlu0 %v13101_v20 }
 0x68f   : > { %1912 = vperm.xlu0 %6923, %v8551_v10  }
 0x690   : > { %6911 = vset.pattern.permute.xlu1 %v13095_v54 }
 0x691   : > { %1744 = vperm.xlu1 %6911, %v8551_v10  }
 0x693   : > { %6925 = vset.pattern.permute.xlu0 %v13102_v52 }
 0x694   : > { %1956 = vperm.xlu0 %6925, %v8540_v50  }
 0x695   : > { %6912 = vset.pattern.permute.xlu1 %v13096_v61 }
 0x696   : > { %1764 = vperm.xlu1 %6912, %v8540_v50  }
 0x698   : > { %6928 = vset.pattern.permute.xlu0 %v13103_v38 }
 0x69a   : > { %6914 = vset.pattern.permute.xlu1 %v13104_v8 }
 0x69b   : > { %1788 = vperm.xlu1 %6914, %v8540_v50  }
 0x69f   : > { %1792 = vperm.xlu1 %6914, %v8551_v10  }
 0x6a3   : > { %6916 = vset.pattern.permute.xlu1 %v13097_v14 }
 0x6a4   : > { %1816 = vperm.xlu1 %6916, %v8551_v10  }
 0x6a8   : > { %6917 = vset.pattern.permute.xlu1 %v13098_v58 }
 0x6a9   : > { %1836 = vperm.xlu1 %6917, %v8540_v50  }
 0x6ad   : > { %6919 = vset.pattern.permute.xlu1 %v13105_v35  ;;  %v13142_v35 = vmov 18  }
 0x6ae   : > { %1860 = vperm.xlu1 %6919, %v8540_v50  }
 0x6b2   : > { %1864 = vperm.xlu1 %6919, %v8551_v10  }
 0x6b6   : > { %6921 = vset.pattern.permute.xlu1 %v13100_v13 }
 0x6b7   : > { %1888 = vperm.xlu1 %6921, %v8551_v10  }
 0x6bb   : > { %6922 = vset.pattern.permute.xlu1 %v13101_v20 }
 0x6bc   : > { %1908 = vperm.xlu1 %6922, %v8540_v50  }
 0x6c0   : > { %6924 = vset.pattern.permute.xlu1 %v13106_v27 }
 0x6c1   : > { %1932 = vperm.xlu1 %6924, %v8540_v50  }
 0x6c5   : > { %1936 = vperm.xlu1 %6924, %v8551_v10  }
 0x6c9   : > { %6926 = vset.pattern.permute.xlu1 %v13102_v52 }
 0x6ca   : > { %1960 = vperm.xlu1 %6926, %v8551_v10  }
 0x6cb   : > { %v8613_v6 = vpop.permute.xlu0 %1547 }
 0x6cc   : > { %v1544_v4 = vpop.permute.xlu1 %1543 }
 0x6cd   : > { %v8658_v0 = vsel %vm278_vm0, 0.0, %v1544_v4 }
 0x6ce   : > { %6927 = vset.pattern.permute.xlu1 %v13103_v38  ;;  %13127 = vst [vmem:[#allocation26_spill] sm:$0xff] %v8658_v0  ;;  %v8667_v46 = vrot.slane %v8658_v0, %v7634_v30 }
 0x6d0   : > { %v1546_v5 = vpop.permute.xlu1 %1545 }
 0x6d1   : > { %v8661_v48 = vsel %vm278_vm0, %v1544_v4, %v1546_v5  ;;  %v8674_v33 = vsel %vm278_vm0, %v1546_v5, 0.0 }
 0x6d2   : > { %13128 = vst [vmem:[#allocation34_spill] sm:$0xff] %v8661_v48  ;;  %v8671_v40 = vrot.slane %v8661_v48, %v7634_v30  ;;  %13130 = vst [vmem:[#allocation35_spill] sm:$0xff] %v8674_v33  ;;  %v8682_v45 = vrot.slane %v8674_v33, %v7634_v30  ;;  %v8742_v63 = vrot.slane %v8661_v48, %v7663_v42 }
 0x6d4   : > { %v8617_v24 = vpop.permute.xlu1 %1549 }
 0x6dc   : > { %v8615_v36 = vpop.permute.xlu0 %1571 }
 0x6dd   : > { %13107 = vst [vmem:[#allocation23_spill] sm:$0xff] %v8615_v36 }
 0x6e1   : > { %v8619_v19 = vpop.permute.xlu0 %1596 }
 0x6e2   : > { %13108 = vst [vmem:[#allocation32_spill] sm:$0xff] %v8619_v19 }
 0x6e5   : > { %v8621_v39 = vpop.permute.xlu1 %1576 }
 0x6e6   : > { %13109 = vst [vmem:[#allocation24_spill] sm:$0xff] %v8621_v39  ;;  %v8623_v15 = vpop.permute.xlu0 %1624 }
 0x6e7   : > { %13110 = vst [vmem:[#allocation13_spill] sm:$0xff] %v8623_v15 }
 0x6ea   : > { %v8625_v17 = vpop.permute.xlu1 %1600 }
 0x6eb   : > { %13111 = vst [vmem:[#allocation27_spill] sm:$0xff] %v8625_v17  ;;  %v8627_v51 = vpop.permute.xlu0 %1668 }
 0x6ec   : > { %13112 = vst [vmem:[#allocation14_spill] sm:$0xff] %v8627_v51 }
 0x6ef   : > { %v8629_v18 = vpop.permute.xlu1 %1620 }
 0x6f0   : > { %13113 = vst [vmem:[#allocation15_spill] sm:$0xff] %v8629_v18  ;;  %v8631_v28 = vpop.permute.xlu0 %1696 }
 0x6f1   : > { %13114 = vst [vmem:[#allocation22_spill] sm:$0xff] %v8631_v28 }
 0x6f4   : > { %v8633_v41 = vpop.permute.xlu1 %1644 }
 0x6f5   : > { %13115 = vst [vmem:[#allocation21_spill] sm:$0xff] %v8633_v41  ;;  %v8635_v2 = vpop.permute.xlu0 %1740 }
 0x6f6   : > { %13116 = vst [vmem:[#allocation31_spill] sm:$0xff] %v8635_v2 }
 0x6f8   : > { %v8637_v22 = vpop.permute.xlu1 %1648 }
 0x6f9   : > { %13117 = vst [vmem:[#allocation28_spill] sm:$0xff] %v8637_v22 }
 0x6fa   : > { %v8639_v56 = vpop.permute.xlu0 %1768 }
 0x6fb   : > { %13118 = vst [vmem:[#allocation16_spill] sm:$0xff] %v8639_v56 }
 0x6fd   : > { %v8641_v32 = vpop.permute.xlu1 %1672 }
 0x6fe   : > { %13119 = vst [vmem:[#allocation17_spill] sm:$0xff] %v8641_v32 }
 0x6ff   : > { %v8643_v37 = vpop.permute.xlu0 %1812 }
 0x700   : > { %13120 = vst [vmem:[#allocation29_spill] sm:$0xff] %v8643_v37 }
 0x702   : > { %v8645_v60 = vpop.permute.xlu1 %1692 }
 0x703   : > { %13121 = vst [vmem:[#allocation18_spill] sm:$0xff] %v8645_v60 }
 0x704   : > { %v8647_v23 = vpop.permute.xlu0 %1840 }
 0x705   : > { %13122 = vst [vmem:[#allocation30_spill] sm:$0xff] %v8647_v23 }
 0x707   : > { %v8649_v59 = vpop.permute.xlu1 %1716 }
 0x708   : > { %13123 = vst [vmem:[#allocation19_spill] sm:$0xff] %v8649_v59 }
 0x709   : > { %v8651_v1 = vpop.permute.xlu0 %1884 }
 0x70a   : > { %13124 = vst [vmem:[#allocation20_spill] sm:$0xff] %v8651_v1 }
 0x70b   : > { %v8653_v62 = vpop.permute.xlu1 %1720 }
 0x70c   : > { %13125 = vst [vmem:[#allocation25_spill] sm:$0xff] %v8653_v62 }
 0x70e   : > { %v8655_v47 = vpop.permute.xlu0 %1912 }
 0x70f   : > { %13126 = vst [vmem:[#allocation33_spill] sm:$0xff] %v8655_v47 }
 0x710   : > { %v8663_v7 = vpop.permute.xlu1 %1744 }
 0x711   : > { %13129 = vst [vmem:[#allocation36_spill] sm:$0xff] %v8663_v7 }
 0x713   : > { %v1957_v43 = vpop.permute.xlu0 %1956 }
 0x714   : > { %v1975_v34 = vmul.f32 %v8667_v46, %v1957_v43  ;;  %v1976_v25 = vmul.f32 %v8671_v40, %v1957_v43  ;;  %v1977_v26 = vmul.f32 %v8682_v45, %v1957_v43 }
 0x715   : > { %v8678_v29 = vpop.permute.xlu1 %1764 }
 0x716   : > { %13131 = vst [vmem:[#allocation37_spill] sm:$0xff] %v8678_v29  ;;  %1987 = vrot.lane.b32.xlu1 %v1975_v34, %s7296_s13  ;;  %1989 = vrot.lane.b32.xlu0 %v1976_v25, %s7296_s13 }
 0x71a   : > { %1991 = vrot.lane.b32.xlu1 %v1977_v26, %s7296_s13  ;;  %v8688_v12 = vpop.permute.xlu1 %1788 }
 0x71b   : > { %13132 = vst [vmem:[#allocation39_spill] sm:$0xff] %v8688_v12 }
 0x71e   : > { %v8690_v52 = vpop.permute.xlu1 %1792 }
 0x71f   : > { %13133 = vst [vmem:[#allocation38_spill] sm:$0xff] %v8690_v52 }
 0x723   : > { %v8692_v38 = vpop.permute.xlu1 %1816 }
 0x724   : > { %13134 = vst [vmem:[#allocation40_spill] sm:$0xff] %v8692_v38 }
 0x728   : > { %v8694_v4 = vpop.permute.xlu1 %1836 }
 0x729   : > { %13135 = vst [vmem:[#allocation42_spill] sm:$0xff] %v8694_v4 }
 0x72d   : > { %v8696_v5 = vpop.permute.xlu1 %1860 }
 0x72e   : > { %13136 = vst [vmem:[#allocation41_spill] sm:$0xff] %v8696_v5 }
 0x731   : > { %v8698_v58 = vpop.permute.xlu1 %1864 }
 0x732   : > { %13137 = vst [vmem:[#allocation43_spill] sm:$0xff] %v8698_v58 }
 0x736   : > { %v8700_v27 = vpop.permute.xlu1 %1888 }
 0x737   : > { %13138 = vst [vmem:[#allocation45_spill] sm:$0xff] %v8700_v27 }
 0x73b   : > { %v8702_v34 = vpop.permute.xlu1 %1908 }
 0x73c   : > { %13139 = vst [vmem:[#allocation44_spill] sm:$0xff] %v8702_v34 }
 0x740   : > { %v8704_v25 = vpop.permute.xlu1 %1932 }
 0x741   : > { %13140 = vst [vmem:[#allocation64_spill] sm:$0xff] %v8704_v25 }
 0x744   : > { %v8706_v43 = vpop.permute.xlu1 %1936 }
 0x745   : > { %13141 = vst [vmem:[#allocation56_spill] sm:$0xff] %v8706_v43 }
 0x749   : > { %v1961_v26 = vpop.permute.xlu1 %1960 }
 0x74a   : > { %v1978_v20 = vmul.f32 %v8667_v46, %v1961_v26  ;;  %v1979_v54 = vmul.f32 %v8671_v40, %v1961_v26  ;;  %v1980_v13 = vmul.f32 %v8682_v45, %v1961_v26  ;;  %v8730_v26 = vrot.slane %v8658_v0, %v7663_v42 }
 0x74c   : > { %1995 = vrot.lane.b32.xlu1 %v1979_v54, %s7296_s13  ;;  %1993 = vrot.lane.b32.xlu0 %v1978_v20, %s7296_s13 }
 0x750   : > { %2012 = vperm.xlu1 %6927, %v8540_v50   ;;  %1997 = vrot.lane.b32.xlu0 %v1980_v13, %s7296_s13  ;;  %v8734_v13 = vrot.slane %v8674_v33, %v7663_v42 }
 0x754   : > { %2016 = vperm.xlu0 %6928, %v8551_v10   ;;  %6930 = vset.pattern.permute.xlu1 %v13142_v35 }
 0x758   : > { %6929 = vset.pattern.permute.xlu0 %v13142_v35 }
 0x788   : > { %v8718_v14 = vpop.permute.xlu1 %1987  ;;  %v8720_v53 = vpop.permute.xlu0 %1989 }
 0x789   : > { %13143 = vst [vmem:[#allocation46_spill] sm:$0xff] %v8718_v14  ;;  %13144 = vst [vmem:[#allocation57_spill] sm:$0xff] %v8720_v53 }
 0x78c   : > { %v8722_v8 = vpop.permute.xlu1 %1991 }
 0x78d   : > { %13145 = vst [vmem:[#allocation49_spill] sm:$0xff] %v8722_v8 }
 0x7be   : > { %v8724_v54 = vpop.permute.xlu0 %1993  ;;  %v8726_v20 = vpop.permute.xlu1 %1995 }
 0x7bf   : > { %13146 = vst [vmem:[#allocation47_spill] sm:$0xff] %v8724_v54  ;;  %13147 = vst [vmem:[#allocation48_spill] sm:$0xff] %v8726_v20 }
 0x7c2   : > { %v8736_v61 = vpop.permute.xlu0 %1997 }
 0x7c3   : > { %13148 = vst [vmem:[#allocation50_spill] sm:$0xff] %v8736_v61 }
 0x7cf   : > { %v2013_v35 = vpop.permute.xlu1 %2012 }
 0x7d0   : > { %v2031_v16 = vmul.f32 %v8730_v26, %v2013_v35  ;;  %v2033_v3 = vmul.f32 %v8734_v13, %v2013_v35  ;;  %v2032_v11 = vmul.f32 %v8742_v63, %v2013_v35 }
 0x7d2   : > { %2047 = vrot.lane.b32.xlu0 %v2033_v3, %s7296_s13  ;;  %2043 = vrot.lane.b32.xlu1 %v2031_v16, %s7296_s13  ;;  %v13149_v3 = vmov 19  }
 0x7d3   : > { %v2017_v9 = vpop.permute.xlu0 %2016 }
 0x7d4   : > { %v2035_v31 = vmul.f32 %v8742_v63, %v2017_v9  ;;  %v2034_v57 = vmul.f32 %v8730_v26, %v2017_v9  ;;  %v2036_v61 = vmul.f32 %v8734_v13, %v2017_v9  ;;  %v8774_v9 = vrot.slane %v8661_v48, %v7688_v55 }
 0x7d6   : > { %2051 = vrot.lane.b32.xlu0 %v2035_v31, %s7296_s13  ;;  %2045 = vrot.lane.b32.xlu1 %v2032_v11, %s7296_s13 }
 0x7da   : > { %2068 = vperm.xlu0 %6929, %v8540_v50   ;;  %2049 = vrot.lane.b32.xlu1 %v2034_v57, %s7296_s13  ;;  %v8770_v57 = vrot.slane %v8658_v0, %v7688_v55 }
 0x7de   : > { %2053 = vrot.lane.b32.xlu1 %v2036_v61, %s7296_s13  ;;  %6932 = vset.pattern.permute.xlu0 %v13149_v3 }
 0x7e2   : > { %2072 = vperm.xlu1 %6930, %v8551_v10  }
 0x7e6   : > { %6931 = vset.pattern.permute.xlu1 %v13149_v3 }
 0x844   : > { %v8758_v16 = vpop.permute.xlu1 %2043  ;;  %v8760_v31 = vpop.permute.xlu0 %2047 }
 0x845   : > { %13150 = vst [vmem:[#allocation51_spill] sm:$0xff] %v8758_v16  ;;  %13151 = vst [vmem:[#allocation52_spill] sm:$0xff] %v8760_v31  ;;  %v8780_v31 = vrot.slane %v8674_v33, %v7688_v55 }
 0x848   : > { %v8762_v11 = vpop.permute.xlu1 %2045  ;;  %v8764_v35 = vpop.permute.xlu0 %2051 }
 0x849   : > { %13152 = vst [vmem:[#allocation58_spill] sm:$0xff] %v8762_v11  ;;  %13153 = vst [vmem:[#allocation53_spill] sm:$0xff] %v8764_v35 }
 0x84c   : > { %v8766_v54 = vpop.permute.xlu1 %2049 }
 0x84d   : > { %13154 = vst [vmem:[#allocation54_spill] sm:$0xff] %v8766_v54 }
 0x850   : > { %v8784_v54 = vpop.permute.xlu1 %2053 }
 0x851   : > { %13155 = vst [vmem:[#allocation55_spill] sm:$0xff] %v8784_v54 }
 0x859   : > { %v2069_v61 = vpop.permute.xlu0 %2068 }
 0x85a   : > { %v2087_v3 = vmul.f32 %v8770_v57, %v2069_v61  ;;  %v2088_v16 = vmul.f32 %v8774_v9, %v2069_v61  ;;  %v2089_v35 = vmul.f32 %v8780_v31, %v2069_v61 }
 0x85c   : > { %2101 = vrot.lane.b32.xlu0 %v2088_v16, %s7296_s13  ;;  %2099 = vrot.lane.b32.xlu1 %v2087_v3, %s7296_s13  ;;  %v13156_v16 = vmov 20  }
 0x860   : > { %2103 = vrot.lane.b32.xlu1 %v2089_v35, %s7296_s13 }
 0x861   : > { %v2073_v11 = vpop.permute.xlu1 %2072 }
 0x862   : > { %v2090_v20 = vmul.f32 %v8770_v57, %v2073_v11  ;;  %v2091_v8 = vmul.f32 %v8774_v9, %v2073_v11  ;;  %v2092_v14 = vmul.f32 %v8780_v31, %v2073_v11  ;;  %v8810_v11 = vrot.slane %v8658_v0, %v7717_v21 }
 0x864   : > { %2107 = vrot.lane.b32.xlu1 %v2091_v8, %s7296_s13  ;;  %2105 = vrot.lane.b32.xlu0 %v2090_v20, %s7296_s13 }
 0x868   : > { %2124 = vperm.xlu1 %6931, %v8540_v50   ;;  %2109 = vrot.lane.b32.xlu0 %v2092_v14, %s7296_s13  ;;  %v8814_v14 = vrot.slane %v8674_v33, %v7717_v21 }
 0x86c   : > { %2128 = vperm.xlu0 %6932, %v8551_v10   ;;  %6934 = vset.pattern.permute.xlu1 %v13156_v16 }
 0x870   : > { %6933 = vset.pattern.permute.xlu0 %v13156_v16 }
 0x8ce   : > { %v8798_v35 = vpop.permute.xlu1 %2099  ;;  %v8800_v61 = vpop.permute.xlu0 %2101 }
 0x8cf   : > { %13157 = vst [vmem:[#allocation60_spill] sm:$0xff] %v8798_v35  ;;  %13158 = vst [vmem:[#allocation62_spill] sm:$0xff] %v8800_v61 }
 0x8d2   : > { %v8802_v3 = vpop.permute.xlu1 %2103 }
 0x8d3   : > { %13159 = vst [vmem:[#allocation66_spill] sm:$0xff] %v8802_v3 }
 0x8d6   : > { %v8804_v8 = vpop.permute.xlu0 %2105  ;;  %v8806_v20 = vpop.permute.xlu1 %2107 }
 0x8d7   : > { %13160 = vst [vmem:[#allocation73_spill] sm:$0xff] %v8804_v8  ;;  %13161 = vst [vmem:[#allocation69_spill] sm:$0xff] %v8806_v20  ;;  %v8822_v8 = vrot.slane %v8661_v48, %v7717_v21 }
 0x8da   : > { %v8816_v54 = vpop.permute.xlu0 %2109 }
 0x8db   : > { %13162 = vst [vmem:[#allocation59_spill] sm:$0xff] %v8816_v54 }
 0x8e7   : > { %v2125_v16 = vpop.permute.xlu1 %2124 }
 0x8e8   : > { %v2143_v35 = vmul.f32 %v8810_v11, %v2125_v16  ;;  %v2145_v61 = vmul.f32 %v8814_v14, %v2125_v16  ;;  %v2144_v3 = vmul.f32 %v8822_v8, %v2125_v16  ;;  %v13167_v16 = vld [vmem:[#allocation8_spill] sm:$0xff] }
 0x8e9   : > { %v8845_v47 = vsub.s32 4, %v13167_v16 }
 0x8ea   : > { %2159 = vrot.lane.b32.xlu0 %v2145_v61, %s7296_s13  ;;  %2155 = vrot.lane.b32.xlu1 %v2143_v35, %s7296_s13  ;;  %v13163_v35 = vmov 21  }
 0x8eb   : > { %v2129_v20 = vpop.permute.xlu0 %2128  ;;  %13168 = vst [vmem:[#allocation63_spill] sm:$0xff] %v8845_v47  ;;  %v8863_v25 = vrot.slane %v8674_v33, %v8845_v47 }
 0x8ec   : > { %v2147_v53 = vmul.f32 %v8822_v8, %v2129_v20  ;;  %v2146_v54 = vmul.f32 %v8810_v11, %v2129_v20  ;;  %v2148_v43 = vmul.f32 %v8814_v14, %v2129_v20 }
 0x8ee   : > { %2163 = vrot.lane.b32.xlu0 %v2147_v53, %s7296_s13  ;;  %2157 = vrot.lane.b32.xlu1 %v2144_v3, %s7296_s13 }
 0x8f2   : > { %2180 = vperm.xlu0 %6933, %v8540_v50   ;;  %2161 = vrot.lane.b32.xlu1 %v2146_v54, %s7296_s13 }
 0x8f6   : > { %2165 = vrot.lane.b32.xlu1 %v2148_v43, %s7296_s13  ;;  %6936 = vset.pattern.permute.xlu0 %v13163_v35  ;;  %v8853_v43 = vrot.slane %v8658_v0, %v8845_v47 }
 0x8fa   : > { %2184 = vperm.xlu1 %6934, %v8551_v10  }
 0x8fe   : > { %6935 = vset.pattern.permute.xlu1 %v13163_v35  ;;  %v8857_v35 = vrot.slane %v8661_v48, %v8845_v47 }
 0x95c   : > { %v8838_v61 = vpop.permute.xlu1 %2155  ;;  %v8840_v53 = vpop.permute.xlu0 %2159 }
 0x95d   : > { %13164 = vst [vmem:[#allocation61_spill] sm:$0xff] %v8838_v61  ;;  %13165 = vst [vmem:[#allocation70_spill] sm:$0xff] %v8840_v53 }
 0x960   : > { %v8842_v3 = vpop.permute.xlu1 %2157  ;;  %v8847_v54 = vpop.permute.xlu0 %2163 }
 0x961   : > { %13166 = vst [vmem:[#allocation68_spill] sm:$0xff] %v8842_v3  ;;  %13169 = vst [vmem:[#allocation65_spill] sm:$0xff] %v8847_v54 }
 0x964   : > { %v8849_v20 = vpop.permute.xlu1 %2161 }
 0x965   : > { %13170 = vst [vmem:[#allocation67_spill] sm:$0xff] %v8849_v20 }
 0x968   : > { %v8867_v20 = vpop.permute.xlu1 %2165 }
 0x969   : > { %13171 = vst [vmem:[#allocation71_spill] sm:$0xff] %v8867_v20 }
 0x971   : > { %v2181_v61 = vpop.permute.xlu0 %2180 }
 0x972   : > { %v2199_v53 = vmul.f32 %v8853_v43, %v2181_v61  ;;  %v2200_v3 = vmul.f32 %v8857_v35, %v2181_v61  ;;  %v2201_v54 = vmul.f32 %v8863_v25, %v2181_v61  ;;  %v13172_v61 = vmov 22  }
 0x974   : > { %2213 = vrot.lane.b32.xlu0 %v2200_v3, %s7296_s13  ;;  %2211 = vrot.lane.b32.xlu1 %v2199_v53, %s7296_s13 }
 0x978   : > { %2215 = vrot.lane.b32.xlu1 %v2201_v54, %s7296_s13 }
 0x979   : > { %v2185_v34 = vpop.permute.xlu1 %2184 }
 0x97a   : > { %v2202_v1 = vmul.f32 %v8853_v43, %v2185_v34  ;;  %v2203_v27 = vmul.f32 %v8857_v35, %v2185_v34  ;;  %v2204_v58 = vmul.f32 %v8863_v25, %v2185_v34 }
 0x97c   : > { %2219 = vrot.lane.b32.xlu1 %v2203_v27, %s7296_s13  ;;  %2217 = vrot.lane.b32.xlu0 %v2202_v1, %s7296_s13  ;;  %v8890_v1 = vsub.s32 5, %v13167_v16 }
 0x97e   : > { %13177 = vst [vmem:[#allocation77_spill] sm:$0xff] %v8890_v1  ;;  %v8908_v20 = vrot.slane %v8661_v48, %v8890_v1 }
 0x980   : > { %2236 = vperm.xlu1 %6935, %v8540_v50   ;;  %2221 = vrot.lane.b32.xlu0 %v2204_v58, %s7296_s13  ;;  %v8896_v58 = vrot.slane %v8658_v0, %v8890_v1 }
 0x984   : > { %2240 = vperm.xlu0 %6936, %v8551_v10   ;;  %6938 = vset.pattern.permute.xlu1 %v13172_v61 }
 0x988   : > { %6937 = vset.pattern.permute.xlu0 %v13172_v61  ;;  %v8900_v61 = vrot.slane %v8674_v33, %v8890_v1 }
 0x98a   : > { %13179 = vst [vmem:[#allocation78_spill] sm:$0xff] %v8900_v61 }
 0x9e6   : > { %v8881_v53 = vpop.permute.xlu1 %2211  ;;  %v8883_v3 = vpop.permute.xlu0 %2213 }
 0x9e7   : > { %13173 = vst [vmem:[#allocation72_spill] sm:$0xff] %v8881_v53  ;;  %13174 = vst [vmem:[#allocation74_spill] sm:$0xff] %v8883_v3 }
 0x9ea   : > { %v8885_v54 = vpop.permute.xlu1 %2215 }
 0x9eb   : > { %13175 = vst [vmem:[#allocation75_spill] sm:$0xff] %v8885_v54 }
 0x9ee   : > { %v8887_v27 = vpop.permute.xlu0 %2217  ;;  %v8892_v34 = vpop.permute.xlu1 %2219 }
 0x9ef   : > { %13176 = vst [vmem:[#allocation76_spill] sm:$0xff] %v8887_v27  ;;  %13178 = vst [vmem:[#allocation80_spill] sm:$0xff] %v8892_v34 }
 0x9f2   : > { %v8902_v53 = vpop.permute.xlu0 %2221 }
 0x9f3   : > { %13180 = vst [vmem:[#allocation79_spill] sm:$0xff] %v8902_v53 }
 0x9ff   : > { %v2237_v3 = vpop.permute.xlu1 %2236 }
 0xa00   : > { %v2255_v54 = vmul.f32 %v8896_v58, %v2237_v3  ;;  %v2257_v27 = vmul.f32 %v8900_v61, %v2237_v3  ;;  %v2256_v23 = vmul.f32 %v8908_v20, %v2237_v3 }
 0xa02   : > { %2271 = vrot.lane.b32.xlu0 %v2257_v27, %s7296_s13  ;;  %2267 = vrot.lane.b32.xlu1 %v2255_v54, %s7296_s13  ;;  %v13181_v54 = vmov 23   ;;  %v8931_v27 = vsub.s32 6, %v13167_v16 }
 0xa03   : > { %v2241_v34 = vpop.permute.xlu0 %2240 }
 0xa04   : > { %v2259_v5 = vmul.f32 %v8908_v20, %v2241_v34  ;;  %v2258_v53 = vmul.f32 %v8896_v58, %v2241_v34  ;;  %v2260_v4 = vmul.f32 %v8900_v61, %v2241_v34  ;;  %13185 = vst [vmem:[#allocation85_spill] sm:$0xff] %v8931_v27  ;;  %v8949_v37 = vrot.slane %v8674_v33, %v8931_v27 }
 0xa06   : > { %2275 = vrot.lane.b32.xlu0 %v2259_v5, %s7296_s13  ;;  %2269 = vrot.lane.b32.xlu1 %v2256_v23, %s7296_s13  ;;  %13190 = vst [vmem:[#allocation92_spill] sm:$0xff] %v8949_v37 }
 0xa0a   : > { %2292 = vperm.xlu0 %6937, %v8540_v50   ;;  %2273 = vrot.lane.b32.xlu1 %v2258_v53, %s7296_s13 }
 0xa0e   : > { %2277 = vrot.lane.b32.xlu1 %v2260_v4, %s7296_s13  ;;  %6940 = vset.pattern.permute.xlu0 %v13181_v54  ;;  %v8939_v4 = vrot.slane %v8658_v0, %v8931_v27 }
 0xa10   : > { %13188 = vst [vmem:[#allocation88_spill] sm:$0xff] %v8939_v4 }
 0xa12   : > { %2296 = vperm.xlu1 %6938, %v8551_v10  }
 0xa16   : > { %6939 = vset.pattern.permute.xlu1 %v13181_v54  ;;  %v8943_v54 = vrot.slane %v8661_v48, %v8931_v27 }
 0xa18   : > { %13189 = vst [vmem:[#allocation87_spill] sm:$0xff] %v8943_v54 }
 0xa74   : > { %v8924_v3 = vpop.permute.xlu1 %2267  ;;  %v8926_v5 = vpop.permute.xlu0 %2271 }
 0xa75   : > { %13182 = vst [vmem:[#allocation81_spill] sm:$0xff] %v8924_v3  ;;  %13183 = vst [vmem:[#allocation82_spill] sm:$0xff] %v8926_v5 }
 0xa78   : > { %v8928_v23 = vpop.permute.xlu1 %2269  ;;  %v8933_v53 = vpop.permute.xlu0 %2275 }
 0xa79   : > { %13184 = vst [vmem:[#allocation83_spill] sm:$0xff] %v8928_v23  ;;  %13186 = vst [vmem:[#allocation84_spill] sm:$0xff] %v8933_v53 }
 0xa7c   : > { %v8935_v34 = vpop.permute.xlu1 %2273 }
 0xa7d   : > { %13187 = vst [vmem:[#allocation86_spill] sm:$0xff] %v8935_v34 }
 0xa80   : > { %v8953_v34 = vpop.permute.xlu1 %2277 }
 0xa81   : > { %13191 = vst [vmem:[#allocation90_spill] sm:$0xff] %v8953_v34 }
 0xa89   : > { %v2293_v3 = vpop.permute.xlu0 %2292 }
 0xa8a   : > { %v2311_v5 = vmul.f32 %v8939_v4, %v2293_v3  ;;  %v2312_v23 = vmul.f32 %v8943_v54, %v2293_v3  ;;  %v2313_v53 = vmul.f32 %v8949_v37, %v2293_v3  ;;  %v13192_v3 = vmov 24  }
 0xa8c   : > { %2325 = vrot.lane.b32.xlu0 %v2312_v23, %s7296_s13  ;;  %2323 = vrot.lane.b32.xlu1 %v2311_v5, %s7296_s13 }
 0xa90   : > { %2327 = vrot.lane.b32.xlu1 %v2313_v53, %s7296_s13 }
 0xa91   : > { %v2297_v38 = vpop.permute.xlu1 %2296 }
 0xa92   : > { %v2314_v52 = vmul.f32 %v8939_v4, %v2297_v38  ;;  %v2315_v56 = vmul.f32 %v8943_v54, %v2297_v38  ;;  %v2316_v12 = vmul.f32 %v8949_v37, %v2297_v38 }
 0xa94   : > { %2331 = vrot.lane.b32.xlu1 %v2315_v56, %s7296_s13  ;;  %2329 = vrot.lane.b32.xlu0 %v2314_v52, %s7296_s13  ;;  %v8976_v52 = vsub.s32 7, %v13167_v16 }
 0xa96   : > { %13197 = vst [vmem:[#allocation95_spill] sm:$0xff] %v8976_v52  ;;  %v8994_v16 = vrot.slane %v8661_v48, %v8976_v52 }
 0xa98   : > { %2348 = vperm.xlu1 %6939, %v8540_v50   ;;  %2333 = vrot.lane.b32.xlu0 %v2316_v12, %s7296_s13  ;;  %v8982_v12 = vrot.slane %v8658_v0, %v8976_v52  ;;  %13202 = vst [vmem:[#allocation103_spill] sm:$0xff] %v8994_v16 }
 0xa9a   : > { %13199 = vst [vmem:[#allocation100_spill] sm:$0xff] %v8982_v12 }
 0xa9c   : > { %2352 = vperm.xlu0 %6940, %v8551_v10   ;;  %6942 = vset.pattern.permute.xlu1 %v13192_v3 }
 0xaa0   : > { %6941 = vset.pattern.permute.xlu0 %v13192_v3  ;;  %v8986_v3 = vrot.slane %v8674_v33, %v8976_v52 }
 0xaa2   : > { %13200 = vst [vmem:[#allocation101_spill] sm:$0xff] %v8986_v3 }
 0xafe   : > { %v8967_v5 = vpop.permute.xlu1 %2323  ;;  %v8969_v23 = vpop.permute.xlu0 %2325 }
 0xaff   : > { %13193 = vst [vmem:[#allocation91_spill] sm:$0xff] %v8967_v5  ;;  %13194 = vst [vmem:[#allocation93_spill] sm:$0xff] %v8969_v23 }
 0xb02   : > { %v8971_v53 = vpop.permute.xlu1 %2327 }
 0xb03   : > { %13195 = vst [vmem:[#allocation94_spill] sm:$0xff] %v8971_v53 }
 0xb06   : > { %v8973_v56 = vpop.permute.xlu0 %2329  ;;  %v8978_v38 = vpop.permute.xlu1 %2331 }
 0xb07   : > { %13196 = vst [vmem:[#allocation89_spill] sm:$0xff] %v8973_v56  ;;  %13198 = vst [vmem:[#allocation8_spill] sm:$0xff] %v8978_v38 }
 0xb0a   : > { %v8988_v5 = vpop.permute.xlu0 %2333 }
 0xb0b   : > { %13201 = vst [vmem:[#allocation102_spill] sm:$0xff] %v8988_v5 }
 0xb17   : > { %v2349_v23 = vpop.permute.xlu1 %2348 }
 0xb18   : > { %v2367_v53 = vmul.f32 %v8982_v12, %v2349_v23  ;;  %v2369_v56 = vmul.f32 %v8986_v3, %v2349_v23  ;;  %v2368_v34 = vmul.f32 %v8994_v16, %v2349_v23 }
 0xb1a   : > { %2383 = vrot.lane.b32.xlu0 %v2369_v56, %s7296_s13  ;;  %2379 = vrot.lane.b32.xlu1 %v2367_v53, %s7296_s13  ;;  %v13203_v53 = vmov 25   ;;  %v9018_v56 = vsel %vm278_vm0, 0.0, %v8613_v6 }
 0xb1b   : > { %v2353_v38 = vpop.permute.xlu0 %2352  ;;  %13207 = vst [vmem:[#allocation107_spill] sm:$0xff] %v9018_v56 }
 0xb1c   : > { %v2371_v29 = vmul.f32 %v8994_v16, %v2353_v38  ;;  %v2370_v5 = vmul.f32 %v8982_v12, %v2353_v38  ;;  %v2372_v2 = vmul.f32 %v8986_v3, %v2353_v38 }
 0xb1e   : > { %2387 = vrot.lane.b32.xlu0 %v2371_v29, %s7296_s13  ;;  %2381 = vrot.lane.b32.xlu1 %v2368_v34, %s7296_s13 }
 0xb22   : > { %2404 = vperm.xlu0 %6941, %v8540_v50   ;;  %2385 = vrot.lane.b32.xlu1 %v2370_v5, %s7296_s13 }
 0xb26   : > { %2389 = vrot.lane.b32.xlu1 %v2372_v2, %s7296_s13  ;;  %6944 = vset.pattern.permute.xlu0 %v13203_v53  ;;  %v9023_v2 = vsel %vm278_vm0, %v8613_v6, %v8617_v24 }
 0xb27   : > { %13208 = vst [vmem:[#allocation108_spill] sm:$0xff] %v9023_v2 }
 0xb2a   : > { %2408 = vperm.xlu1 %6942, %v8551_v10  }
 0xb2e   : > { %6943 = vset.pattern.permute.xlu1 %v13203_v53  ;;  %v9031_v53 = vrot.slane %v9018_v56, %v7634_v30 }
 0xb30   : > { %13211 = vst [vmem:[#allocation111_spill] sm:$0xff] %v9031_v53 }
 0xb8c   : > { %v9010_v23 = vpop.permute.xlu1 %2379  ;;  %v9012_v29 = vpop.permute.xlu0 %2383 }
 0xb8d   : > { %13204 = vst [vmem:[#allocation104_spill] sm:$0xff] %v9010_v23  ;;  %13205 = vst [vmem:[#allocation105_spill] sm:$0xff] %v9012_v29  ;;  %v9035_v29 = vrot.slane %v9023_v2, %v7634_v30  ;;  %v9039_v23 = vsel %vm278_vm0, %v8617_v24, 0.0 }
 0xb8e   : > { %13213 = vst [vmem:[#allocation113_spill] sm:$0xff] %v9039_v23 }
 0xb8f   : > { %13212 = vst [vmem:[#allocation112_spill] sm:$0xff] %v9035_v29 }
 0xb90   : > { %v9014_v34 = vpop.permute.xlu1 %2381  ;;  %v9025_v5 = vpop.permute.xlu0 %2387 }
 0xb91   : > { %13206 = vst [vmem:[#allocation106_spill] sm:$0xff] %v9014_v34  ;;  %13209 = vst [vmem:[#allocation109_spill] sm:$0xff] %v9025_v5 }
 0xb94   : > { %v9027_v38 = vpop.permute.xlu1 %2385 }
 0xb95   : > { %13210 = vst [vmem:[#allocation110_spill] sm:$0xff] %v9027_v38  ;;  %v9045_v38 = vrot.slane %v9039_v23, %v7634_v30 }
 0xb97   : > { %13214 = vst [vmem:[#allocation114_spill] sm:$0xff] %v9045_v38 }
 0xb98   : > { %v9049_v5 = vpop.permute.xlu1 %2389 }
 0xb99   : > { %13215 = vst [vmem:[#allocation115_spill] sm:$0xff] %v9049_v5 }
 0xba1   : > { %v2405_v34 = vpop.permute.xlu0 %2404 }
 0xba2   : > { %v2423_v6 = vmul.f32 %v9031_v53, %v2405_v34  ;;  %v2424_v7 = vmul.f32 %v9035_v29, %v2405_v34  ;;  %v2425_v62 = vmul.f32 %v9045_v38, %v2405_v34 }
 0xba4   : > { %2437 = vrot.lane.b32.xlu0 %v2424_v7, %s7296_s13  ;;  %2435 = vrot.lane.b32.xlu1 %v2423_v6, %s7296_s13  ;;  %v13216_v7 = vmov 26  }
 0xba8   : > { %2439 = vrot.lane.b32.xlu1 %v2425_v62, %s7296_s13 }
 0xba9   : > { %v2409_v24 = vpop.permute.xlu1 %2408 }
 0xbaa   : > { %v2426_v28 = vmul.f32 %v9031_v53, %v2409_v24  ;;  %v2427_v59 = vmul.f32 %v9035_v29, %v2409_v24  ;;  %v2428_v60 = vmul.f32 %v9045_v38, %v2409_v24  ;;  %v9075_v24 = vrot.slane %v9018_v56, %v7663_v42 }
 0xbac   : > { %2443 = vrot.lane.b32.xlu1 %v2427_v59, %s7296_s13  ;;  %2441 = vrot.lane.b32.xlu0 %v2426_v28, %s7296_s13  ;;  %13222 = vst [vmem:[#allocation121_spill] sm:$0xff] %v9075_v24 }
 0xbb0   : > { %2460 = vperm.xlu1 %6943, %v8540_v50   ;;  %2445 = vrot.lane.b32.xlu0 %v2428_v60, %s7296_s13  ;;  %v9079_v60 = vrot.slane %v9039_v23, %v7663_v42 }
 0xbb2   : > { %13223 = vst [vmem:[#allocation122_spill] sm:$0xff] %v9079_v60 }
 0xbb4   : > { %2464 = vperm.xlu0 %6944, %v8551_v10   ;;  %6946 = vset.pattern.permute.xlu1 %v13216_v7 }
 0xbb8   : > { %6945 = vset.pattern.permute.xlu0 %v13216_v7 }
 0xc16   : > { %v9063_v62 = vpop.permute.xlu1 %2435  ;;  %v9065_v34 = vpop.permute.xlu0 %2437 }
 0xc17   : > { %13217 = vst [vmem:[#allocation116_spill] sm:$0xff] %v9063_v62  ;;  %13218 = vst [vmem:[#allocation117_spill] sm:$0xff] %v9065_v34 }
 0xc1a   : > { %v9067_v6 = vpop.permute.xlu1 %2439 }
 0xc1b   : > { %13219 = vst [vmem:[#allocation118_spill] sm:$0xff] %v9067_v6 }
 0xc1e   : > { %v9069_v59 = vpop.permute.xlu0 %2441  ;;  %v9071_v28 = vpop.permute.xlu1 %2443 }
 0xc1f   : > { %13220 = vst [vmem:[#allocation119_spill] sm:$0xff] %v9069_v59  ;;  %13221 = vst [vmem:[#allocation120_spill] sm:$0xff] %v9071_v28  ;;  %v9087_v59 = vrot.slane %v9023_v2, %v7663_v42 }
 0xc21   : > { %13225 = vst [vmem:[#allocation124_spill] sm:$0xff] %v9087_v59 }
 0xc22   : > { %v9081_v5 = vpop.permute.xlu0 %2445 }
 0xc23   : > { %13224 = vst [vmem:[#allocation123_spill] sm:$0xff] %v9081_v5 }
 0xc2f   : > { %v2461_v7 = vpop.permute.xlu1 %2460 }
 0xc30   : > { %v2479_v62 = vmul.f32 %v9075_v24, %v2461_v7  ;;  %v2481_v34 = vmul.f32 %v9079_v60, %v2461_v7  ;;  %v2480_v6 = vmul.f32 %v9087_v59, %v2461_v7 }
 0xc32   : > { %2495 = vrot.lane.b32.xlu0 %v2481_v34, %s7296_s13  ;;  %2491 = vrot.lane.b32.xlu1 %v2479_v62, %s7296_s13  ;;  %v13226_v62 = vmov 27  }
 0xc33   : > { %v2465_v28 = vpop.permute.xlu0 %2464 }
 0xc34   : > { %v2483_v51 = vmul.f32 %v9087_v59, %v2465_v28  ;;  %v2482_v5 = vmul.f32 %v9075_v24, %v2465_v28  ;;  %v2484_v32 = vmul.f32 %v9079_v60, %v2465_v28 }
 0xc36   : > { %2499 = vrot.lane.b32.xlu0 %v2483_v51, %s7296_s13  ;;  %2493 = vrot.lane.b32.xlu1 %v2480_v6, %s7296_s13 }
 0xc3a   : > { %2516 = vperm.xlu0 %6945, %v8540_v50   ;;  %2497 = vrot.lane.b32.xlu1 %v2482_v5, %s7296_s13  ;;  %v9115_v5 = vrot.slane %v9018_v56, %v7688_v55 }
 0xc3c   : > { %13232 = vst [vmem:[#allocation130_spill] sm:$0xff] %v9115_v5 }
 0xc3e   : > { %2501 = vrot.lane.b32.xlu1 %v2484_v32, %s7296_s13  ;;  %6948 = vset.pattern.permute.xlu0 %v13226_v62  ;;  %v9119_v32 = vrot.slane %v9023_v2, %v7688_v55 }
 0xc40   : > { %13233 = vst [vmem:[#allocation131_spill] sm:$0xff] %v9119_v32 }
 0xc42   : > { %2520 = vperm.xlu1 %6946, %v8551_v10  }
 0xc46   : > { %6947 = vset.pattern.permute.xlu1 %v13226_v62 }
 0xca4   : > { %v9103_v34 = vpop.permute.xlu1 %2491  ;;  %v9105_v51 = vpop.permute.xlu0 %2495 }
 0xca5   : > { %13227 = vst [vmem:[#allocation125_spill] sm:$0xff] %v9103_v34  ;;  %13228 = vst [vmem:[#allocation126_spill] sm:$0xff] %v9105_v51  ;;  %v9125_v51 = vrot.slane %v9039_v23, %v7688_v55 }
 0xca7   : > { %13234 = vst [vmem:[#allocation132_spill] sm:$0xff] %v9125_v51 }
 0xca8   : > { %v9107_v6 = vpop.permute.xlu1 %2493  ;;  %v9109_v7 = vpop.permute.xlu0 %2499 }
 0xca9   : > { %13229 = vst [vmem:[#allocation127_spill] sm:$0xff] %v9107_v6  ;;  %13230 = vst [vmem:[#allocation128_spill] sm:$0xff] %v9109_v7 }
 0xcac   : > { %v9111_v22 = vpop.permute.xlu1 %2497 }
 0xcad   : > { %13231 = vst [vmem:[#allocation129_spill] sm:$0xff] %v9111_v22 }
 0xcb0   : > { %v9129_v22 = vpop.permute.xlu1 %2501 }
 0xcb1   : > { %13235 = vst [vmem:[#allocation133_spill] sm:$0xff] %v9129_v22 }
 0xcb9   : > { %v2517_v28 = vpop.permute.xlu0 %2516 }
 0xcba   : > { %v2535_v62 = vmul.f32 %v9115_v5, %v2517_v28  ;;  %v2536_v34 = vmul.f32 %v9119_v32, %v2517_v28  ;;  %v2537_v7 = vmul.f32 %v9125_v51, %v2517_v28 }
 0xcbc   : > { %2549 = vrot.lane.b32.xlu0 %v2536_v34, %s7296_s13  ;;  %2547 = vrot.lane.b32.xlu1 %v2535_v62, %s7296_s13  ;;  %v13236_v34 = vmov 28  }
 0xcc0   : > { %2551 = vrot.lane.b32.xlu1 %v2537_v7, %s7296_s13 }
 0xcc1   : > { %v2521_v6 = vpop.permute.xlu1 %2520 }
 0xcc2   : > { %v2538_v15 = vmul.f32 %v9115_v5, %v2521_v6  ;;  %v2539_v41 = vmul.f32 %v9119_v32, %v2521_v6  ;;  %v2540_v18 = vmul.f32 %v9125_v51, %v2521_v6  ;;  %v9155_v6 = vrot.slane %v9018_v56, %v7717_v21 }
 0xcc4   : > { %2555 = vrot.lane.b32.xlu1 %v2539_v41, %s7296_s13  ;;  %2553 = vrot.lane.b32.xlu0 %v2538_v15, %s7296_s13  ;;  %13242 = vst [vmem:[#allocation139_spill] sm:$0xff] %v9155_v6 }
 0xcc8   : > { %2572 = vperm.xlu1 %6947, %v8540_v50   ;;  %2557 = vrot.lane.b32.xlu0 %v2540_v18, %s7296_s13  ;;  %v9159_v18 = vrot.slane %v9039_v23, %v7717_v21 }
 0xcca   : > { %13243 = vst [vmem:[#allocation140_spill] sm:$0xff] %v9159_v18 }
 0xccc   : > { %2576 = vperm.xlu0 %6948, %v8551_v10   ;;  %6950 = vset.pattern.permute.xlu1 %v13236_v34 }
 0xcd0   : > { %6949 = vset.pattern.permute.xlu0 %v13236_v34 }
 0xd2e   : > { %v9143_v7 = vpop.permute.xlu1 %2547  ;;  %v9145_v28 = vpop.permute.xlu0 %2549 }
 0xd2f   : > { %13237 = vst [vmem:[#allocation134_spill] sm:$0xff] %v9143_v7  ;;  %13238 = vst [vmem:[#allocation135_spill] sm:$0xff] %v9145_v28 }
 0xd32   : > { %v9147_v62 = vpop.permute.xlu1 %2551 }
 0xd33   : > { %13239 = vst [vmem:[#allocation136_spill] sm:$0xff] %v9147_v62 }
 0xd36   : > { %v9149_v41 = vpop.permute.xlu0 %2553  ;;  %v9151_v15 = vpop.permute.xlu1 %2555 }
 0xd37   : > { %13240 = vst [vmem:[#allocation137_spill] sm:$0xff] %v9149_v41  ;;  %13241 = vst [vmem:[#allocation138_spill] sm:$0xff] %v9151_v15  ;;  %v9167_v41 = vrot.slane %v9023_v2, %v7717_v21 }
 0xd39   : > { %13245 = vst [vmem:[#allocation142_spill] sm:$0xff] %v9167_v41 }
 0xd3a   : > { %v9161_v22 = vpop.permute.xlu0 %2557 }
 0xd3b   : > { %13244 = vst [vmem:[#allocation141_spill] sm:$0xff] %v9161_v22 }
 0xd47   : > { %v2573_v34 = vpop.permute.xlu1 %2572 }
 0xd48   : > { %v2591_v7 = vmul.f32 %v9155_v6, %v2573_v34  ;;  %v2593_v28 = vmul.f32 %v9159_v18, %v2573_v34  ;;  %v2592_v62 = vmul.f32 %v9167_v41, %v2573_v34 }
 0xd4a   : > { %2607 = vrot.lane.b32.xlu0 %v2593_v28, %s7296_s13  ;;  %2603 = vrot.lane.b32.xlu1 %v2591_v7, %s7296_s13  ;;  %v13246_v7 = vmov 29  }
 0xd4b   : > { %v2577_v15 = vpop.permute.xlu0 %2576 }
 0xd4c   : > { %v2595_v39 = vmul.f32 %v9167_v41, %v2577_v15  ;;  %v2594_v22 = vmul.f32 %v9155_v6, %v2577_v15  ;;  %v2596_v21 = vmul.f32 %v9159_v18, %v2577_v15 }
 0xd4e   : > { %2611 = vrot.lane.b32.xlu0 %v2595_v39, %s7296_s13  ;;  %2605 = vrot.lane.b32.xlu1 %v2592_v62, %s7296_s13 }
 0xd52   : > { %2628 = vperm.xlu0 %6949, %v8540_v50   ;;  %2609 = vrot.lane.b32.xlu1 %v2594_v22, %s7296_s13  ;;  %v9195_v22 = vrot.slane %v9018_v56, %v8845_v47 }
 0xd54   : > { %13252 = vst [vmem:[#allocation148_spill] sm:$0xff] %v9195_v22 }
 0xd56   : > { %2613 = vrot.lane.b32.xlu1 %v2596_v21, %s7296_s13  ;;  %6952 = vset.pattern.permute.xlu0 %v13246_v7  ;;  %v9199_v21 = vrot.slane %v9023_v2, %v8845_v47 }
 0xd58   : > { %13253 = vst [vmem:[#allocation149_spill] sm:$0xff] %v9199_v21 }
 0xd5a   : > { %2632 = vperm.xlu1 %6950, %v8551_v10  }
 0xd5e   : > { %6951 = vset.pattern.permute.xlu1 %v13246_v7 }
 0xdbc   : > { %v9183_v28 = vpop.permute.xlu1 %2603  ;;  %v9185_v39 = vpop.permute.xlu0 %2607 }
 0xdbd   : > { %13247 = vst [vmem:[#allocation143_spill] sm:$0xff] %v9183_v28  ;;  %13248 = vst [vmem:[#allocation144_spill] sm:$0xff] %v9185_v39  ;;  %v9205_v39 = vrot.slane %v9039_v23, %v8845_v47 }
 0xdbf   : > { %13254 = vst [vmem:[#allocation150_spill] sm:$0xff] %v9205_v39 }
 0xdc0   : > { %v9187_v62 = vpop.permute.xlu1 %2605  ;;  %v9189_v34 = vpop.permute.xlu0 %2611 }
 0xdc1   : > { %13249 = vst [vmem:[#allocation145_spill] sm:$0xff] %v9187_v62  ;;  %13250 = vst [vmem:[#allocation146_spill] sm:$0xff] %v9189_v34 }
 0xdc4   : > { %v9191_v36 = vpop.permute.xlu1 %2609 }
 0xdc5   : > { %13251 = vst [vmem:[#allocation147_spill] sm:$0xff] %v9191_v36 }
 0xdc8   : > { %v9209_v36 = vpop.permute.xlu1 %2613 }
 0xdc9   : > { %13255 = vst [vmem:[#allocation151_spill] sm:$0xff] %v9209_v36 }
 0xdd1   : > { %v2629_v15 = vpop.permute.xlu0 %2628 }
 0xdd2   : > { %v2647_v7 = vmul.f32 %v9195_v22, %v2629_v15  ;;  %v2648_v28 = vmul.f32 %v9199_v21, %v2629_v15  ;;  %v2649_v34 = vmul.f32 %v9205_v39, %v2629_v15 }
 0xdd4   : > { %2661 = vrot.lane.b32.xlu0 %v2648_v28, %s7296_s13  ;;  %2659 = vrot.lane.b32.xlu1 %v2647_v7, %s7296_s13  ;;  %v13256_v28 = vmov 30  }
 0xdd8   : > { %2663 = vrot.lane.b32.xlu1 %v2649_v34, %s7296_s13 }
 0xdd9   : > { %v2633_v62 = vpop.permute.xlu1 %2632 }
 0xdda   : > { %v2650_v17 = vmul.f32 %v9195_v22, %v2633_v62  ;;  %v2651_v55 = vmul.f32 %v9199_v21, %v2633_v62  ;;  %v2652_v47 = vmul.f32 %v9205_v39, %v2633_v62  ;;  %v9235_v62 = vrot.slane %v9018_v56, %v8890_v1 }
 0xddc   : > { %2667 = vrot.lane.b32.xlu1 %v2651_v55, %s7296_s13  ;;  %2665 = vrot.lane.b32.xlu0 %v2650_v17, %s7296_s13  ;;  %13262 = vst [vmem:[#allocation157_spill] sm:$0xff] %v9235_v62 }
 0xde0   : > { %2684 = vperm.xlu1 %6951, %v8540_v50   ;;  %2669 = vrot.lane.b32.xlu0 %v2652_v47, %s7296_s13  ;;  %v9239_v47 = vrot.slane %v9039_v23, %v8890_v1 }
 0xde2   : > { %13263 = vst [vmem:[#allocation158_spill] sm:$0xff] %v9239_v47 }
 0xde4   : > { %2688 = vperm.xlu0 %6952, %v8551_v10   ;;  %6954 = vset.pattern.permute.xlu1 %v13256_v28 }
 0xde8   : > { %6953 = vset.pattern.permute.xlu0 %v13256_v28 }
 0xe46   : > { %v9223_v34 = vpop.permute.xlu1 %2659  ;;  %v9225_v15 = vpop.permute.xlu0 %2661 }
 0xe47   : > { %13257 = vst [vmem:[#allocation152_spill] sm:$0xff] %v9223_v34  ;;  %13258 = vst [vmem:[#allocation153_spill] sm:$0xff] %v9225_v15 }
 0xe4a   : > { %v9227_v7 = vpop.permute.xlu1 %2663 }
 0xe4b   : > { %13259 = vst [vmem:[#allocation154_spill] sm:$0xff] %v9227_v7 }
 0xe4e   : > { %v9229_v55 = vpop.permute.xlu0 %2665  ;;  %v9231_v17 = vpop.permute.xlu1 %2667 }
 0xe4f   : > { %13260 = vst [vmem:[#allocation155_spill] sm:$0xff] %v9229_v55  ;;  %13261 = vst [vmem:[#allocation156_spill] sm:$0xff] %v9231_v17  ;;  %v9247_v55 = vrot.slane %v9023_v2, %v8890_v1 }
 0xe51   : > { %13265 = vst [vmem:[#allocation160_spill] sm:$0xff] %v9247_v55 }
 0xe52   : > { %v9241_v36 = vpop.permute.xlu0 %2669 }
 0xe53   : > { %13264 = vst [vmem:[#allocation159_spill] sm:$0xff] %v9241_v36 }
 0xe5f   : > { %v2685_v28 = vpop.permute.xlu1 %2684 }
 0xe60   : > { %v2703_v34 = vmul.f32 %v9235_v62, %v2685_v28  ;;  %v2705_v15 = vmul.f32 %v9239_v47, %v2685_v28  ;;  %v2704_v7 = vmul.f32 %v9247_v55, %v2685_v28 }
 0xe62   : > { %2719 = vrot.lane.b32.xlu0 %v2705_v15, %s7296_s13  ;;  %2715 = vrot.lane.b32.xlu1 %v2703_v34, %s7296_s13  ;;  %v13266_v34 = vmov 31  }
 0xe63   : > { %v2689_v17 = vpop.permute.xlu0 %2688 }
 0xe64   : > { %v2707_v19 = vmul.f32 %v9247_v55, %v2689_v17  ;;  %v2706_v36 = vmul.f32 %v9235_v62, %v2689_v17  ;;  %v2708_v1 = vmul.f32 %v9239_v47, %v2689_v17 }
 0xe66   : > { %2723 = vrot.lane.b32.xlu0 %v2707_v19, %s7296_s13  ;;  %2717 = vrot.lane.b32.xlu1 %v2704_v7, %s7296_s13 }
 0xe6a   : > { %2740 = vperm.xlu0 %6953, %v8540_v50   ;;  %2721 = vrot.lane.b32.xlu1 %v2706_v36, %s7296_s13  ;;  %v9275_v36 = vrot.slane %v9018_v56, %v8931_v27 }
 0xe6c   : > { %13272 = vst [vmem:[#allocation166_spill] sm:$0xff] %v9275_v36 }
 0xe6e   : > { %2725 = vrot.lane.b32.xlu1 %v2708_v1, %s7296_s13  ;;  %6956 = vset.pattern.permute.xlu0 %v13266_v34  ;;  %v9279_v1 = vrot.slane %v9023_v2, %v8931_v27 }
 0xe70   : > { %13273 = vst [vmem:[#allocation167_spill] sm:$0xff] %v9279_v1 }
 0xe72   : > { %2744 = vperm.xlu1 %6954, %v8551_v10  }
 0xe76   : > { %6955 = vset.pattern.permute.xlu1 %v13266_v34 }
 0xed4   : > { %v9263_v15 = vpop.permute.xlu1 %2715  ;;  %v9265_v19 = vpop.permute.xlu0 %2719 }
 0xed5   : > { %13267 = vst [vmem:[#allocation161_spill] sm:$0xff] %v9263_v15  ;;  %13268 = vst [vmem:[#allocation162_spill] sm:$0xff] %v9265_v19  ;;  %v9285_v19 = vrot.slane %v9039_v23, %v8931_v27 }
 0xed7   : > { %13274 = vst [vmem:[#allocation168_spill] sm:$0xff] %v9285_v19 }
 0xed8   : > { %v9267_v7 = vpop.permute.xlu1 %2717  ;;  %v9269_v28 = vpop.permute.xlu0 %2723 }
 0xed9   : > { %13269 = vst [vmem:[#allocation163_spill] sm:$0xff] %v9267_v7  ;;  %13270 = vst [vmem:[#allocation164_spill] sm:$0xff] %v9269_v28 }
 0xedc   : > { %v9271_v30 = vpop.permute.xlu1 %2721 }
 0xedd   : > { %13271 = vst [vmem:[#allocation165_spill] sm:$0xff] %v9271_v30 }
 0xee0   : > { %v9289_v30 = vpop.permute.xlu1 %2725 }
 0xee1   : > { %13275 = vst [vmem:[#allocation169_spill] sm:$0xff] %v9289_v30  ;;  %v7325_v30 = vmov 39  }
 0xee9   : > { %v2741_v17 = vpop.permute.xlu0 %2740 }
 0xeea   : > { %v2759_v34 = vmul.f32 %v9275_v36, %v2741_v17  ;;  %v2760_v15 = vmul.f32 %v9279_v1, %v2741_v17  ;;  %v2761_v28 = vmul.f32 %v9285_v19, %v2741_v17 }
 0xeec   : > { %2773 = vrot.lane.b32.xlu0 %v2760_v15, %s7296_s13  ;;  %2771 = vrot.lane.b32.xlu1 %v2759_v34, %s7296_s13  ;;  %v13276_v15 = vmov 32  }
 0xef0   : > { %2775 = vrot.lane.b32.xlu1 %v2761_v28, %s7296_s13 }
 0xef1   : > { %v2745_v7 = vpop.permute.xlu1 %2744 }
 0xef2   : > { %v2762_v42 = vmul.f32 %v9275_v36, %v2745_v7  ;;  %v2763_v44 = vmul.f32 %v9279_v1, %v2745_v7  ;;  %v2764_v27 = vmul.f32 %v9285_v19, %v2745_v7 }
 0xef4   : > { %2779 = vrot.lane.b32.xlu1 %v2763_v44, %s7296_s13  ;;  %2777 = vrot.lane.b32.xlu0 %v2762_v42, %s7296_s13 }
 0xef8   : > { %2796 = vperm.xlu1 %6955, %v8540_v50   ;;  %2781 = vrot.lane.b32.xlu0 %v2764_v27, %s7296_s13  ;;  %v9315_v50 = vrot.slane %v9018_v56, %v8976_v52 }
 0xefa   : > { %13282 = vst [vmem:[#allocation175_spill] sm:$0xff] %v9315_v50 }
 0xefc   : > { %2800 = vperm.xlu0 %6956, %v8551_v10   ;;  %6958 = vset.pattern.permute.xlu1 %v13276_v15  ;;  %v9319_v10 = vrot.slane %v9039_v23, %v8976_v52 }
 0xefe   : > { %13283 = vst [vmem:[#allocation176_spill] sm:$0xff] %v9319_v10 }
 0xf00   : > { %6957 = vset.pattern.permute.xlu0 %v13276_v15 }
 0xf5e   : > { %v9303_v28 = vpop.permute.xlu1 %2771  ;;  %v9305_v17 = vpop.permute.xlu0 %2773 }
 0xf5f   : > { %13277 = vst [vmem:[#allocation170_spill] sm:$0xff] %v9303_v28  ;;  %13278 = vst [vmem:[#allocation171_spill] sm:$0xff] %v9305_v17 }
 0xf62   : > { %v9307_v34 = vpop.permute.xlu1 %2775 }
 0xf63   : > { %13279 = vst [vmem:[#allocation172_spill] sm:$0xff] %v9307_v34 }
 0xf66   : > { %v9309_v44 = vpop.permute.xlu0 %2777  ;;  %v9311_v42 = vpop.permute.xlu1 %2779 }
 0xf67   : > { %13280 = vst [vmem:[#allocation173_spill] sm:$0xff] %v9309_v44  ;;  %13281 = vst [vmem:[#allocation174_spill] sm:$0xff] %v9311_v42  ;;  %v9327_v44 = vrot.slane %v9023_v2, %v8976_v52  ;;  %v7328_v52 = vmov 37  }
 0xf69   : > { %13285 = vst [vmem:[#allocation178_spill] sm:$0xff] %v9327_v44 }
 0xf6a   : > { %v9321_v27 = vpop.permute.xlu0 %2781 }
 0xf6b   : > { %13284 = vst [vmem:[#allocation177_spill] sm:$0xff] %v9321_v27 }
 0xf77   : > { %v2797_v7 = vpop.permute.xlu1 %2796 }
 0xf78   : > { %v2815_v15 = vmul.f32 %v9315_v50, %v2797_v7  ;;  %v2817_v28 = vmul.f32 %v9319_v10, %v2797_v7  ;;  %v2816_v34 = vmul.f32 %v9327_v44, %v2797_v7  ;;  %v7323_v7 = vmov 36  }
 0xf7a   : > { %2831 = vrot.lane.b32.xlu0 %v2817_v28, %s7296_s13  ;;  %2827 = vrot.lane.b32.xlu1 %v2815_v15, %s7296_s13  ;;  %v13288_v15 = vmov 34  }
 0xf7b   : > { %v2801_v42 = vpop.permute.xlu0 %2800 }
 0xf7c   : > { %v2819_v17 = vmul.f32 %v9327_v44, %v2801_v42  ;;  %v2818_v27 = vmul.f32 %v9315_v50, %v2801_v42  ;;  %v2820_v28 = vmul.f32 %v9319_v10, %v2801_v42  ;;  %v9361_v42 = vld [vmem:[%s12407_s2 + $0x10] sm:$0xff]  ;;  %v7333_v10 = vmov 48  }
 0xf7e   : > { %2835 = vrot.lane.b32.xlu0 %v2819_v17, %s7296_s13  ;;  %2829 = vrot.lane.b32.xlu1 %v2816_v34, %s7296_s13  ;;  %v9350_v17 = vld [vmem:[%s12407_s2] sm:$0xff]  ;;  %v13286_v34 = vmov 33  }
 0xf82   : > { %2855 = vrot.lane.b32.xlu0 %v8658_v0, %s7295_s12  ;;  %2833 = vrot.lane.b32.xlu1 %v2818_v27, %s7296_s13  ;;  %v13287_v27 = vmov 35  }
 0xf86   : > { %2859 = vrot.lane.b32.xlu0 %v8674_v33, %s7295_s12  ;;  %2837 = vrot.lane.b32.xlu1 %v2820_v28, %s7296_s13  ;;  %v7324_v28 = vmov 38  }
 0xf8a   : > { %2863 = vrot.lane.b32.xlu0 %v9023_v2, %s7295_s12  ;;  %2857 = vrot.lane.b32.xlu1 %v8661_v48, %s7295_s12 }
 0xf8e   : > { %2880 = vperm.xlu0 %6957, %v9350_v17   ;;  %2861 = vrot.lane.b32.xlu1 %v9018_v56, %s7295_s12 }
 0xf92   : > { %6960 = vset.pattern.permute.xlu0 %v13286_v34  ;;  %2865 = vrot.lane.b32.xlu1 %v9039_v23, %s7295_s12  ;;  %s7417_s12 = smov [#allocation5]  }
 0xf93   : > { %2908 = vperm.xlu0 %6960, %v9361_v42   ;;  %s7211_s8 = sshll.u32 %s7417_s12, 4  ;;  %s7212_s8 = int_to_ptr.vmem [resolvable:$false] %s7211_s8 }
 0xf94   : > { %s7213_s30 = scalar_lea.vmem %s7212_s8, 1024 }
 0xf96   : > { %2884 = vperm.xlu1 %6958, %v9361_v42  }
 0xf97   : > { %6962 = vset.pattern.permute.xlu0 %v13287_v27 }
 0xf98   : > { %2952 = vperm.xlu0 %6962, %v9350_v17  }
 0xf9a   : > { %6959 = vset.pattern.permute.xlu1 %v13286_v34  ;;  %v7326_v34 = vmov 41  }
 0xf9b   : > { %2904 = vperm.xlu1 %6959, %v9350_v17  }
 0xf9c   : > { %6965 = vset.pattern.permute.xlu0 %v7323_v7 }
 0xf9d   : > { %2980 = vperm.xlu0 %6965, %v9361_v42  }
 0xf9f   : > { %6961 = vset.pattern.permute.xlu1 %v13288_v15  ;;  %v7327_v15 = vmov 42  }
 0xfa0   : > { %2928 = vperm.xlu1 %6961, %v9350_v17  }
 0xfa1   : > { %6967 = vset.pattern.permute.xlu0 %v7324_v28 }
 0xfa2   : > { %3024 = vperm.xlu0 %6967, %v9350_v17  }
 0xfa4   : > { %2932 = vperm.xlu1 %6961, %v9361_v42  }
 0xfa6   : > { %6970 = vset.pattern.permute.xlu0 %v7325_v30 }
 0xfa7   : > { %3052 = vperm.xlu0 %6970, %v9361_v42  }
 0xfa8   : > { %6963 = vset.pattern.permute.xlu1 %v13287_v27  ;;  %v7330_v27 = vmov 45  }
 0xfa9   : > { %2956 = vperm.xlu1 %6963, %v9361_v42  }
 0xfab   : > { %6972 = vset.pattern.permute.xlu0 %v7326_v34 }
 0xfac   : > { %3096 = vperm.xlu0 %6972, %v9350_v17  }
 0xfad   : > { %6964 = vset.pattern.permute.xlu1 %v7323_v7  ;;  %v7331_v7 = vmov 47  }
 0xfae   : > { %2976 = vperm.xlu1 %6964, %v9350_v17  }
 0xfb0   : > { %6975 = vset.pattern.permute.xlu0 %v7327_v15 }
 0xfb1   : > { %3124 = vperm.xlu0 %6975, %v9361_v42  }
 0xfb2   : > { %6966 = vset.pattern.permute.xlu1 %v7328_v52  ;;  %v7332_v52 = vmov 40  }
 0xfb3   : > { %3000 = vperm.xlu1 %6966, %v9350_v17  }
 0xfb5   : > { %6977 = vset.pattern.permute.xlu0 %v7329_v49 }
 0xfb6   : > { %3168 = vperm.xlu0 %6977, %v9350_v17  }
 0xfb7   : > { %3004 = vperm.xlu1 %6966, %v9361_v42  }
 0xfba   : > { %6980 = vset.pattern.permute.xlu0 %v7330_v27 }
 0xfbb   : > { %3196 = vperm.xlu0 %6980, %v9361_v42   ;;  %6968 = vset.pattern.permute.xlu1 %v7324_v28  ;;  %v7335_v28 = vmov 43  }
 0xfbc   : > { %3028 = vperm.xlu1 %6968, %v9361_v42  }
 0xfbf   : > { %6982 = vset.pattern.permute.xlu0 %v7331_v7 }
 0xfc0   : > { %3240 = vperm.xlu0 %6982, %v9350_v17   ;;  %6969 = vset.pattern.permute.xlu1 %v7325_v30  ;;  %v7334_v30 = vmov 50  }
 0xfc1   : > { %3048 = vperm.xlu1 %6969, %v9350_v17  }
 0xfc4   : > { %3265 = vrot.lane.b32.xlu0 %v8661_v48, %s7294_s11 }
 0xfc5   : > { %6971 = vset.pattern.permute.xlu1 %v7332_v52  ;;  %6985 = vset.pattern.permute.xlu0 %v7333_v10  ;;  %v7336_v52 = vmov 51  }
 0xfc6   : > { %3072 = vperm.xlu1 %6971, %v9350_v17  }
 0xfc8   : > { %3269 = vrot.lane.b32.xlu0 %v9018_v56, %s7294_s11 }
 0xfca   : > { %3076 = vperm.xlu1 %6971, %v9361_v42  }
 0xfcc   : > { %3273 = vrot.lane.b32.xlu0 %v9039_v23, %s7294_s11  ;;  %v7340_v23 = vmov 46  }
 0xfce   : > { %6973 = vset.pattern.permute.xlu1 %v7326_v34  ;;  %v7337_v34 = vmov 53  }
 0xfcf   : > { %3100 = vperm.xlu1 %6973, %v9361_v42  }
 0xfd0   : > { %3292 = vperm.xlu0 %6985, %v9361_v42  }
 0xfd3   : > { %6974 = vset.pattern.permute.xlu1 %v7327_v15  ;;  %v7338_v15 = vmov 54  }
 0xfd4   : > { %3120 = vperm.xlu1 %6974, %v9350_v17   ;;  %6987 = vset.pattern.permute.xlu0 %v7334_v30 }
 0xfd5   : > { %3336 = vperm.xlu0 %6987, %v9350_v17  }
 0xfd8   : > { %6976 = vset.pattern.permute.xlu1 %v7335_v28  ;;  %v12639_v28 = vmov 56  }
 0xfd9   : > { %3144 = vperm.xlu1 %6976, %v9350_v17   ;;  %6990 = vset.pattern.permute.xlu0 %v7336_v52 }
 0xfda   : > { %3364 = vperm.xlu0 %6990, %v9361_v42  }
 0xfdd   : > { %3148 = vperm.xlu1 %6976, %v9361_v42  }
 0xfde   : > { %6992 = vset.pattern.permute.xlu0 %v7337_v34 }
 0xfdf   : > { %3408 = vperm.xlu0 %6992, %v9350_v17  }
 0xfe1   : > { %6978 = vset.pattern.permute.xlu1 %v7329_v49  ;;  %v7341_v49 = vmov 57  }
 0xfe2   : > { %3172 = vperm.xlu1 %6978, %v9361_v42  }
 0xfe3   : > { %6995 = vset.pattern.permute.xlu0 %v7338_v15 }
 0xfe4   : > { %3436 = vperm.xlu0 %6995, %v9361_v42  }
 0xfe6   : > { %6979 = vset.pattern.permute.xlu1 %v7330_v27  ;;  %v12640_v27 = vmov 59  }
 0xfe7   : > { %3192 = vperm.xlu1 %6979, %v9350_v17  }
 0xfe8   : > { %6997 = vset.pattern.permute.xlu0 %v12639_v28 }
 0xfe9   : > { %3480 = vperm.xlu0 %6997, %v9350_v17  }
 0xfeb   : > { %6981 = vset.pattern.permute.xlu1 %v7340_v23  ;;  %v7343_v23 = vmov 60  }
 0xfec   : > { %3216 = vperm.xlu1 %6981, %v9350_v17   ;;  %v9409_v56 = vpop.permute.xlu1 %2827 }
 0xfed   : > { %13289 = vst [vmem:[#allocation179_spill] sm:$0xff] %v9409_v56  ;;  %7000 = vset.pattern.permute.xlu0 %v7341_v49  ;;  %v12641_v56 = vmov 62  }
 0xfee   : > { %3508 = vperm.xlu0 %7000, %v9361_v42  }
 0xff0   : > { %3220 = vperm.xlu1 %6981, %v9361_v42   ;;  %v9414_v48 = vpop.permute.xlu1 %2829 }
 0xff1   : > { %13290 = vst [vmem:[#allocation180_spill] sm:$0xff] %v9414_v48 }
 0xff2   : > { %7002 = vset.pattern.permute.xlu0 %v12640_v27  ;;  %v7345_v27 = vmov 63  }
 0xff3   : > { %3552 = vperm.xlu0 %7002, %v9350_v17  }
 0xff4   : > { %6983 = vset.pattern.permute.xlu1 %v7331_v7  ;;  %v9419_v28 = vpop.permute.xlu1 %2833 }
 0xff5   : > { %3244 = vperm.xlu1 %6983, %v9361_v42   ;;  %13291 = vst [vmem:[#allocation181_spill] sm:$0xff] %v9419_v28 }
 0xff7   : > { %7005 = vset.pattern.permute.xlu0 %v7343_v23 }
 0xff8   : > { %3580 = vperm.xlu0 %7005, %v9361_v42   ;;  %v9427_v7 = vpop.permute.xlu1 %2837 }
 0xff9   : > { %3263 = vrot.lane.b32.xlu1 %v8658_v0, %s7294_s11  ;;  %13292 = vst [vmem:[#allocation182_spill] sm:$0xff] %v9427_v7 }
 0xffa   : > { %6984 = vset.pattern.permute.xlu1 %v7333_v10  ;;  %v7346_v10 = vmov 49  }
 0xffc   : > { %7007 = vset.pattern.permute.xlu0 %v12641_v56  ;;  %v9432_v28 = vpop.permute.xlu1 %2857 }
 0xffd   : > { %3267 = vrot.lane.b32.xlu1 %v8674_v33, %s7294_s11  ;;  %3624 = vperm.xlu0 %7007, %v9350_v17   ;;  %13293 = vst [vmem:[#allocation183_spill] sm:$0xff] %v9432_v28 }
0x1000   : > { %v9436_v56 = vpop.permute.xlu1 %2861 }
0x1001   : > { %3271 = vrot.lane.b32.xlu1 %v9023_v2, %s7294_s11  ;;  %7010 = vset.pattern.permute.xlu0 %v7345_v27  ;;  %13294 = vst [vmem:[#allocation184_spill] sm:$0xff] %v9436_v56  ;;  %v7347_v2 = vmov 52  }
0x1002   : > { %3652 = vperm.xlu0 %7010, %v9361_v42  }
0x1004   : > { %v9439_v7 = vpop.permute.xlu1 %2865 }
0x1005   : > { %3288 = vperm.xlu1 %6984, %v9350_v17   ;;  %13295 = vst [vmem:[#allocation185_spill] sm:$0xff] %v9439_v7  ;;  %v7348_v7 = vmov 55  }
0x1009   : > { %6986 = vset.pattern.permute.xlu1 %v7346_v10 }
0x100a   : > { %3312 = vperm.xlu1 %6986, %v9350_v17  }
0x100e   : > { %3316 = vperm.xlu1 %6986, %v9361_v42  }
0x1012   : > { %6988 = vset.pattern.permute.xlu1 %v7334_v30 }
0x1013   : > { %3340 = vperm.xlu1 %6988, %v9361_v42  }
0x1015   : > { %v9442_v48 = vpop.permute.xlu1 %2884 }
0x1016   : > { %13296 = vst [vmem:[#allocation186_spill] sm:$0xff] %v9442_v48 }
0x1017   : > { %6989 = vset.pattern.permute.xlu1 %v7336_v52 }
0x1018   : > { %3360 = vperm.xlu1 %6989, %v9350_v17  }
0x101a   : > { %v9445_v28 = vpop.permute.xlu1 %2904 }
0x101b   : > { %13297 = vst [vmem:[#allocation187_spill] sm:$0xff] %v9445_v28 }
0x101c   : > { %6991 = vset.pattern.permute.xlu1 %v7347_v2 }
0x101d   : > { %3384 = vperm.xlu1 %6991, %v9350_v17  }
0x101f   : > { %v9448_v10 = vpop.permute.xlu1 %2928 }
0x1020   : > { %13298 = vst [vmem:[#allocation188_spill] sm:$0xff] %v9448_v10 }
0x1021   : > { %3388 = vperm.xlu1 %6991, %v9361_v42  }
0x1023   : > { %v9451_v56 = vpop.permute.xlu1 %2932 }
0x1024   : > { %13299 = vst [vmem:[#allocation189_spill] sm:$0xff] %v9451_v56 }
0x1025   : > { %6993 = vset.pattern.permute.xlu1 %v7337_v34  ;;  %v13304_v34 = vmov 56  }
0x1026   : > { %3412 = vperm.xlu1 %6993, %v9361_v42  }
0x1028   : > { %v9454_v30 = vpop.permute.xlu1 %2956 }
0x1029   : > { %13300 = vst [vmem:[#allocation190_spill] sm:$0xff] %v9454_v30 }
0x102a   : > { %6994 = vset.pattern.permute.xlu1 %v7338_v15 }
0x102b   : > { %3432 = vperm.xlu1 %6994, %v9350_v17  }
0x102d   : > { %v9457_v52 = vpop.permute.xlu1 %2976 }
0x102e   : > { %13301 = vst [vmem:[#allocation191_spill] sm:$0xff] %v9457_v52 }
0x102f   : > { %6996 = vset.pattern.permute.xlu1 %v7348_v7  ;;  %v7349_v7 = vmov 58  }
0x1030   : > { %3456 = vperm.xlu1 %6996, %v9350_v17  }
0x1032   : > { %v9460_v2 = vpop.permute.xlu1 %3000 }
0x1033   : > { %13302 = vst [vmem:[#allocation192_spill] sm:$0xff] %v9460_v2 }
0x1034   : > { %3460 = vperm.xlu1 %6996, %v9361_v42  }
0x1036   : > { %v9463_v10 = vpop.permute.xlu1 %3004 }
0x1037   : > { %13303 = vst [vmem:[#allocation193_spill] sm:$0xff] %v9463_v10 }
0x1038   : > { %6998 = vset.pattern.permute.xlu1 %v13304_v34  ;;  %v13309_v34 = vmov 59  }
0x1039   : > { %3484 = vperm.xlu1 %6998, %v9361_v42  }
0x103b   : > { %v9467_v30 = vpop.permute.xlu1 %3028 }
0x103c   : > { %13305 = vst [vmem:[#allocation194_spill] sm:$0xff] %v9467_v30 }
0x103d   : > { %6999 = vset.pattern.permute.xlu1 %v7341_v49 }
0x103e   : > { %3504 = vperm.xlu1 %6999, %v9350_v17  }
0x1040   : > { %v9470_v15 = vpop.permute.xlu1 %3048 }
0x1041   : > { %13306 = vst [vmem:[#allocation195_spill] sm:$0xff] %v9470_v15 }
0x1042   : > { %7001 = vset.pattern.permute.xlu1 %v7349_v7  ;;  %v7350_v7 = vmov 61  }
0x1043   : > { %3528 = vperm.xlu1 %7001, %v9350_v17  }
0x1045   : > { %v9473_v2 = vpop.permute.xlu1 %3072 }
0x1046   : > { %13307 = vst [vmem:[#allocation196_spill] sm:$0xff] %v9473_v2 }
0x1047   : > { %3532 = vperm.xlu1 %7001, %v9361_v42  }
0x1049   : > { %v9476_v10 = vpop.permute.xlu1 %3076 }
0x104a   : > { %13308 = vst [vmem:[#allocation197_spill] sm:$0xff] %v9476_v10 }
0x104b   : > { %7003 = vset.pattern.permute.xlu1 %v13309_v34  ;;  %v13314_v34 = vmov 62  }
0x104c   : > { %3556 = vperm.xlu1 %7003, %v9361_v42  }
0x104e   : > { %v9480_v30 = vpop.permute.xlu1 %3100 }
0x104f   : > { %13310 = vst [vmem:[#allocation198_spill] sm:$0xff] %v9480_v30 }
0x1050   : > { %7004 = vset.pattern.permute.xlu1 %v7343_v23 }
0x1051   : > { %3576 = vperm.xlu1 %7004, %v9350_v17  }
0x1053   : > { %v9483_v49 = vpop.permute.xlu1 %3120 }
0x1054   : > { %13311 = vst [vmem:[#allocation199_spill] sm:$0xff] %v9483_v49  ;;  %v7352_v49 = vmov 65  }
0x1055   : > { %7006 = vset.pattern.permute.xlu1 %v7350_v7  ;;  %v7351_v7 = vmov 64   ;;  %7012 = vset.pattern.permute.xlu0 %v7352_v49 }
0x1056   : > { %3600 = vperm.xlu1 %7006, %v9350_v17  }
0x1058   : > { %v9486_v2 = vpop.permute.xlu1 %3144 }
0x1059   : > { %13312 = vst [vmem:[#allocation200_spill] sm:$0xff] %v9486_v2 }
0x105a   : > { %3604 = vperm.xlu1 %7006, %v9361_v42  }
0x105c   : > { %v9489_v10 = vpop.permute.xlu1 %3148 }
0x105d   : > { %13313 = vst [vmem:[#allocation201_spill] sm:$0xff] %v9489_v10 }
0x105e   : > { %7008 = vset.pattern.permute.xlu1 %v13314_v34 }
0x105f   : > { %3628 = vperm.xlu1 %7008, %v9361_v42  }
0x1061   : > { %v9493_v30 = vpop.permute.xlu1 %3172 }
0x1062   : > { %13315 = vst [vmem:[#allocation202_spill] sm:$0xff] %v9493_v30 }
0x1063   : > { %7009 = vset.pattern.permute.xlu1 %v7345_v27 }
0x1064   : > { %3648 = vperm.xlu1 %7009, %v9350_v17  }
0x1066   : > { %v9496_v23 = vpop.permute.xlu1 %3192 }
0x1067   : > { %13316 = vst [vmem:[#allocation203_spill] sm:$0xff] %v9496_v23 }
0x1068   : > { %7011 = vset.pattern.permute.xlu1 %v7351_v7 }
0x1069   : > { %3672 = vperm.xlu1 %7011, %v9350_v17  }
0x106b   : > { %v9499_v2 = vpop.permute.xlu1 %3216 }
0x106c   : > { %13317 = vst [vmem:[#allocation204_spill] sm:$0xff] %v9499_v2 }
0x106d   : > { %3676 = vperm.xlu1 %7011, %v9361_v42  }
0x106f   : > { %v9502_v10 = vpop.permute.xlu1 %3220 }
0x1070   : > { %13318 = vst [vmem:[#allocation205_spill] sm:$0xff] %v9502_v10 }
0x1071   : > { %7013 = vset.pattern.permute.xlu1 %v7352_v49 }
0x1074   : > { %v9504_v34 = vpop.permute.xlu1 %3244 }
0x1075   : > { %13319 = vst [vmem:[#allocation206_spill] sm:$0xff] %v9504_v34 }
0x1078   : > { %v9506_v27 = vpop.permute.xlu1 %3263 }
0x1079   : > { %13320 = vst [vmem:[#allocation207_spill] sm:$0xff] %v9506_v27 }
0x107c   : > { %v9508_v30 = vpop.permute.xlu1 %3267 }
0x107d   : > { %13321 = vst [vmem:[#allocation208_spill] sm:$0xff] %v9508_v30 }
0x1080   : > { %v9510_v23 = vpop.permute.xlu1 %3271 }
0x1081   : > { %13322 = vst [vmem:[#allocation209_spill] sm:$0xff] %v9510_v23 }
0x1084   : > { %v9512_v7 = vpop.permute.xlu1 %3288 }
0x1085   : > { %13323 = vst [vmem:[#allocation210_spill] sm:$0xff] %v9512_v7  ;;  %v9534_v7 = vpop.permute.xlu0 %2831 }
0x1086   : > { %13334 = vst [vmem:[#allocation221_spill] sm:$0xff] %v9534_v7 }
0x1089   : > { %v9514_v15 = vpop.permute.xlu1 %3312 }
0x108a   : > { %13324 = vst [vmem:[#allocation211_spill] sm:$0xff] %v9514_v15 }
0x108d   : > { %v9516_v2 = vpop.permute.xlu1 %3316 }
0x108e   : > { %13325 = vst [vmem:[#allocation212_spill] sm:$0xff] %v9516_v2 }
0x1092   : > { %v9518_v52 = vpop.permute.xlu1 %3340 }
0x1093   : > { %13326 = vst [vmem:[#allocation213_spill] sm:$0xff] %v9518_v52  ;;  %v9540_v52 = vpop.permute.xlu0 %2835 }
0x1094   : > { %13337 = vst [vmem:[#allocation224_spill] sm:$0xff] %v9540_v52 }
0x1097   : > { %v9520_v10 = vpop.permute.xlu1 %3360 }
0x1098   : > { %13327 = vst [vmem:[#allocation214_spill] sm:$0xff] %v9520_v10 }
0x109c   : > { %v9522_v34 = vpop.permute.xlu1 %3384 }
0x109d   : > { %13328 = vst [vmem:[#allocation215_spill] sm:$0xff] %v9522_v34  ;;  %v9544_v34 = vpop.permute.xlu0 %2855 }
0x10a0   : > { %v9524_v56 = vpop.permute.xlu1 %3388 }
0x10a1   : > { %13329 = vst [vmem:[#allocation216_spill] sm:$0xff] %v9524_v56 }
0x10a5   : > { %v9526_v49 = vpop.permute.xlu1 %3412 }
0x10a6   : > { %13330 = vst [vmem:[#allocation217_spill] sm:$0xff] %v9526_v49  ;;  %v9548_v49 = vpop.permute.xlu0 %2859 }
0x10aa   : > { %v9528_v27 = vpop.permute.xlu1 %3432 }
0x10ab   : > { %13331 = vst [vmem:[#allocation218_spill] sm:$0xff] %v9528_v27 }
0x10af   : > { %v9530_v30 = vpop.permute.xlu1 %3456 }
0x10b0   : > { %13332 = vst [vmem:[#allocation219_spill] sm:$0xff] %v9530_v30  ;;  %v9552_v30 = vpop.permute.xlu0 %2863 }
0x10b1   : > { %13341 = vst [vmem:[#allocation228_spill] sm:$0xff] %v9552_v30 }
0x10b3   : > { %v9532_v23 = vpop.permute.xlu1 %3460 }
0x10b4   : > { %13333 = vst [vmem:[#allocation220_spill] sm:$0xff] %v9532_v23  ;;  %v9556_v28 = vpop.permute.xlu0 %2880 }
0x10b5   : > { %13343 = vst [vmem:[#allocation230_spill] sm:$0xff] %v9556_v28 }
0x10b8   : > { %v9536_v15 = vpop.permute.xlu1 %3484  ;;  %v9562_v48 = vpop.permute.xlu0 %2908 }
0x10b9   : > { %13335 = vst [vmem:[#allocation222_spill] sm:$0xff] %v9536_v15  ;;  %13346 = vst [vmem:[#allocation233_spill] sm:$0xff] %v9562_v48 }
0x10bc   : > { %v9566_v52 = vpop.permute.xlu0 %2952 }
0x10bd   : > { %v9538_v2 = vpop.permute.xlu1 %3504  ;;  %13348 = vst [vmem:[#allocation235_spill] sm:$0xff] %v9566_v52 }
0x10be   : > { %13336 = vst [vmem:[#allocation223_spill] sm:$0xff] %v9538_v2 }
0x10c0   : > { %v9570_v7 = vpop.permute.xlu0 %2980 }
0x10c1   : > { %13350 = vst [vmem:[#allocation237_spill] sm:$0xff] %v9570_v7 }
0x10c2   : > { %v9542_v10 = vpop.permute.xlu1 %3528 }
0x10c3   : > { %13338 = vst [vmem:[#allocation225_spill] sm:$0xff] %v9542_v10 }
0x10c6   : > { %v9546_v56 = vpop.permute.xlu1 %3532 }
0x10c7   : > { %13339 = vst [vmem:[#allocation226_spill] sm:$0xff] %v9546_v56 }
0x10cb   : > { %v9550_v27 = vpop.permute.xlu1 %3556 }
0x10cc   : > { %13340 = vst [vmem:[#allocation227_spill] sm:$0xff] %v9550_v27 }
0x10d0   : > { %v9554_v23 = vpop.permute.xlu1 %3576 }
0x10d1   : > { %13342 = vst [vmem:[#allocation229_spill] sm:$0xff] %v9554_v23 }
0x10d5   : > { %v9558_v15 = vpop.permute.xlu1 %3600 }
0x10d6   : > { %13344 = vst [vmem:[#allocation231_spill] sm:$0xff] %v9558_v15 }
0x10d9   : > { %v9560_v2 = vpop.permute.xlu1 %3604 }
0x10da   : > { %13345 = vst [vmem:[#allocation232_spill] sm:$0xff] %v9560_v2  ;;  %v9576_v2 = vpop.permute.xlu0 %3024 }
0x10db   : > { %13351 = vst [vmem:[#allocation238_spill] sm:$0xff] %v9576_v2 }
0x10de   : > { %v9564_v10 = vpop.permute.xlu1 %3628  ;;  %v9584_v48 = vpop.permute.xlu0 %3052 }
0x10df   : > { %13347 = vst [vmem:[#allocation234_spill] sm:$0xff] %v9564_v10  ;;  %13352 = vst [vmem:[#allocation239_spill] sm:$0xff] %v9584_v48 }
0x10e3   : > { %v9568_v56 = vpop.permute.xlu1 %3648 }
0x10e4   : > { %13349 = vst [vmem:[#allocation236_spill] sm:$0xff] %v9568_v56 }
0x10e8   : > { %v3673_v27 = vpop.permute.xlu1 %3672 }
0x10e9   : > { %v3679_v30 = vmul.f32 %v3673_v27, %v8667_v46  ;;  %v3680_v23 = vmul.f32 %v3673_v27, %v8671_v40  ;;  %v3681_v10 = vmul.f32 %v3673_v27, %v8682_v45 }
0x10eb   : > { %3693 = vrot.lane.b32.xlu1 %v3680_v23, %s7300_s14  ;;  %3691 = vrot.lane.b32.xlu0 %v3679_v30, %s7300_s14  ;;  %v9590_v30 = vpop.permute.xlu0 %3096 }
0x10ec   : > { %v3677_v15 = vpop.permute.xlu1 %3676  ;;  %13353 = vst [vmem:[#allocation240_spill] sm:$0xff] %v9590_v30 }
0x10ed   : > { %v3682_v52 = vmul.f32 %v3677_v15, %v8667_v46  ;;  %v3683_v56 = vmul.f32 %v3677_v15, %v8671_v40  ;;  %v3684_v7 = vmul.f32 %v3677_v15, %v8682_v45 }
0x10ef   : > { %3695 = vrot.lane.b32.xlu0 %v3681_v10, %s7300_s14  ;;  %3697 = vrot.lane.b32.xlu1 %v3682_v52, %s7300_s14  ;;  %v9592_v23 = vpop.permute.xlu0 %3124  ;;  %v7353_v10 = vmov 66  }
0x10f0   : > { %13354 = vst [vmem:[#allocation241_spill] sm:$0xff] %v9592_v23 }
0x10f3   : > { %3699 = vrot.lane.b32.xlu0 %v3683_v56, %s7300_s14  ;;  %3701 = vrot.lane.b32.xlu1 %v3684_v7, %s7300_s14  ;;  %v9594_v52 = vpop.permute.xlu0 %3168 }
0x10f4   : > { %13355 = vst [vmem:[#allocation242_spill] sm:$0xff] %v9594_v52 }
0x10f7   : > { %3716 = vperm.xlu0 %7012, %v9350_v17   ;;  %3720 = vperm.xlu1 %7013, %v9361_v42   ;;  %v9596_v15 = vpop.permute.xlu0 %3196 }
0x10f8   : > { %13356 = vst [vmem:[#allocation243_spill] sm:$0xff] %v9596_v15 }
0x10fb   : > { %7015 = vset.pattern.permute.xlu0 %v7353_v10  ;;  %7014 = vset.pattern.permute.xlu1 %v7353_v10  ;;  %v9598_v27 = vpop.permute.xlu0 %3240 }
0x10fc   : > { %13357 = vst [vmem:[#allocation244_spill] sm:$0xff] %v9598_v27 }
0x10ff   : > { %v9600_v56 = vpop.permute.xlu0 %3265 }
0x1100   : > { %13358 = vst [vmem:[#allocation245_spill] sm:$0xff] %v9600_v56 }
0x1103   : > { %v9602_v7 = vpop.permute.xlu0 %3269 }
0x1104   : > { %13359 = vst [vmem:[#allocation246_spill] sm:$0xff] %v9602_v7 }
0x1107   : > { %v9604_v48 = vpop.permute.xlu0 %3273 }
0x1108   : > { %13360 = vst [vmem:[#allocation247_spill] sm:$0xff] %v9604_v48 }
0x110b   : > { %v9606_v2 = vpop.permute.xlu0 %3292 }
0x110c   : > { %13361 = vst [vmem:[#allocation248_spill] sm:$0xff] %v9606_v2 }
0x110f   : > { %v9608_v30 = vpop.permute.xlu0 %3336 }
0x1110   : > { %13362 = vst [vmem:[#allocation249_spill] sm:$0xff] %v9608_v30 }
0x1113   : > { %v9610_v23 = vpop.permute.xlu0 %3364 }
0x1114   : > { %13363 = vst [vmem:[#allocation250_spill] sm:$0xff] %v9610_v23 }
0x1117   : > { %v9612_v28 = vpop.permute.xlu0 %3408 }
0x1118   : > { %13364 = vst [vmem:[#allocation251_spill] sm:$0xff] %v9612_v28 }
0x111b   : > { %v9614_v10 = vpop.permute.xlu0 %3436 }
0x111c   : > { %13365 = vst [vmem:[#allocation252_spill] sm:$0xff] %v9614_v10 }
0x111f   : > { %v9616_v52 = vpop.permute.xlu0 %3480 }
0x1120   : > { %13366 = vst [vmem:[#allocation253_spill] sm:$0xff] %v9616_v52 }
0x1123   : > { %v9618_v15 = vpop.permute.xlu0 %3508 }
0x1124   : > { %13367 = vst [vmem:[#allocation254_spill] sm:$0xff] %v9618_v15 }
0x1127   : > { %v9620_v27 = vpop.permute.xlu0 %3552 }
0x1128   : > { %13368 = vst [vmem:[#allocation255_spill] sm:$0xff] %v9620_v27 }
0x112b   : > { %v9622_v56 = vpop.permute.xlu0 %3580 }
0x112c   : > { %13369 = vst [vmem:[#allocation256_spill] sm:$0xff] %v9622_v56 }
0x112f   : > { %v9624_v7 = vpop.permute.xlu0 %3624 }
0x1130   : > { %13370 = vst [vmem:[#allocation257_spill] sm:$0xff] %v9624_v7 }
0x1133   : > { %v9626_v48 = vpop.permute.xlu0 %3652 }
0x1134   : > { %13371 = vst [vmem:[#allocation258_spill] sm:$0xff] %v9626_v48 }
0x115d   : > { %v9628_v2 = vpop.permute.xlu0 %3691  ;;  %v9630_v30 = vpop.permute.xlu1 %3693 }
0x115e   : > { %13372 = vst [vmem:[#allocation259_spill] sm:$0xff] %v9628_v2  ;;  %13373 = vst [vmem:[#allocation260_spill] sm:$0xff] %v9630_v30 }
0x1161   : > { %v9632_v23 = vpop.permute.xlu0 %3695  ;;  %v9634_v28 = vpop.permute.xlu1 %3697 }
0x1162   : > { %13374 = vst [vmem:[#allocation261_spill] sm:$0xff] %v9632_v23  ;;  %13375 = vst [vmem:[#allocation262_spill] sm:$0xff] %v9634_v28 }
0x1165   : > { %v9636_v10 = vpop.permute.xlu0 %3699  ;;  %v9638_v52 = vpop.permute.xlu1 %3701 }
0x1166   : > { %13376 = vst [vmem:[#allocation263_spill] sm:$0xff] %v9636_v10  ;;  %13377 = vst [vmem:[#allocation264_spill] sm:$0xff] %v9638_v52 }
0x1176   : > { %v3717_v15 = vpop.permute.xlu0 %3716  ;;  %v3721_v7 = vpop.permute.xlu1 %3720 }
0x1177   : > { %v3723_v27 = vmul.f32 %v3717_v15, %v8730_v26  ;;  %v3724_v56 = vmul.f32 %v3717_v15, %v8742_v63  ;;  %v3725_v48 = vmul.f32 %v3717_v15, %v8734_v13  ;;  %v3726_v23 = vmul.f32 %v3721_v7, %v8730_v26 }
0x1178   : > { %v3727_v52 = vmul.f32 %v3721_v7, %v8742_v63  ;;  %v3728_v28 = vmul.f32 %v3721_v7, %v8734_v13 }
0x1179   : > { %3737 = vrot.lane.b32.xlu0 %v3724_v56, %s7300_s14  ;;  %3735 = vrot.lane.b32.xlu1 %v3723_v27, %s7300_s14  ;;  %v7354_v27 = vmov 67  }
0x117d   : > { %3739 = vrot.lane.b32.xlu1 %v3725_v48, %s7300_s14  ;;  %3741 = vrot.lane.b32.xlu0 %v3726_v23, %s7300_s14 }
0x1181   : > { %3743 = vrot.lane.b32.xlu1 %v3727_v52, %s7300_s14  ;;  %3745 = vrot.lane.b32.xlu0 %v3728_v28, %s7300_s14 }
0x1185   : > { %3760 = vperm.xlu1 %7014, %v9350_v17   ;;  %3764 = vperm.xlu0 %7015, %v9361_v42  }
0x1189   : > { %7016 = vset.pattern.permute.xlu0 %v7354_v27  ;;  %7017 = vset.pattern.permute.xlu1 %v7354_v27 }
0x11eb   : > { %v9654_v15 = vpop.permute.xlu1 %3735  ;;  %v9656_v48 = vpop.permute.xlu0 %3737 }
0x11ec   : > { %13378 = vst [vmem:[#allocation265_spill] sm:$0xff] %v9654_v15 }
0x11ef   : > { %v9658_v23 = vpop.permute.xlu1 %3739  ;;  %v9660_v56 = vpop.permute.xlu0 %3741 }
0x11f0   : > { %13379 = vst [vmem:[#allocation266_spill] sm:$0xff] %v9658_v23  ;;  %13380 = vst [vmem:[#allocation267_spill] sm:$0xff] %v9660_v56 }
0x11f3   : > { %v9662_v7 = vpop.permute.xlu1 %3743  ;;  %v9664_v52 = vpop.permute.xlu0 %3745 }
0x11f4   : > { %13381 = vst [vmem:[#allocation268_spill] sm:$0xff] %v9662_v7  ;;  %13382 = vst [vmem:[#allocation269_spill] sm:$0xff] %v9664_v52 }
0x1204   : > { %v3761_v28 = vpop.permute.xlu1 %3760  ;;  %v3765_v30 = vpop.permute.xlu0 %3764 }
0x1205   : > { %v3767_v10 = vmul.f32 %v3761_v28, %v8770_v57  ;;  %v3769_v2 = vmul.f32 %v3761_v28, %v8780_v31  ;;  %v3768_v27 = vmul.f32 %v3761_v28, %v8774_v9  ;;  %v3771_v23 = vmul.f32 %v3765_v30, %v8774_v9 }
0x1206   : > { %v3770_v52 = vmul.f32 %v3765_v30, %v8770_v57  ;;  %v3772_v56 = vmul.f32 %v3765_v30, %v8780_v31 }
0x1207   : > { %3779 = vrot.lane.b32.xlu1 %v3767_v10, %s7300_s14  ;;  %3783 = vrot.lane.b32.xlu0 %v3769_v2, %s7300_s14  ;;  %v7355_v2 = vmov 68  }
0x120b   : > { %3781 = vrot.lane.b32.xlu1 %v3768_v27, %s7300_s14  ;;  %3787 = vrot.lane.b32.xlu0 %v3771_v23, %s7300_s14 }
0x120f   : > { %3785 = vrot.lane.b32.xlu1 %v3770_v52, %s7300_s14  ;;  %3804 = vperm.xlu0 %7016, %v9350_v17  }
0x1213   : > { %3789 = vrot.lane.b32.xlu1 %v3772_v56, %s7300_s14  ;;  %7019 = vset.pattern.permute.xlu0 %v7355_v2 }
0x1217   : > { %3808 = vperm.xlu1 %7017, %v9361_v42  }
0x121b   : > { %7018 = vset.pattern.permute.xlu1 %v7355_v2 }
0x1279   : > { %v9680_v10 = vpop.permute.xlu1 %3779  ;;  %v9682_v28 = vpop.permute.xlu0 %3783 }
0x127a   : > { %13383 = vst [vmem:[#allocation270_spill] sm:$0xff] %v9680_v10  ;;  %13384 = vst [vmem:[#allocation271_spill] sm:$0xff] %v9682_v28 }
0x127d   : > { %v9684_v23 = vpop.permute.xlu1 %3781  ;;  %v9686_v27 = vpop.permute.xlu0 %3787 }
0x127e   : > { %13385 = vst [vmem:[#allocation272_spill] sm:$0xff] %v9684_v23  ;;  %13386 = vst [vmem:[#allocation273_spill] sm:$0xff] %v9686_v27 }
0x1281   : > { %v9688_v52 = vpop.permute.xlu1 %3785 }
0x1282   : > { %13387 = vst [vmem:[#allocation274_spill] sm:$0xff] %v9688_v52 }
0x1285   : > { %v9692_v15 = vpop.permute.xlu1 %3789 }
0x1286   : > { %13388 = vst [vmem:[#allocation275_spill] sm:$0xff] %v9692_v15 }
0x128e   : > { %v3805_v7 = vpop.permute.xlu0 %3804 }
0x128f   : > { %v3811_v30 = vmul.f32 %v3805_v7, %v8810_v11  ;;  %v3812_v56 = vmul.f32 %v3805_v7, %v8822_v8  ;;  %v3813_v2 = vmul.f32 %v3805_v7, %v8814_v14  ;;  %v7356_v7 = vmov 69  }
0x1291   : > { %3825 = vrot.lane.b32.xlu0 %v3812_v56, %s7300_s14  ;;  %3823 = vrot.lane.b32.xlu1 %v3811_v30, %s7300_s14 }
0x1295   : > { %3827 = vrot.lane.b32.xlu1 %v3813_v2, %s7300_s14 }
0x1296   : > { %v3809_v28 = vpop.permute.xlu1 %3808 }
0x1297   : > { %v3814_v27 = vmul.f32 %v3809_v28, %v8810_v11  ;;  %v3815_v52 = vmul.f32 %v3809_v28, %v8822_v8  ;;  %v3816_v10 = vmul.f32 %v3809_v28, %v8814_v14 }
0x1299   : > { %3829 = vrot.lane.b32.xlu0 %v3814_v27, %s7300_s14  ;;  %3831 = vrot.lane.b32.xlu1 %v3815_v52, %s7300_s14 }
0x129d   : > { %3833 = vrot.lane.b32.xlu0 %v3816_v10, %s7300_s14  ;;  %3848 = vperm.xlu1 %7018, %v9350_v17  }
0x12a1   : > { %3852 = vperm.xlu0 %7019, %v9361_v42   ;;  %7021 = vset.pattern.permute.xlu1 %v7356_v7 }
0x12a5   : > { %7020 = vset.pattern.permute.xlu0 %v7356_v7 }
0x1303   : > { %v9706_v30 = vpop.permute.xlu1 %3823  ;;  %v9708_v56 = vpop.permute.xlu0 %3825 }
0x1304   : > { %13389 = vst [vmem:[#allocation276_spill] sm:$0xff] %v9706_v30 }
0x1307   : > { %v9710_v2 = vpop.permute.xlu1 %3827 }
0x1308   : > { %13390 = vst [vmem:[#allocation277_spill] sm:$0xff] %v9710_v2 }
0x130b   : > { %v9712_v27 = vpop.permute.xlu0 %3829  ;;  %v9714_v52 = vpop.permute.xlu1 %3831 }
0x130c   : > { %13391 = vst [vmem:[#allocation278_spill] sm:$0xff] %v9712_v27  ;;  %13392 = vst [vmem:[#allocation279_spill] sm:$0xff] %v9714_v52 }
0x130f   : > { %v9716_v28 = vpop.permute.xlu0 %3833 }
0x1310   : > { %13393 = vst [vmem:[#allocation280_spill] sm:$0xff] %v9716_v28 }
0x131c   : > { %v3849_v10 = vpop.permute.xlu1 %3848 }
0x131d   : > { %v3855_v15 = vmul.f32 %v3849_v10, %v8853_v43  ;;  %v3857_v23 = vmul.f32 %v3849_v10, %v8863_v25  ;;  %v3856_v2 = vmul.f32 %v3849_v10, %v8857_v35 }
0x131f   : > { %3871 = vrot.lane.b32.xlu0 %v3857_v23, %s7300_s14  ;;  %3867 = vrot.lane.b32.xlu1 %v3855_v15, %s7300_s14  ;;  %v7357_v15 = vmov 70  }
0x1320   : > { %v3853_v7 = vpop.permute.xlu0 %3852 }
0x1321   : > { %v3859_v30 = vmul.f32 %v3853_v7, %v8857_v35  ;;  %v3858_v28 = vmul.f32 %v3853_v7, %v8853_v43  ;;  %v3860_v27 = vmul.f32 %v3853_v7, %v8863_v25 }
0x1323   : > { %3875 = vrot.lane.b32.xlu0 %v3859_v30, %s7300_s14  ;;  %3869 = vrot.lane.b32.xlu1 %v3856_v2, %s7300_s14 }
0x1327   : > { %3892 = vperm.xlu0 %7020, %v9350_v17   ;;  %3873 = vrot.lane.b32.xlu1 %v3858_v28, %s7300_s14 }
0x132b   : > { %3877 = vrot.lane.b32.xlu1 %v3860_v27, %s7300_s14  ;;  %7023 = vset.pattern.permute.xlu0 %v7357_v15 }
0x132f   : > { %3896 = vperm.xlu1 %7021, %v9361_v42  }
0x1333   : > { %7022 = vset.pattern.permute.xlu1 %v7357_v15 }
0x1391   : > { %v9732_v23 = vpop.permute.xlu1 %3867  ;;  %v9734_v30 = vpop.permute.xlu0 %3871 }
0x1392   : > { %13394 = vst [vmem:[#allocation281_spill] sm:$0xff] %v9732_v23  ;;  %13395 = vst [vmem:[#allocation282_spill] sm:$0xff] %v9734_v30 }
0x1395   : > { %v9736_v2 = vpop.permute.xlu1 %3869  ;;  %v9738_v10 = vpop.permute.xlu0 %3875 }
0x1396   : > { %13396 = vst [vmem:[#allocation283_spill] sm:$0xff] %v9736_v2  ;;  %13397 = vst [vmem:[#allocation284_spill] sm:$0xff] %v9738_v10 }
0x1399   : > { %v9740_v52 = vpop.permute.xlu1 %3873 }
0x139a   : > { %13398 = vst [vmem:[#allocation285_spill] sm:$0xff] %v9740_v52 }
0x139d   : > { %v9746_v15 = vpop.permute.xlu1 %3877 }
0x139e   : > { %13399 = vst [vmem:[#allocation286_spill] sm:$0xff] %v9746_v15 }
0x13a6   : > { %v3893_v28 = vpop.permute.xlu0 %3892 }
0x13a7   : > { %v3899_v7 = vmul.f32 %v3893_v28, %v8896_v58  ;;  %v3900_v27 = vmul.f32 %v3893_v28, %v8908_v20  ;;  %v3901_v23 = vmul.f32 %v3893_v28, %v8900_v61  ;;  %v7358_v28 = vmov 71  }
0x13a9   : > { %3913 = vrot.lane.b32.xlu0 %v3900_v27, %s7300_s14  ;;  %3911 = vrot.lane.b32.xlu1 %v3899_v7, %s7300_s14 }
0x13ad   : > { %3915 = vrot.lane.b32.xlu1 %v3901_v23, %s7300_s14 }
0x13ae   : > { %v3897_v30 = vpop.permute.xlu1 %3896 }
0x13af   : > { %v3902_v10 = vmul.f32 %v3897_v30, %v8896_v58  ;;  %v3903_v52 = vmul.f32 %v3897_v30, %v8908_v20  ;;  %v3904_v2 = vmul.f32 %v3897_v30, %v8900_v61 }
0x13b1   : > { %3919 = vrot.lane.b32.xlu1 %v3903_v52, %s7300_s14  ;;  %3917 = vrot.lane.b32.xlu0 %v3902_v10, %s7300_s14 }
0x13b5   : > { %3936 = vperm.xlu1 %7022, %v9350_v17   ;;  %3921 = vrot.lane.b32.xlu0 %v3904_v2, %s7300_s14 }
0x13b9   : > { %3940 = vperm.xlu0 %7023, %v9361_v42   ;;  %7025 = vset.pattern.permute.xlu1 %v7358_v28 }
0x13bd   : > { %7024 = vset.pattern.permute.xlu0 %v7358_v28 }
0x141b   : > { %v9758_v23 = vpop.permute.xlu1 %3911  ;;  %v9760_v7 = vpop.permute.xlu0 %3913 }
0x141c   : > { %13400 = vst [vmem:[#allocation287_spill] sm:$0xff] %v9758_v23  ;;  %13401 = vst [vmem:[#allocation288_spill] sm:$0xff] %v9760_v7  ;;  %v13718_v7 = vld [vmem:[#allocation192_spill] sm:$0xff] }
0x141f   : > { %v9762_v27 = vpop.permute.xlu1 %3915 }
0x1420   : > { %13402 = vst [vmem:[#allocation289_spill] sm:$0xff] %v9762_v27 }
0x1423   : > { %v9764_v52 = vpop.permute.xlu0 %3917  ;;  %v9766_v10 = vpop.permute.xlu1 %3919 }
0x1424   : > { %13403 = vst [vmem:[#allocation290_spill] sm:$0xff] %v9764_v52  ;;  %13404 = vst [vmem:[#allocation291_spill] sm:$0xff] %v9766_v10 }
0x1427   : > { %v9768_v30 = vpop.permute.xlu0 %3921 }
0x1428   : > { %13405 = vst [vmem:[#allocation292_spill] sm:$0xff] %v9768_v30 }
0x1434   : > { %v3937_v61 = vpop.permute.xlu1 %3936 }
0x1435   : > { %v3943_v2 = vmul.f32 %v3937_v61, %v8939_v4  ;;  %v3945_v15 = vmul.f32 %v3937_v61, %v8949_v37  ;;  %v3944_v23 = vmul.f32 %v3937_v61, %v8943_v54 }
0x1437   : > { %3959 = vrot.lane.b32.xlu0 %v3945_v15, %s7300_s14  ;;  %3955 = vrot.lane.b32.xlu1 %v3943_v2, %s7300_s14  ;;  %v7359_v15 = vmov 72  }
0x1438   : > { %v3941_v28 = vpop.permute.xlu0 %3940 }
0x1439   : > { %v3947_v27 = vmul.f32 %v3941_v28, %v8943_v54  ;;  %v3946_v30 = vmul.f32 %v3941_v28, %v8939_v4  ;;  %v3948_v52 = vmul.f32 %v3941_v28, %v8949_v37 }
0x143b   : > { %3963 = vrot.lane.b32.xlu0 %v3947_v27, %s7300_s14  ;;  %3957 = vrot.lane.b32.xlu1 %v3944_v23, %s7300_s14 }
0x143f   : > { %3980 = vperm.xlu0 %7024, %v9350_v17   ;;  %3961 = vrot.lane.b32.xlu1 %v3946_v30, %s7300_s14 }
0x1443   : > { %3965 = vrot.lane.b32.xlu1 %v3948_v52, %s7300_s14  ;;  %7027 = vset.pattern.permute.xlu0 %v7359_v15 }
0x1447   : > { %3984 = vperm.xlu1 %7025, %v9361_v42  }
0x144b   : > { %7026 = vset.pattern.permute.xlu1 %v7359_v15 }
0x14a9   : > { %v9784_v61 = vpop.permute.xlu1 %3955  ;;  %v9786_v27 = vpop.permute.xlu0 %3959 }
0x14aa   : > { %13406 = vst [vmem:[#allocation293_spill] sm:$0xff] %v9784_v61  ;;  %13407 = vst [vmem:[#allocation294_spill] sm:$0xff] %v9786_v27 }
0x14ad   : > { %v9788_v23 = vpop.permute.xlu1 %3957  ;;  %v9790_v2 = vpop.permute.xlu0 %3963 }
0x14ae   : > { %13408 = vst [vmem:[#allocation295_spill] sm:$0xff] %v9788_v23  ;;  %13409 = vst [vmem:[#allocation296_spill] sm:$0xff] %v9790_v2 }
0x14b1   : > { %v9792_v54 = vpop.permute.xlu1 %3961 }
0x14b2   : > { %13410 = vst [vmem:[#allocation297_spill] sm:$0xff] %v9792_v54 }
0x14b5   : > { %v9798_v15 = vpop.permute.xlu1 %3965 }
0x14b6   : > { %13411 = vst [vmem:[#allocation298_spill] sm:$0xff] %v9798_v15  ;;  %v13589_v15 = vld [vmem:[#allocation38_spill] sm:$0xff] }
0x14be   : > { %v3981_v30 = vpop.permute.xlu0 %3980 }
0x14bf   : > { %v3987_v28 = vmul.f32 %v3981_v30, %v8982_v12  ;;  %v3988_v52 = vmul.f32 %v3981_v30, %v8994_v16  ;;  %v3989_v37 = vmul.f32 %v3981_v30, %v8986_v3  ;;  %v7360_v30 = vmov 73  }
0x14c1   : > { %4001 = vrot.lane.b32.xlu0 %v3988_v52, %s7300_s14  ;;  %3999 = vrot.lane.b32.xlu1 %v3987_v28, %s7300_s14 }
0x14c5   : > { %4003 = vrot.lane.b32.xlu1 %v3989_v37, %s7300_s14 }
0x14c6   : > { %v3985_v4 = vpop.permute.xlu1 %3984 }
0x14c7   : > { %v3990_v2 = vmul.f32 %v3985_v4, %v8982_v12  ;;  %v3991_v54 = vmul.f32 %v3985_v4, %v8994_v16  ;;  %v3992_v27 = vmul.f32 %v3985_v4, %v8986_v3 }
0x14c9   : > { %4007 = vrot.lane.b32.xlu1 %v3991_v54, %s7300_s14  ;;  %4005 = vrot.lane.b32.xlu0 %v3990_v2, %s7300_s14 }
0x14cd   : > { %4024 = vperm.xlu1 %7026, %v9350_v17   ;;  %4009 = vrot.lane.b32.xlu0 %v3992_v27, %s7300_s14 }
0x14d1   : > { %4028 = vperm.xlu0 %7027, %v9361_v42   ;;  %7029 = vset.pattern.permute.xlu1 %v7360_v30 }
0x14d5   : > { %7028 = vset.pattern.permute.xlu0 %v7360_v30 }
0x1533   : > { %v9810_v37 = vpop.permute.xlu1 %3999  ;;  %v9812_v28 = vpop.permute.xlu0 %4001 }
0x1534   : > { %13412 = vst [vmem:[#allocation299_spill] sm:$0xff] %v9810_v37  ;;  %13413 = vst [vmem:[#allocation300_spill] sm:$0xff] %v9812_v28 }
0x1537   : > { %v9814_v52 = vpop.permute.xlu1 %4003 }
0x1538   : > { %13414 = vst [vmem:[#allocation301_spill] sm:$0xff] %v9814_v52 }
0x153b   : > { %v9816_v54 = vpop.permute.xlu0 %4005  ;;  %v9818_v2 = vpop.permute.xlu1 %4007 }
0x153c   : > { %13415 = vst [vmem:[#allocation302_spill] sm:$0xff] %v9816_v54  ;;  %13416 = vst [vmem:[#allocation303_spill] sm:$0xff] %v9818_v2 }
0x153f   : > { %v9820_v4 = vpop.permute.xlu0 %4009 }
0x1540   : > { %13417 = vst [vmem:[#allocation304_spill] sm:$0xff] %v9820_v4 }
0x154c   : > { %v4025_v3 = vpop.permute.xlu1 %4024 }
0x154d   : > { %v4031_v27 = vmul.f32 %v4025_v3, %v9031_v53  ;;  %v4033_v16 = vmul.f32 %v4025_v3, %v9045_v38  ;;  %v4032_v12 = vmul.f32 %v4025_v3, %v9035_v29 }
0x154f   : > { %4047 = vrot.lane.b32.xlu0 %v4033_v16, %s7300_s14  ;;  %4043 = vrot.lane.b32.xlu1 %v4031_v27, %s7300_s14  ;;  %v7361_v16 = vmov 74  }
0x1550   : > { %v4029_v30 = vpop.permute.xlu0 %4028 }
0x1551   : > { %v4035_v52 = vmul.f32 %v4029_v30, %v9035_v29  ;;  %v4034_v4 = vmul.f32 %v4029_v30, %v9031_v53  ;;  %v4036_v54 = vmul.f32 %v4029_v30, %v9045_v38 }
0x1553   : > { %4051 = vrot.lane.b32.xlu0 %v4035_v52, %s7300_s14  ;;  %4045 = vrot.lane.b32.xlu1 %v4032_v12, %s7300_s14 }
0x1557   : > { %4068 = vperm.xlu0 %7028, %v9350_v17   ;;  %4049 = vrot.lane.b32.xlu1 %v4034_v4, %s7300_s14 }
0x155b   : > { %4053 = vrot.lane.b32.xlu1 %v4036_v54, %s7300_s14  ;;  %7031 = vset.pattern.permute.xlu0 %v7361_v16 }
0x155f   : > { %4072 = vperm.xlu1 %7029, %v9361_v42  }
0x1563   : > { %7030 = vset.pattern.permute.xlu1 %v7361_v16 }
0x15c1   : > { %v9836_v3 = vpop.permute.xlu1 %4043  ;;  %v9838_v52 = vpop.permute.xlu0 %4047 }
0x15c2   : > { %13418 = vst [vmem:[#allocation305_spill] sm:$0xff] %v9836_v3  ;;  %13419 = vst [vmem:[#allocation306_spill] sm:$0xff] %v9838_v52  ;;  %v13573_v3 = vld [vmem:[#allocation77_spill] sm:$0xff] }
0x15c5   : > { %v9840_v12 = vpop.permute.xlu1 %4045  ;;  %v9842_v27 = vpop.permute.xlu0 %4051 }
0x15c6   : > { %13420 = vst [vmem:[#allocation307_spill] sm:$0xff] %v9840_v12  ;;  %13421 = vst [vmem:[#allocation308_spill] sm:$0xff] %v9842_v27 }
0x15c9   : > { %v9844_v29 = vpop.permute.xlu1 %4049 }
0x15ca   : > { %13422 = vst [vmem:[#allocation309_spill] sm:$0xff] %v9844_v29 }
0x15cd   : > { %v9850_v16 = vpop.permute.xlu1 %4053 }
0x15ce   : > { %13423 = vst [vmem:[#allocation310_spill] sm:$0xff] %v9850_v16 }
0x15d6   : > { %v4069_v4 = vpop.permute.xlu0 %4068 }
0x15d7   : > { %v4075_v30 = vmul.f32 %v4069_v4, %v9075_v24  ;;  %v4076_v54 = vmul.f32 %v4069_v4, %v9087_v59  ;;  %v4077_v38 = vmul.f32 %v4069_v4, %v9079_v60  ;;  %v7362_v4 = vmov 75  }
0x15d9   : > { %4089 = vrot.lane.b32.xlu0 %v4076_v54, %s7300_s14  ;;  %4087 = vrot.lane.b32.xlu1 %v4075_v30, %s7300_s14 }
0x15dd   : > { %4091 = vrot.lane.b32.xlu1 %v4077_v38, %s7300_s14 }
0x15de   : > { %v4073_v53 = vpop.permute.xlu1 %4072 }
0x15df   : > { %v4078_v27 = vmul.f32 %v4073_v53, %v9075_v24  ;;  %v4079_v29 = vmul.f32 %v4073_v53, %v9087_v59  ;;  %v4080_v52 = vmul.f32 %v4073_v53, %v9079_v60 }
0x15e1   : > { %4095 = vrot.lane.b32.xlu1 %v4079_v29, %s7300_s14  ;;  %4093 = vrot.lane.b32.xlu0 %v4078_v27, %s7300_s14 }
0x15e5   : > { %4112 = vperm.xlu1 %7030, %v9350_v17   ;;  %4097 = vrot.lane.b32.xlu0 %v4080_v52, %s7300_s14 }
0x15e9   : > { %4116 = vperm.xlu0 %7031, %v9361_v42   ;;  %7033 = vset.pattern.permute.xlu1 %v7362_v4 }
0x15ed   : > { %7032 = vset.pattern.permute.xlu0 %v7362_v4 }
0x164b   : > { %v9862_v38 = vpop.permute.xlu1 %4087  ;;  %v9864_v30 = vpop.permute.xlu0 %4089 }
0x164c   : > { %13424 = vst [vmem:[#allocation311_spill] sm:$0xff] %v9862_v38  ;;  %13425 = vst [vmem:[#allocation312_spill] sm:$0xff] %v9864_v30 }
0x164f   : > { %v9866_v54 = vpop.permute.xlu1 %4091 }
0x1650   : > { %13426 = vst [vmem:[#allocation313_spill] sm:$0xff] %v9866_v54 }
0x1653   : > { %v9868_v29 = vpop.permute.xlu0 %4093  ;;  %v9870_v27 = vpop.permute.xlu1 %4095 }
0x1654   : > { %13427 = vst [vmem:[#allocation314_spill] sm:$0xff] %v9868_v29  ;;  %13428 = vst [vmem:[#allocation315_spill] sm:$0xff] %v9870_v27 }
0x1657   : > { %v9872_v53 = vpop.permute.xlu0 %4097 }
0x1658   : > { %13429 = vst [vmem:[#allocation316_spill] sm:$0xff] %v9872_v53 }
0x1664   : > { %v4113_v60 = vpop.permute.xlu1 %4112 }
0x1665   : > { %v4119_v52 = vmul.f32 %v4113_v60, %v9115_v5  ;;  %v4121_v59 = vmul.f32 %v4113_v60, %v9125_v51  ;;  %v4120_v24 = vmul.f32 %v4113_v60, %v9119_v32 }
0x1667   : > { %4135 = vrot.lane.b32.xlu0 %v4121_v59, %s7300_s14  ;;  %4131 = vrot.lane.b32.xlu1 %v4119_v52, %s7300_s14  ;;  %v7363_v59 = vmov 76  }
0x1668   : > { %v4117_v4 = vpop.permute.xlu0 %4116 }
0x1669   : > { %v4123_v54 = vmul.f32 %v4117_v4, %v9119_v32  ;;  %v4122_v53 = vmul.f32 %v4117_v4, %v9115_v5  ;;  %v4124_v29 = vmul.f32 %v4117_v4, %v9125_v51 }
0x166b   : > { %4139 = vrot.lane.b32.xlu0 %v4123_v54, %s7300_s14  ;;  %4133 = vrot.lane.b32.xlu1 %v4120_v24, %s7300_s14 }
0x166f   : > { %4156 = vperm.xlu0 %7032, %v9350_v17   ;;  %4137 = vrot.lane.b32.xlu1 %v4122_v53, %s7300_s14 }
0x1673   : > { %4141 = vrot.lane.b32.xlu1 %v4124_v29, %s7300_s14  ;;  %7035 = vset.pattern.permute.xlu0 %v7363_v59 }
0x1677   : > { %4160 = vperm.xlu1 %7033, %v9361_v42  }
0x167b   : > { %7034 = vset.pattern.permute.xlu1 %v7363_v59 }
0x16d9   : > { %v9888_v60 = vpop.permute.xlu1 %4131  ;;  %v9890_v54 = vpop.permute.xlu0 %4135 }
0x16da   : > { %13430 = vst [vmem:[#allocation317_spill] sm:$0xff] %v9888_v60  ;;  %13431 = vst [vmem:[#allocation318_spill] sm:$0xff] %v9890_v54  ;;  %v13568_v54 = vld [vmem:[#allocation21_spill] sm:$0xff] }
0x16dd   : > { %v9892_v24 = vpop.permute.xlu1 %4133  ;;  %v9894_v52 = vpop.permute.xlu0 %4139 }
0x16de   : > { %13432 = vst [vmem:[#allocation319_spill] sm:$0xff] %v9892_v24  ;;  %13433 = vst [vmem:[#allocation320_spill] sm:$0xff] %v9894_v52 }
0x16e1   : > { %v9896_v17 = vpop.permute.xlu1 %4137 }
0x16e2   : > { %13434 = vst [vmem:[#allocation321_spill] sm:$0xff] %v9896_v17 }
0x16e5   : > { %v9902_v42 = vpop.permute.xlu1 %4141 }
0x16e6   : > { %13435 = vst [vmem:[#allocation322_spill] sm:$0xff] %v9902_v42 }
0x16ee   : > { %v4157_v53 = vpop.permute.xlu0 %4156 }
0x16ef   : > { %v4163_v4 = vmul.f32 %v4157_v53, %v9155_v6  ;;  %v4164_v29 = vmul.f32 %v4157_v53, %v9167_v41  ;;  %v4165_v59 = vmul.f32 %v4157_v53, %v9159_v18  ;;  %v9921_v53 = vld [vmem:[%s12407_s2 + $0x10] sm:$0xff] }
0x16f1   : > { %4177 = vrot.lane.b32.xlu0 %v4164_v29, %s7300_s14  ;;  %4175 = vrot.lane.b32.xlu1 %v4163_v4, %s7300_s14  ;;  %v9914_v4 = vld [vmem:[%s12407_s2] sm:$0xff] }
0x16f5   : > { %4179 = vrot.lane.b32.xlu1 %v4165_v59, %s7300_s14 }
0x16f6   : > { %v4161_v51 = vpop.permute.xlu1 %4160 }
0x16f7   : > { %v4166_v32 = vmul.f32 %v4161_v51, %v9155_v6  ;;  %v4167_v5 = vmul.f32 %v4161_v51, %v9167_v41  ;;  %v4168_v17 = vmul.f32 %v4161_v51, %v9159_v18 }
0x16f9   : > { %4183 = vrot.lane.b32.xlu1 %v4167_v5, %s7300_s14  ;;  %4181 = vrot.lane.b32.xlu0 %v4166_v32, %s7300_s14  ;;  %v7364_v5 = vmov 77  }
0x16fd   : > { %4200 = vperm.xlu1 %7034, %v9914_v4   ;;  %4185 = vrot.lane.b32.xlu0 %v4168_v17, %s7300_s14 }
0x1701   : > { %4204 = vperm.xlu0 %7035, %v9921_v53   ;;  %7037 = vset.pattern.permute.xlu1 %v7364_v5 }
0x1705   : > { %7036 = vset.pattern.permute.xlu0 %v7364_v5 }
0x1763   : > { %v9924_v51 = vpop.permute.xlu1 %4175  ;;  %v9926_v32 = vpop.permute.xlu0 %4177 }
0x1764   : > { %13436 = vst [vmem:[#allocation323_spill] sm:$0xff] %v9924_v51  ;;  %13437 = vst [vmem:[#allocation324_spill] sm:$0xff] %v9926_v32 }
0x1767   : > { %v9928_v29 = vpop.permute.xlu1 %4179 }
0x1768   : > { %13438 = vst [vmem:[#allocation325_spill] sm:$0xff] %v9928_v29 }
0x176b   : > { %v9930_v59 = vpop.permute.xlu0 %4181  ;;  %v9932_v18 = vpop.permute.xlu1 %4183 }
0x176c   : > { %13439 = vst [vmem:[#allocation326_spill] sm:$0xff] %v9930_v59  ;;  %13440 = vst [vmem:[#allocation327_spill] sm:$0xff] %v9932_v18 }
0x176f   : > { %v9934_v17 = vpop.permute.xlu0 %4185 }
0x1770   : > { %13441 = vst [vmem:[#allocation328_spill] sm:$0xff] %v9934_v17 }
0x177c   : > { %v4201_v41 = vpop.permute.xlu1 %4200 }
0x177d   : > { %v4207_v6 = vmul.f32 %v4201_v41, %v9195_v22  ;;  %v4209_v42 = vmul.f32 %v4201_v41, %v9205_v39  ;;  %v4208_v51 = vmul.f32 %v4201_v41, %v9199_v21 }
0x177f   : > { %4223 = vrot.lane.b32.xlu0 %v4209_v42, %s7300_s14  ;;  %4219 = vrot.lane.b32.xlu1 %v4207_v6, %s7300_s14  ;;  %v7365_v6 = vmov 78  }
0x1780   : > { %v4205_v5 = vpop.permute.xlu0 %4204 }
0x1781   : > { %v4211_v29 = vmul.f32 %v4205_v5, %v9199_v21  ;;  %v4210_v17 = vmul.f32 %v4205_v5, %v9195_v22  ;;  %v4212_v59 = vmul.f32 %v4205_v5, %v9205_v39 }
0x1783   : > { %4227 = vrot.lane.b32.xlu0 %v4211_v29, %s7300_s14  ;;  %4221 = vrot.lane.b32.xlu1 %v4208_v51, %s7300_s14 }
0x1787   : > { %4244 = vperm.xlu0 %7036, %v9914_v4   ;;  %4225 = vrot.lane.b32.xlu1 %v4210_v17, %s7300_s14 }
0x178b   : > { %4229 = vrot.lane.b32.xlu1 %v4212_v59, %s7300_s14  ;;  %7039 = vset.pattern.permute.xlu0 %v7365_v6 }
0x178f   : > { %4248 = vperm.xlu1 %7037, %v9921_v53  }
0x1793   : > { %7038 = vset.pattern.permute.xlu1 %v7365_v6 }
0x17f1   : > { %v9950_v41 = vpop.permute.xlu1 %4219  ;;  %v9952_v42 = vpop.permute.xlu0 %4223 }
0x17f2   : > { %13442 = vst [vmem:[#allocation329_spill] sm:$0xff] %v9950_v41  ;;  %13443 = vst [vmem:[#allocation330_spill] sm:$0xff] %v9952_v42 }
0x17f5   : > { %v9954_v51 = vpop.permute.xlu1 %4221  ;;  %v9956_v29 = vpop.permute.xlu0 %4227 }
0x17f6   : > { %13444 = vst [vmem:[#allocation331_spill] sm:$0xff] %v9954_v51  ;;  %13445 = vst [vmem:[#allocation332_spill] sm:$0xff] %v9956_v29 }
0x17f9   : > { %v9958_v21 = vpop.permute.xlu1 %4225 }
0x17fa   : > { %13446 = vst [vmem:[#allocation333_spill] sm:$0xff] %v9958_v21 }
0x17fd   : > { %v9964_v6 = vpop.permute.xlu1 %4229 }
0x17fe   : > { %13447 = vst [vmem:[#allocation334_spill] sm:$0xff] %v9964_v6  ;;  %v13567_v6 = vld [vmem:[#allocation12_spill] sm:$0xff] }
0x1806   : > { %v4245_v17 = vpop.permute.xlu0 %4244 }
0x1807   : > { %v4251_v5 = vmul.f32 %v4245_v17, %v9235_v62  ;;  %v4252_v59 = vmul.f32 %v4245_v17, %v9247_v55  ;;  %v4253_v39 = vmul.f32 %v4245_v17, %v9239_v47  ;;  %v7366_v17 = vmov 79  }
0x1809   : > { %4265 = vrot.lane.b32.xlu0 %v4252_v59, %s7300_s14  ;;  %4263 = vrot.lane.b32.xlu1 %v4251_v5, %s7300_s14 }
0x180d   : > { %4267 = vrot.lane.b32.xlu1 %v4253_v39, %s7300_s14 }
0x180e   : > { %v4249_v22 = vpop.permute.xlu1 %4248 }
0x180f   : > { %v4254_v29 = vmul.f32 %v4249_v22, %v9235_v62  ;;  %v4255_v21 = vmul.f32 %v4249_v22, %v9247_v55  ;;  %v4256_v42 = vmul.f32 %v4249_v22, %v9239_v47 }
0x1811   : > { %4271 = vrot.lane.b32.xlu1 %v4255_v21, %s7300_s14  ;;  %4269 = vrot.lane.b32.xlu0 %v4254_v29, %s7300_s14 }
0x1815   : > { %4288 = vperm.xlu1 %7038, %v9914_v4   ;;  %4273 = vrot.lane.b32.xlu0 %v4256_v42, %s7300_s14 }
0x1819   : > { %4292 = vperm.xlu0 %7039, %v9921_v53   ;;  %7041 = vset.pattern.permute.xlu1 %v7366_v17 }
0x181d   : > { %7040 = vset.pattern.permute.xlu0 %v7366_v17 }
0x187b   : > { %v9976_v39 = vpop.permute.xlu1 %4263  ;;  %v9978_v5 = vpop.permute.xlu0 %4265 }
0x187c   : > { %13448 = vst [vmem:[#allocation335_spill] sm:$0xff] %v9976_v39  ;;  %13449 = vst [vmem:[#allocation336_spill] sm:$0xff] %v9978_v5 }
0x187f   : > { %v9980_v59 = vpop.permute.xlu1 %4267 }
0x1880   : > { %13450 = vst [vmem:[#allocation337_spill] sm:$0xff] %v9980_v59 }
0x1883   : > { %v9982_v21 = vpop.permute.xlu0 %4269  ;;  %v9984_v29 = vpop.permute.xlu1 %4271 }
0x1884   : > { %13451 = vst [vmem:[#allocation338_spill] sm:$0xff] %v9982_v21  ;;  %13452 = vst [vmem:[#allocation339_spill] sm:$0xff] %v9984_v29 }
0x1887   : > { %v9986_v22 = vpop.permute.xlu0 %4273 }
0x1888   : > { %13453 = vst [vmem:[#allocation340_spill] sm:$0xff] %v9986_v22 }
0x1894   : > { %v4289_v55 = vpop.permute.xlu1 %4288 }
0x1895   : > { %v4295_v42 = vmul.f32 %v4289_v55, %v9275_v36  ;;  %v4297_v47 = vmul.f32 %v4289_v55, %v9285_v19  ;;  %v4296_v62 = vmul.f32 %v4289_v55, %v9279_v1 }
0x1897   : > { %4311 = vrot.lane.b32.xlu0 %v4297_v47, %s7300_s14  ;;  %4307 = vrot.lane.b32.xlu1 %v4295_v42, %s7300_s14  ;;  %v7367_v47 = vmov 80  }
0x1898   : > { %v4293_v17 = vpop.permute.xlu0 %4292 }
0x1899   : > { %v4299_v59 = vmul.f32 %v4293_v17, %v9279_v1  ;;  %v4298_v22 = vmul.f32 %v4293_v17, %v9275_v36  ;;  %v4300_v21 = vmul.f32 %v4293_v17, %v9285_v19  ;;  %v13460_v19 = vld [vmem:[#allocation176_spill] sm:$0xff] }
0x189b   : > { %4315 = vrot.lane.b32.xlu0 %v4299_v59, %s7300_s14  ;;  %4309 = vrot.lane.b32.xlu1 %v4296_v62, %s7300_s14 }
0x189f   : > { %4332 = vperm.xlu0 %7040, %v9914_v4   ;;  %4313 = vrot.lane.b32.xlu1 %v4298_v22, %s7300_s14 }
0x18a3   : > { %4317 = vrot.lane.b32.xlu1 %v4300_v21, %s7300_s14  ;;  %7043 = vset.pattern.permute.xlu0 %v7367_v47 }
0x18a7   : > { %4336 = vperm.xlu1 %7041, %v9921_v53  }
0x18ab   : > { %7042 = vset.pattern.permute.xlu1 %v7367_v47 }
0x1909   : > { %v10002_v55 = vpop.permute.xlu1 %4307  ;;  %v10004_v59 = vpop.permute.xlu0 %4311 }
0x190a   : > { %13454 = vst [vmem:[#allocation341_spill] sm:$0xff] %v10002_v55  ;;  %13455 = vst [vmem:[#allocation342_spill] sm:$0xff] %v10004_v59 }
0x190d   : > { %v10006_v62 = vpop.permute.xlu1 %4309  ;;  %v10008_v42 = vpop.permute.xlu0 %4315 }
0x190e   : > { %13456 = vst [vmem:[#allocation343_spill] sm:$0xff] %v10006_v62  ;;  %13457 = vst [vmem:[#allocation344_spill] sm:$0xff] %v10008_v42  ;;  %v7389_v62 = vmov 105  }
0x1911   : > { %v10010_v1 = vpop.permute.xlu1 %4313 }
0x1912   : > { %13458 = vst [vmem:[#allocation345_spill] sm:$0xff] %v10010_v1 }
0x1915   : > { %v10016_v47 = vpop.permute.xlu1 %4317 }
0x1916   : > { %13459 = vst [vmem:[#allocation346_spill] sm:$0xff] %v10016_v47  ;;  %v7382_v47 = vmov 90  }
0x191e   : > { %v4333_v22 = vpop.permute.xlu0 %4332 }
0x191f   : > { %v4339_v17 = vmul.f32 %v4333_v22, %v9315_v50  ;;  %v4340_v21 = vmul.f32 %v4333_v22, %v9327_v44  ;;  %v4341_v36 = vmul.f32 %v4333_v22, %v13460_v19  ;;  %v13462_v22 = vld [vmem:[#allocation108_spill] sm:$0xff] }
0x1921   : > { %4353 = vrot.lane.b32.xlu0 %v4340_v21, %s7300_s14  ;;  %4351 = vrot.lane.b32.xlu1 %v4339_v17, %s7300_s14  ;;  %v7370_v17 = vmov 83   ;;  %v7371_v21 = vmov 85  }
0x1925   : > { %4355 = vrot.lane.b32.xlu1 %v4341_v36, %s7300_s14  ;;  %v13461_v36 = vld [vmem:[#allocation34_spill] sm:$0xff] }
0x1926   : > { %v4337_v59 = vpop.permute.xlu1 %4336 }
0x1927   : > { %v4342_v42 = vmul.f32 %v4337_v59, %v9315_v50  ;;  %v4343_v1 = vmul.f32 %v4337_v59, %v9327_v44  ;;  %v4344_v55 = vmul.f32 %v4337_v59, %v13460_v19  ;;  %v13464_v59 = vld [vmem:[#allocation113_spill] sm:$0xff]  ;;  %v7373_v19 = vmov 86  }
0x1928   : > { %v7377_v50 = vmov 87   ;;  %v7378_v44 = vmov 92  }
0x1929   : > { %4359 = vrot.lane.b32.xlu1 %v4343_v1, %s7300_s14  ;;  %4357 = vrot.lane.b32.xlu0 %v4342_v42, %s7300_s14  ;;  %v13463_v1 = vld [vmem:[#allocation107_spill] sm:$0xff]  ;;  %v7368_v42 = vmov 81  }
0x192a   : > { %v10361_v24 = vsel %vm8174_vm1, %v13463_v1, 0.0 }
0x192d   : > { %4375 = vrot.lane.b32.xlu1 %v8658_v0, %s7304_s15  ;;  %4361 = vrot.lane.b32.xlu0 %v4344_v55, %s7300_s14  ;;  %v7369_v55 = vmov 82  }
0x1931   : > { %4379 = vrot.lane.b32.xlu1 %v8674_v33, %s7304_s15  ;;  %4377 = vrot.lane.b32.xlu0 %v13461_v36, %s7304_s15 }
0x1935   : > { %4383 = vrot.lane.b32.xlu1 %v13462_v22, %s7304_s15  ;;  %4381 = vrot.lane.b32.xlu0 %v13463_v1, %s7304_s15 }
0x1939   : > { %4400 = vperm.xlu1 %7042, %v9914_v4   ;;  %4385 = vrot.lane.b32.xlu0 %v13464_v59, %s7304_s15  ;;  %s7416_s15 = smov 123  }
0x193d   : > { %7044 = vset.pattern.permute.xlu1 %v7368_v42  ;;  %4404 = vperm.xlu0 %7043, %v9921_v53   ;;  %v7372_v42 = vmov 84  }
0x193e   : > { %4424 = vperm.xlu1 %7044, %v9914_v4  }
0x1941   : > { %7045 = vset.pattern.permute.xlu0 %v7369_v55 }
0x1942   : > { %4428 = vperm.xlu1 %7044, %v9921_v53   ;;  %4448 = vperm.xlu0 %7045, %v9914_v4  }
0x1946   : > { %7046 = vset.pattern.permute.xlu1 %v7369_v55  ;;  %7048 = vset.pattern.permute.xlu0 %v7370_v17  ;;  %v7374_v55 = vmov 88  }
0x1947   : > { %4452 = vperm.xlu1 %7046, %v9921_v53   ;;  %4476 = vperm.xlu0 %7048, %v9921_v53  }
0x194b   : > { %7047 = vset.pattern.permute.xlu1 %v7370_v17  ;;  %7050 = vset.pattern.permute.xlu0 %v7371_v21  ;;  %v7375_v17 = vmov 89  }
0x194c   : > { %4472 = vperm.xlu1 %7047, %v9914_v4   ;;  %4520 = vperm.xlu0 %7050, %v9914_v4  }
0x1950   : > { %7049 = vset.pattern.permute.xlu1 %v7372_v42  ;;  %7053 = vset.pattern.permute.xlu0 %v7373_v19  ;;  %v7376_v42 = vmov 91  }
0x1951   : > { %4496 = vperm.xlu1 %7049, %v9914_v4   ;;  %4548 = vperm.xlu0 %7053, %v9921_v53  }
0x1955   : > { %4500 = vperm.xlu1 %7049, %v9921_v53   ;;  %7055 = vset.pattern.permute.xlu0 %v7374_v55 }
0x1956   : > { %4592 = vperm.xlu0 %7055, %v9914_v4  }
0x1959   : > { %7051 = vset.pattern.permute.xlu1 %v7371_v21  ;;  %v7379_v21 = vmov 94  }
0x195a   : > { %4524 = vperm.xlu1 %7051, %v9921_v53   ;;  %7058 = vset.pattern.permute.xlu0 %v7375_v17 }
0x195b   : > { %4620 = vperm.xlu0 %7058, %v9921_v53  }
0x195e   : > { %7052 = vset.pattern.permute.xlu1 %v7373_v19  ;;  %v7380_v19 = vmov 95  }
0x195f   : > { %4544 = vperm.xlu1 %7052, %v9914_v4   ;;  %7060 = vset.pattern.permute.xlu0 %v7376_v42 }
0x1960   : > { %4664 = vperm.xlu0 %7060, %v9914_v4  }
0x1963   : > { %7054 = vset.pattern.permute.xlu1 %v7377_v50  ;;  %v7381_v50 = vmov 96  }
0x1964   : > { %4568 = vperm.xlu1 %7054, %v9914_v4   ;;  %7063 = vset.pattern.permute.xlu0 %v7378_v44 }
0x1965   : > { %4692 = vperm.xlu0 %7063, %v9921_v53  }
0x1968   : > { %4572 = vperm.xlu1 %7054, %v9921_v53  }
0x1969   : > { %7065 = vset.pattern.permute.xlu0 %v7379_v21 }
0x196a   : > { %4736 = vperm.xlu0 %7065, %v9914_v4  }
0x196c   : > { %7056 = vset.pattern.permute.xlu1 %v7374_v55  ;;  %v7383_v55 = vmov 97  }
0x196d   : > { %4596 = vperm.xlu1 %7056, %v9921_v53  }
0x196e   : > { %7068 = vset.pattern.permute.xlu0 %v7380_v19 }
0x196f   : > { %4764 = vperm.xlu0 %7068, %v9921_v53  }
0x1971   : > { %7057 = vset.pattern.permute.xlu1 %v7375_v17  ;;  %v7384_v17 = vmov 99  }
0x1972   : > { %4616 = vperm.xlu1 %7057, %v9914_v4  }
0x1973   : > { %4787 = vrot.lane.b32.xlu0 %v8674_v33, %s7308_s16  ;;  %v7386_v33 = vmov 100  }
0x1974   : > { %7069 = vset.pattern.permute.xlu0 %v7381_v50 }
0x1976   : > { %7059 = vset.pattern.permute.xlu1 %v7382_v47  ;;  %v7385_v47 = vmov 93  }
0x1977   : > { %4640 = vperm.xlu1 %7059, %v9914_v4   ;;  %4791 = vrot.lane.b32.xlu0 %v13462_v22, %s7308_s16 }
0x197b   : > { %4644 = vperm.xlu1 %7059, %v9921_v53   ;;  %4808 = vperm.xlu0 %7069, %v9914_v4  }
0x197f   : > { %7061 = vset.pattern.permute.xlu1 %v7376_v42  ;;  %7072 = vset.pattern.permute.xlu0 %v7383_v55  ;;  %v7387_v42 = vmov 102  }
0x1980   : > { %4668 = vperm.xlu1 %7061, %v9921_v53   ;;  %4836 = vperm.xlu0 %7072, %v9921_v53  }
0x1984   : > { %7062 = vset.pattern.permute.xlu1 %v7378_v44  ;;  %7074 = vset.pattern.permute.xlu0 %v7384_v17  ;;  %v7388_v44 = vmov 103  }
0x1985   : > { %4688 = vperm.xlu1 %7062, %v9914_v4   ;;  %4880 = vperm.xlu0 %7074, %v9914_v4  }
0x1989   : > { %7064 = vset.pattern.permute.xlu1 %v7385_v47  ;;  %7077 = vset.pattern.permute.xlu0 %v7386_v33 }
0x198a   : > { %4712 = vperm.xlu1 %7064, %v9914_v4   ;;  %4908 = vperm.xlu0 %7077, %v9921_v53  }
0x198e   : > { %4716 = vperm.xlu1 %7064, %v9921_v53   ;;  %7079 = vset.pattern.permute.xlu0 %v7387_v42 }
0x198f   : > { %4952 = vperm.xlu0 %7079, %v9914_v4  }
0x1992   : > { %7066 = vset.pattern.permute.xlu1 %v7379_v21  ;;  %v7390_v21 = vmov 106  }
0x1993   : > { %4740 = vperm.xlu1 %7066, %v9921_v53   ;;  %7082 = vset.pattern.permute.xlu0 %v7388_v44  ;;  %v10079_v47 = vpop.permute.xlu1 %4351 }
0x1994   : > { %4980 = vperm.xlu0 %7082, %v9921_v53   ;;  %13465 = vst [vmem:[#allocation347_spill] sm:$0xff] %v10079_v47  ;;  %v12790_v47 = vmov 108  }
0x1997   : > { %7067 = vset.pattern.permute.xlu1 %v7380_v19  ;;  %v10083_v29 = vpop.permute.xlu1 %4355 }
0x1998   : > { %4760 = vperm.xlu1 %7067, %v9914_v4   ;;  %7084 = vset.pattern.permute.xlu0 %v7389_v62  ;;  %13466 = vst [vmem:[#allocation348_spill] sm:$0xff] %v10083_v29  ;;  %v12791_v29 = vmov 109  }
0x1999   : > { %5024 = vperm.xlu0 %7084, %v9914_v4  }
0x199b   : > { %v10090_v19 = vpop.permute.xlu1 %4359 }
0x199c   : > { %4783 = vrot.lane.b32.xlu1 %v8658_v0, %s7308_s16  ;;  %13467 = vst [vmem:[#allocation349_spill] sm:$0xff] %v10090_v19  ;;  %v7395_v19 = vmov 98  }
0x199d   : > { %7087 = vset.pattern.permute.xlu0 %v7390_v21  ;;  %7070 = vset.pattern.permute.xlu1 %v7381_v50  ;;  %v12794_v50 = vmov 111  }
0x199e   : > { %5052 = vperm.xlu0 %7087, %v9921_v53  }
0x199f   : > { %v10097_v39 = vpop.permute.xlu1 %4375 }
0x19a0   : > { %4785 = vrot.lane.b32.xlu1 %v13461_v36, %s7308_s16  ;;  %13468 = vst [vmem:[#allocation350_spill] sm:$0xff] %v10097_v39 }
0x19a2   : > { %7089 = vset.pattern.permute.xlu0 %v12790_v47 }
0x19a3   : > { %5096 = vperm.xlu0 %7089, %v9914_v4   ;;  %v10105_v47 = vpop.permute.xlu1 %4379 }
0x19a4   : > { %4789 = vrot.lane.b32.xlu1 %v13463_v1, %s7308_s16  ;;  %13469 = vst [vmem:[#allocation351_spill] sm:$0xff] %v10105_v47 }
0x19a7   : > { %7092 = vset.pattern.permute.xlu0 %v12791_v29  ;;  %v12795_v29 = vmov 112  }
0x19a8   : > { %4793 = vrot.lane.b32.xlu1 %v13464_v59, %s7308_s16  ;;  %5124 = vperm.xlu0 %7092, %v9921_v53   ;;  %v10110_v59 = vpop.permute.xlu1 %4383  ;;  %s230_s16 = sand.u32 1, %s7265_s19  }
0x19a9   : > { %13470 = vst [vmem:[#allocation352_spill] sm:$0xff] %v10110_v59  ;;  %v7396_v59 = vmov 101   ;;  %s6631_s25 = sshll.u32 %s230_s16, 5  ;;  %s12364_s22 = scalar_lea.sflag [#allocation4], %s230_s16 }
0x19aa   : > { %s232_s10 = scalar_lea.vmem [#allocation5], %s6631_s25 }
0x19ab   : > { %s6551_s6 = sshll.u32 %s232_s10, 4  ;;  %s12360_s6 = int_to_ptr.vmem [resolvable:$true] %s6551_s6 }
0x19ac   : > { %4812 = vperm.xlu1 %7070, %v9921_v53   ;;  %7094 = vset.pattern.permute.xlu0 %v12794_v50  ;;  %s7207_s11 = scalar_lea.vmem %s12360_s6, 512  ;;  %p7214_p2 = scmp.lt.s32.totalorder %s12360_s6, %s7212_s8 }
0x19ad   : > { %5168 = vperm.xlu0 %7094, %v9914_v4   ;;  %p7208_p6 = scmp.ne.s32.totalorder %s12360_s6, %s7207_s11  ;;  %p7215_p3 = scmp.lt.s32.totalorder %s7213_s30, %s7207_s11 }
0x19af   : > { %p7209_p10 = pnand %p7208_p6, %p14032_p9  ;;  %p7216_p4 = por %p7215_p3, %p7214_p2 }
0x19b0   : > { %7071 = vset.pattern.permute.xlu1 %v7383_v55 }
0x19b1   : > { %4832 = vperm.xlu1 %7071, %v9914_v4   ;;  %7097 = vset.pattern.permute.xlu0 %v12795_v29  ;;  %p7210_p12 = pneg %p7209_p10 }
0x19b2   : > { %5196 = vperm.xlu0 %7097, %v9921_v53  }
0x19b3   : > { %p7217_p7 = pnand %p7216_p4, %p7210_p12 }
0x19b5   : > { %7073 = vset.pattern.permute.xlu1 %v7395_v19 }
0x19b6   : > { %4856 = vperm.xlu1 %7073, %v9914_v4  }
0x19b8   : > { %v10113_v39 = vpop.permute.xlu1 %4400 }
0x19b9   : > { %13471 = vst [vmem:[#allocation353_spill] sm:$0xff] %v10113_v39 }
0x19ba   : > { %4860 = vperm.xlu1 %7073, %v9921_v53  }
0x19bd   : > { %v10116_v50 = vpop.permute.xlu1 %4424 }
0x19be   : > { %13472 = vst [vmem:[#allocation354_spill] sm:$0xff] %v10116_v50  ;;  %7075 = vset.pattern.permute.xlu1 %v7384_v17  ;;  %v13492_v50 = vmov 109  }
0x19bf   : > { %4884 = vperm.xlu1 %7075, %v9921_v53  }
0x19c1   : > { %v10119_v55 = vpop.permute.xlu1 %4428 }
0x19c2   : > { %13473 = vst [vmem:[#allocation355_spill] sm:$0xff] %v10119_v55  ;;  %v7399_v55 = vmov 110  }
0x19c3   : > { %7076 = vset.pattern.permute.xlu1 %v7386_v33 }
0x19c4   : > { %4904 = vperm.xlu1 %7076, %v9914_v4  }
0x19c6   : > { %v10122_v29 = vpop.permute.xlu1 %4452 }
0x19c7   : > { %13474 = vst [vmem:[#allocation356_spill] sm:$0xff] %v10122_v29  ;;  %v7397_v29 = vmov 104  }
0x19c8   : > { %7078 = vset.pattern.permute.xlu1 %v7396_v59 }
0x19c9   : > { %4928 = vperm.xlu1 %7078, %v9914_v4  }
0x19cb   : > { %v10125_v19 = vpop.permute.xlu1 %4472 }
0x19cc   : > { %13475 = vst [vmem:[#allocation357_spill] sm:$0xff] %v10125_v19  ;;  %v10140_v19 = vpop.permute.xlu0 %4353 }
0x19cd   : > { %4932 = vperm.xlu1 %7078, %v9921_v53   ;;  %13480 = vst [vmem:[#allocation362_spill] sm:$0xff] %v10140_v19 }
0x19d0   : > { %v10128_v39 = vpop.permute.xlu1 %4496 }
0x19d1   : > { %13476 = vst [vmem:[#allocation358_spill] sm:$0xff] %v10128_v39  ;;  %7080 = vset.pattern.permute.xlu1 %v7387_v42 }
0x19d2   : > { %4956 = vperm.xlu1 %7080, %v9921_v53  }
0x19d4   : > { %v10131_v17 = vpop.permute.xlu1 %4500 }
0x19d5   : > { %13477 = vst [vmem:[#allocation359_spill] sm:$0xff] %v10131_v17 }
0x19d6   : > { %7081 = vset.pattern.permute.xlu1 %v7388_v44  ;;  %v10145_v44 = vpop.permute.xlu0 %4357 }
0x19d7   : > { %4976 = vperm.xlu1 %7081, %v9914_v4   ;;  %13482 = vst [vmem:[#allocation364_spill] sm:$0xff] %v10145_v44 }
0x19d9   : > { %v10134_v33 = vpop.permute.xlu1 %4524 }
0x19da   : > { %13478 = vst [vmem:[#allocation360_spill] sm:$0xff] %v10134_v33  ;;  %v10152_v33 = vpop.permute.xlu0 %4361 }
0x19db   : > { %7083 = vset.pattern.permute.xlu1 %v7397_v29  ;;  %13485 = vst [vmem:[#allocation367_spill] sm:$0xff] %v10152_v33 }
0x19dc   : > { %5000 = vperm.xlu1 %7083, %v9914_v4  }
0x19de   : > { %v10137_v59 = vpop.permute.xlu1 %4544 }
0x19df   : > { %13479 = vst [vmem:[#allocation361_spill] sm:$0xff] %v10137_v59  ;;  %v7398_v59 = vmov 107  }
0x19e0   : > { %5004 = vperm.xlu1 %7083, %v9921_v53  }
0x19e3   : > { %v10142_v42 = vpop.permute.xlu1 %4568 }
0x19e4   : > { %13481 = vst [vmem:[#allocation363_spill] sm:$0xff] %v10142_v42  ;;  %7085 = vset.pattern.permute.xlu1 %v7389_v62  ;;  %v10157_v62 = vpop.permute.xlu0 %4377 }
0x19e5   : > { %5028 = vperm.xlu1 %7085, %v9921_v53   ;;  %13487 = vst [vmem:[#allocation369_spill] sm:$0xff] %v10157_v62  ;;  %v13566_v62 = vld [vmem:[#allocation15_spill] sm:$0xff] }
0x19e7   : > { %v10147_v39 = vpop.permute.xlu1 %4572 }
0x19e8   : > { %13483 = vst [vmem:[#allocation365_spill] sm:$0xff] %v10147_v39  ;;  %v13489_v39 = vmov 108  }
0x19e9   : > { %7086 = vset.pattern.permute.xlu1 %v7390_v21  ;;  %v10164_v21 = vpop.permute.xlu0 %4381 }
0x19ea   : > { %5048 = vperm.xlu1 %7086, %v9914_v4   ;;  %13490 = vst [vmem:[#allocation371_spill] sm:$0xff] %v10164_v21 }
0x19ec   : > { %v10150_v29 = vpop.permute.xlu1 %4596 }
0x19ed   : > { %13484 = vst [vmem:[#allocation366_spill] sm:$0xff] %v10150_v29 }
0x19ee   : > { %7088 = vset.pattern.permute.xlu1 %v7398_v59  ;;  %v10170_v59 = vpop.permute.xlu0 %4385 }
0x19ef   : > { %5072 = vperm.xlu1 %7088, %v9914_v4   ;;  %13493 = vst [vmem:[#allocation373_spill] sm:$0xff] %v10170_v59 }
0x19f1   : > { %v10155_v17 = vpop.permute.xlu1 %4616 }
0x19f2   : > { %13486 = vst [vmem:[#allocation368_spill] sm:$0xff] %v10155_v17 }
0x19f3   : > { %5076 = vperm.xlu1 %7088, %v9921_v53  }
0x19f6   : > { %v10160_v42 = vpop.permute.xlu1 %4640 }
0x19f7   : > { %13488 = vst [vmem:[#allocation370_spill] sm:$0xff] %v10160_v42  ;;  %7090 = vset.pattern.permute.xlu1 %v13489_v39  ;;  %v10175_v42 = vpop.permute.xlu0 %4404 }
0x19f8   : > { %5100 = vperm.xlu1 %7090, %v9921_v53   ;;  %13495 = vst [vmem:[#allocation375_spill] sm:$0xff] %v10175_v42 }
0x19fa   : > { %v10166_v29 = vpop.permute.xlu1 %4644 }
0x19fb   : > { %13491 = vst [vmem:[#allocation372_spill] sm:$0xff] %v10166_v29  ;;  %v10180_v21 = vpop.permute.xlu0 %4448 }
0x19fc   : > { %7091 = vset.pattern.permute.xlu1 %v13492_v50  ;;  %13497 = vst [vmem:[#allocation377_spill] sm:$0xff] %v10180_v21  ;;  %v13499_v50 = vmov 111   ;;  %v7400_v21 = vmov 113  }
0x19fd   : > { %5120 = vperm.xlu1 %7091, %v9914_v4   ;;  %7098 = vset.pattern.permute.xlu0 %v7400_v21 }
0x19ff   : > { %v10172_v17 = vpop.permute.xlu1 %4668 }
0x1a00   : > { %13494 = vst [vmem:[#allocation374_spill] sm:$0xff] %v10172_v17  ;;  %v10188_v17 = vpop.permute.xlu0 %4476 }
0x1a01   : > { %7093 = vset.pattern.permute.xlu1 %v7399_v55  ;;  %13501 = vst [vmem:[#allocation380_spill] sm:$0xff] %v10188_v17  ;;  %v13502_v55 = vmov 112  }
0x1a02   : > { %5144 = vperm.xlu1 %7093, %v9914_v4  }
0x1a04   : > { %v10177_v39 = vpop.permute.xlu1 %4688 }
0x1a05   : > { %13496 = vst [vmem:[#allocation376_spill] sm:$0xff] %v10177_v39  ;;  %v10194_v39 = vpop.permute.xlu0 %4520 }
0x1a06   : > { %5148 = vperm.xlu1 %7093, %v9921_v53   ;;  %13504 = vst [vmem:[#allocation382_spill] sm:$0xff] %v10194_v39 }
0x1a09   : > { %v10182_v29 = vpop.permute.xlu1 %4712 }
0x1a0a   : > { %13498 = vst [vmem:[#allocation378_spill] sm:$0xff] %v10182_v29  ;;  %7095 = vset.pattern.permute.xlu1 %v13499_v50  ;;  %v10198_v50 = vpop.permute.xlu0 %4548 }
0x1a0b   : > { %5172 = vperm.xlu1 %7095, %v9921_v53   ;;  %13506 = vst [vmem:[#allocation384_spill] sm:$0xff] %v10198_v50 }
0x1a0d   : > { %v10186_v59 = vpop.permute.xlu1 %4716 }
0x1a0e   : > { %13500 = vst [vmem:[#allocation379_spill] sm:$0xff] %v10186_v59  ;;  %v10204_v17 = vpop.permute.xlu0 %4592 }
0x1a0f   : > { %7096 = vset.pattern.permute.xlu1 %v13502_v55  ;;  %13509 = vst [vmem:[#allocation387_spill] sm:$0xff] %v10204_v17 }
0x1a10   : > { %5192 = vperm.xlu1 %7096, %v9914_v4  }
0x1a12   : > { %v10192_v42 = vpop.permute.xlu1 %4740  ;;  %v10208_v44 = vpop.permute.xlu0 %4620 }
0x1a13   : > { %13503 = vst [vmem:[#allocation381_spill] sm:$0xff] %v10192_v42  ;;  %13511 = vst [vmem:[#allocation389_spill] sm:$0xff] %v10208_v44 }
0x1a14   : > { %7099 = vset.pattern.permute.xlu1 %v7400_v21 }
0x1a17   : > { %v10196_v33 = vpop.permute.xlu1 %4760 }
0x1a18   : > { %13505 = vst [vmem:[#allocation383_spill] sm:$0xff] %v10196_v33  ;;  %v10214_v33 = vpop.permute.xlu0 %4664 }
0x1a19   : > { %13514 = vst [vmem:[#allocation392_spill] sm:$0xff] %v10214_v33 }
0x1a1b   : > { %v10200_v29 = vpop.permute.xlu1 %4783 }
0x1a1c   : > { %13507 = vst [vmem:[#allocation385_spill] sm:$0xff] %v10200_v29  ;;  %v10218_v21 = vpop.permute.xlu0 %4692 }
0x1a1d   : > { %13516 = vst [vmem:[#allocation394_spill] sm:$0xff] %v10218_v21 }
0x1a1f   : > { %v10202_v59 = vpop.permute.xlu1 %4785 }
0x1a20   : > { %13508 = vst [vmem:[#allocation386_spill] sm:$0xff] %v10202_v59  ;;  %v10222_v29 = vpop.permute.xlu0 %4736 }
0x1a21   : > { %13518 = vst [vmem:[#allocation396_spill] sm:$0xff] %v10222_v29 }
0x1a23   : > { %v10206_v55 = vpop.permute.xlu1 %4789 }
0x1a24   : > { %13510 = vst [vmem:[#allocation388_spill] sm:$0xff] %v10206_v55  ;;  %v10228_v55 = vpop.permute.xlu0 %4764 }
0x1a25   : > { %13521 = vst [vmem:[#allocation399_spill] sm:$0xff] %v10228_v55 }
0x1a27   : > { %v10210_v42 = vpop.permute.xlu1 %4793 }
0x1a28   : > { %13512 = vst [vmem:[#allocation390_spill] sm:$0xff] %v10210_v42  ;;  %v10232_v42 = vpop.permute.xlu0 %4787 }
0x1a29   : > { %13523 = vst [vmem:[#allocation401_spill] sm:$0xff] %v10232_v42 }
0x1a2b   : > { %v10212_v39 = vpop.permute.xlu1 %4812 }
0x1a2c   : > { %13513 = vst [vmem:[#allocation391_spill] sm:$0xff] %v10212_v39  ;;  %v10236_v33 = vpop.permute.xlu0 %4791 }
0x1a2d   : > { %13525 = vst [vmem:[#allocation403_spill] sm:$0xff] %v10236_v33 }
0x1a30   : > { %v10216_v19 = vpop.permute.xlu1 %4832  ;;  %v10240_v21 = vpop.permute.xlu0 %4808 }
0x1a31   : > { %13515 = vst [vmem:[#allocation393_spill] sm:$0xff] %v10216_v19  ;;  %13527 = vst [vmem:[#allocation405_spill] sm:$0xff] %v10240_v21 }
0x1a34   : > { %v10244_v29 = vpop.permute.xlu0 %4836 }
0x1a35   : > { %v10220_v50 = vpop.permute.xlu1 %4856  ;;  %13529 = vst [vmem:[#allocation407_spill] sm:$0xff] %v10244_v29 }
0x1a36   : > { %13517 = vst [vmem:[#allocation395_spill] sm:$0xff] %v10220_v50 }
0x1a39   : > { %v10224_v59 = vpop.permute.xlu1 %4860 }
0x1a3a   : > { %13519 = vst [vmem:[#allocation397_spill] sm:$0xff] %v10224_v59 }
0x1a3e   : > { %v10226_v17 = vpop.permute.xlu1 %4884 }
0x1a3f   : > { %13520 = vst [vmem:[#allocation398_spill] sm:$0xff] %v10226_v17  ;;  %v10248_v17 = vpop.permute.xlu0 %4880 }
0x1a40   : > { %13531 = vst [vmem:[#allocation409_spill] sm:$0xff] %v10248_v17 }
0x1a43   : > { %v10230_v44 = vpop.permute.xlu1 %4904  ;;  %v10254_v42 = vpop.permute.xlu0 %4908 }
0x1a44   : > { %13522 = vst [vmem:[#allocation400_spill] sm:$0xff] %v10230_v44  ;;  %13534 = vst [vmem:[#allocation412_spill] sm:$0xff] %v10254_v42 }
0x1a47   : > { %v10258_v33 = vpop.permute.xlu0 %4952 }
0x1a48   : > { %v10234_v39 = vpop.permute.xlu1 %4928  ;;  %13536 = vst [vmem:[#allocation414_spill] sm:$0xff] %v10258_v33 }
0x1a49   : > { %13524 = vst [vmem:[#allocation402_spill] sm:$0xff] %v10234_v39 }
0x1a4b   : > { %v10262_v21 = vpop.permute.xlu0 %4980 }
0x1a4c   : > { %v10238_v19 = vpop.permute.xlu1 %4932  ;;  %13538 = vst [vmem:[#allocation416_spill] sm:$0xff] %v10262_v21 }
0x1a4d   : > { %13526 = vst [vmem:[#allocation404_spill] sm:$0xff] %v10238_v19 }
0x1a51   : > { %v10242_v50 = vpop.permute.xlu1 %4956 }
0x1a52   : > { %13528 = vst [vmem:[#allocation406_spill] sm:$0xff] %v10242_v50 }
0x1a56   : > { %v10246_v59 = vpop.permute.xlu1 %4976 }
0x1a57   : > { %13530 = vst [vmem:[#allocation408_spill] sm:$0xff] %v10246_v59  ;;  %v10268_v59 = vpop.permute.xlu0 %5024 }
0x1a58   : > { %13541 = vst [vmem:[#allocation419_spill] sm:$0xff] %v10268_v59 }
0x1a5b   : > { %v10250_v55 = vpop.permute.xlu1 %5000 }
0x1a5c   : > { %13532 = vst [vmem:[#allocation410_spill] sm:$0xff] %v10250_v55  ;;  %v10272_v55 = vpop.permute.xlu0 %5052 }
0x1a5d   : > { %13543 = vst [vmem:[#allocation421_spill] sm:$0xff] %v10272_v55 }
0x1a5f   : > { %v10252_v44 = vpop.permute.xlu1 %5004 }
0x1a60   : > { %13533 = vst [vmem:[#allocation411_spill] sm:$0xff] %v10252_v44  ;;  %v10276_v42 = vpop.permute.xlu0 %5096 }
0x1a61   : > { %13545 = vst [vmem:[#allocation423_spill] sm:$0xff] %v10276_v42 }
0x1a64   : > { %v10256_v39 = vpop.permute.xlu1 %5028  ;;  %v10280_v33 = vpop.permute.xlu0 %5124 }
0x1a65   : > { %13535 = vst [vmem:[#allocation413_spill] sm:$0xff] %v10256_v39  ;;  %13547 = vst [vmem:[#allocation425_spill] sm:$0xff] %v10280_v33 }
0x1a69   : > { %v10260_v19 = vpop.permute.xlu1 %5048 }
0x1a6a   : > { %13537 = vst [vmem:[#allocation415_spill] sm:$0xff] %v10260_v19 }
0x1a6e   : > { %v10264_v50 = vpop.permute.xlu1 %5072 }
0x1a6f   : > { %13539 = vst [vmem:[#allocation417_spill] sm:$0xff] %v10264_v50  ;;  %v10286_v50 = vpop.permute.xlu0 %5168 }
0x1a70   : > { %13550 = vst [vmem:[#allocation428_spill] sm:$0xff] %v10286_v50 }
0x1a72   : > { %v10266_v29 = vpop.permute.xlu1 %5076 }
0x1a73   : > { %13540 = vst [vmem:[#allocation418_spill] sm:$0xff] %v10266_v29  ;;  %v5197_v55 = vpop.permute.xlu0 %5196 }
0x1a74   : > { %v5202_v50 = vmul.f32 %v5197_v55, %v8667_v46 }
0x1a77   : > { %v10270_v17 = vpop.permute.xlu1 %5100 }
0x1a78   : > { %13542 = vst [vmem:[#allocation420_spill] sm:$0xff] %v10270_v17 }
0x1a7c   : > { %v10274_v44 = vpop.permute.xlu1 %5120 }
0x1a7d   : > { %13544 = vst [vmem:[#allocation422_spill] sm:$0xff] %v10274_v44 }
0x1a81   : > { %v10278_v39 = vpop.permute.xlu1 %5144 }
0x1a82   : > { %13546 = vst [vmem:[#allocation424_spill] sm:$0xff] %v10278_v39  ;;  %v5203_v39 = vmul.f32 %v5197_v55, %v8671_v40 }
0x1a85   : > { %v10282_v19 = vpop.permute.xlu1 %5148 }
0x1a86   : > { %13548 = vst [vmem:[#allocation426_spill] sm:$0xff] %v10282_v19 }
0x1a8a   : > { %v10284_v21 = vpop.permute.xlu1 %5172 }
0x1a8b   : > { %13549 = vst [vmem:[#allocation427_spill] sm:$0xff] %v10284_v21  ;;  %v5204_v21 = vmul.f32 %v5197_v55, %v8682_v45 }
0x1a8f   : > { %v5193_v29 = vpop.permute.xlu1 %5192 }
0x1a90   : > { %v5199_v59 = vmul.f32 %v5193_v29, %v8667_v46  ;;  %v5201_v17 = vmul.f32 %v5193_v29, %v8682_v45  ;;  %v5200_v33 = vmul.f32 %v5193_v29, %v8671_v40 }
0x1a92   : > { %5215 = vrot.lane.b32.xlu0 %v5201_v17, %s7315_s17  ;;  %5211 = vrot.lane.b32.xlu1 %v5199_v59, %s7315_s17  ;;  %v7401_v17 = vmov 114  }
0x1a96   : > { %5219 = vrot.lane.b32.xlu0 %v5203_v39, %s7315_s17  ;;  %5213 = vrot.lane.b32.xlu1 %v5200_v33, %s7315_s17 }
0x1a9a   : > { %5236 = vperm.xlu0 %7098, %v9914_v4   ;;  %5217 = vrot.lane.b32.xlu1 %v5202_v50, %s7315_s17 }
0x1a9e   : > { %5221 = vrot.lane.b32.xlu1 %v5204_v21, %s7315_s17  ;;  %7101 = vset.pattern.permute.xlu0 %v7401_v17 }
0x1aa2   : > { %5240 = vperm.xlu1 %7099, %v9921_v53  }
0x1aa6   : > { %7100 = vset.pattern.permute.xlu1 %v7401_v17 }
0x1b04   : > { %v10302_v40 = vpop.permute.xlu1 %5211  ;;  %v10304_v29 = vpop.permute.xlu0 %5215 }
0x1b05   : > { %13551 = vst [vmem:[#allocation429_spill] sm:$0xff] %v10302_v40  ;;  %13552 = vst [vmem:[#allocation430_spill] sm:$0xff] %v10304_v29 }
0x1b08   : > { %v10306_v33 = vpop.permute.xlu1 %5213  ;;  %v10308_v46 = vpop.permute.xlu0 %5219 }
0x1b09   : > { %13553 = vst [vmem:[#allocation431_spill] sm:$0xff] %v10306_v33  ;;  %13554 = vst [vmem:[#allocation432_spill] sm:$0xff] %v10308_v46 }
0x1b0c   : > { %v10310_v59 = vpop.permute.xlu1 %5217 }
0x1b0d   : > { %13555 = vst [vmem:[#allocation433_spill] sm:$0xff] %v10310_v59  ;;  %v13563_v59 = vld [vmem:[#allocation27_spill] sm:$0xff] }
0x1b10   : > { %v10316_v55 = vpop.permute.xlu1 %5221 }
0x1b11   : > { %13556 = vst [vmem:[#allocation434_spill] sm:$0xff] %v10316_v55 }
0x1b19   : > { %v5237_v39 = vpop.permute.xlu0 %5236 }
0x1b1a   : > { %v5243_v45 = vmul.f32 %v5237_v39, %v8730_v26  ;;  %v5244_v50 = vmul.f32 %v5237_v39, %v8742_v63  ;;  %v5245_v21 = vmul.f32 %v5237_v39, %v8734_v13  ;;  %v7402_v39 = vmov 115  }
0x1b1c   : > { %5257 = vrot.lane.b32.xlu0 %v5244_v50, %s7315_s17  ;;  %5255 = vrot.lane.b32.xlu1 %v5243_v45, %s7315_s17 }
0x1b20   : > { %5259 = vrot.lane.b32.xlu1 %v5245_v21, %s7315_s17  ;;  %v13561_v21 = vld [vmem:[#allocation32_spill] sm:$0xff] }
0x1b21   : > { %v5241_v17 = vpop.permute.xlu1 %5240 }
0x1b22   : > { %v5246_v29 = vmul.f32 %v5241_v17, %v8730_v26  ;;  %v5247_v40 = vmul.f32 %v5241_v17, %v8742_v63  ;;  %v5248_v33 = vmul.f32 %v5241_v17, %v8734_v13  ;;  %v10331_v26 = vsel %vm8174_vm1, %v8658_v0, 0.0  ;;  %v13564_v0 = vld [vmem:[#allocation23_spill] sm:$0xff] }
0x1b23   : > { %v1654_v41 = vrot.slane %v10331_v26, %v13567_v6 }
0x1b24   : > { %5263 = vrot.lane.b32.xlu1 %v5247_v40, %s7315_s17  ;;  %5261 = vrot.lane.b32.xlu0 %v5246_v29, %s7315_s17  ;;  %v1564_v40 = vsel %vm8178_vm2, %v13461_v36, 0.0  ;;  %v13559_v29 = vld [vmem:[#allocation10_spill] sm:$0xff]  ;;  %v13565_v36 = vld [vmem:[#allocation24_spill] sm:$0xff] }
0x1b25   : > { %v1606_v13 = vrot.slane %v10331_v26, %v13559_v29  ;;  %v1658_v52 = vrot.slane %v1564_v40, %v13567_v6  ;;  %v1659_v60 = vmul.f32 %v1654_v41, %v13568_v54 }
0x1b27   : > { %v1611_v17 = vmul.f32 %v1606_v13, %v13561_v21  ;;  %v1613_v18 = vmul.f32 %v1606_v13, %v13563_v59  ;;  %v13571_v13 = vld [vmem:[#allocation63_spill] sm:$0xff] }
0x1b28   : > { %5280 = vperm.xlu1 %7100, %v9914_v4   ;;  %5265 = vrot.lane.b32.xlu0 %v5248_v33, %s7315_s17  ;;  %v1610_v4 = vrot.slane %v1564_v40, %v13559_v29  ;;  %v13560_v33 = vld [vmem:[#allocation9_spill] sm:$0xff]  ;;  %v1682_v30 = vrot.slane %v1564_v40, %v13571_v13  ;;  %v1678_v16 = vrot.slane %v10331_v26, %v13571_v13 }
0x1b29   : > { %v1586_v50 = vrot.slane %v1564_v40, %v13560_v33 }
0x1b2a   : > { %v1614_v46 = vmul.f32 %v1610_v4, %v13563_v59  ;;  %v1612_v19 = vmul.f32 %v1610_v4, %v13561_v21  ;;  %v13570_v59 = vld [vmem:[#allocation13_spill] sm:$0xff] }
0x1b2b   : > { %v1590_v47 = vmul.f32 %v1586_v50, %v13565_v36  ;;  %v1588_v51 = vmul.f32 %v1586_v50, %v13564_v0 }
0x1b2c   : > { %5284 = vperm.xlu0 %7101, %v9921_v53   ;;  %7102 = vset.pattern.permute.xlu1 %v7402_v39  ;;  %v1582_v53 = vrot.slane %v10331_v26, %v13560_v33 }
0x1b2d   : > { %v1618_v21 = vadd.f32 %v1614_v46, %v1590_v47  ;;  %v1616_v27 = vadd.f32 %v1612_v19, %v1588_v51  ;;  %v13572_v47 = vld [vmem:[#allocation28_spill] sm:$0xff]  ;;  %v1702_v51 = vrot.slane %v10331_v26, %v13573_v3 }
0x1b2e   : > { %v1587_v42 = vmul.f32 %v1582_v53, %v13564_v0  ;;  %v1589_v38 = vmul.f32 %v1582_v53, %v13565_v36  ;;  %v1660_v0 = vmul.f32 %v1658_v52, %v13568_v54  ;;  %v1662_v46 = vmul.f32 %v1658_v52, %v13572_v47  ;;  %v13574_v54 = vld [vmem:[#allocation17_spill] sm:$0xff] }
0x1b2f   : > { %v1686_v53 = vmul.f32 %v1682_v30, %v13574_v54 }
0x1b30   : > { %7103 = vset.pattern.permute.xlu0 %v7402_v39  ;;  %v13562_v39 = vld [vmem:[#allocation11_spill] sm:$0xff]  ;;  %v1615_v4 = vadd.f32 %v1611_v17, %v1587_v42  ;;  %v1617_v17 = vadd.f32 %v1613_v18, %v1589_v38  ;;  %v1661_v18 = vmul.f32 %v1654_v41, %v13572_v47  ;;  %v13576_v38 = vld [vmem:[#allocation14_spill] sm:$0xff] }
0x1b31   : > { %v1630_v55 = vrot.slane %v10331_v26, %v13562_v39  ;;  %v1634_v44 = vrot.slane %v1564_v40, %v13562_v39  ;;  %v13579_v47 = vld [vmem:[#allocation19_spill] sm:$0xff] }
0x1b33   : > { %v1635_v5 = vmul.f32 %v1630_v55, %v13566_v62  ;;  %v1636_v32 = vmul.f32 %v1634_v44, %v13566_v62  ;;  %v1638_v62 = vmul.f32 %v1634_v44, %v13570_v59  ;;  %v1637_v12 = vmul.f32 %v1630_v55, %v13570_v59 }
0x1b35   : > { %v1639_v42 = vadd.f32 %v1635_v5, %v1615_v4  ;;  %v1640_v1 = vadd.f32 %v1636_v32, %v1616_v27  ;;  %v1642_v36 = vadd.f32 %v1638_v62, %v1618_v21  ;;  %v1706_v5 = vrot.slane %v1564_v40, %v13573_v3 }
0x1b36   : > { %v1683_v4 = vmul.f32 %v1678_v16, %v13576_v38  ;;  %v1684_v27 = vmul.f32 %v1682_v30, %v13576_v38  ;;  %v1685_v62 = vmul.f32 %v1678_v16, %v13574_v54  ;;  %v13580_v16 = vld [vmem:[#allocation22_spill] sm:$0xff]  ;;  %v1774_v54 = vrot.slane %v10361_v24, %v13560_v33 }
0x1b37   : > { %v1663_v19 = vadd.f32 %v1659_v60, %v1639_v42  ;;  %v1664_v52 = vadd.f32 %v1660_v0, %v1640_v1  ;;  %v1666_v32 = vadd.f32 %v1662_v46, %v1642_v36  ;;  %v1641_v60 = vadd.f32 %v1637_v12, %v1617_v17  ;;  %v13577_v42 = vld [vmem:[#allocation18_spill] sm:$0xff]  ;;  %v13581_v17 = vld [vmem:[#allocation95_spill] sm:$0xff] }
0x1b38   : > { %v1707_v2 = vmul.f32 %v1702_v51, %v13577_v42  ;;  %v1708_v37 = vmul.f32 %v1706_v5, %v13577_v42  ;;  %v10393_v12 = vsel %vm8178_vm2, %v13462_v22, 0.0  ;;  %v1710_v46 = vmul.f32 %v1706_v5, %v13580_v16 }
0x1b39   : > { %v1687_v59 = vadd.f32 %v1683_v4, %v1663_v19  ;;  %v1690_v1 = vadd.f32 %v1686_v53, %v1666_v32  ;;  %v1688_v0 = vadd.f32 %v1684_v27, %v1664_v52  ;;  %v1665_v41 = vadd.f32 %v1661_v18, %v1641_v60  ;;  %v13582_v18 = vld [vmem:[#allocation25_spill] sm:$0xff] }
0x1b3a   : > { %v1754_v36 = vrot.slane %v1564_v40, %v13581_v17  ;;  %v1709_v4 = vmul.f32 %v1702_v51, %v13580_v16  ;;  %v1750_v27 = vrot.slane %v10331_v26, %v13581_v17  ;;  %v1822_v60 = vrot.slane %v10361_v24, %v13562_v39 }
0x1b3b   : > { %v1689_v19 = vadd.f32 %v1685_v62, %v1665_v41  ;;  %v1711_v53 = vadd.f32 %v1707_v2, %v1687_v59  ;;  %v1712_v52 = vadd.f32 %v1708_v37, %v1688_v0  ;;  %v1714_v32 = vadd.f32 %v1710_v46, %v1690_v1  ;;  %v13585_v37 = vld [vmem:[#allocation31_spill] sm:$0xff]  ;;  %v13586_v0 = vld [vmem:[#allocation37_spill] sm:$0xff] }
0x1b3c   : > { %v1755_v2 = vmul.f32 %v1750_v27, %v13585_v37  ;;  %v1778_v51 = vrot.slane %v10393_v12, %v13560_v33  ;;  %v1779_v41 = vmul.f32 %v1774_v54, %v13586_v0  ;;  %v1802_v16 = vrot.slane %v10393_v12, %v13559_v29 }
0x1b3d   : > { %v1713_v59 = vadd.f32 %v1709_v4, %v1689_v19  ;;  %v1870_v46 = vrot.slane %v10361_v24, %v13571_v13 }
0x1b8e   : > { %v10365_v50 = vpop.permute.xlu1 %5255 }
0x1b8f   : > { %13569 = vst [vmem:[#allocation96_spill] sm:$0xff] %v10365_v50  ;;  %v13575_v50 = vld [vmem:[#allocation85_spill] sm:$0xff] }
0x1b90   : > { %v1726_v44 = vrot.slane %v10331_v26, %v13575_v50  ;;  %v1730_v21 = vrot.slane %v1564_v40, %v13575_v50  ;;  %v10414_v26 = vrot.slane %v10361_v24, %v13567_v6 }
0x1b92   : > { %v10386_v55 = vpop.permute.xlu1 %5259  ;;  %v1731_v28 = vmul.f32 %v1726_v44, %v13579_v47  ;;  %v1732_v30 = vmul.f32 %v1730_v21, %v13579_v47  ;;  %v1734_v38 = vmul.f32 %v1730_v21, %v13582_v18  ;;  %v1733_v40 = vmul.f32 %v1726_v44, %v13582_v18  ;;  %v13583_v47 = vld [vmem:[#allocation36_spill] sm:$0xff] }
0x1b93   : > { %13578 = vst [vmem:[#allocation97_spill] sm:$0xff] %v10386_v55  ;;  %v1758_v22 = vmul.f32 %v1754_v36, %v13583_v47  ;;  %v1798_v21 = vrot.slane %v10361_v24, %v13559_v29  ;;  %v1757_v1 = vmul.f32 %v1750_v27, %v13583_v47 }
0x1b94   : > { %v1735_v5 = vadd.f32 %v1731_v28, %v1711_v53  ;;  %v1736_v42 = vadd.f32 %v1732_v30, %v1712_v52  ;;  %v1756_v28 = vmul.f32 %v1754_v36, %v13585_v37  ;;  %v1738_v44 = vadd.f32 %v1734_v38, %v1714_v32  ;;  %v13587_v36 = vld [vmem:[#allocation39_spill] sm:$0xff]  ;;  %v13588_v32 = vld [vmem:[#allocation16_spill] sm:$0xff] }
0x1b95   : > { %v1780_v30 = vmul.f32 %v1778_v51, %v13586_v0  ;;  %v1737_v18 = vadd.f32 %v1733_v40, %v1713_v59  ;;  %v1803_v19 = vmul.f32 %v1798_v21, %v13587_v36  ;;  %v1804_v38 = vmul.f32 %v1802_v16, %v13587_v36  ;;  %v13590_v59 = vld [vmem:[#allocation40_spill] sm:$0xff] }
0x1b96   : > { %v10407_v62 = vpop.permute.xlu1 %5263  ;;  %v1759_v53 = vadd.f32 %v1755_v2, %v1735_v5  ;;  %v1760_v52 = vadd.f32 %v1756_v28, %v1736_v42  ;;  %v1762_v55 = vadd.f32 %v1758_v22, %v1738_v44  ;;  %v1782_v47 = vmul.f32 %v1778_v51, %v13588_v32 }
0x1b97   : > { %13584 = vst [vmem:[#allocation10_spill] sm:$0xff] %v10407_v62  ;;  %v1826_v37 = vrot.slane %v10393_v12, %v13562_v39  ;;  %v1761_v0 = vadd.f32 %v1757_v1, %v1737_v18  ;;  %v1806_v5 = vmul.f32 %v1802_v16, %v13589_v15  ;;  %v1850_v22 = vrot.slane %v10393_v12, %v13567_v6 }
0x1b98   : > { %v1783_v42 = vadd.f32 %v1779_v41, %v1759_v53  ;;  %v1784_v40 = vadd.f32 %v1780_v30, %v1760_v52  ;;  %v1781_v2 = vmul.f32 %v1774_v54, %v13588_v32  ;;  %v1786_v28 = vadd.f32 %v1782_v47, %v1762_v55  ;;  %v13591_v41 = vld [vmem:[#allocation29_spill] sm:$0xff]  ;;  %v13592_v55 = vld [vmem:[#allocation42_spill] sm:$0xff] }
0x1b99   : > { %v1805_v51 = vmul.f32 %v1798_v21, %v13589_v15  ;;  %v1830_v44 = vmul.f32 %v1826_v37, %v13590_v59  ;;  %v1874_v16 = vrot.slane %v10393_v12, %v13571_v13  ;;  %v1827_v30 = vmul.f32 %v1822_v60, %v13591_v41  ;;  %v13593_v47 = vld [vmem:[#allocation41_spill] sm:$0xff] }
0x1b9a   : > { %v1807_v36 = vadd.f32 %v1803_v19, %v1783_v42  ;;  %v1808_v1 = vadd.f32 %v1804_v38, %v1784_v40  ;;  %v1785_v53 = vadd.f32 %v1781_v2, %v1761_v0  ;;  %v1810_v52 = vadd.f32 %v1806_v5, %v1786_v28  ;;  %v10453_v19 = vld [vmem:[%s12407_s2 + $0x10] sm:$0xff]  ;;  %v13594_v5 = vld [vmem:[#allocation30_spill] sm:$0xff] }
0x1b9b   : > { %v1828_v54 = vmul.f32 %v1826_v37, %v13591_v41  ;;  %v1851_v15 = vmul.f32 %v10414_v26, %v13592_v55  ;;  %v1852_v21 = vmul.f32 %v1850_v22, %v13592_v55  ;;  %v1875_v37 = vmul.f32 %v1870_v46, %v13593_v47  ;;  %v13595_v41 = vld [vmem:[#allocation43_spill] sm:$0xff] }
0x1b9c   : > { %v1834_v38 = vadd.f32 %v1830_v44, %v1810_v52  ;;  %v1876_v0 = vmul.f32 %v1874_v16, %v13593_v47  ;;  %v1854_v42 = vmul.f32 %v1850_v22, %v13594_v5  ;;  %v1898_v40 = vrot.slane %v10393_v12, %v13573_v3 }
0x1b9d   : > { %v1832_v32 = vadd.f32 %v1828_v54, %v1808_v1  ;;  %v1918_v2 = vrot.slane %v10361_v24, %v13575_v50  ;;  %v7403_v44 = vmov 117   ;;  %v1853_v22 = vmul.f32 %v10414_v26, %v13594_v5 }
0x1b9e   : > { %v1858_v1 = vadd.f32 %v1854_v42, %v1834_v38  ;;  %v1922_v54 = vrot.slane %v10393_v12, %v13575_v50  ;;  %v7405_v42 = vmov 118  }
0x1ba7   : > { %v5281_v62 = vpop.permute.xlu1 %5280 }
0x1ba8   : > { %v5287_v4 = vmul.f32 %v5281_v62, %v8770_v57  ;;  %v5289_v27 = vmul.f32 %v5281_v62, %v8780_v31  ;;  %v5288_v18 = vmul.f32 %v5281_v62, %v8774_v9  ;;  %v1894_v62 = vrot.slane %v10361_v24, %v13573_v3 }
0x1baa   : > { %5303 = vrot.lane.b32.xlu0 %v5289_v27, %s7315_s17  ;;  %5299 = vrot.lane.b32.xlu1 %v5287_v4, %s7315_s17  ;;  %v1829_v4 = vmul.f32 %v1822_v60, %v13590_v59  ;;  %v1809_v60 = vadd.f32 %v1805_v51, %v1785_v53  ;;  %v1831_v27 = vadd.f32 %v1827_v30, %v1807_v36  ;;  %v10470_v36 = vld [vmem:[%s12407_s2] sm:$0xff] }
0x1bab   : > { %v1878_v51 = vmul.f32 %v1874_v16, %v13595_v41  ;;  %v1877_v30 = vmul.f32 %v1870_v46, %v13595_v41  ;;  %v13596_v16 = vld [vmem:[#allocation45_spill] sm:$0xff] }
0x1bac   : > { %v1833_v28 = vadd.f32 %v1829_v4, %v1809_v60  ;;  %v1855_v59 = vadd.f32 %v1851_v15, %v1831_v27  ;;  %v1902_v4 = vmul.f32 %v1898_v40, %v13596_v16  ;;  %v1901_v15 = vmul.f32 %v1894_v62, %v13596_v16  ;;  %v13597_v60 = vld [vmem:[#allocation20_spill] sm:$0xff]  ;;  %v13600_v41 = vld [vmem:[#allocation33_spill] sm:$0xff] }
0x1bad   : > { %v1899_v26 = vmul.f32 %v1894_v62, %v13597_v60  ;;  %v1900_v38 = vmul.f32 %v1898_v40, %v13597_v60  ;;  %v1882_v46 = vadd.f32 %v1878_v51, %v1858_v1  ;;  %v1946_v27 = vrot.slane %v10393_v12, %v13581_v17  ;;  %v13601_v16 = vld [vmem:[#allocation56_spill] sm:$0xff] }
0x1bae   : > { %5328 = vperm.xlu0 %7103, %v10453_v19   ;;  %5301 = vrot.lane.b32.xlu1 %v5288_v18, %s7315_s17  ;;  %v1856_v18 = vadd.f32 %v1852_v21, %v1832_v32  ;;  %v1879_v53 = vadd.f32 %v1875_v37, %v1855_v59  ;;  %v1857_v55 = vadd.f32 %v1853_v22, %v1833_v28  ;;  %v7404_v32 = vmov 116   ;;  %v13598_v37 = vld [vmem:[#allocation44_spill] sm:$0xff] }
0x1baf   : > { %v1942_v21 = vrot.slane %v10361_v24, %v13581_v17  ;;  %v1924_v5 = vmul.f32 %v1922_v54, %v13598_v37  ;;  %v1906_v62 = vadd.f32 %v1902_v4, %v1882_v46  ;;  %v13599_v59 = vld [vmem:[#allocation64_spill] sm:$0xff]  ;;  %v1925_v51 = vmul.f32 %v1918_v2, %v13600_v41  ;;  %v13603_v4 = vld [vmem:[#allocation46_spill] sm:$0xff] }
0x1bb0   : > { %v1880_v52 = vadd.f32 %v1876_v0, %v1856_v18  ;;  %v1881_v47 = vadd.f32 %v1877_v30, %v1857_v55  ;;  %v1923_v0 = vmul.f32 %v1918_v2, %v13598_v37  ;;  %v1903_v24 = vadd.f32 %v1899_v26, %v1879_v53  ;;  %v13604_v26 = vld [vmem:[#allocation49_spill] sm:$0xff]  ;;  %v13607_v37 = vld [vmem:[#allocation50_spill] sm:$0xff] }
0x1bb1   : > { %v1947_v18 = vmul.f32 %v1942_v21, %v13599_v59  ;;  %v1948_v12 = vmul.f32 %v1946_v27, %v13599_v59  ;;  %v1926_v22 = vmul.f32 %v1922_v54, %v13600_v41  ;;  %v1949_v55 = vmul.f32 %v1942_v21, %v13601_v16  ;;  %v13605_v21 = vld [vmem:[#allocation48_spill] sm:$0xff] }
0x1bb2   : > { %7105 = vset.pattern.permute.xlu0 %v7403_v44  ;;  %5324 = vperm.xlu1 %7102, %v10470_v36   ;;  %v1904_v28 = vadd.f32 %v1900_v38, %v1880_v52  ;;  %v1905_v40 = vadd.f32 %v1901_v15, %v1881_v47  ;;  %v1927_v1 = vadd.f32 %v1923_v0, %v1903_v24  ;;  %v13602_v52 = vld [vmem:[#allocation57_spill] sm:$0xff]  ;;  %v7406_v2 = vmov 120   ;;  %v13606_v47 = vld [vmem:[#allocation47_spill] sm:$0xff] }
0x1bb3   : > { %5412 = vperm.xlu0 %7105, %v10470_v36   ;;  %v1950_v60 = vmul.f32 %v1946_v27, %v13601_v16  ;;  %v1930_v53 = vadd.f32 %v1926_v22, %v1906_v62  ;;  %v1999_v15 = vsel %vm435_vm5, %v13603_v4, %v13602_v52  ;;  %v2000_v38 = vsel %vm435_vm5, %v13602_v52, %v13604_v26  ;;  %v13609_v24 = vld [vmem:[#allocation51_spill] sm:$0xff]  ;;  %v13610_v62 = vld [vmem:[#allocation52_spill] sm:$0xff]  ;;  %v13612_v22 = vld [vmem:[#allocation54_spill] sm:$0xff] }
0x1bb4   : > { %v1928_v30 = vadd.f32 %v1924_v5, %v1904_v28  ;;  %v1951_v54 = vadd.f32 %v1947_v18, %v1927_v1  ;;  %v2001_v27 = vsel %vm435_vm5, %v13606_v47, %v13605_v21  ;;  %v2002_v0 = vsel %vm435_vm5, %v13605_v21, %v13607_v37  ;;  %v13608_v5 = vld [vmem:[#allocation58_spill] sm:$0xff]  ;;  %v13615_v4 = vld [vmem:[#allocation60_spill] sm:$0xff]  ;;  %v13619_v47 = vld [vmem:[#allocation59_spill] sm:$0xff] }
0x1bb5   : > { %v2055_v28 = vsel %vm435_vm5, %v13609_v24, %v13608_v5  ;;  %v2056_v59 = vsel %vm435_vm5, %v13608_v5, %v13610_v62  ;;  %v13614_v52 = vld [vmem:[#allocation62_spill] sm:$0xff]  ;;  %v13620_v5 = vld [vmem:[#allocation68_spill] sm:$0xff] }
0x1bb6   : > { %7104 = vset.pattern.permute.xlu1 %v7404_v32  ;;  %v1952_v46 = vadd.f32 %v1948_v12, %v1928_v30  ;;  %v1929_v32 = vadd.f32 %v1925_v51, %v1905_v40  ;;  %v1954_v40 = vadd.f32 %v1950_v60, %v1930_v53  ;;  %v2007_v12 = vadd.f32 %v1999_v15, %v1951_v54  ;;  %v13611_v51 = vld [vmem:[#allocation53_spill] sm:$0xff]  ;;  %v13613_v30 = vld [vmem:[#allocation55_spill] sm:$0xff] }
0x1bb7   : > { %7108 = vset.pattern.permute.xlu0 %v7405_v42  ;;  %5368 = vperm.xlu1 %7104, %v10470_v36   ;;  %v2057_v1 = vsel %vm435_vm5, %v13612_v22, %v13611_v51  ;;  %v2058_v16 = vsel %vm435_vm5, %v13611_v51, %v13613_v30  ;;  %v2111_v26 = vsel %vm435_vm5, %v13615_v4, %v13614_v52  ;;  %v7407_v15 = vmov 121   ;;  %v13617_v54 = vld [vmem:[#allocation69_spill] sm:$0xff]  ;;  %v13625_v51 = vld [vmem:[#allocation71_spill] sm:$0xff] }
0x1bb8   : > { %5460 = vperm.xlu0 %7108, %v10453_v19   ;;  %v1953_v18 = vadd.f32 %v1949_v55, %v1929_v32  ;;  %v2008_v41 = vadd.f32 %v2000_v38, %v1952_v46  ;;  %v2010_v55 = vadd.f32 %v2002_v0, %v1954_v40  ;;  %v2063_v60 = vadd.f32 %v2055_v28, %v2007_v12  ;;  %v13618_v46 = vld [vmem:[#allocation73_spill] sm:$0xff]  ;;  %v13624_v12 = vld [vmem:[#allocation67_spill] sm:$0xff] }
0x1bb9   : > { %v2113_v32 = vsel %vm435_vm5, %v13618_v46, %v13617_v54  ;;  %v2114_v37 = vsel %vm435_vm5, %v13617_v54, %v13619_v47  ;;  %v13623_v40 = vld [vmem:[#allocation65_spill] sm:$0xff]  ;;  %v13630_v54 = vld [vmem:[#allocation76_spill] sm:$0xff]  ;;  %v7408_v47 = vmov 123  }
0x1bba   : > { %v2009_v21 = vadd.f32 %v2001_v27, %v1953_v18  ;;  %v2064_v53 = vadd.f32 %v2056_v59, %v2008_v41  ;;  %v13621_v27 = vld [vmem:[#allocation61_spill] sm:$0xff]  ;;  %v2066_v28 = vadd.f32 %v2058_v16, %v2010_v55  ;;  %v2119_v62 = vadd.f32 %v2111_v26, %v2063_v60  ;;  %v13622_v59 = vld [vmem:[#allocation70_spill] sm:$0xff]  ;;  %v13627_v16 = vld [vmem:[#allocation72_spill] sm:$0xff] }
0x1bbb   : > { %5372 = vperm.xlu1 %7104, %v10453_v19   ;;  %v2167_v0 = vsel %vm435_vm5, %v13621_v27, %v13620_v5  ;;  %v2168_v18 = vsel %vm435_vm5, %v13620_v5, %v13622_v59  ;;  %v2169_v41 = vsel %vm435_vm5, %v13624_v12, %v13623_v40  ;;  %v2170_v22 = vsel %vm435_vm5, %v13623_v40, %v13625_v51  ;;  %v13629_v60 = vld [vmem:[#allocation80_spill] sm:$0xff]  ;;  %v10565_v5 = vpop.permute.xlu0 %5257  ;;  %v13633_v27 = vld [vmem:[#allocation83_spill] sm:$0xff] }
0x1bbc   : > { %7110 = vset.pattern.permute.xlu0 %v7406_v2  ;;  %v2065_v24 = vadd.f32 %v2057_v1, %v2009_v21  ;;  %v2122_v4 = vadd.f32 %v2114_v37, %v2066_v28  ;;  %v13626_v1 = vld [vmem:[#allocation74_spill] sm:$0xff]  ;;  %v13628_v21 = vld [vmem:[#allocation75_spill] sm:$0xff]  ;;  %v2225_v46 = vsel %vm435_vm5, %v13630_v54, %v13629_v60  ;;  %13632 = vst [vmem:[#allocation9_spill] sm:$0xff] %v10565_v5  ;;  %v13636_v59 = vld [vmem:[#allocation84_spill] sm:$0xff] }
0x1bbd   : > { %5544 = vperm.xlu0 %7110, %v10470_v36   ;;  %v2223_v26 = vsel %vm435_vm5, %v13627_v16, %v13626_v1  ;;  %v2224_v55 = vsel %vm435_vm5, %v13626_v1, %v13628_v21  ;;  %v13635_v28 = vld [vmem:[#allocation82_spill] sm:$0xff]  ;;  %v13639_v1 = vld [vmem:[#allocation93_spill] sm:$0xff]  ;;  %v13640_v16 = vld [vmem:[#allocation91_spill] sm:$0xff] }
0x1bbe   : > { %v2335_v21 = vsel %vm435_vm5, %v13640_v16, %v13639_v1  ;;  %v13653_v16 = vld [vmem:[#allocation116_spill] sm:$0xff] }
0x1bbf   : > { %7106 = vset.pattern.permute.xlu1 %v7403_v44  ;;  %v13616_v44 = vld [vmem:[#allocation66_spill] sm:$0xff] }
0x1bc0   : > { %5416 = vperm.xlu1 %7106, %v10453_v19   ;;  %v2112_v38 = vsel %vm435_vm5, %v13614_v52, %v13616_v44  ;;  %v2121_v52 = vadd.f32 %v2113_v32, %v2065_v24  ;;  %v2175_v44 = vadd.f32 %v2167_v0, %v2119_v62  ;;  %v13631_v32 = vld [vmem:[#allocation79_spill] sm:$0xff]  ;;  %v13634_v0 = vld [vmem:[#allocation81_spill] sm:$0xff]  ;;  %v2280_v62 = vsel %vm435_vm5, %v13633_v27, %v13635_v28  ;;  %v13646_v28 = vld [vmem:[#allocation106_spill] sm:$0xff] }
0x1bc1   : > { %7113 = vset.pattern.permute.xlu0 %v7407_v15  ;;  %v2120_v30 = vadd.f32 %v2112_v38, %v2064_v53  ;;  %v2178_v38 = vadd.f32 %v2170_v22, %v2122_v4  ;;  %v2226_v37 = vsel %vm435_vm5, %v13629_v60, %v13631_v32  ;;  %v2279_v24 = vsel %vm435_vm5, %v13634_v0, %v13633_v27  ;;  %v13638_v22 = vld [vmem:[#allocation90_spill] sm:$0xff]  ;;  %v10590_v32 = vpop.permute.xlu0 %5261 }
0x1bc2   : > { %5592 = vperm.xlu0 %7113, %v10453_v19   ;;  %v2177_v53 = vadd.f32 %v2169_v41, %v2121_v52  ;;  %v2231_v12 = vadd.f32 %v2223_v26, %v2175_v44  ;;  %v7409_v52 = vmov 119   ;;  %v13641_v60 = vld [vmem:[#allocation94_spill] sm:$0xff]  ;;  %13644 = vst [vmem:[#allocation32_spill] sm:$0xff] %v10590_v32 }
0x1bc3   : > { %v2234_v4 = vadd.f32 %v2226_v37, %v2178_v38  ;;  %v2336_v54 = vsel %vm435_vm5, %v13639_v1, %v13641_v60  ;;  %v12885_v38 = vmov 124   ;;  %v13645_v27 = vld [vmem:[#allocation102_spill] sm:$0xff]  ;;  %v13652_v1 = vld [vmem:[#allocation117_spill] sm:$0xff] }
0x1bc4   : > { %7107 = vset.pattern.permute.xlu1 %v7405_v42  ;;  %v2176_v42 = vadd.f32 %v2168_v18, %v2120_v30  ;;  %v13637_v18 = vld [vmem:[#allocation86_spill] sm:$0xff]  ;;  %v2233_v51 = vadd.f32 %v2225_v46, %v2177_v53  ;;  %v2282_v30 = vsel %vm435_vm5, %v13636_v59, %v13638_v22  ;;  %v2287_v44 = vadd.f32 %v2279_v24, %v2231_v12  ;;  %v13642_v46 = vld [vmem:[#allocation8_spill] sm:$0xff] }
0x1bc5   : > { %5456 = vperm.xlu1 %7107, %v10470_v36   ;;  %v2281_v40 = vsel %vm435_vm5, %v13637_v18, %v13636_v59  ;;  %v2290_v37 = vadd.f32 %v2282_v30, %v2234_v4  ;;  %v2338_v0 = vsel %vm435_vm5, %v13642_v46, %v13645_v27  ;;  %v13647_v59 = vld [vmem:[#allocation104_spill] sm:$0xff]  ;;  %v2447_v60 = vsel %vm435_vm5, %v13653_v16, %v13652_v1  ;;  %v13664_v16 = vld [vmem:[#allocation133_spill] sm:$0xff] }
0x1bc6   : > { %7115 = vset.pattern.permute.xlu0 %v7408_v47  ;;  %v2232_v41 = vadd.f32 %v2224_v55, %v2176_v42  ;;  %v2289_v55 = vadd.f32 %v2281_v40, %v2233_v51  ;;  %v13643_v42 = vld [vmem:[#allocation89_spill] sm:$0xff]  ;;  %v2391_v24 = vsel %vm435_vm5, %v13647_v59, %v13646_v28  ;;  %v2343_v40 = vadd.f32 %v2335_v21, %v2287_v44  ;;  %v13650_v51 = vld [vmem:[#allocation110_spill] sm:$0xff]  ;;  %v13655_v27 = vld [vmem:[#allocation120_spill] sm:$0xff] }
0x1bc7   : > { %5676 = vperm.xlu0 %7115, %v10470_v36   ;;  %v2337_v53 = vsel %vm435_vm5, %v13643_v42, %v13642_v46  ;;  %v13654_v46 = vld [vmem:[#allocation118_spill] sm:$0xff]  ;;  %v2346_v21 = vadd.f32 %v2338_v0, %v2290_v37 }
0x1bc8   : > { %v2288_v26 = vadd.f32 %v2280_v62, %v2232_v41  ;;  %v13648_v62 = vld [vmem:[#allocation105_spill] sm:$0xff]  ;;  %v2345_v30 = vadd.f32 %v2337_v53, %v2289_v55  ;;  %v2448_v42 = vsel %vm435_vm5, %v13652_v1, %v13654_v46  ;;  %v13656_v55 = vld [vmem:[#allocation119_spill] sm:$0xff] }
0x1bc9   : > { %7109 = vset.pattern.permute.xlu1 %v7409_v52  ;;  %v2392_v18 = vsel %vm435_vm5, %v13646_v28, %v13648_v62  ;;  %v13649_v41 = vld [vmem:[#allocation109_spill] sm:$0xff]  ;;  %v13651_v52 = vld [vmem:[#allocation115_spill] sm:$0xff]  ;;  %v2449_v53 = vsel %vm435_vm5, %v13656_v55, %v13655_v27 }
0x1bca   : > { %5500 = vperm.xlu1 %7109, %v10470_v36   ;;  %v2344_v12 = vadd.f32 %v2336_v54, %v2288_v26  ;;  %v2393_v22 = vsel %vm435_vm5, %v13650_v51, %v13649_v41  ;;  %v2394_v4 = vsel %vm435_vm5, %v13649_v41, %v13651_v52  ;;  %v2399_v54 = vadd.f32 %v2391_v24, %v2343_v40  ;;  %v13657_v28 = vld [vmem:[#allocation123_spill] sm:$0xff]  ;;  %v13659_v41 = vld [vmem:[#allocation125_spill] sm:$0xff]  ;;  %v13660_v24 = vld [vmem:[#allocation126_spill] sm:$0xff]  ;;  %v10629_v40 = vpop.permute.xlu0 %5265 }
0x1bcb   : > { %7118 = vset.pattern.permute.xlu0 %v12885_v38  ;;  %v2401_v26 = vadd.f32 %v2393_v22, %v2345_v30  ;;  %v2450_v59 = vsel %vm435_vm5, %v13655_v27, %v13657_v28  ;;  %v13658_v62 = vld [vmem:[#allocation127_spill] sm:$0xff]  ;;  %v12884_v52 = vmov 126   ;;  %v2402_v1 = vadd.f32 %v2394_v4, %v2346_v21  ;;  %13661 = vst [vmem:[#allocation11_spill] sm:$0xff] %v10629_v40  ;;  %v13663_v22 = vld [vmem:[#allocation129_spill] sm:$0xff]  ;;  %v13666_v4 = vld [vmem:[#allocation134_spill] sm:$0xff] }
0x1bcc   : > { %5724 = vperm.xlu0 %7118, %v10453_v19   ;;  %v2400_v44 = vadd.f32 %v2392_v18, %v2344_v12  ;;  %v2503_v51 = vsel %vm435_vm5, %v13659_v41, %v13658_v62  ;;  %v2455_v37 = vadd.f32 %v2447_v60, %v2399_v54  ;;  %v2504_v18 = vsel %vm435_vm5, %v13658_v62, %v13660_v24  ;;  %v13662_v12 = vld [vmem:[#allocation128_spill] sm:$0xff]  ;;  %v13665_v27 = vld [vmem:[#allocation135_spill] sm:$0xff]  ;;  %v13668_v62 = vld [vmem:[#allocation138_spill] sm:$0xff] }
0x1bcd   : > { %v2505_v30 = vsel %vm435_vm5, %v13663_v22, %v13662_v12  ;;  %v2506_v46 = vsel %vm435_vm5, %v13662_v12, %v13664_v16  ;;  %v2559_v60 = vsel %vm435_vm5, %v13666_v4, %v13665_v27  ;;  %v2458_v21 = vadd.f32 %v2450_v59, %v2402_v1  ;;  %v13669_v41 = vld [vmem:[#allocation137_spill] sm:$0xff]  ;;  %v13674_v4 = vld [vmem:[#allocation146_spill] sm:$0xff] }
0x1bce   : > { %5504 = vperm.xlu1 %7109, %v10453_v19   ;;  %v2456_v0 = vadd.f32 %v2448_v42, %v2400_v44  ;;  %v2457_v42 = vadd.f32 %v2449_v53, %v2401_v26  ;;  %v2511_v54 = vadd.f32 %v2503_v51, %v2455_v37  ;;  %v13667_v44 = vld [vmem:[#allocation136_spill] sm:$0xff]  ;;  %v2561_v24 = vsel %vm435_vm5, %v13669_v41, %v13668_v62  ;;  %v13670_v12 = vld [vmem:[#allocation141_spill] sm:$0xff]  ;;  %v10655_v1 = vpop.permute.xlu0 %5284  ;;  %v13676_v41 = vld [vmem:[#allocation151_spill] sm:$0xff] }
0x1bcf   : > { %v2560_v55 = vsel %vm435_vm5, %v13665_v27, %v13667_v44  ;;  %v2562_v22 = vsel %vm435_vm5, %v13668_v62, %v13670_v12  ;;  %v13671_v16 = vld [vmem:[#allocation145_spill] sm:$0xff]  ;;  %v2514_v59 = vadd.f32 %v2506_v46, %v2458_v21  ;;  %v12883_v37 = vmov 127   ;;  %v13675_v44 = vld [vmem:[#allocation147_spill] sm:$0xff] }
0x1bd0   : > { %7120 = vset.pattern.permute.xlu0 %v12884_v52  ;;  %v2512_v28 = vadd.f32 %v2504_v18, %v2456_v0  ;;  %v2513_v53 = vadd.f32 %v2505_v30, %v2457_v42  ;;  %v2567_v51 = vadd.f32 %v2559_v60, %v2511_v54  ;;  %v13673_v18 = vld [vmem:[#allocation144_spill] sm:$0xff]  ;;  %v2617_v62 = vsel %vm435_vm5, %v13675_v44, %v13674_v4  ;;  %v13677_v21 = vld [vmem:[#allocation153_spill] sm:$0xff] }
0x1bd1   : > { %5808 = vperm.xlu0 %7120, %v10470_v36   ;;  %v2616_v27 = vsel %vm435_vm5, %v13671_v16, %v13673_v18  ;;  %v2618_v30 = vsel %vm435_vm5, %v13674_v4, %v13676_v41  ;;  %v2570_v60 = vadd.f32 %v2562_v22, %v2514_v59  ;;  %v13678_v54 = vld [vmem:[#allocation152_spill] sm:$0xff]  ;;  %v13682_v4 = vld [vmem:[#allocation159_spill] sm:$0xff]  ;;  %v5292_v22 = vmul.f32 %v10655_v1, %v8780_v31  ;;  %v13685_v41 = vld [vmem:[#allocation162_spill] sm:$0xff] }
0x1bd2   : > { %7111 = vset.pattern.permute.xlu1 %v7406_v2  ;;  %v13672_v2 = vld [vmem:[#allocation143_spill] sm:$0xff]  ;;  %v2568_v0 = vadd.f32 %v2560_v55, %v2512_v28  ;;  %v2569_v46 = vadd.f32 %v2561_v24, %v2513_v53  ;;  %v2671_v55 = vsel %vm435_vm5, %v13678_v54, %v13677_v21  ;;  %v13679_v28 = vld [vmem:[#allocation154_spill] sm:$0xff] }
0x1bd3   : > { %5548 = vperm.xlu1 %7111, %v10453_v19   ;;  %v2615_v26 = vsel %vm435_vm5, %v13672_v2, %v13671_v16  ;;  %v2672_v12 = vsel %vm435_vm5, %v13677_v21, %v13679_v28  ;;  %v13680_v16 = vld [vmem:[#allocation156_spill] sm:$0xff]  ;;  %v13681_v2 = vld [vmem:[#allocation155_spill] sm:$0xff] }
0x1bd4   : > { %v2623_v42 = vadd.f32 %v2615_v26, %v2567_v51  ;;  %v2673_v18 = vsel %vm435_vm5, %v13681_v2, %v13680_v16  ;;  %v2674_v24 = vsel %vm435_vm5, %v13680_v16, %v13682_v4  ;;  %v2624_v26 = vadd.f32 %v2616_v27, %v2568_v0  ;;  %v13683_v59 = vld [vmem:[#allocation163_spill] sm:$0xff]  ;;  %v13684_v51 = vld [vmem:[#allocation161_spill] sm:$0xff] }
0x1bd5   : > { %7123 = vset.pattern.permute.xlu0 %v12883_v37  ;;  %v2625_v53 = vadd.f32 %v2617_v62, %v2569_v46  ;;  %v2727_v44 = vsel %vm435_vm5, %v13684_v51, %v13683_v59  ;;  %v2728_v21 = vsel %vm435_vm5, %v13683_v59, %v13685_v41  ;;  %v13686_v54 = vld [vmem:[#allocation183_spill] sm:$0xff]  ;;  %v13687_v46 = vmov 0   ;;  %v13689_v16 = vld [vmem:[#allocation165_spill] sm:$0xff]  ;;  %v13692_v51 = vld [vmem:[#allocation170_spill] sm:$0xff] }
0x1bd6   : > { %5856 = vperm.xlu0 %7123, %v10453_v19   ;;  %v2867_v28 = vsel %vm628_vm4, %v9544_v34, %v13686_v54  ;;  %v2868_v31 = vsel %vm628_vm4, %v13686_v54, %v9548_v49  ;;  %v2679_v0 = vadd.f32 %v2671_v55, %v2623_v42  ;;  %v2680_v27 = vadd.f32 %v2672_v12, %v2624_v26  ;;  %v13690_v4 = vld [vmem:[#allocation169_spill] sm:$0xff]  ;;  %v13691_v59 = vld [vmem:[#allocation171_spill] sm:$0xff]  ;;  %v13693_v41 = vld [vmem:[#allocation172_spill] sm:$0xff] }
0x1bd7   : > { %7112 = vset.pattern.permute.xlu1 %v7407_v15  ;;  %v2626_v15 = vadd.f32 %v2618_v30, %v2570_v60  ;;  %v2681_v62 = vadd.f32 %v2673_v18, %v2625_v53  ;;  %v13688_v60 = vld [vmem:[#allocation164_spill] sm:$0xff]  ;;  %v2783_v49 = vsel %vm435_vm5, %v13692_v51, %v13691_v59  ;;  %v2784_v42 = vsel %vm435_vm5, %v13691_v59, %v13693_v41  ;;  %v13697_v54 = vld [vmem:[#allocation173_spill] sm:$0xff]  ;;  %v13700_v59 = vld [vmem:[#allocation179_spill] sm:$0xff] }
0x1bd8   : > { %5588 = vperm.xlu1 %7112, %v10470_v36   ;;  %v2729_v2 = vsel %vm435_vm5, %v13689_v16, %v13688_v60  ;;  %v2730_v34 = vsel %vm435_vm5, %v13688_v60, %v13690_v4  ;;  %v7413_v55 = vmov 122   ;;  %v2735_v12 = vadd.f32 %v2727_v44, %v2679_v0  ;;  %v13698_v16 = vld [vmem:[#allocation177_spill] sm:$0xff]  ;;  %v13953_v26 = vld [vmem:[#allocation398_spill] sm:$0xff] }
0x1bd9   : > { %v2682_v30 = vadd.f32 %v2674_v24, %v2626_v15  ;;  %v2736_v18 = vadd.f32 %v2728_v21, %v2680_v27  ;;  %v10716_v53 = vsel %vm8219_vm6, %v2868_v31, 0.0  ;;  %v13696_v15 = vld [vmem:[#allocation174_spill] sm:$0xff]  ;;  %v2737_v44 = vadd.f32 %v2729_v2, %v2681_v62  ;;  %v13701_v31 = vld [vmem:[#allocation221_spill] sm:$0xff]  ;;  %v13702_v62 = vld [vmem:[#allocation224_spill] sm:$0xff] }
0x1bda   : > { %5309 = vrot.lane.b32.xlu0 %v5292_v22, %s7315_s17  ;;  %v10712_v22 = vsel %vm8190_vm3, %v2867_v28, 0.0  ;;  %v2785_v60 = vsel %vm435_vm5, %v13697_v54, %v13696_v15  ;;  %v2786_v4 = vsel %vm435_vm5, %v13696_v15, %v13698_v16  ;;  %v2791_v0 = vadd.f32 %v2783_v49, %v2735_v12  ;;  %v13699_v28 = vld [vmem:[#allocation180_spill] sm:$0xff] }
0x1bdb   : > { %7125 = vset.pattern.permute.xlu0 %v13687_v46  ;;  %v2738_v21 = vadd.f32 %v2730_v34, %v2682_v30  ;;  %v2792_v27 = vadd.f32 %v2784_v42, %v2736_v18  ;;  %v2839_v51 = vsel %vm435_vm5, %v13700_v59, %v13699_v28  ;;  %v2840_v41 = vsel %vm435_vm5, %v13699_v28, %v13701_v31  ;;  %v13703_v30 = vld [vmem:[#allocation181_spill] sm:$0xff]  ;;  %v13704_v34 = vld [vmem:[#allocation182_spill] sm:$0xff] }
0x1bdc   : > { %7114 = vset.pattern.permute.xlu1 %v7413_v55  ;;  %v2890_v55 = vrot.slane %v10712_v22, %v13560_v33  ;;  %v2894_v54 = vrot.slane %v10716_v53, %v13560_v33  ;;  %v2793_v37 = vadd.f32 %v2785_v60, %v2737_v44  ;;  %v2841_v2 = vsel %vm435_vm5, %v13703_v30, %v13702_v62  ;;  %v13705_v42 = vld [vmem:[#allocation230_spill] sm:$0xff]  ;;  %v13707_v30 = vld [vmem:[#allocation187_spill] sm:$0xff] }
0x1bdd   : > { %5632 = vperm.xlu1 %7114, %v10470_v36   ;;  %v2794_v15 = vadd.f32 %v2786_v4, %v2738_v21  ;;  %v2842_v49 = vsel %vm435_vm5, %v13702_v62, %v13704_v34  ;;  %v2914_v16 = vrot.slane %v10712_v22, %v13559_v29  ;;  %v2918_v60 = vrot.slane %v10716_v53, %v13559_v29  ;;  %v13706_v59 = vld [vmem:[#allocation186_spill] sm:$0xff] }
0x1bde   : > { %v2895_v12 = vmul.f32 %v2890_v55, %v13705_v42  ;;  %v2896_v18 = vmul.f32 %v2894_v54, %v13705_v42  ;;  %v2847_v4 = vadd.f32 %v2839_v51, %v2791_v0  ;;  %v2848_v44 = vadd.f32 %v2840_v41, %v2792_v27  ;;  %v13708_v51 = vld [vmem:[#allocation188_spill] sm:$0xff] }
0x1bdf   : > { %v2938_v21 = vrot.slane %v10712_v22, %v13562_v39  ;;  %v2942_v28 = vrot.slane %v10716_v53, %v13562_v39  ;;  %v2897_v31 = vmul.f32 %v2890_v55, %v13706_v59  ;;  %v2898_v62 = vmul.f32 %v2894_v54, %v13706_v59 }
0x1be0   : > { %v2919_v34 = vmul.f32 %v2914_v16, %v13707_v30  ;;  %v2920_v42 = vmul.f32 %v2918_v60, %v13707_v30  ;;  %v2849_v52 = vadd.f32 %v2841_v2, %v2793_v37  ;;  %v2850_v38 = vadd.f32 %v2842_v49, %v2794_v15 }
0x1be1   : > { %5636 = vperm.xlu1 %7114, %v10453_v19   ;;  %v2899_v0 = vadd.f32 %v2895_v12, %v2847_v4  ;;  %v2900_v27 = vadd.f32 %v2896_v18, %v2848_v44  ;;  %v2943_v41 = vmul.f32 %v2938_v21, %v13708_v51  ;;  %v2944_v5 = vmul.f32 %v2942_v28, %v13708_v51  ;;  %v13709_v12 = vld [vmem:[#allocation228_spill] sm:$0xff]  ;;  %v13711_v51 = vld [vmem:[#allocation233_spill] sm:$0xff] }
0x1be2   : > { %v2962_v55 = vrot.slane %v10712_v22, %v13567_v6  ;;  %v2966_v54 = vrot.slane %v10716_v53, %v13567_v6  ;;  %v2986_v37 = vrot.slane %v10712_v22, %v13571_v13  ;;  %v2901_v15 = vadd.f32 %v2897_v31, %v2849_v52  ;;  %v13710_v18 = vld [vmem:[#allocation184_spill] sm:$0xff] }
0x1be3   : > { %v2902_v2 = vadd.f32 %v2898_v62, %v2850_v38  ;;  %v2924_v49 = vadd.f32 %v2920_v42, %v2900_v27  ;;  %v2869_v4 = vsel %vm628_vm4, %v13710_v18, %v13709_v12  ;;  %v2990_v44 = vrot.slane %v10716_v53, %v13571_v13  ;;  %v13715_v18 = vld [vmem:[#allocation189_spill] sm:$0xff] }
0x1be4   : > { %v3010_v59 = vrot.slane %v10712_v22, %v13573_v3  ;;  %v3014_v30 = vrot.slane %v10716_v53, %v13573_v3  ;;  %v2921_v40 = vmul.f32 %v2914_v16, %v13711_v51  ;;  %v2922_v52 = vmul.f32 %v2918_v60, %v13711_v51 }
0x1be5   : > { %7116 = vset.pattern.permute.xlu1 %v7408_v47  ;;  %v2923_v47 = vadd.f32 %v2919_v34, %v2899_v0  ;;  %v2948_v31 = vadd.f32 %v2944_v5, %v2924_v49  ;;  %v13712_v62 = vmov 124   ;;  %v13713_v34 = vld [vmem:[#allocation185_spill] sm:$0xff]  ;;  %v13714_v0 = vld [vmem:[#allocation235_spill] sm:$0xff]  ;;  %v2945_v32 = vmul.f32 %v2938_v21, %v13715_v18 }
0x1be6   : > { %5680 = vperm.xlu1 %7116, %v10453_v19   ;;  %v2870_v42 = vsel %vm628_vm4, %v13709_v12, %v13713_v34  ;;  %v2967_v27 = vmul.f32 %v2962_v55, %v13714_v0  ;;  %v2946_v61 = vmul.f32 %v2942_v28, %v13715_v18  ;;  %v2925_v23 = vadd.f32 %v2921_v40, %v2901_v15  ;;  %v13717_v49 = vld [vmem:[#allocation191_spill] sm:$0xff] }
0x1be7   : > { %v2947_v38 = vadd.f32 %v2943_v41, %v2923_v47  ;;  %v2926_v16 = vadd.f32 %v2922_v52, %v2902_v2  ;;  %v2968_v60 = vmul.f32 %v2966_v54, %v13714_v0  ;;  %v13716_v41 = vld [vmem:[#allocation190_spill] sm:$0xff]  ;;  %v2991_v51 = vmul.f32 %v2986_v37, %v13717_v49 }
0x1be8   : > { %v2969_v5 = vmul.f32 %v2962_v55, %v13716_v41  ;;  %v2970_v47 = vmul.f32 %v2966_v54, %v13716_v41  ;;  %v2992_v12 = vmul.f32 %v2990_v44, %v13717_v49  ;;  %v2949_v10 = vadd.f32 %v2945_v32, %v2925_v23  ;;  %v13722_v49 = vld [vmem:[#allocation194_spill] sm:$0xff] }
0x1be9   : > { %v2972_v34 = vadd.f32 %v2968_v60, %v2948_v31  ;;  %v2950_v21 = vadd.f32 %v2946_v61, %v2926_v16  ;;  %v3015_v28 = vmul.f32 %v3010_v59, %v13718_v7  ;;  %v3016_v18 = vmul.f32 %v3014_v30, %v13718_v7 }
0x1bea   : > { %7117 = vset.pattern.permute.xlu1 %v13712_v62  ;;  %v2971_v62 = vadd.f32 %v2967_v27, %v2947_v38  ;;  %v7414_v40 = vmov 125   ;;  %v10794_v15 = vsel %vm8190_vm3, %v2869_v4, 0.0  ;;  %v10798_v55 = vsel %vm8219_vm6, %v2870_v42, 0.0  ;;  %v13719_v38 = vld [vmem:[#allocation237_spill] sm:$0xff] }
0x1beb   : > { %5720 = vperm.xlu1 %7117, %v10470_v36   ;;  %v2973_v54 = vadd.f32 %v2969_v5, %v2949_v10  ;;  %v2974_v2 = vadd.f32 %v2970_v47, %v2950_v21  ;;  %v2996_v61 = vadd.f32 %v2992_v12, %v2972_v34  ;;  %v3034_v32 = vrot.slane %v10712_v22, %v13575_v50  ;;  %v13720_v27 = vld [vmem:[#allocation193_spill] sm:$0xff]  ;;  %v13723_v12 = vld [vmem:[#allocation195_spill] sm:$0xff] }
0x1bec   : > { %v2995_v23 = vadd.f32 %v2991_v51, %v2971_v62  ;;  %v3038_v7 = vrot.slane %v10716_v53, %v13575_v50  ;;  %v3058_v4 = vrot.slane %v10712_v22, %v13581_v17  ;;  %v3062_v52 = vrot.slane %v10716_v53, %v13581_v17  ;;  %v13721_v22 = vld [vmem:[#allocation238_spill] sm:$0xff] }
0x1bed   : > { %v2993_v31 = vmul.f32 %v2986_v37, %v13719_v38  ;;  %v2994_v42 = vmul.f32 %v2990_v44, %v13719_v38  ;;  %v3020_v0 = vadd.f32 %v3016_v18, %v2996_v61  ;;  %v3017_v16 = vmul.f32 %v3010_v59, %v13720_v27 }
0x1bee   : > { %v3019_v10 = vadd.f32 %v3015_v28, %v2995_v23  ;;  %v3018_v60 = vmul.f32 %v3014_v30, %v13720_v27  ;;  %v3082_v41 = vrot.slane %v10794_v15, %v13560_v33  ;;  %v3086_v5 = vrot.slane %v10798_v55, %v13560_v33  ;;  %v13726_v27 = vld [vmem:[#allocation239_spill] sm:$0xff] }
0x1bef   : > { %7119 = vset.pattern.permute.xlu1 %v7414_v40  ;;  %v3039_v53 = vmul.f32 %v3034_v32, %v13721_v22  ;;  %v3040_v37 = vmul.f32 %v3038_v7, %v13721_v22  ;;  %v2997_v47 = vadd.f32 %v2993_v31, %v2973_v54  ;;  %v2998_v44 = vadd.f32 %v2994_v42, %v2974_v2  ;;  %v13724_v40 = vld [vmem:[#allocation196_spill] sm:$0xff] }
0x1bf0   : > { %5764 = vperm.xlu1 %7119, %v10470_v36   ;;  %v3041_v51 = vmul.f32 %v3034_v32, %v13722_v49  ;;  %v3042_v59 = vmul.f32 %v3038_v7, %v13722_v49  ;;  %v3063_v30 = vmul.f32 %v3058_v4, %v13723_v12  ;;  %v3064_v62 = vmul.f32 %v3062_v52, %v13723_v12 }
0x1bf1   : > { %v3043_v34 = vadd.f32 %v3039_v53, %v3019_v10  ;;  %v3044_v21 = vadd.f32 %v3040_v37, %v3020_v0  ;;  %v3021_v28 = vadd.f32 %v3017_v16, %v2997_v47  ;;  %v3022_v18 = vadd.f32 %v3018_v60, %v2998_v44  ;;  %v13727_v37 = vld [vmem:[#allocation197_spill] sm:$0xff] }
0x1bf2   : > { %v3087_v23 = vmul.f32 %v3082_v41, %v13724_v40  ;;  %v3088_v61 = vmul.f32 %v3086_v5, %v13724_v40  ;;  %v13725_v38 = vmov 126   ;;  %v3106_v31 = vrot.slane %v10794_v15, %v13559_v29 }
0x1bf3   : > { %v3045_v54 = vadd.f32 %v3041_v51, %v3021_v28  ;;  %v3046_v2 = vadd.f32 %v3042_v59, %v3022_v18  ;;  %v3067_v32 = vadd.f32 %v3063_v30, %v3043_v34  ;;  %v3068_v7 = vadd.f32 %v3064_v62, %v3044_v21  ;;  %v13729_v59 = vld [vmem:[#allocation240_spill] sm:$0xff]  ;;  %v13730_v62 = vld [vmem:[#allocation198_spill] sm:$0xff] }
0x1bf4   : > { %5768 = vperm.xlu1 %7119, %v10453_v19   ;;  %v3110_v42 = vrot.slane %v10798_v55, %v13559_v29  ;;  %v3130_v10 = vrot.slane %v10794_v15, %v13562_v39  ;;  %v3154_v0 = vrot.slane %v10794_v15, %v13567_v6  ;;  %v3065_v16 = vmul.f32 %v3058_v4, %v13726_v27 }
0x1bf5   : > { %v3091_v60 = vadd.f32 %v3087_v23, %v3067_v32  ;;  %v3092_v22 = vadd.f32 %v3088_v61, %v3068_v7  ;;  %v3134_v53 = vrot.slane %v10798_v55, %v13562_v39  ;;  %v3089_v47 = vmul.f32 %v3082_v41, %v13727_v37  ;;  %v13731_v41 = vld [vmem:[#allocation199_spill] sm:$0xff]  ;;  %v13732_v32 = vld [vmem:[#allocation200_spill] sm:$0xff] }
0x1bf6   : > { %v3090_v44 = vmul.f32 %v3086_v5, %v13727_v37  ;;  %v3158_v49 = vrot.slane %v10798_v55, %v13567_v6  ;;  %v13728_v51 = vmov 127   ;;  %v3111_v12 = vmul.f32 %v3106_v31, %v13729_v59 }
0x1bf7   : > { %v3112_v4 = vmul.f32 %v3110_v42, %v13729_v59  ;;  %v3069_v30 = vadd.f32 %v3065_v16, %v3045_v54  ;;  %v3113_v34 = vmul.f32 %v3106_v31, %v13730_v62  ;;  %v3114_v21 = vmul.f32 %v3110_v42, %v13730_v62  ;;  %v13735_v62 = vld [vmem:[#allocation201_spill] sm:$0xff] }
0x1bf8   : > { %7121 = vset.pattern.permute.xlu1 %v13725_v38  ;;  %v3135_v28 = vmul.f32 %v3130_v10, %v13731_v41  ;;  %v3136_v5 = vmul.f32 %v3134_v53, %v13731_v41  ;;  %v3115_v18 = vadd.f32 %v3111_v12, %v3091_v60  ;;  %v5290_v23 = vmul.f32 %v10655_v1, %v8770_v57 }
0x1bf9   : > { %5812 = vperm.xlu1 %7121, %v10453_v19   ;;  %v3066_v19 = vmul.f32 %v3062_v52, %v13726_v27  ;;  %v3116_v40 = vadd.f32 %v3112_v4, %v3092_v22  ;;  %v3093_v61 = vadd.f32 %v3089_v47, %v3069_v30  ;;  %v3159_v54 = vmul.f32 %v3154_v0, %v13732_v32  ;;  %v13733_v47 = vld [vmem:[#allocation241_spill] sm:$0xff]  ;;  %v13734_v4 = vld [vmem:[#allocation242_spill] sm:$0xff] }
0x1bfa   : > { %v3202_v7 = vrot.slane %v10794_v15, %v13573_v3  ;;  %v3226_v31 = vrot.slane %v10794_v15, %v13575_v50  ;;  %v3139_v57 = vadd.f32 %v3135_v28, %v3115_v18  ;;  %v3206_v60 = vrot.slane %v10798_v55, %v13573_v3 }
0x1bfb   : > { %v3070_v52 = vadd.f32 %v3066_v19, %v3046_v2  ;;  %v3160_v2 = vmul.f32 %v3158_v49, %v13732_v32  ;;  %v3117_v42 = vadd.f32 %v3113_v34, %v3093_v61  ;;  %v3140_v16 = vadd.f32 %v3136_v5, %v3116_v40  ;;  %v13736_v5 = vld [vmem:[#allocation203_spill] sm:$0xff]  ;;  %v13738_v40 = vld [vmem:[#allocation245_spill] sm:$0xff] }
0x1bfc   : > { %v3182_v19 = vrot.slane %v10798_v55, %v13571_v13  ;;  %v3230_v22 = vrot.slane %v10798_v55, %v13575_v50  ;;  %v5291_v37 = vmul.f32 %v10655_v1, %v8774_v9  ;;  %v3163_v59 = vadd.f32 %v3159_v54, %v3139_v57  ;;  %v13741_v54 = vld [vmem:[#allocation204_spill] sm:$0xff] }
0x1bfd   : > { %7122 = vset.pattern.permute.xlu1 %v13728_v51  ;;  %v3094_v38 = vadd.f32 %v3090_v44, %v3070_v52  ;;  %v3137_v44 = vmul.f32 %v3130_v10, %v13733_v47  ;;  %v3138_v51 = vmul.f32 %v3134_v53, %v13733_v47  ;;  %v3164_v12 = vadd.f32 %v3160_v2, %v3140_v16  ;;  %v13737_v10 = vld [vmem:[#allocation202_spill] sm:$0xff] }
0x1bfe   : > { %5852 = vperm.xlu1 %7122, %v10470_v36   ;;  %v3178_v36 = vrot.slane %v10794_v15, %v13571_v13  ;;  %v3184_v52 = vmul.f32 %v3182_v19, %v13734_v4  ;;  %v3161_v34 = vmul.f32 %v3154_v0, %v13735_v62  ;;  %v3207_v9 = vmul.f32 %v3202_v7, %v13736_v5 }
0x1bff   : > { %v3118_v27 = vadd.f32 %v3114_v21, %v3094_v38  ;;  %v3162_v21 = vmul.f32 %v3158_v49, %v13735_v62  ;;  %v3141_v28 = vadd.f32 %v3137_v44, %v3117_v42  ;;  %v3208_v1 = vmul.f32 %v3206_v60, %v13736_v5  ;;  %v13740_v38 = vld [vmem:[#allocation208_spill] sm:$0xff] }
0x1c00   : > { %v3183_v30 = vmul.f32 %v3178_v36, %v13734_v4  ;;  %v3185_v53 = vmul.f32 %v3178_v36, %v13737_v10  ;;  %v3186_v18 = vmul.f32 %v3182_v19, %v13737_v10  ;;  %v3276_v0 = vsel %vm737_vm7, %v13738_v40, %v13740_v38  ;;  %v13744_v5 = vld [vmem:[#allocation244_spill] sm:$0xff]  ;;  %v13745_v10 = vld [vmem:[#allocation206_spill] sm:$0xff] }
0x1c01   : > { %v3142_v41 = vadd.f32 %v3138_v51, %v3118_v27  ;;  %v3188_v32 = vadd.f32 %v3184_v52, %v3164_v12  ;;  %v3231_v2 = vmul.f32 %v3226_v31, %v13741_v54  ;;  %v3232_v42 = vmul.f32 %v3230_v22, %v13741_v54  ;;  %v13742_v12 = vld [vmem:[#allocation243_spill] sm:$0xff] }
0x1c02   : > { %5305 = vrot.lane.b32.xlu1 %v5290_v23, %s7315_s17  ;;  %v13739_v23 = vld [vmem:[#allocation207_spill] sm:$0xff]  ;;  %v3187_v49 = vadd.f32 %v3183_v30, %v3163_v59  ;;  %v3165_v27 = vadd.f32 %v3161_v34, %v3141_v28  ;;  %v3250_v47 = vrot.slane %v10794_v15, %v13581_v17  ;;  %v3254_v44 = vrot.slane %v10798_v55, %v13581_v17  ;;  %v13743_v34 = vld [vmem:[#allocation205_spill] sm:$0xff] }
0x1c03   : > { %7124 = vset.pattern.permute.xlu1 %v13687_v46  ;;  %v3275_v61 = vsel %vm737_vm7, %v13739_v23, %v13738_v40  ;;  %v3166_v57 = vadd.f32 %v3162_v21, %v3142_v41  ;;  %v3212_v36 = vadd.f32 %v3208_v1, %v3188_v32  ;;  %v3209_v4 = vmul.f32 %v3202_v7, %v13742_v12  ;;  %v13746_v23 = vld [vmem:[#allocation248_spill] sm:$0xff] }
0x1c04   : > { %v3211_v16 = vadd.f32 %v3207_v9, %v3187_v49  ;;  %v10893_v19 = vsel %vm8174_vm1, %v3275_v61, 0.0  ;;  %v3189_v51 = vadd.f32 %v3185_v53, %v3165_v27  ;;  %v3210_v30 = vmul.f32 %v3206_v60, %v13742_v12 }
0x1c05   : > { %v3190_v59 = vadd.f32 %v3186_v18, %v3166_v57  ;;  %v3236_v62 = vadd.f32 %v3232_v42, %v3212_v36  ;;  %v3233_v21 = vmul.f32 %v3226_v31, %v13743_v34  ;;  %v3234_v41 = vmul.f32 %v3230_v22, %v13743_v34  ;;  %v13748_v36 = vld [vmem:[#allocation211_spill] sm:$0xff]  ;;  %v13750_v34 = vld [vmem:[#allocation213_spill] sm:$0xff] }
0x1c06   : > { %5307 = vrot.lane.b32.xlu1 %v5291_v37, %s7315_s17  ;;  %v10897_v37 = vsel %vm8178_vm2, %v3276_v0, 0.0  ;;  %v3235_v52 = vadd.f32 %v3231_v2, %v3211_v16  ;;  %v3298_v28 = vrot.slane %v10893_v19, %v13560_v33  ;;  %v3255_v55 = vmul.f32 %v3250_v47, %v13744_v5  ;;  %v13747_v0 = vld [vmem:[#allocation210_spill] sm:$0xff] }
0x1c07   : > { %v3302_v15 = vrot.slane %v10897_v37, %v13560_v33  ;;  %v3256_v9 = vmul.f32 %v3254_v44, %v13744_v5  ;;  %v3214_v1 = vadd.f32 %v3210_v30, %v3190_v59  ;;  %v3213_v7 = vadd.f32 %v3209_v4, %v3189_v51  ;;  %v13749_v51 = vld [vmem:[#allocation212_spill] sm:$0xff] }
0x1c08   : > { %v3257_v60 = vmul.f32 %v3250_v47, %v13745_v10  ;;  %v3258_v53 = vmul.f32 %v3254_v44, %v13745_v10  ;;  %v3259_v18 = vadd.f32 %v3255_v55, %v3235_v52  ;;  %v3305_v61 = vmul.f32 %v3298_v28, %v13746_v23 }
0x1c09   : > { %v3260_v31 = vadd.f32 %v3256_v9, %v3236_v62  ;;  %v3237_v40 = vadd.f32 %v3233_v21, %v3213_v7  ;;  %v3238_v22 = vadd.f32 %v3234_v41, %v3214_v1  ;;  %v3306_v38 = vmul.f32 %v3302_v15, %v13746_v23  ;;  %v13752_v23 = vld [vmem:[#allocation214_spill] sm:$0xff] }
0x1c0a   : > { %v3303_v49 = vmul.f32 %v3298_v28, %v13747_v0  ;;  %v3304_v32 = vmul.f32 %v3302_v15, %v13747_v0  ;;  %v3322_v54 = vrot.slane %v10893_v19, %v13559_v29  ;;  %v3326_v2 = vrot.slane %v10897_v37, %v13559_v29 }
0x1c0b   : > { %v3261_v42 = vadd.f32 %v3257_v60, %v3237_v40  ;;  %v3262_v27 = vadd.f32 %v3258_v53, %v3238_v22  ;;  %v3346_v57 = vrot.slane %v10893_v19, %v13562_v39  ;;  %v3350_v16 = vrot.slane %v10897_v37, %v13562_v39  ;;  %v13751_v53 = vld [vmem:[#allocation249_spill] sm:$0xff] }
0x1c0c   : > { %v3327_v47 = vmul.f32 %v3322_v54, %v13748_v36  ;;  %v3328_v44 = vmul.f32 %v3326_v2, %v13748_v36  ;;  %v3329_v59 = vmul.f32 %v3322_v54, %v13749_v51  ;;  %v3330_v12 = vmul.f32 %v3326_v2, %v13749_v51 }
0x1c0d   : > { %v3309_v4 = vadd.f32 %v3305_v61, %v3261_v42  ;;  %v3310_v30 = vadd.f32 %v3306_v38, %v3262_v27  ;;  %v3307_v52 = vadd.f32 %v3303_v49, %v3259_v18  ;;  %v3308_v62 = vadd.f32 %v3304_v32, %v3260_v31  ;;  %v13753_v49 = vld [vmem:[#allocation250_spill] sm:$0xff] }
0x1c0e   : > { %v3353_v21 = vmul.f32 %v3346_v57, %v13750_v34  ;;  %v3354_v41 = vmul.f32 %v3350_v16, %v13750_v34  ;;  %v3374_v28 = vrot.slane %v10897_v37, %v13567_v6  ;;  %v3370_v15 = vrot.slane %v10893_v19, %v13567_v6 }
0x1c0f   : > { %v3331_v5 = vadd.f32 %v3327_v47, %v3307_v52  ;;  %v3332_v55 = vadd.f32 %v3328_v44, %v3308_v62  ;;  %v3333_v9 = vadd.f32 %v3329_v59, %v3309_v4  ;;  %v3334_v1 = vadd.f32 %v3330_v12, %v3310_v30  ;;  %v13755_v47 = vld [vmem:[#allocation216_spill] sm:$0xff]  ;;  %v13756_v59 = vld [vmem:[#allocation209_spill] sm:$0xff]  ;;  %v13757_v12 = vld [vmem:[#allocation246_spill] sm:$0xff] }
0x1c10   : > { %v3394_v7 = vrot.slane %v10893_v19, %v13571_v13  ;;  %v3418_v10 = vrot.slane %v10893_v19, %v13573_v3  ;;  %v3442_v60 = vrot.slane %v10893_v19, %v13575_v50  ;;  %v3351_v18 = vmul.f32 %v3346_v57, %v13751_v53  ;;  %v13754_v57 = vld [vmem:[#allocation215_spill] sm:$0xff] }
0x1c11   : > { %v3352_v31 = vmul.f32 %v3350_v16, %v13751_v53  ;;  %v3357_v40 = vadd.f32 %v3353_v21, %v3333_v9  ;;  %v3358_v22 = vadd.f32 %v3354_v41, %v3334_v1  ;;  %v3375_v61 = vmul.f32 %v3370_v15, %v13752_v23  ;;  %v13758_v30 = vld [vmem:[#allocation247_spill] sm:$0xff] }
0x1c12   : > { %v3376_v38 = vmul.f32 %v3374_v28, %v13752_v23  ;;  %v3398_v0 = vrot.slane %v10897_v37, %v13571_v13  ;;  %v3377_v32 = vmul.f32 %v3370_v15, %v13753_v49  ;;  %v3355_v54 = vadd.f32 %v3351_v18, %v3331_v5 }
0x1c13   : > { %v3356_v2 = vadd.f32 %v3352_v31, %v3332_v55  ;;  %v3378_v42 = vmul.f32 %v3374_v28, %v13753_v49  ;;  %v3422_v27 = vrot.slane %v10897_v37, %v13573_v3  ;;  %v3399_v16 = vmul.f32 %v3394_v7, %v13754_v57  ;;  %v13759_v28 = vld [vmem:[#allocation217_spill] sm:$0xff]  ;;  %v13761_v49 = vld [vmem:[#allocation252_spill] sm:$0xff] }
0x1c14   : > { %v3400_v36 = vmul.f32 %v3398_v0, %v13754_v57  ;;  %v3401_v44 = vmul.f32 %v3394_v7, %v13755_v47  ;;  %v3402_v51 = vmul.f32 %v3398_v0, %v13755_v47  ;;  %v3277_v4 = vsel %vm737_vm7, %v13757_v12, %v13756_v59  ;;  %v13763_v47 = vld [vmem:[#allocation219_spill] sm:$0xff] }
0x1c15   : > { %v3278_v52 = vsel %vm737_vm7, %v13756_v59, %v13758_v30  ;;  %v3382_v62 = vadd.f32 %v3378_v42, %v3358_v22  ;;  %v3381_v34 = vadd.f32 %v3377_v32, %v3357_v40  ;;  %v3379_v21 = vadd.f32 %v3375_v61, %v3355_v54  ;;  %v13760_v40 = vld [vmem:[#allocation251_spill] sm:$0xff]  ;;  %v13762_v54 = vld [vmem:[#allocation218_spill] sm:$0xff] }
0x1c16   : > { %v3380_v41 = vadd.f32 %v3376_v38, %v3356_v2  ;;  %v3425_v15 = vmul.f32 %v3418_v10, %v13759_v28  ;;  %v3426_v5 = vmul.f32 %v3422_v27, %v13759_v28  ;;  %v3446_v55 = vrot.slane %v10897_v37, %v13575_v50 }
0x1c17   : > { %v3403_v9 = vadd.f32 %v3399_v16, %v3379_v21  ;;  %v3405_v7 = vadd.f32 %v3401_v44, %v3381_v34  ;;  %v3406_v53 = vadd.f32 %v3402_v51, %v3382_v62  ;;  %v10969_v18 = vsel %vm8174_vm1, %v3277_v4, 0.0  ;;  %v13765_v34 = vld [vmem:[#allocation222_spill] sm:$0xff] }
0x1c18   : > { %v3404_v1 = vadd.f32 %v3400_v36, %v3380_v41  ;;  %v10973_v31 = vsel %vm8178_vm2, %v3278_v52, 0.0  ;;  %v3423_v22 = vmul.f32 %v3418_v10, %v13760_v40  ;;  %v3466_v23 = vrot.slane %v10893_v19, %v13581_v17 }
0x1c19   : > { %v3424_v61 = vmul.f32 %v3422_v27, %v13760_v40  ;;  %v3429_v38 = vadd.f32 %v3425_v15, %v3405_v7  ;;  %v3430_v0 = vadd.f32 %v3426_v5, %v3406_v53  ;;  %v3449_v32 = vmul.f32 %v3442_v60, %v13761_v49  ;;  %v13766_v53 = vld [vmem:[#allocation253_spill] sm:$0xff] }
0x1c1a   : > { %v3447_v2 = vmul.f32 %v3442_v60, %v13762_v54  ;;  %v3448_v42 = vmul.f32 %v3446_v55, %v13762_v54  ;;  %v3470_v57 = vrot.slane %v10897_v37, %v13581_v17  ;;  %v3450_v16 = vmul.f32 %v3446_v55, %v13761_v49  ;;  %v13764_v60 = vld [vmem:[#allocation220_spill] sm:$0xff] }
0x1c1b   : > { %v3427_v36 = vadd.f32 %v3423_v22, %v3403_v9  ;;  %v3428_v10 = vadd.f32 %v3424_v61, %v3404_v1  ;;  %v3490_v19 = vrot.slane %v10969_v18, %v13560_v33  ;;  %v3494_v27 = vrot.slane %v10973_v31, %v13560_v33 }
0x1c1c   : > { %v3471_v44 = vmul.f32 %v3466_v23, %v13763_v47  ;;  %v3472_v51 = vmul.f32 %v3470_v57, %v13763_v47  ;;  %v3473_v59 = vmul.f32 %v3466_v23, %v13764_v60  ;;  %v3474_v12 = vmul.f32 %v3470_v57, %v13764_v60  ;;  %v10993_v4 = vpop.permute.xlu1 %5299 }
0x1c1d   : > { %v3453_v37 = vadd.f32 %v3449_v32, %v3429_v38  ;;  %v3454_v30 = vadd.f32 %v3450_v16, %v3430_v0  ;;  %v3451_v52 = vadd.f32 %v3447_v2, %v3427_v36  ;;  %v3452_v62 = vadd.f32 %v3448_v42, %v3428_v10  ;;  %v13767_v0 = vld [vmem:[#allocation223_spill] sm:$0xff]  ;;  %v13768_v42 = vld [vmem:[#allocation254_spill] sm:$0xff] }
0x1c1e   : > { %v3497_v21 = vmul.f32 %v3490_v19, %v13765_v34  ;;  %v3498_v41 = vmul.f32 %v3494_v27, %v13765_v34  ;;  %v3514_v28 = vrot.slane %v10969_v18, %v13559_v29  ;;  %v3518_v15 = vrot.slane %v10973_v31, %v13559_v29 }
0x1c1f   : > { %v3475_v5 = vadd.f32 %v3471_v44, %v3451_v52  ;;  %v3476_v55 = vadd.f32 %v3472_v51, %v3452_v62  ;;  %v3477_v9 = vadd.f32 %v3473_v59, %v3453_v37  ;;  %v3478_v1 = vadd.f32 %v3474_v12, %v3454_v30  ;;  %v11022_v51 = vpop.permute.xlu0 %5303  ;;  %v13771_v59 = vld [vmem:[#allocation226_spill] sm:$0xff] }
0x1c20   : > { %v11003_v7 = vrot.slane %v10969_v18, %v13581_v17  ;;  %v3495_v40 = vmul.f32 %v3490_v19, %v13766_v53  ;;  %v3496_v22 = vmul.f32 %v3494_v27, %v13766_v53  ;;  %v3538_v23 = vrot.slane %v10969_v18, %v13562_v39  ;;  %v11011_v54 = vpop.permute.xlu1 %5301  ;;  %v13769_v27 = vld [vmem:[#allocation225_spill] sm:$0xff]  ;;  %13770 = vst [vmem:[#allocation27_spill] sm:$0xff] %v11022_v51 }
0x1c21   : > { %v3501_v61 = vadd.f32 %v3497_v21, %v3477_v9  ;;  %v3502_v38 = vadd.f32 %v3498_v41, %v3478_v1  ;;  %v3519_v49 = vmul.f32 %v3514_v28, %v13767_v0  ;;  %v3520_v32 = vmul.f32 %v3518_v15, %v13767_v0 }
0x1c22   : > { %v3542_v2 = vrot.slane %v10973_v31, %v13562_v39  ;;  %v3521_v57 = vmul.f32 %v3514_v28, %v13768_v42  ;;  %v3522_v16 = vmul.f32 %v3518_v15, %v13768_v42  ;;  %v3562_v36 = vrot.slane %v10969_v18, %v13567_v6  ;;  %v13772_v28 = vld [vmem:[#allocation227_spill] sm:$0xff]  ;;  %v13774_v42 = vld [vmem:[#allocation229_spill] sm:$0xff] }
0x1c23   : > { %v3499_v10 = vadd.f32 %v3495_v40, %v3475_v5  ;;  %v3500_v19 = vadd.f32 %v3496_v22, %v3476_v55  ;;  %v3543_v47 = vmul.f32 %v3538_v23, %v13769_v27  ;;  %v3566_v44 = vrot.slane %v10973_v31, %v13567_v6 }
0x1c24   : > { %v3544_v60 = vmul.f32 %v3542_v2, %v13769_v27  ;;  %v3545_v12 = vmul.f32 %v3538_v23, %v13771_v59  ;;  %v3546_v37 = vmul.f32 %v3542_v2, %v13771_v59  ;;  %v3586_v30 = vrot.slane %v10969_v18, %v13571_v13 }
0x1c25   : > { %v3523_v52 = vadd.f32 %v3519_v49, %v3499_v10  ;;  %v3524_v62 = vadd.f32 %v3520_v32, %v3500_v19  ;;  %v3525_v34 = vadd.f32 %v3521_v57, %v3501_v61  ;;  %v3526_v21 = vadd.f32 %v3522_v16, %v3502_v38  ;;  %v13773_v49 = vld [vmem:[#allocation255_spill] sm:$0xff] }
0x1c26   : > { %v3569_v15 = vmul.f32 %v3562_v36, %v13772_v28  ;;  %v3570_v5 = vmul.f32 %v3566_v44, %v13772_v28  ;;  %v3590_v53 = vrot.slane %v10973_v31, %v13571_v13  ;;  %v3610_v40 = vrot.slane %v10969_v18, %v13573_v3 }
0x1c27   : > { %v3547_v1 = vadd.f32 %v3543_v47, %v3523_v52  ;;  %v3614_v22 = vrot.slane %v10973_v31, %v13573_v3  ;;  %v3548_v61 = vadd.f32 %v3544_v60, %v3524_v62  ;;  %v3549_v38 = vadd.f32 %v3545_v12, %v3525_v34  ;;  %v13775_v12 = vld [vmem:[#allocation231_spill] sm:$0xff]  ;;  %v13776_v52 = vld [vmem:[#allocation256_spill] sm:$0xff] }
0x1c28   : > { %v3550_v0 = vadd.f32 %v3546_v37, %v3526_v21  ;;  %v3567_v32 = vmul.f32 %v3562_v36, %v13773_v49  ;;  %v3568_v2 = vmul.f32 %v3566_v44, %v13773_v49  ;;  %v3591_v57 = vmul.f32 %v3586_v30, %v13774_v42  ;;  %v13777_v21 = vld [vmem:[#allocation232_spill] sm:$0xff] }
0x1c29   : > { %v3634_v16 = vrot.slane %v10969_v18, %v13575_v50  ;;  %v3573_v10 = vadd.f32 %v3569_v15, %v3549_v38  ;;  %v3592_v59 = vmul.f32 %v3590_v53, %v13774_v42  ;;  %v3615_v37 = vmul.f32 %v3610_v40, %v13775_v12  ;;  %v13780_v42 = vld [vmem:[#allocation236_spill] sm:$0xff] }
0x1c2a   : > { %v3574_v19 = vadd.f32 %v3570_v5, %v3550_v0  ;;  %v3571_v60 = vadd.f32 %v3567_v32, %v3547_v1  ;;  %v3593_v36 = vmul.f32 %v3586_v30, %v13776_v52  ;;  %v3572_v62 = vadd.f32 %v3568_v2, %v3548_v61  ;;  %v13778_v61 = vld [vmem:[#allocation234_spill] sm:$0xff]  ;;  %v13779_v32 = vld [vmem:[#allocation257_spill] sm:$0xff] }
0x1c2b   : > { %v3594_v44 = vmul.f32 %v3590_v53, %v13776_v52  ;;  %v3638_v34 = vrot.slane %v10973_v31, %v13575_v50  ;;  %v3616_v18 = vmul.f32 %v3614_v22, %v13775_v12  ;;  %v3618_v28 = vmul.f32 %v3614_v22, %v13777_v21 }
0x1c2c   : > { %v3597_v5 = vadd.f32 %v3593_v36, %v3573_v10  ;;  %v3596_v1 = vadd.f32 %v3592_v59, %v3572_v62  ;;  %v3641_v38 = vmul.f32 %v3634_v16, %v13778_v61  ;;  %v3662_v49 = vrot.slane %v10973_v31, %v13581_v17  ;;  %v13782_v59 = vld [vmem:[#allocation259_spill] sm:$0xff] }
0x1c2d   : > { %v5329_v23 = vpop.permute.xlu0 %5328  ;;  %v3598_v30 = vadd.f32 %v3594_v44, %v3574_v19  ;;  %v3642_v0 = vmul.f32 %v3638_v34, %v13778_v61  ;;  %v13788_v61 = vld [vmem:[#allocation265_spill] sm:$0xff] }
0x1c2e   : > { %v5334_v27 = vmul.f32 %v5329_v23, %v8810_v11  ;;  %v3620_v22 = vadd.f32 %v3616_v18, %v3596_v1  ;;  %v13785_v18 = vld [vmem:[#allocation263_spill] sm:$0xff]  ;;  %v13787_v1 = vld [vmem:[#allocation264_spill] sm:$0xff] }
0x1c31   : > { %v5325_v41 = vpop.permute.xlu1 %5324 }
0x1c32   : > { %v5331_v55 = vmul.f32 %v5325_v41, %v8810_v11  ;;  %v5332_v9 = vmul.f32 %v5325_v41, %v8822_v8  ;;  %v5333_v47 = vmul.f32 %v5325_v41, %v8814_v14  ;;  %v3595_v11 = vadd.f32 %v3591_v57, %v3571_v60  ;;  %v13781_v60 = vld [vmem:[#allocation260_spill] sm:$0xff] }
0x1c33   : > { %v3617_v41 = vmul.f32 %v3610_v40, %v13777_v21  ;;  %v3639_v40 = vmul.f32 %v3634_v16, %v13779_v32  ;;  %v3664_v16 = vmul.f32 %v3662_v49, %v13780_v42  ;;  %v3703_v12 = vsel %vm872_vm8, %v13782_v59, %v13781_v60  ;;  %v13786_v21 = vld [vmem:[#allocation262_spill] sm:$0xff] }
0x1c34   : > { %5345 = vrot.lane.b32.xlu0 %v5332_v9, %s7315_s17  ;;  %5343 = vrot.lane.b32.xlu1 %v5331_v55, %s7315_s17  ;;  %v5335_v55 = vmul.f32 %v5329_v23, %v8822_v8  ;;  %v5336_v9 = vmul.f32 %v5329_v23, %v8814_v14  ;;  %v3619_v53 = vadd.f32 %v3615_v37, %v3595_v11  ;;  %v13783_v37 = vld [vmem:[#allocation258_spill] sm:$0xff] }
0x1c35   : > { %v3621_v2 = vadd.f32 %v3617_v41, %v3597_v5  ;;  %v3622_v8 = vadd.f32 %v3618_v28, %v3598_v30  ;;  %v3663_v14 = vmul.f32 %v11003_v7, %v13780_v42  ;;  %v3640_v23 = vmul.f32 %v3638_v34, %v13779_v32  ;;  %v13784_v34 = vld [vmem:[#allocation261_spill] sm:$0xff]  ;;  %v13790_v32 = vld [vmem:[#allocation268_spill] sm:$0xff]  ;;  %v13797_v59 = vld [vmem:[#allocation274_spill] sm:$0xff] }
0x1c36   : > { %v5369_v15 = vpop.permute.xlu1 %5368  ;;  %v3665_v52 = vmul.f32 %v11003_v7, %v13783_v37  ;;  %v3666_v36 = vmul.f32 %v3662_v49, %v13783_v37  ;;  %v3704_v11 = vsel %vm872_vm8, %v13781_v60, %v13784_v34  ;;  %v3705_v41 = vsel %vm872_vm8, %v13786_v21, %v13785_v18  ;;  %v13793_v42 = vld [vmem:[#allocation272_spill] sm:$0xff]  ;;  %v13796_v60 = vld [vmem:[#allocation273_spill] sm:$0xff]  ;;  %v5413_v37 = vpop.permute.xlu0 %5412 }
0x1c37   : > { %v5375_v57 = vmul.f32 %v5369_v15, %v8853_v43  ;;  %v5376_v10 = vmul.f32 %v5369_v15, %v8857_v35  ;;  %v3645_v19 = vadd.f32 %v3641_v38, %v3621_v2  ;;  %v3646_v31 = vadd.f32 %v3642_v0, %v3622_v8  ;;  %v13789_v0 = vld [vmem:[#allocation266_spill] sm:$0xff]  ;;  %v13792_v2 = vld [vmem:[#allocation269_spill] sm:$0xff] }
0x1c38   : > { %5349 = vrot.lane.b32.xlu0 %v5334_v27, %s7315_s17  ;;  %5347 = vrot.lane.b32.xlu1 %v5333_v47, %s7315_s17  ;;  %v3643_v27 = vadd.f32 %v3639_v40, %v3619_v53  ;;  %v3644_v44 = vadd.f32 %v3640_v23, %v3620_v22  ;;  %v5377_v28 = vmul.f32 %v5369_v15, %v8863_v25  ;;  %v13791_v40 = vld [vmem:[#allocation267_spill] sm:$0xff]  ;;  %v13800_v34 = vld [vmem:[#allocation277_spill] sm:$0xff] }
0x1c39   : > { %v3670_v7 = vadd.f32 %v3666_v36, %v3646_v31  ;;  %v3706_v53 = vsel %vm872_vm8, %v13785_v18, %v13787_v1  ;;  %v3747_v38 = vsel %vm872_vm8, %v13788_v61, %v9656_v48  ;;  %v3748_v49 = vsel %vm872_vm8, %v9656_v48, %v13789_v0  ;;  %v13805_v0 = vld [vmem:[#allocation281_spill] sm:$0xff] }
0x1c3a   : > { %v5373_v47 = vpop.permute.xlu1 %5372  ;;  %v3667_v62 = vadd.f32 %v3663_v14, %v3643_v27  ;;  %v3749_v22 = vsel %vm872_vm8, %v13791_v40, %v13790_v32  ;;  %v3750_v8 = vsel %vm872_vm8, %v13790_v32, %v13792_v2  ;;  %v13794_v14 = vld [vmem:[#allocation270_spill] sm:$0xff]  ;;  %v13807_v32 = vld [vmem:[#allocation284_spill] sm:$0xff]  ;;  %v13808_v40 = vld [vmem:[#allocation285_spill] sm:$0xff] }
0x1c3b   : > { %v5378_v5 = vmul.f32 %v5373_v47, %v8853_v43  ;;  %v3791_v23 = vsel %vm872_vm8, %v13794_v14, %v13793_v42  ;;  %v3714_v31 = vadd.f32 %v3706_v53, %v3670_v7 }
0x1c3c   : > { %5353 = vrot.lane.b32.xlu0 %v5336_v9, %s7315_s17  ;;  %5351 = vrot.lane.b32.xlu1 %v5335_v55, %s7315_s17  ;;  %v3711_v30 = vadd.f32 %v3703_v12, %v3667_v62  ;;  %v3668_v55 = vadd.f32 %v3664_v16, %v3644_v44  ;;  %v3669_v9 = vadd.f32 %v3665_v52, %v3645_v19  ;;  %v13798_v52 = vld [vmem:[#allocation275_spill] sm:$0xff]  ;;  %v13799_v62 = vld [vmem:[#allocation276_spill] sm:$0xff] }
0x1c3d   : > { %v5380_v19 = vmul.f32 %v5373_v47, %v8863_v25  ;;  %v3793_v12 = vsel %vm872_vm8, %v13797_v59, %v13796_v60  ;;  %v3794_v36 = vsel %vm872_vm8, %v13796_v60, %v13798_v52  ;;  %v3835_v44 = vsel %vm872_vm8, %v13799_v62, %v9708_v56  ;;  %v13815_v60 = vld [vmem:[#allocation78_spill] sm:$0xff] }
0x1c3e   : > { %v3712_v43 = vadd.f32 %v3704_v11, %v3668_v55  ;;  %v3713_v15 = vadd.f32 %v3705_v41, %v3669_v9  ;;  %v3755_v27 = vadd.f32 %v3747_v38, %v3711_v30  ;;  %v3836_v25 = vsel %vm872_vm8, %v9708_v56, %v13800_v34  ;;  %v13801_v41 = vld [vmem:[#allocation279_spill] sm:$0xff]  ;;  %v13803_v30 = vld [vmem:[#allocation280_spill] sm:$0xff] }
0x1c3f   : > { %v3758_v11 = vadd.f32 %v3750_v8, %v3714_v31  ;;  %v3838_v55 = vsel %vm872_vm8, %v13801_v41, %v13803_v30  ;;  %v5419_v9 = vmul.f32 %v5413_v37, %v8896_v58  ;;  %v5420_v56 = vmul.f32 %v5413_v37, %v8908_v20  ;;  %v13804_v38 = vld [vmem:[#allocation283_spill] sm:$0xff]  ;;  %v13816_v34 = vld [vmem:[#allocation292_spill] sm:$0xff] }
0x1c40   : > { %5389 = vrot.lane.b32.xlu0 %v5376_v10, %s7315_s17  ;;  %5387 = vrot.lane.b32.xlu1 %v5375_v57, %s7315_s17  ;;  %v13795_v57 = vld [vmem:[#allocation271_spill] sm:$0xff]  ;;  %v5379_v10 = vmul.f32 %v5373_v47, %v8857_v35  ;;  %v3756_v16 = vadd.f32 %v3748_v49, %v3712_v43  ;;  %v5417_v35 = vpop.permute.xlu1 %5416  ;;  %v3757_v47 = vadd.f32 %v3749_v22, %v3713_v15  ;;  %v13806_v43 = vld [vmem:[#allocation282_spill] sm:$0xff] }
0x1c41   : > { %v3792_v48 = vsel %vm872_vm8, %v13793_v42, %v13795_v57  ;;  %v3799_v18 = vadd.f32 %v3791_v23, %v3755_v27  ;;  %v3802_v1 = vadd.f32 %v3794_v36, %v3758_v11  ;;  %v3879_v49 = vsel %vm872_vm8, %v13805_v0, %v13804_v38  ;;  %v13809_v42 = vld [vmem:[#allocation286_spill] sm:$0xff]  ;;  %v13810_v23 = vld [vmem:[#allocation288_spill] sm:$0xff]  ;;  %v13811_v57 = vld [vmem:[#allocation287_spill] sm:$0xff] }
0x1c42   : > { %v3800_v21 = vadd.f32 %v3792_v48, %v3756_v16  ;;  %v3801_v7 = vadd.f32 %v3793_v12, %v3757_v47  ;;  %v3880_v15 = vsel %vm872_vm8, %v13804_v38, %v13806_v43  ;;  %v3881_v22 = vsel %vm872_vm8, %v13808_v40, %v13807_v32  ;;  %v13813_v31 = vld [vmem:[#allocation291_spill] sm:$0xff]  ;;  %v13814_v27 = vld [vmem:[#allocation290_spill] sm:$0xff]  ;;  %v13818_v11 = vld [vmem:[#allocation293_spill] sm:$0xff] }
0x1c43   : > { %v3843_v53 = vadd.f32 %v3835_v44, %v3799_v18  ;;  %v3846_v8 = vadd.f32 %v3838_v55, %v3802_v1  ;;  %v3882_v14 = vsel %vm872_vm8, %v13807_v32, %v13809_v42  ;;  %v3923_v48 = vsel %vm872_vm8, %v13811_v57, %v13810_v23  ;;  %v13817_v47 = vld [vmem:[#allocation295_spill] sm:$0xff]  ;;  %v13823_v1 = vld [vmem:[#allocation300_spill] sm:$0xff]  ;;  %v13825_v40 = vld [vmem:[#allocation301_spill] sm:$0xff] }
0x1c44   : > { %5391 = vrot.lane.b32.xlu1 %v5377_v28, %s7315_s17  ;;  %5393 = vrot.lane.b32.xlu0 %v5378_v5, %s7315_s17  ;;  %v13802_v28 = vld [vmem:[#allocation278_spill] sm:$0xff]  ;;  %v3844_v61 = vadd.f32 %v3836_v25, %v3800_v21  ;;  %v3925_v16 = vsel %vm872_vm8, %v13814_v27, %v13813_v31  ;;  %v5421_v59 = vmul.f32 %v5413_v37, %v13815_v60  ;;  %v5457_v52 = vpop.permute.xlu1 %5456  ;;  %v13821_v37 = vld [vmem:[#allocation297_spill] sm:$0xff] }
0x1c45   : > { %v3837_v5 = vsel %vm872_vm8, %v13802_v28, %v13801_v41  ;;  %v5422_v12 = vmul.f32 %v5417_v35, %v8896_v58  ;;  %v3887_v36 = vadd.f32 %v3879_v49, %v3843_v53  ;;  %v3926_v25 = vsel %vm872_vm8, %v13813_v31, %v13816_v34  ;;  %v13819_v21 = vld [vmem:[#allocation294_spill] sm:$0xff]  ;;  %v13820_v28 = vld [vmem:[#allocation296_spill] sm:$0xff]  ;;  %v13824_v53 = vld [vmem:[#allocation299_spill] sm:$0xff] }
0x1c46   : > { %v3845_v2 = vadd.f32 %v3837_v5, %v3801_v7  ;;  %v3888_v62 = vadd.f32 %v3880_v15, %v3844_v61  ;;  %v3967_v18 = vsel %vm872_vm8, %v13818_v11, %v13817_v47  ;;  %v3968_v41 = vsel %vm872_vm8, %v13817_v47, %v13819_v21  ;;  %v13831_v31 = vld [vmem:[#allocation306_spill] sm:$0xff]  ;;  %v13836_v34 = vld [vmem:[#allocation87_spill] sm:$0xff]  ;;  %v13837_v21 = vld [vmem:[#allocation312_spill] sm:$0xff] }
0x1c47   : > { %v3969_v58 = vsel %vm872_vm8, %v13821_v37, %v13820_v28  ;;  %v3890_v5 = vadd.f32 %v3882_v14, %v3846_v8  ;;  %v3931_v30 = vadd.f32 %v3923_v48, %v3887_v36  ;;  %v4011_v61 = vsel %vm872_vm8, %v13824_v53, %v13823_v1  ;;  %v13827_v8 = vld [vmem:[#allocation302_spill] sm:$0xff]  ;;  %v13828_v14 = vld [vmem:[#allocation304_spill] sm:$0xff]  ;;  %v13829_v48 = vld [vmem:[#allocation307_spill] sm:$0xff]  ;;  %v5461_v37 = vpop.permute.xlu0 %5460 }
0x1c48   : > { %5395 = vrot.lane.b32.xlu1 %v5379_v10, %s7315_s17  ;;  %5397 = vrot.lane.b32.xlu0 %v5380_v19, %s7315_s17  ;;  %v13812_v10 = vld [vmem:[#allocation289_spill] sm:$0xff]  ;;  %v3889_v44 = vadd.f32 %v3881_v22, %v3845_v2  ;;  %v5423_v38 = vmul.f32 %v5417_v35, %v8908_v20  ;;  %v5424_v0 = vmul.f32 %v5417_v35, %v13815_v60  ;;  %v13826_v2 = vld [vmem:[#allocation303_spill] sm:$0xff] }
0x1c49   : > { %v3924_v19 = vsel %vm872_vm8, %v13810_v23, %v13812_v10  ;;  %v3934_v49 = vadd.f32 %v3926_v25, %v3890_v5  ;;  %v3975_v43 = vadd.f32 %v3967_v18, %v3931_v30  ;;  %v4012_v22 = vsel %vm872_vm8, %v13823_v1, %v13825_v40  ;;  %v11193_v57 = vpop.permute.xlu1 %5500  ;;  %v13830_v10 = vld [vmem:[#allocation305_spill] sm:$0xff]  ;;  %v13840_v30 = vld [vmem:[#allocation315_spill] sm:$0xff] }
0x1c4a   : > { %v3932_v55 = vadd.f32 %v3924_v19, %v3888_v62  ;;  %v4013_v42 = vsel %vm872_vm8, %v13827_v8, %v13826_v2  ;;  %v4014_v23 = vsel %vm872_vm8, %v13826_v2, %v13828_v14  ;;  %v4055_v19 = vsel %vm872_vm8, %v13830_v10, %v13829_v48  ;;  %v13833_v60 = vld [vmem:[#allocation309_spill] sm:$0xff]  ;;  %v13835_v62 = vld [vmem:[#allocation88_spill] sm:$0xff] }
0x1c4b   : > { %v4019_v35 = vadd.f32 %v4011_v61, %v3975_v43  ;;  %v4056_v27 = vsel %vm872_vm8, %v13829_v48, %v13831_v31  ;;  %v5464_v25 = vmul.f32 %v5457_v52, %v13836_v34  ;;  %v5466_v40 = vmul.f32 %v5461_v37, %v13835_v62  ;;  %v13848_v48 = vld [vmem:[#allocation321_spill] sm:$0xff] }
0x1c4c   : > { %5431 = vrot.lane.b32.xlu1 %v5419_v9, %s7315_s17  ;;  %5433 = vrot.lane.b32.xlu0 %v5420_v56, %s7315_s17  ;;  %v3933_v9 = vadd.f32 %v3925_v16, %v3889_v44  ;;  %v13822_v56 = vld [vmem:[#allocation298_spill] sm:$0xff]  ;;  %v3976_v15 = vadd.f32 %v3968_v41, %v3932_v55  ;;  %v13832_v16 = vld [vmem:[#allocation308_spill] sm:$0xff]  ;;  %v5463_v44 = vmul.f32 %v5457_v52, %v13835_v62  ;;  %v13838_v41 = vld [vmem:[#allocation311_spill] sm:$0xff] }
0x1c4d   : > { %v3970_v7 = vsel %vm872_vm8, %v13820_v28, %v13822_v56  ;;  %v4099_v28 = vsel %vm872_vm8, %v13838_v41, %v13837_v21  ;;  %v13841_v55 = vld [vmem:[#allocation314_spill] sm:$0xff]  ;;  %v13842_v56 = vld [vmem:[#allocation316_spill] sm:$0xff]  ;;  %v4063_v1 = vadd.f32 %v4055_v19, %v4019_v35  ;;  %v11233_v8 = vpop.permute.xlu1 %5504  ;;  %v13853_v62 = vld [vmem:[#allocation327_spill] sm:$0xff] }
0x1c4e   : > { %v3977_v32 = vadd.f32 %v3969_v58, %v3933_v9  ;;  %v3978_v20 = vadd.f32 %v3970_v7, %v3934_v49  ;;  %v4020_v47 = vadd.f32 %v4012_v22, %v3976_v15  ;;  %v13839_v58 = vld [vmem:[#allocation313_spill] sm:$0xff]  ;;  %v4101_v9 = vsel %vm872_vm8, %v13841_v55, %v13840_v30  ;;  %v13845_v15 = vld [vmem:[#allocation318_spill] sm:$0xff]  ;;  %v13846_v22 = vld [vmem:[#allocation92_spill] sm:$0xff] }
0x1c4f   : > { %v4100_v5 = vsel %vm872_vm8, %v13837_v21, %v13839_v58  ;;  %v4102_v7 = vsel %vm872_vm8, %v13840_v30, %v13842_v56  ;;  %v13844_v49 = vld [vmem:[#allocation317_spill] sm:$0xff]  ;;  %v5465_v2 = vmul.f32 %v5457_v52, %v13846_v22  ;;  %v13847_v35 = vld [vmem:[#allocation320_spill] sm:$0xff]  ;;  %v13849_v19 = vld [vmem:[#allocation322_spill] sm:$0xff]  ;;  %v5468_v58 = vmul.f32 %v5461_v37, %v13846_v22 }
0x1c50   : > { %5435 = vrot.lane.b32.xlu1 %v5421_v59, %s7315_s17  ;;  %5437 = vrot.lane.b32.xlu0 %v5422_v12, %s7315_s17  ;;  %v4057_v59 = vsel %vm872_vm8, %v13833_v60, %v13832_v16  ;;  %v13834_v12 = vld [vmem:[#allocation310_spill] sm:$0xff]  ;;  %v4021_v11 = vadd.f32 %v4013_v42, %v3977_v32  ;;  %v4022_v18 = vadd.f32 %v4014_v23, %v3978_v20  ;;  %v13857_v21 = vld [vmem:[#allocation329_spill] sm:$0xff] }
0x1c51   : > { %v4058_v36 = vsel %vm872_vm8, %v13832_v16, %v13834_v12  ;;  %v4064_v53 = vadd.f32 %v4056_v27, %v4020_v47  ;;  %v4107_v42 = vadd.f32 %v4099_v28, %v4063_v1  ;;  %v4145_v10 = vsel %vm872_vm8, %v13848_v48, %v13847_v35  ;;  %v13850_v27 = vld [vmem:[#allocation324_spill] sm:$0xff]  ;;  %v13851_v16 = vld [vmem:[#allocation323_spill] sm:$0xff]  ;;  %v13852_v12 = vld [vmem:[#allocation325_spill] sm:$0xff] }
0x1c52   : > { %v4065_v61 = vadd.f32 %v4057_v59, %v4021_v11  ;;  %v4146_v31 = vsel %vm872_vm8, %v13847_v35, %v13849_v19  ;;  %v4187_v60 = vsel %vm872_vm8, %v13851_v16, %v13850_v27  ;;  %v13855_v47 = vld [vmem:[#allocation328_spill] sm:$0xff]  ;;  %v5467_v28 = vmul.f32 %v5461_v37, %v13836_v34  ;;  %v13860_v1 = vld [vmem:[#allocation333_spill] sm:$0xff]  ;;  %v11272_v37 = vpop.permute.xlu1 %5548 }
0x1c53   : > { %v4108_v14 = vadd.f32 %v4100_v5, %v4064_v53  ;;  %v4190_v11 = vsel %vm872_vm8, %v13853_v62, %v13855_v47  ;;  %v13864_v22 = vld [vmem:[#allocation337_spill] sm:$0xff]  ;;  %v13873_v47 = vld [vmem:[#allocation344_spill] sm:$0xff] }
0x1c54   : > { %5439 = vrot.lane.b32.xlu1 %v5423_v38, %s7315_s17  ;;  %5441 = vrot.lane.b32.xlu0 %v5424_v0, %s7315_s17  ;;  %v4066_v38 = vadd.f32 %v4058_v36, %v4022_v18  ;;  %v13843_v0 = vld [vmem:[#allocation319_spill] sm:$0xff]  ;;  %v4109_v23 = vadd.f32 %v4101_v9, %v4065_v61  ;;  %v4188_v36 = vsel %vm872_vm8, %v13850_v27, %v13852_v12  ;;  %v13858_v9 = vld [vmem:[#allocation330_spill] sm:$0xff]  ;;  %v13871_v12 = vld [vmem:[#allocation341_spill] sm:$0xff] }
0x1c55   : > { %v4143_v43 = vsel %vm872_vm8, %v13844_v49, %v13843_v0  ;;  %v4144_v32 = vsel %vm872_vm8, %v13843_v0, %v13845_v15  ;;  %v13856_v18 = vld [vmem:[#allocation331_spill] sm:$0xff]  ;;  %v13861_v61 = vld [vmem:[#allocation334_spill] sm:$0xff]  ;;  %v13862_v0 = vld [vmem:[#allocation336_spill] sm:$0xff] }
0x1c56   : > { %v4110_v20 = vadd.f32 %v4102_v7, %v4066_v38  ;;  %v4151_v52 = vadd.f32 %v4143_v43, %v4107_v42  ;;  %v4152_v59 = vadd.f32 %v4144_v32, %v4108_v14  ;;  %v4231_v41 = vsel %vm872_vm8, %v13857_v21, %v13856_v18  ;;  %v13859_v7 = vld [vmem:[#allocation332_spill] sm:$0xff]  ;;  %v13863_v49 = vld [vmem:[#allocation335_spill] sm:$0xff]  ;;  %v13868_v27 = vld [vmem:[#allocation338_spill] sm:$0xff] }
0x1c57   : > { %v4153_v5 = vadd.f32 %v4145_v10, %v4109_v23  ;;  %v4232_v56 = vsel %vm872_vm8, %v13856_v18, %v13858_v9  ;;  %v4233_v53 = vsel %vm872_vm8, %v13860_v1, %v13859_v7  ;;  %v4234_v38 = vsel %vm872_vm8, %v13859_v7, %v13861_v61  ;;  %v13865_v42 = vld [vmem:[#allocation100_spill] sm:$0xff]  ;;  %v13866_v23 = vld [vmem:[#allocation103_spill] sm:$0xff]  ;;  %v13875_v21 = vld [vmem:[#allocation369_spill] sm:$0xff]  ;;  %v11313_v1 = vpop.permute.xlu1 %5588 }
0x1c58   : > { %5477 = vrot.lane.b32.xlu0 %v5464_v25, %s7315_s17  ;;  %5475 = vrot.lane.b32.xlu1 %v5463_v44, %s7315_s17  ;;  %v13854_v44 = vld [vmem:[#allocation326_spill] sm:$0xff]  ;;  %v4154_v30 = vadd.f32 %v4146_v31, %v4110_v20  ;;  %v4195_v55 = vadd.f32 %v4187_v60, %v4151_v52  ;;  %v4275_v34 = vsel %vm872_vm8, %v13863_v49, %v13862_v0  ;;  %v13867_v31 = vld [vmem:[#allocation339_spill] sm:$0xff]  ;;  %v13869_v60 = vld [vmem:[#allocation340_spill] sm:$0xff] }
0x1c59   : > { %v4189_v25 = vsel %vm872_vm8, %v13854_v44, %v13853_v62  ;;  %v4196_v43 = vadd.f32 %v4188_v36, %v4152_v59  ;;  %v5507_v14 = vmul.f32 %v11193_v57, %v13865_v42  ;;  %v5508_v20 = vmul.f32 %v11193_v57, %v13866_v23  ;;  %v13870_v59 = vld [vmem:[#allocation343_spill] sm:$0xff]  ;;  %v13872_v44 = vld [vmem:[#allocation342_spill] sm:$0xff]  ;;  %v13879_v9 = vld [vmem:[#allocation101_spill] sm:$0xff] }
0x1c5a   : > { %v4197_v15 = vadd.f32 %v4189_v25, %v4153_v5  ;;  %v4198_v32 = vadd.f32 %v4190_v11, %v4154_v30  ;;  %v4277_v16 = vsel %vm872_vm8, %v13868_v27, %v13867_v31  ;;  %v4278_v52 = vsel %vm872_vm8, %v13867_v31, %v13869_v60  ;;  %v13874_v11 = vld [vmem:[#allocation345_spill] sm:$0xff]  ;;  %v13878_v30 = vld [vmem:[#allocation351_spill] sm:$0xff] }
0x1c5b   : > { %v4240_v35 = vadd.f32 %v4232_v56, %v4196_v43  ;;  %v4319_v36 = vsel %vm872_vm8, %v13871_v12, %v13870_v59  ;;  %v4320_v25 = vsel %vm872_vm8, %v13870_v59, %v13872_v44  ;;  %v4321_v18 = vsel %vm872_vm8, %v13874_v11, %v13873_v47  ;;  %v13881_v49 = vld [vmem:[#allocation347_spill] sm:$0xff]  ;;  %v13882_v43 = vld [vmem:[#allocation348_spill] sm:$0xff]  ;;  %v5545_v59 = vpop.permute.xlu0 %5544 }
0x1c5c   : > { %5481 = vrot.lane.b32.xlu0 %v5466_v40, %s7315_s17  ;;  %5479 = vrot.lane.b32.xlu1 %v5465_v2, %s7315_s17  ;;  %v4239_v40 = vadd.f32 %v4231_v41, %v4195_v55  ;;  %v4276_v2 = vsel %vm872_vm8, %v13862_v0, %v13864_v22  ;;  %v4241_v48 = vadd.f32 %v4233_v53, %v4197_v15  ;;  %v13876_v41 = vld [vmem:[#allocation350_spill] sm:$0xff]  ;;  %v13885_v22 = vld [vmem:[#allocation367_spill] sm:$0xff] }
0x1c5d   : > { %v4242_v10 = vadd.f32 %v4234_v38, %v4198_v32  ;;  %v4284_v62 = vadd.f32 %v4276_v2, %v4240_v35  ;;  %v4388_v55 = vsel %vm1023_vm9, %v13875_v21, %v13878_v30  ;;  %v5509_v56 = vmul.f32 %v11193_v57, %v13879_v9  ;;  %v13880_v0 = vld [vmem:[#allocation362_spill] sm:$0xff]  ;;  %v13883_v32 = vld [vmem:[#allocation349_spill] sm:$0xff]  ;;  %v13890_v30 = vld [vmem:[#allocation112_spill] sm:$0xff] }
0x1c5e   : > { %v4283_v19 = vadd.f32 %v4275_v34, %v4239_v40  ;;  %v5510_v7 = vmul.f32 %v11233_v8, %v13865_v42  ;;  %v4285_v53 = vadd.f32 %v4277_v16, %v4241_v48  ;;  %v4363_v34 = vsel %vm872_vm8, %v13881_v49, %v13880_v0  ;;  %v13884_v40 = vld [vmem:[#allocation364_spill] sm:$0xff] }
0x1c5f   : > { %v4286_v61 = vadd.f32 %v4278_v52, %v4242_v10  ;;  %v4364_v15 = vsel %vm872_vm8, %v13880_v0, %v13882_v43  ;;  %v4365_v57 = vsel %vm872_vm8, %v13884_v40, %v13883_v32  ;;  %v4366_v2 = vsel %vm872_vm8, %v13883_v32, %v13885_v22  ;;  %v13894_v40 = vld [vmem:[#allocation356_spill] sm:$0xff] }
0x1c60   : > { %5485 = vrot.lane.b32.xlu0 %v5468_v58, %s7315_s17  ;;  %5483 = vrot.lane.b32.xlu1 %v5467_v28, %s7315_s17  ;;  %v4387_v28 = vsel %vm1023_vm9, %v13876_v41, %v13875_v21  ;;  %v13877_v58 = vld [vmem:[#allocation346_spill] sm:$0xff]  ;;  %v4327_v38 = vadd.f32 %v4319_v36, %v4283_v19  ;;  %v11335_v48 = vsel %vm8219_vm6, %v4388_v55, 0.0  ;;  %v5511_v19 = vmul.f32 %v11233_v8, %v13866_v23  ;;  %v11349_v23 = vpop.permute.xlu1 %5632  ;;  %v13888_v21 = vld [vmem:[#allocation371_spill] sm:$0xff] }
0x1c61   : > { %v4322_v5 = vsel %vm872_vm8, %v13873_v47, %v13877_v58  ;;  %v11329_v42 = vsel %vm8190_vm3, %v4387_v28, 0.0  ;;  %v5512_v31 = vmul.f32 %v11233_v8, %v13879_v9  ;;  %v4414_v12 = vrot.slane %v11335_v48, %v13560_v33  ;;  %v13886_v8 = vld [vmem:[#allocation375_spill] sm:$0xff]  ;;  %v13891_v9 = vld [vmem:[#allocation353_spill] sm:$0xff] }
0x1c62   : > { %v4330_v35 = vadd.f32 %v4322_v5, %v4286_v61  ;;  %v4371_v10 = vadd.f32 %v4363_v34, %v4327_v38  ;;  %v4410_v52 = vrot.slane %v11329_v42, %v13560_v33  ;;  %v4434_v36 = vrot.slane %v11329_v42, %v13559_v29  ;;  %v13889_v58 = vld [vmem:[#allocation111_spill] sm:$0xff] }
0x1c63   : > { %v4462_v47 = vrot.slane %v11335_v48, %v13562_v39  ;;  %v4482_v11 = vrot.slane %v11329_v42, %v13567_v6  ;;  %v4486_v28 = vrot.slane %v11335_v48, %v13567_v6  ;;  %v5551_v5 = vmul.f32 %v5545_v59, %v13889_v58 }
0x1c64   : > { %5521 = vrot.lane.b32.xlu0 %v5508_v20, %s7315_s17  ;;  %5519 = vrot.lane.b32.xlu1 %v5507_v14, %s7315_s17  ;;  %v4328_v14 = vadd.f32 %v4320_v25, %v4284_v62  ;;  %v4329_v20 = vadd.f32 %v4321_v18, %v4285_v53  ;;  %v4374_v60 = vadd.f32 %v4366_v2, %v4330_v35  ;;  %v13887_v18 = vld [vmem:[#allocation352_spill] sm:$0xff]  ;;  %v13892_v53 = vld [vmem:[#allocation355_spill] sm:$0xff] }
0x1c65   : > { %v4438_v62 = vrot.slane %v11335_v48, %v13559_v29  ;;  %v4417_v44 = vmul.f32 %v4410_v52, %v13886_v8  ;;  %v4458_v25 = vrot.slane %v11329_v42, %v13562_v39  ;;  %v4389_v41 = vsel %vm1023_vm9, %v13888_v21, %v13887_v18 }
0x1c66   : > { %v4372_v27 = vadd.f32 %v4364_v15, %v4328_v14  ;;  %v4373_v16 = vadd.f32 %v4365_v57, %v4329_v20  ;;  %v5552_v55 = vmul.f32 %v5545_v59, %v13890_v30  ;;  %v4441_v61 = vmul.f32 %v4434_v36, %v13892_v53  ;;  %v13893_v15 = vld [vmem:[#allocation354_spill] sm:$0xff] }
0x1c67   : > { %v11372_v38 = vrot.slane %v11329_v42, %v13573_v3  ;;  %v4418_v0 = vmul.f32 %v4414_v12, %v13886_v8  ;;  %v11377_v49 = vrot.slane %v11335_v48, %v13573_v3  ;;  %v11381_v34 = vrot.slane %v11329_v42, %v13575_v50  ;;  %v13895_v20 = vld [vmem:[#allocation114_spill] sm:$0xff] }
0x1c68   : > { %5523 = vrot.lane.b32.xlu1 %v5509_v56, %s7315_s17  ;;  %5525 = vrot.lane.b32.xlu0 %v5510_v7, %s7315_s17  ;;  %v4415_v56 = vmul.f32 %v4410_v52, %v13891_v9  ;;  %v4416_v7 = vmul.f32 %v4414_v12, %v13891_v9  ;;  %v4421_v43 = vadd.f32 %v4417_v44, %v4373_v16  ;;  %v13896_v12 = vld [vmem:[#allocation377_spill] sm:$0xff] }
0x1c69   : > { %v4439_v32 = vmul.f32 %v4434_v36, %v13893_v15  ;;  %v4465_v57 = vmul.f32 %v4458_v25, %v13894_v40  ;;  %v4506_v22 = vrot.slane %v11329_v42, %v13571_v13  ;;  %v4440_v2 = vmul.f32 %v4438_v62, %v13893_v15 }
0x1c6a   : > { %v4442_v14 = vmul.f32 %v4438_v62, %v13892_v53  ;;  %v5553_v35 = vmul.f32 %v5545_v59, %v13895_v20  ;;  %v4419_v52 = vadd.f32 %v4415_v56, %v4371_v10  ;;  %v4420_v16 = vadd.f32 %v4416_v7, %v4372_v27  ;;  %v13897_v59 = vld [vmem:[#allocation373_spill] sm:$0xff]  ;;  %v13898_v56 = vld [vmem:[#allocation380_spill] sm:$0xff] }
0x1c6b   : > { %v4463_v36 = vmul.f32 %v4458_v25, %v13896_v12  ;;  %v4445_v8 = vadd.f32 %v4441_v61, %v4421_v43  ;;  %v4422_v44 = vadd.f32 %v4418_v0, %v4374_v60  ;;  %v4464_v21 = vmul.f32 %v4462_v47, %v13896_v12  ;;  %v13899_v53 = vld [vmem:[#allocation357_spill] sm:$0xff] }
0x1c6c   : > { %5527 = vrot.lane.b32.xlu1 %v5511_v19, %s7315_s17  ;;  %5529 = vrot.lane.b32.xlu0 %v5512_v31, %s7315_s17  ;;  %v5554_v19 = vmul.f32 %v11272_v37, %v13889_v58  ;;  %v11394_v31 = vpop.permute.xlu1 %5636  ;;  %v4390_v62 = vsel %vm1023_vm9, %v13887_v18, %v13897_v59  ;;  %v4443_v58 = vadd.f32 %v4439_v32, %v4419_v52  ;;  %v11415_v0 = vsel %vm8190_vm3, %v4389_v41, 0.0  ;;  %v13900_v32 = vld [vmem:[#allocation359_spill] sm:$0xff] }
0x1c6d   : > { %v4510_v10 = vrot.slane %v11335_v48, %v13571_v13  ;;  %v4444_v27 = vadd.f32 %v4440_v2, %v4420_v16  ;;  %v4446_v25 = vadd.f32 %v4442_v14, %v4422_v44  ;;  %v5555_v60 = vmul.f32 %v11272_v37, %v13890_v30  ;;  %v13901_v30 = vld [vmem:[#allocation358_spill] sm:$0xff]  ;;  %v13904_v16 = vld [vmem:[#allocation124_spill] sm:$0xff]  ;;  %v5593_v44 = vpop.permute.xlu0 %5592 }
0x1c6e   : > { %v4467_v9 = vadd.f32 %v4463_v36, %v4443_v58  ;;  %v4489_v7 = vmul.f32 %v4482_v11, %v13898_v56  ;;  %v4487_v61 = vmul.f32 %v4482_v11, %v13899_v53  ;;  %v4488_v18 = vmul.f32 %v4486_v28, %v13899_v53  ;;  %v13906_v53 = vld [vmem:[#allocation382_spill] sm:$0xff] }
0x1c6f   : > { %v4468_v43 = vadd.f32 %v4464_v21, %v4444_v27  ;;  %v4511_v11 = vmul.f32 %v4506_v22, %v13901_v30  ;;  %v4512_v2 = vmul.f32 %v4510_v10, %v13901_v30  ;;  %v4514_v41 = vmul.f32 %v4510_v10, %v13900_v32 }
0x1c70   : > { %5563 = vrot.lane.b32.xlu1 %v5551_v5, %s7315_s17  ;;  %5565 = vrot.lane.b32.xlu0 %v5552_v55, %s7315_s17  ;;  %v4466_v5 = vmul.f32 %v4462_v47, %v13894_v40  ;;  %v4469_v55 = vadd.f32 %v4465_v57, %v4445_v8  ;;  %v5556_v47 = vmul.f32 %v11272_v37, %v13895_v20  ;;  %v11418_v57 = vpop.permute.xlu1 %5680  ;;  %v13902_v20 = vld [vmem:[#allocation360_spill] sm:$0xff]  ;;  %v11438_v21 = vsel %vm8219_vm6, %v4390_v62, 0.0 }
0x1c71   : > { %v4513_v40 = vmul.f32 %v4506_v22, %v13900_v32  ;;  %v4490_v37 = vmul.f32 %v4486_v28, %v13898_v56  ;;  %v5596_v12 = vmul.f32 %v11313_v1, %v13904_v16  ;;  %v4491_v36 = vadd.f32 %v4487_v61, %v4467_v9  ;;  %v13905_v9 = vld [vmem:[#allocation122_spill] sm:$0xff] }
0x1c72   : > { %v4470_v15 = vadd.f32 %v4466_v5, %v4446_v25  ;;  %v4493_v14 = vadd.f32 %v4489_v7, %v4469_v55  ;;  %v4492_v8 = vadd.f32 %v4488_v18, %v4468_v43  ;;  %v4558_v28 = vrot.slane %v11335_v48, %v13575_v50 }
0x1c73   : > { %v4602_v22 = vrot.slane %v11415_v0, %v13560_v33  ;;  %v4538_v58 = vmul.f32 %v11377_v49, %v13902_v20  ;;  %v4515_v55 = vadd.f32 %v4511_v11, %v4491_v36  ;;  %v4626_v27 = vrot.slane %v11415_v0, %v13559_v29  ;;  %v13909_v11 = vld [vmem:[#allocation365_spill] sm:$0xff]  ;;  %v13911_v36 = vld [vmem:[#allocation366_spill] sm:$0xff] }
0x1c74   : > { %5567 = vrot.lane.b32.xlu1 %v5553_v35, %s7315_s17  ;;  %5569 = vrot.lane.b32.xlu0 %v5554_v19, %s7315_s17  ;;  %v4537_v35 = vmul.f32 %v11372_v38, %v13902_v20  ;;  %v13903_v19 = vld [vmem:[#allocation121_spill] sm:$0xff]  ;;  %v4494_v5 = vadd.f32 %v4490_v37, %v4470_v15  ;;  %v4517_v59 = vadd.f32 %v4513_v40, %v4493_v14  ;;  %v11451_v7 = vpop.permute.xlu1 %5720  ;;  %v13907_v15 = vld [vmem:[#allocation384_spill] sm:$0xff] }
0x1c75   : > { %v5595_v52 = vmul.f32 %v11313_v1, %v13903_v19  ;;  %v4516_v10 = vadd.f32 %v4512_v2, %v4492_v8  ;;  %v4578_v25 = vrot.slane %v11329_v42, %v13581_v17  ;;  %v5597_v56 = vmul.f32 %v11313_v1, %v13905_v9  ;;  %v13908_v37 = vld [vmem:[#allocation361_spill] sm:$0xff] }
0x1c76   : > { %v4541_v62 = vadd.f32 %v4537_v35, %v4517_v59  ;;  %v4535_v61 = vmul.f32 %v11372_v38, %v13906_v53  ;;  %v4536_v18 = vmul.f32 %v11377_v49, %v13906_v53  ;;  %v4606_v43 = vrot.slane %v11438_v21, %v13560_v33  ;;  %v13910_v35 = vld [vmem:[#allocation363_spill] sm:$0xff] }
0x1c77   : > { %v4582_v42 = vrot.slane %v11335_v48, %v13581_v17  ;;  %v4561_v32 = vmul.f32 %v11381_v34, %v13907_v15  ;;  %v4562_v40 = vmul.f32 %v4558_v28, %v13907_v15  ;;  %v4559_v49 = vmul.f32 %v11381_v34, %v13908_v37 }
0x1c78   : > { %5571 = vrot.lane.b32.xlu1 %v5555_v60, %s7315_s17  ;;  %5573 = vrot.lane.b32.xlu0 %v5556_v47, %s7315_s17  ;;  %v4518_v60 = vadd.f32 %v4514_v41, %v4494_v5  ;;  %v5598_v47 = vmul.f32 %v5593_v44, %v13903_v19  ;;  %v4539_v38 = vadd.f32 %v4535_v61, %v4515_v55  ;;  %v11480_v59 = vpop.permute.xlu1 %5764 }
0x1c79   : > { %v4560_v30 = vmul.f32 %v4558_v28, %v13908_v37  ;;  %v4585_v2 = vmul.f32 %v4578_v25, %v13909_v11  ;;  %v4540_v14 = vadd.f32 %v4536_v18, %v4516_v10  ;;  %v4565_v48 = vadd.f32 %v4561_v32, %v4541_v62 }
0x1c7a   : > { %v4542_v1 = vadd.f32 %v4538_v58, %v4518_v60  ;;  %v5599_v41 = vmul.f32 %v5593_v44, %v13904_v16  ;;  %v5600_v20 = vmul.f32 %v5593_v44, %v13905_v9  ;;  %v4583_v19 = vmul.f32 %v4578_v25, %v13910_v35  ;;  %v13912_v60 = vld [vmem:[#allocation130_spill] sm:$0xff] }
0x1c7b   : > { %v4609_v8 = vmul.f32 %v4602_v22, %v13911_v36  ;;  %v4674_v34 = vrot.slane %v11415_v0, %v13567_v6  ;;  %v4650_v5 = vrot.slane %v11415_v0, %v13562_v39  ;;  %v4563_v16 = vadd.f32 %v4559_v49, %v4539_v38  ;;  %v13916_v49 = vld [vmem:[#allocation368_spill] sm:$0xff] }
0x1c7c   : > { %5609 = vrot.lane.b32.xlu0 %v5596_v12, %s7315_s17  ;;  %5607 = vrot.lane.b32.xlu1 %v5595_v52, %s7315_s17  ;;  %v4584_v52 = vmul.f32 %v4582_v42, %v13910_v35  ;;  %v4586_v12 = vmul.f32 %v4582_v42, %v13909_v11  ;;  %v4566_v28 = vadd.f32 %v4562_v40, %v4542_v1  ;;  %v13914_v42 = vld [vmem:[#allocation387_spill] sm:$0xff]  ;;  %v13915_v1 = vld [vmem:[#allocation389_spill] sm:$0xff]  ;;  %v11508_v35 = vpop.permute.xlu1 %5768 }
0x1c7d   : > { %v4564_v44 = vadd.f32 %v4560_v30, %v4540_v14  ;;  %v4589_v58 = vadd.f32 %v4585_v2, %v4565_v48  ;;  %v4610_v55 = vmul.f32 %v4606_v43, %v13911_v36  ;;  %v4630_v10 = vrot.slane %v11438_v21, %v13559_v29  ;;  %v13917_v14 = vld [vmem:[#allocation372_spill] sm:$0xff]  ;;  %v5677_v48 = vpop.permute.xlu0 %5676 }
0x1c7e   : > { %v4678_v25 = vrot.slane %v11438_v21, %v13567_v6  ;;  %v5639_v62 = vmul.f32 %v11349_v23, %v13912_v60  ;;  %v4590_v61 = vadd.f32 %v4586_v12, %v4566_v28  ;;  %v4607_v15 = vmul.f32 %v4602_v22, %v13914_v42  ;;  %v13919_v12 = vld [vmem:[#allocation370_spill] sm:$0xff] }
0x1c7f   : > { %v4588_v53 = vadd.f32 %v4584_v52, %v4564_v44  ;;  %v4613_v18 = vadd.f32 %v4609_v8, %v4589_v58  ;;  %v4608_v32 = vmul.f32 %v4606_v43, %v13914_v42  ;;  %v4654_v40 = vrot.slane %v11438_v21, %v13562_v39  ;;  %v13918_v43 = vld [vmem:[#allocation132_spill] sm:$0xff] }
0x1c80   : > { %5613 = vrot.lane.b32.xlu0 %v5598_v47, %s7315_s17  ;;  %5611 = vrot.lane.b32.xlu1 %v5597_v56, %s7315_s17  ;;  %v13913_v47 = vld [vmem:[#allocation131_spill] sm:$0xff]  ;;  %v4587_v56 = vadd.f32 %v4583_v19, %v4563_v16  ;;  %v4633_v38 = vmul.f32 %v4626_v27, %v13915_v1  ;;  %v4614_v37 = vadd.f32 %v4610_v55, %v4590_v61  ;;  %v13920_v16 = vld [vmem:[#allocation374_spill] sm:$0xff] }
0x1c81   : > { %v5640_v9 = vmul.f32 %v11349_v23, %v13913_v47  ;;  %v4631_v30 = vmul.f32 %v4626_v27, %v13916_v49  ;;  %v4632_v11 = vmul.f32 %v4630_v10, %v13916_v49  ;;  %v4634_v2 = vmul.f32 %v4630_v10, %v13915_v1 }
0x1c82   : > { %v4657_v22 = vmul.f32 %v4650_v5, %v13917_v14  ;;  %v4611_v19 = vadd.f32 %v4607_v15, %v4587_v56  ;;  %v4612_v52 = vadd.f32 %v4608_v32, %v4588_v53  ;;  %v4655_v36 = vmul.f32 %v4650_v5, %v13919_v12  ;;  %v11527_v32 = vpop.permute.xlu0 %5724 }
0x1c83   : > { %v4637_v27 = vadd.f32 %v4633_v38, %v4613_v18  ;;  %v4656_v8 = vmul.f32 %v4654_v40, %v13919_v12  ;;  %v4658_v28 = vmul.f32 %v4654_v40, %v13917_v14  ;;  %v4681_v44 = vmul.f32 %v4674_v34, %v13920_v16  ;;  %v11529_v40 = vpop.permute.xlu1 %5812  ;;  %v13924_v14 = vld [vmem:[#allocation139_spill] sm:$0xff] }
0x1c84   : > { %5617 = vrot.lane.b32.xlu0 %v5600_v20, %s7315_s17  ;;  %5615 = vrot.lane.b32.xlu1 %v5599_v41, %s7315_s17  ;;  %v5641_v41 = vmul.f32 %v11349_v23, %v13918_v43  ;;  %v5642_v20 = vmul.f32 %v11394_v31, %v13912_v60  ;;  %v4635_v23 = vadd.f32 %v4631_v30, %v4611_v19 }
0x1c85   : > { %v4636_v58 = vadd.f32 %v4632_v11, %v4612_v52  ;;  %v4638_v55 = vadd.f32 %v4634_v2, %v4614_v37  ;;  %v4661_v10 = vadd.f32 %v4657_v22, %v4637_v27  ;;  %v4682_v60 = vmul.f32 %v4678_v25, %v13920_v16  ;;  %v13922_v37 = vld [vmem:[#allocation394_spill] sm:$0xff]  ;;  %v13923_v11 = vld [vmem:[#allocation376_spill] sm:$0xff]  ;;  %v13927_v16 = vld [vmem:[#allocation379_spill] sm:$0xff] }
0x1c86   : > { %v5643_v5 = vmul.f32 %v11394_v31, %v13913_v47  ;;  %v4746_v56 = vrot.slane %v11415_v0, %v13575_v50  ;;  %v4659_v53 = vadd.f32 %v4655_v36, %v4635_v23  ;;  %v4722_v61 = vrot.slane %v11415_v0, %v13573_v3  ;;  %v13926_v27 = vld [vmem:[#allocation378_spill] sm:$0xff] }
0x1c87   : > { %v4660_v18 = vadd.f32 %v4656_v8, %v4636_v58  ;;  %v4662_v42 = vadd.f32 %v4658_v28, %v4638_v55  ;;  %v4685_v15 = vadd.f32 %v4681_v44, %v4661_v10  ;;  %v4702_v38 = vrot.slane %v11438_v21, %v13571_v13  ;;  %v13928_v10 = vld [vmem:[#allocation140_spill] sm:$0xff] }
0x1c88   : > { %5653 = vrot.lane.b32.xlu0 %v5640_v9, %s7315_s17  ;;  %5651 = vrot.lane.b32.xlu1 %v5639_v62, %s7315_s17  ;;  %v5644_v62 = vmul.f32 %v11394_v31, %v13918_v43  ;;  %v4698_v9 = vrot.slane %v11415_v0, %v13571_v13  ;;  %v13921_v31 = vld [vmem:[#allocation392_spill] sm:$0xff]  ;;  %v5683_v22 = vmul.f32 %v5677_v48, %v13924_v14  ;;  %v13925_v43 = vld [vmem:[#allocation142_spill] sm:$0xff] }
0x1c89   : > { %v4679_v47 = vmul.f32 %v4674_v34, %v13921_v31  ;;  %v4680_v1 = vmul.f32 %v4678_v25, %v13921_v31  ;;  %v4686_v30 = vadd.f32 %v4682_v60, %v4662_v42  ;;  %v4750_v19 = vrot.slane %v11438_v21, %v13575_v50  ;;  %v13931_v31 = vld [vmem:[#allocation385_spill] sm:$0xff] }
0x1c8a   : > { %v4705_v49 = vmul.f32 %v4698_v9, %v13922_v37  ;;  %v4703_v2 = vmul.f32 %v4698_v9, %v13923_v11  ;;  %v4704_v34 = vmul.f32 %v4702_v38, %v13923_v11  ;;  %v4726_v25 = vrot.slane %v11438_v21, %v13573_v3  ;;  %v11558_v9 = vpop.permute.xlu1 %5852 }
0x1c8b   : > { %v4683_v52 = vadd.f32 %v4679_v47, %v4659_v53  ;;  %v4684_v12 = vadd.f32 %v4680_v1, %v4660_v18  ;;  %v4727_v8 = vmul.f32 %v4722_v61, %v13926_v27  ;;  %v4729_v44 = vmul.f32 %v4722_v61, %v13927_v16  ;;  %v13929_v18 = vld [vmem:[#allocation381_spill] sm:$0xff] }
0x1c8c   : > { %5655 = vrot.lane.b32.xlu1 %v5641_v41, %s7315_s17  ;;  %5657 = vrot.lane.b32.xlu0 %v5642_v20, %s7315_s17  ;;  %v5684_v41 = vmul.f32 %v5677_v48, %v13925_v43  ;;  %v4706_v20 = vmul.f32 %v4702_v38, %v13922_v37  ;;  %v4709_v36 = vadd.f32 %v4705_v49, %v4685_v15  ;;  %v13930_v15 = vld [vmem:[#allocation386_spill] sm:$0xff]  ;;  %v13932_v47 = vld [vmem:[#allocation401_spill] sm:$0xff] }
0x1c8d   : > { %v4728_v28 = vmul.f32 %v4726_v25, %v13926_v27  ;;  %v4730_v23 = vmul.f32 %v4726_v25, %v13927_v16  ;;  %v4707_v58 = vadd.f32 %v4703_v2, %v4683_v52  ;;  %v5685_v60 = vmul.f32 %v5677_v48, %v13928_v10  ;;  %v13934_v25 = vld [vmem:[#allocation399_spill] sm:$0xff] }
0x1c8e   : > { %v4710_v55 = vadd.f32 %v4706_v20, %v4686_v30  ;;  %v4708_v53 = vadd.f32 %v4704_v34, %v4684_v12  ;;  %v4753_v42 = vmul.f32 %v4746_v56, %v13929_v18  ;;  %v4795_v61 = vsel %vm1132_vm10, %v13931_v31, %v13930_v15 }
0x1c8f   : > { %v4796_v1 = vsel %vm1132_vm10, %v13930_v15, %v13932_v47  ;;  %v4770_v48 = vrot.slane %v11415_v0, %v13581_v17  ;;  %v4774_v38 = vrot.slane %v11438_v21, %v13581_v17  ;;  %v4754_v37 = vmul.f32 %v4750_v19, %v13929_v18 }
0x1c90   : > { %5659 = vrot.lane.b32.xlu1 %v5643_v5, %s7315_s17  ;;  %5661 = vrot.lane.b32.xlu0 %v5644_v62, %s7315_s17  ;;  %v11554_v5 = vpop.permute.xlu0 %5808  ;;  %v5686_v62 = vmul.f32 %v11418_v57, %v13924_v14  ;;  %v4731_v49 = vadd.f32 %v4727_v8, %v4707_v58  ;;  %v4732_v30 = vadd.f32 %v4728_v28, %v4708_v53  ;;  %v11576_v14 = vsel %vm8174_vm1, %v4795_v61, 0.0  ;;  %v13935_v8 = vld [vmem:[#allocation383_spill] sm:$0xff]  ;;  %v13939_v53 = vld [vmem:[#allocation149_spill] sm:$0xff] }
0x1c91   : > { %v4733_v11 = vadd.f32 %v4729_v44, %v4709_v36  ;;  %v4734_v2 = vadd.f32 %v4730_v23, %v4710_v55  ;;  %v11580_v0 = vsel %vm8178_vm2, %v4796_v1, 0.0  ;;  %v5687_v21 = vmul.f32 %v11418_v57, %v13925_v43  ;;  %v11593_v44 = vpop.permute.xlu1 %5305  ;;  %v13936_v58 = vld [vmem:[#allocation403_spill] sm:$0xff]  ;;  %v13937_v55 = vld [vmem:[#allocation388_spill] sm:$0xff] }
0x1c92   : > { %v4777_v52 = vmul.f32 %v4770_v48, %v13934_v25  ;;  %v4778_v36 = vmul.f32 %v4774_v38, %v13934_v25  ;;  %v4775_v28 = vmul.f32 %v4770_v48, %v13935_v8  ;;  %v4818_v43 = vrot.slane %v11576_v14, %v13560_v33  ;;  %v13942_v25 = vld [vmem:[#allocation391_spill] sm:$0xff] }
0x1c93   : > { %v4757_v12 = vadd.f32 %v4753_v42, %v4733_v11  ;;  %v4758_v27 = vadd.f32 %v4754_v37, %v4734_v2  ;;  %v5728_v18 = vmul.f32 %v11451_v7, %v13939_v53  ;;  %v4842_v15 = vrot.slane %v11576_v14, %v13559_v29 }
0x1c94   : > { %5695 = vrot.lane.b32.xlu1 %v5683_v22, %s7315_s17  ;;  %5697 = vrot.lane.b32.xlu0 %v5684_v41, %s7315_s17  ;;  %v5688_v22 = vmul.f32 %v11418_v57, %v13928_v10  ;;  %v13933_v41 = vld [vmem:[#allocation396_spill] sm:$0xff]  ;;  %v11591_v16 = vpop.permute.xlu0 %5856  ;;  %v4797_v10 = vsel %vm1132_vm10, %v13937_v55, %v13936_v58  ;;  %v4846_v31 = vrot.slane %v11580_v0, %v13559_v29  ;;  %v13945_v55 = vld [vmem:[#allocation393_spill] sm:$0xff] }
0x1c95   : > { %v4751_v20 = vmul.f32 %v4746_v56, %v13933_v41  ;;  %v4752_v34 = vmul.f32 %v4750_v19, %v13933_v41  ;;  %v4776_v56 = vmul.f32 %v4774_v38, %v13935_v8  ;;  %v4822_v19 = vrot.slane %v11580_v0, %v13560_v33  ;;  %v13944_v8 = vld [vmem:[#allocation409_spill] sm:$0xff] }
0x1c96   : > { %v4781_v42 = vadd.f32 %v4777_v52, %v4757_v12  ;;  %v4890_v61 = vrot.slane %v11576_v14, %v13567_v6  ;;  %v4782_v1 = vadd.f32 %v4778_v36, %v4758_v27  ;;  %v4894_v48 = vrot.slane %v11580_v0, %v13567_v6  ;;  %v13943_v12 = vld [vmem:[#allocation407_spill] sm:$0xff] }
0x1c97   : > { %v4755_v57 = vadd.f32 %v4751_v20, %v4731_v49  ;;  %v4756_v23 = vadd.f32 %v4752_v34, %v4732_v30  ;;  %v11621_v37 = vsel %vm8174_vm1, %v4797_v10, 0.0  ;;  %v13940_v49 = vld [vmem:[#allocation405_spill] sm:$0xff]  ;;  %v4866_v2 = vrot.slane %v11576_v14, %v13562_v39  ;;  %v13941_v20 = vld [vmem:[#allocation150_spill] sm:$0xff]  ;;  %v11635_v34 = vpop.permute.xlu1 %5307 }
0x1c98   : > { %5699 = vrot.lane.b32.xlu1 %v5685_v60, %s7315_s17  ;;  %5701 = vrot.lane.b32.xlu0 %v5686_v62, %s7315_s17  ;;  %v13938_v60 = vld [vmem:[#allocation148_spill] sm:$0xff]  ;;  %v4823_v30 = vmul.f32 %v4818_v43, %v13940_v49  ;;  %v4824_v11 = vmul.f32 %v4822_v19, %v13940_v49  ;;  %v11631_v41 = vpop.permute.xlu0 %5309  ;;  %v5729_v45 = vmul.f32 %v11451_v7, %v13941_v20 }
0x1c99   : > { %v5727_v62 = vmul.f32 %v11451_v7, %v13938_v60  ;;  %v4779_v47 = vadd.f32 %v4775_v28, %v4755_v57  ;;  %v4780_v38 = vadd.f32 %v4776_v56, %v4756_v23  ;;  %v4825_v52 = vmul.f32 %v4818_v43, %v13942_v25 }
0x1c9a   : > { %v4849_v36 = vmul.f32 %v4842_v15, %v13943_v12  ;;  %v4850_v27 = vmul.f32 %v4846_v31, %v13943_v12  ;;  %v4895_v28 = vmul.f32 %v4890_v61, %v13944_v8  ;;  %v11643_v57 = vrot.slane %v11621_v37, %v13573_v3 }
0x1c9b   : > { %v4826_v56 = vmul.f32 %v4822_v19, %v13942_v25  ;;  %v4896_v23 = vmul.f32 %v4894_v48, %v13944_v8  ;;  %v4827_v7 = vadd.f32 %v4823_v30, %v4779_v47  ;;  %v4828_v43 = vadd.f32 %v4824_v11, %v4780_v38 }
0x1c9c   : > { %5703 = vrot.lane.b32.xlu1 %v5687_v21, %s7315_s17  ;;  %5705 = vrot.lane.b32.xlu0 %v5688_v22, %s7315_s17  ;;  %v4870_v21 = vrot.slane %v11580_v0, %v13562_v39  ;;  %v5730_v22 = vmul.f32 %v11527_v32, %v13938_v60  ;;  %v4847_v10 = vmul.f32 %v4842_v15, %v13945_v55  ;;  %v13948_v15 = vld [vmem:[#allocation395_spill] sm:$0xff] }
0x1c9d   : > { %v4914_v60 = vrot.slane %v11576_v14, %v13571_v13  ;;  %v5731_v19 = vmul.f32 %v11527_v32, %v13939_v53  ;;  %v5732_v49 = vmul.f32 %v11527_v32, %v13941_v20  ;;  %v4829_v38 = vadd.f32 %v4825_v52, %v4781_v42  ;;  %v13950_v20 = vld [vmem:[#allocation397_spill] sm:$0xff] }
0x1c9e   : > { %v4871_v30 = vmul.f32 %v4866_v2, %v13948_v15  ;;  %v4938_v11 = vrot.slane %v11576_v14, %v13573_v3  ;;  %v4830_v25 = vadd.f32 %v4826_v56, %v4782_v1  ;;  %v4872_v32 = vmul.f32 %v4870_v21, %v13948_v15  ;;  %v11687_v1 = vld [vmem:[%s12407_s2 + $0x8] sm:$0xff] }
0x1c9f   : > { %v4851_v42 = vadd.f32 %v4847_v10, %v4827_v7  ;;  %v4873_v52 = vmul.f32 %v4866_v2, %v13950_v20  ;;  %v4962_v12 = vrot.slane %v11576_v14, %v13575_v50  ;;  %v4966_v8 = vrot.slane %v11580_v0, %v13575_v50  ;;  %v13951_v2 = vld [vmem:[#allocation412_spill] sm:$0xff] }
0x1ca0   : > { %5741 = vrot.lane.b32.xlu0 %v5728_v18, %s7315_s17  ;;  %5739 = vrot.lane.b32.xlu1 %v5727_v62, %s7315_s17  ;;  %v4848_v62 = vmul.f32 %v4846_v31, %v13945_v55  ;;  %v4918_v18 = vrot.slane %v11580_v0, %v13571_v13  ;;  %v4942_v31 = vrot.slane %v11580_v0, %v13573_v3 }
0x1ca1   : > { %v4874_v7 = vmul.f32 %v4870_v21, %v13950_v20  ;;  %v4921_v55 = vmul.f32 %v4914_v60, %v13951_v2  ;;  %v4875_v15 = vadd.f32 %v4871_v30, %v4851_v42  ;;  %v4897_v24 = vmul.f32 %v4890_v61, %v13953_v26  ;;  %v13957_v30 = vld [vmem:[#allocation158_spill] sm:$0xff] }
0x1ca2   : > { %v4852_v56 = vadd.f32 %v4848_v62, %v4828_v43  ;;  %v4922_v10 = vmul.f32 %v4918_v18, %v13951_v2  ;;  %v4986_v46 = vrot.slane %v11576_v14, %v13581_v17  ;;  %v4898_v43 = vmul.f32 %v4894_v48, %v13953_v26  ;;  %v13954_v62 = vld [vmem:[#allocation400_spill] sm:$0xff]  ;;  %v13955_v2 = vld [vmem:[#allocation414_spill] sm:$0xff]  ;;  %v13956_v14 = vld [vmem:[#allocation157_spill] sm:$0xff] }
0x1ca3   : > { %v4919_v20 = vmul.f32 %v4914_v60, %v13954_v62  ;;  %v4990_v61 = vrot.slane %v11580_v0, %v13581_v17  ;;  %v5773_v26 = vmul.f32 %v11480_v59, %v13957_v30  ;;  %v4899_v60 = vadd.f32 %v4895_v28, %v4875_v15  ;;  %v13960_v28 = vld [vmem:[#allocation404_spill] sm:$0xff] }
0x1ca4   : > { %5745 = vrot.lane.b32.xlu0 %v5730_v22, %s7315_s17  ;;  %5743 = vrot.lane.b32.xlu1 %v5729_v45, %s7315_s17  ;;  %v13949_v45 = vld [vmem:[#allocation390_spill] sm:$0xff]  ;;  %v4920_v42 = vmul.f32 %v4918_v18, %v13954_v62  ;;  %v4945_v15 = vmul.f32 %v4938_v11, %v13960_v28  ;;  %v13961_v18 = vmov 1  }
0x1ca5   : > { %v4798_v53 = vsel %vm1132_vm10, %v13936_v58, %v13949_v45  ;;  %v11682_v58 = vld [vmem:[%s12407_s2 + $0x18] sm:$0xff]  ;;  %v4853_v45 = vadd.f32 %v4849_v36, %v4829_v38  ;;  %v4968_v36 = vmul.f32 %v4966_v8, %v13955_v2  ;;  %v4923_v51 = vadd.f32 %v4919_v20, %v4899_v60 }
0x1ca6   : > { %v11659_v22 = vpop.permute.xlu0 %5345  ;;  %v11661_v47 = vpop.permute.xlu1 %5343 }
0x1ca7   : > { %13946 = vst [vmem:[#allocation23_spill] sm:$0xff] %v11659_v22  ;;  %13947 = vst [vmem:[#allocation24_spill] sm:$0xff] %v11661_v47  ;;  %v4876_v47 = vadd.f32 %v4872_v32, %v4852_v56  ;;  %v4854_v22 = vadd.f32 %v4850_v27, %v4830_v25  ;;  %v4877_v21 = vadd.f32 %v4873_v52, %v4853_v45  ;;  %v13958_v52 = vld [vmem:[#allocation402_spill] sm:$0xff]  ;;  %v13959_v45 = vld [vmem:[#allocation416_spill] sm:$0xff] }
0x1ca8   : > { %5749 = vrot.lane.b32.xlu0 %v5732_v49, %s7315_s17  ;;  %5747 = vrot.lane.b32.xlu1 %v5731_v19, %s7315_s17  ;;  %v5771_v27 = vmul.f32 %v11480_v59, %v13956_v14  ;;  %v4943_v56 = vmul.f32 %v4938_v11, %v13958_v52  ;;  %v4993_v0 = vmul.f32 %v4986_v46, %v13959_v45 }
0x1ca9   : > { %v4878_v38 = vadd.f32 %v4874_v7, %v4854_v22  ;;  %v4901_v32 = vadd.f32 %v4897_v24, %v4877_v21  ;;  %v4900_v7 = vadd.f32 %v4896_v23, %v4876_v47  ;;  %v4944_v24 = vmul.f32 %v4942_v31, %v13958_v52 }
0x1caa   : > { %v11692_v19 = vpop.permute.xlu0 %5349  ;;  %v11694_v49 = vpop.permute.xlu1 %5347  ;;  %v13962_v21 = vmov 2   ;;  %v4946_v23 = vmul.f32 %v4942_v31, %v13960_v28  ;;  %v5010_v47 = vrot.slane %v11621_v37, %v13560_v33  ;;  %v5034_v28 = vrot.slane %v11621_v37, %v13559_v29 }
0x1cab   : > { %13952 = vst [vmem:[#allocation15_spill] sm:$0xff] %v11694_v49  ;;  %v4967_v49 = vmul.f32 %v4962_v12, %v13955_v2  ;;  %v4902_v22 = vadd.f32 %v4898_v43, %v4878_v38  ;;  %v11722_v2 = vsel %vm8178_vm2, %v4798_v53, 0.0  ;;  %v13963_v43 = vld [vmem:[#allocation160_spill] sm:$0xff]  ;;  %v4924_v11 = vadd.f32 %v4920_v42, %v4900_v7  ;;  %v13967_v7 = vld [vmem:[#allocation410_spill] sm:$0xff] }
0x1cac   : > { %5928 = vperm.xlu0 %7125, %v11682_v58   ;;  %5923 = vperm.xlu1 %7124, %v11687_v1   ;;  %v5772_v62 = vmul.f32 %v11480_v59, %v13963_v43  ;;  %v5775_v63 = vmul.f32 %v11508_v35, %v13963_v43  ;;  %v4947_v38 = vadd.f32 %v4943_v56, %v4923_v51 }
0x1cad   : > { %v4926_v52 = vadd.f32 %v4922_v10, %v4902_v22  ;;  %v4948_v59 = vadd.f32 %v4944_v24, %v4924_v11  ;;  %v5014_v51 = vrot.slane %v11722_v2, %v13560_v33  ;;  %v5774_v10 = vmul.f32 %v11508_v35, %v13956_v14 }
0x1cae   : > { %v11711_v48 = vpop.permute.xlu0 %5353  ;;  %v11713_v25 = vpop.permute.xlu1 %5351  ;;  %v4971_v22 = vadd.f32 %v4967_v49, %v4947_v38  ;;  %v5015_v24 = vmul.f32 %v5010_v47, %v13967_v7  ;;  %v13970_v49 = vld [vmem:[#allocation411_spill] sm:$0xff] }
0x1caf   : > { %v4972_v14 = vadd.f32 %v4968_v36, %v4948_v59  ;;  %v5017_v38 = vmul.f32 %v5010_v47, %v13970_v49 }
0x1cb0   : > { %5787 = vrot.lane.b32.xlu0 %v5773_v26, %s7315_s17  ;;  %5783 = vrot.lane.b32.xlu1 %v5771_v27, %s7315_s17  ;;  %v4925_v27 = vadd.f32 %v4921_v55, %v4901_v32  ;;  %v13965_v26 = vld [vmem:[#allocation406_spill] sm:$0xff]  ;;  %v4950_v55 = vadd.f32 %v4946_v23, %v4926_v52  ;;  %v13968_v23 = vld [vmem:[#allocation419_spill] sm:$0xff]  ;;  %v5776_v52 = vmul.f32 %v11508_v35, %v13957_v30 }
0x1cb1   : > { %7126 = vset.pattern.permute.xlu1 %v13961_v18  ;;  %7127 = vset.pattern.permute.xlu0 %v13962_v21  ;;  %v4969_v60 = vmul.f32 %v4962_v12, %v13965_v26  ;;  %v4970_v31 = vmul.f32 %v4966_v8, %v13965_v26  ;;  %v13966_v18 = vld [vmem:[#allocation408_spill] sm:$0xff]  ;;  %v4994_v12 = vmul.f32 %v4990_v61, %v13959_v45  ;;  %v13971_v26 = vld [vmem:[#allocation166_spill] sm:$0xff] }
0x1cb2   : > { %v11735_v53 = vpop.permute.xlu0 %5389  ;;  %v11737_v20 = vpop.permute.xlu1 %5387  ;;  %v4949_v43 = vadd.f32 %v4945_v15, %v4925_v27  ;;  %v5038_v8 = vrot.slane %v11722_v2, %v13559_v29  ;;  %v5058_v45 = vrot.slane %v11621_v37, %v13562_v39  ;;  %v5016_v27 = vmul.f32 %v5014_v51, %v13967_v7  ;;  %v13973_v7 = vld [vmem:[#allocation415_spill] sm:$0xff] }
0x1cb3   : > { %13964 = vst [vmem:[#allocation21_spill] sm:$0xff] %v11735_v53  ;;  %v4991_v53 = vmul.f32 %v4986_v46, %v13966_v18  ;;  %v4992_v46 = vmul.f32 %v4990_v61, %v13966_v18  ;;  %v4974_v15 = vadd.f32 %v4970_v31, %v4950_v55  ;;  %v5018_v61 = vmul.f32 %v5014_v51, %v13970_v49  ;;  %v13972_v55 = vld [vmem:[#allocation413_spill] sm:$0xff] }
0x1cb4   : > { %5785 = vrot.lane.b32.xlu1 %v5772_v62, %s7315_s17  ;;  %5791 = vrot.lane.b32.xlu0 %v5775_v63, %s7315_s17  ;;  %v4973_v56 = vadd.f32 %v4969_v60, %v4949_v43  ;;  %v5039_v62 = vmul.f32 %v5034_v28, %v13968_v23  ;;  %v13969_v63 = vld [vmem:[#allocation34_spill] sm:$0xff]  ;;  %v5040_v18 = vmul.f32 %v5038_v8, %v13968_v23 }
0x1cb5   : > { %v4995_v11 = vadd.f32 %v4991_v53, %v4971_v22  ;;  %v5815_v60 = vmul.f32 %v11554_v5, %v13971_v26  ;;  %v4996_v36 = vadd.f32 %v4992_v46, %v4972_v14  ;;  %v4998_v47 = vadd.f32 %v4994_v12, %v4974_v15 }
0x1cb6   : > { %v11753_v32 = vpop.permute.xlu0 %5393  ;;  %v11755_v42 = vpop.permute.xlu1 %5391  ;;  %v4997_v59 = vadd.f32 %v4993_v0, %v4973_v56  ;;  %v5042_v51 = vmul.f32 %v5038_v8, %v13972_v55  ;;  %v5062_v22 = vrot.slane %v11722_v2, %v13562_v39  ;;  %v5063_v23 = vmul.f32 %v5058_v45, %v13973_v7  ;;  %v13974_v8 = vld [vmem:[#allocation168_spill] sm:$0xff] }
0x1cb7   : > { %v5019_v53 = vadd.f32 %v5015_v24, %v4995_v11  ;;  %v5020_v35 = vadd.f32 %v5016_v27, %v4996_v36  ;;  %v5082_v46 = vrot.slane %v11621_v37, %v13567_v6  ;;  %v5022_v0 = vadd.f32 %v5018_v61, %v4998_v47  ;;  %v13975_v27 = vld [vmem:[#allocation417_spill] sm:$0xff]  ;;  %v13977_v47 = vld [vmem:[#allocation418_spill] sm:$0xff] }
0x1cb8   : > { %5897 = vrot.lane.b32.xlu0 %v13969_v63, %s7319_s23  ;;  %5789 = vrot.lane.b32.xlu1 %v5774_v10, %s7315_s17  ;;  %v5041_v10 = vmul.f32 %v5034_v28, %v13972_v55  ;;  %v5021_v30 = vadd.f32 %v5017_v38, %v4997_v59  ;;  %v5086_v28 = vrot.slane %v11722_v2, %v13567_v6  ;;  %v13976_v61 = vld [vmem:[#allocation421_spill] sm:$0xff]  ;;  %v13982_v6 = vld [vmem:[#allocation422_spill] sm:$0xff] }
0x1cb9   : > { %v5106_v12 = vrot.slane %v11621_v37, %v13571_v13  ;;  %v5817_v56 = vmul.f32 %v11554_v5, %v13974_v8  ;;  %v5043_v14 = vadd.f32 %v5039_v62, %v5019_v53  ;;  %v5064_v11 = vmul.f32 %v5062_v22, %v13973_v7 }
0x1cba   : > { %v11773_v31 = vpop.permute.xlu0 %5397  ;;  %v11775_v43 = vpop.permute.xlu1 %5395  ;;  %v5045_v63 = vadd.f32 %v5041_v10, %v5021_v30  ;;  %v5087_v49 = vmul.f32 %v5082_v46, %v13975_v27  ;;  %v5046_v38 = vadd.f32 %v5042_v51, %v5022_v0  ;;  %v5044_v36 = vadd.f32 %v5040_v18, %v5020_v35  ;;  %v13978_v51 = vld [vmem:[#allocation423_spill] sm:$0xff] }
0x1cbb   : > { %v5067_v59 = vadd.f32 %v5063_v23, %v5043_v14  ;;  %v5088_v55 = vmul.f32 %v5086_v28, %v13975_v27  ;;  %v5089_v10 = vmul.f32 %v5082_v46, %v13977_v47  ;;  %v5090_v62 = vmul.f32 %v5086_v28, %v13977_v47 }
0x1cbc   : > { %5827 = vrot.lane.b32.xlu0 %v5815_v60, %s7315_s17  ;;  %5793 = vrot.lane.b32.xlu1 %v5776_v52, %s7315_s17  ;;  %v5065_v60 = vmul.f32 %v5058_v45, %v13976_v61  ;;  %v5066_v52 = vmul.f32 %v5062_v22, %v13976_v61  ;;  %v5110_v53 = vrot.slane %v11722_v2, %v13571_v13  ;;  %v13979_v45 = vld [vmem:[#allocation167_spill] sm:$0xff]  ;;  %v13981_v61 = vld [vmem:[#allocation26_spill] sm:$0xff] }
0x1cbd   : > { %v5111_v30 = vmul.f32 %v5106_v12, %v13978_v51  ;;  %v5819_v22 = vmul.f32 %v11529_v40, %v13979_v45  ;;  %v5068_v18 = vadd.f32 %v5064_v11, %v5044_v36  ;;  %v5091_v35 = vadd.f32 %v5087_v49, %v5067_v59 }
0x1cbe   : > { %v11792_v24 = vpop.permute.xlu0 %5433  ;;  %v11794_v15 = vpop.permute.xlu1 %5431  ;;  %v5069_v23 = vadd.f32 %v5065_v60, %v5045_v63  ;;  %v5070_v46 = vadd.f32 %v5066_v52, %v5046_v38  ;;  %v5134_v27 = vrot.slane %v11722_v2, %v13573_v3  ;;  %v5135_v11 = vmul.f32 %v11643_v57, %v13982_v6 }
0x1cbf   : > { %v5092_v47 = vadd.f32 %v5088_v55, %v5068_v18  ;;  %v5154_v63 = vrot.slane %v11621_v37, %v13575_v50  ;;  %v5112_v38 = vmul.f32 %v5110_v53, %v13978_v51  ;;  %v5158_v60 = vrot.slane %v11722_v2, %v13575_v50 }
0x1cc0   : > { %5831 = vrot.lane.b32.xlu0 %v5817_v56, %s7315_s17  ;;  %5952 = vperm.xlu1 %7126, %v11682_v58   ;;  %v13980_v56 = vld [vmem:[#allocation420_spill] sm:$0xff]  ;;  %v5093_v13 = vadd.f32 %v5089_v10, %v5069_v23  ;;  %v5094_v49 = vadd.f32 %v5090_v62, %v5070_v46  ;;  %v5115_v55 = vadd.f32 %v5111_v30, %v5091_v35  ;;  %v13984_v23 = vld [vmem:[#allocation425_spill] sm:$0xff]  ;;  %v13986_v35 = vld [vmem:[#allocation426_spill] sm:$0xff] }
0x1cc1   : > { %v5113_v14 = vmul.f32 %v5106_v12, %v13980_v56  ;;  %v5114_v28 = vmul.f32 %v5110_v53, %v13980_v56  ;;  %v5178_v12 = vrot.slane %v11621_v37, %v13581_v17  ;;  %v5136_v10 = vmul.f32 %v5134_v27, %v13982_v6  ;;  %v13985_v53 = vld [vmem:[#allocation35_spill] sm:$0xff] }
0x1cc2   : > { %v11810_v7 = vpop.permute.xlu0 %5437  ;;  %v11812_v0 = vpop.permute.xlu1 %5435  ;;  %v5137_v56 = vmul.f32 %v11643_v57, %v13984_v23  ;;  %v5182_v37 = vrot.slane %v11722_v2, %v13581_v17  ;;  %v5116_v51 = vadd.f32 %v5112_v38, %v5092_v47  ;;  %v5139_v30 = vadd.f32 %v5135_v11, %v5115_v55  ;;  %v13987_v2 = vld [vmem:[#allocation178_spill] sm:$0xff]  ;;  %v13988_v55 = vld [vmem:[#allocation427_spill] sm:$0xff] }
0x1cc3   : > { %v5117_v59 = vadd.f32 %v5113_v14, %v5093_v13  ;;  %v5118_v62 = vadd.f32 %v5114_v28, %v5094_v49  ;;  %v5138_v13 = vmul.f32 %v5134_v27, %v13984_v23  ;;  %v5161_v14 = vmul.f32 %v5154_v63, %v13986_v35  ;;  %v13991_v17 = vld [vmem:[#allocation175_spill] sm:$0xff] }
0x1cc4   : > { %5895 = vrot.lane.b32.xlu1 %v13981_v61, %s7319_s23  ;;  %5835 = vrot.lane.b32.xlu0 %v5819_v22, %s7315_s17  ;;  %v13983_v22 = vld [vmem:[#allocation424_spill] sm:$0xff]  ;;  %v5162_v46 = vmul.f32 %v5158_v60, %v13986_v35  ;;  %v5816_v57 = vmul.f32 %v11554_v5, %v13979_v45  ;;  %v5860_v28 = vmul.f32 %v11558_v9, %v13987_v2  ;;  %v13990_v23 = vmov 3  }
0x1cc5   : > { %7128 = vset.pattern.permute.xlu1 %v13962_v21  ;;  %v5159_v18 = vmul.f32 %v5154_v63, %v13983_v22  ;;  %v5160_v6 = vmul.f32 %v5158_v60, %v13983_v22  ;;  %v5140_v47 = vadd.f32 %v5136_v10, %v5116_v51  ;;  %v5141_v27 = vadd.f32 %v5137_v56, %v5117_v59  ;;  %v13989_v5 = vld [vmem:[#allocation428_spill] sm:$0xff] }
0x1cc6   : > { %v11831_v52 = vpop.permute.xlu0 %5441  ;;  %v11833_v36 = vpop.permute.xlu1 %5439  ;;  %v5142_v11 = vadd.f32 %v5138_v13, %v5118_v62  ;;  %v5185_v22 = vmul.f32 %v5178_v12, %v13988_v55  ;;  %v5186_v63 = vmul.f32 %v5182_v37, %v13988_v55  ;;  %v5183_v45 = vmul.f32 %v5178_v12, %v13989_v5  ;;  %v13992_v13 = vld [vmem:[#allocation432_spill] sm:$0xff] }
0x1cc7   : > { %v5163_v38 = vadd.f32 %v5159_v18, %v5139_v30  ;;  %v5164_v60 = vadd.f32 %v5160_v6, %v5140_v47  ;;  %v5862_v10 = vmul.f32 %v11591_v16, %v13991_v17  ;;  %v5818_v59 = vmul.f32 %v11529_v40, %v13971_v26  ;;  %v13993_v30 = vld [vmem:[#allocation433_spill] sm:$0xff]  ;;  %v13994_v6 = vld [vmem:[#allocation434_spill] sm:$0xff]  ;;  %v13999_v55 = vld [vmem:[#allocation32_spill] sm:$0xff] }
0x1cc8   : > { %5899 = vrot.lane.b32.xlu1 %v13985_v53, %s7319_s23  ;;  %5972 = vperm.xlu0 %7127, %v11687_v1   ;;  %v5165_v53 = vadd.f32 %v5161_v14, %v5141_v27  ;;  %v5166_v35 = vadd.f32 %v5162_v46, %v5142_v11  ;;  %v5184_v62 = vmul.f32 %v5182_v37, %v13989_v5  ;;  %v13995_v46 = vld [vmem:[#allocation431_spill] sm:$0xff]  ;;  %v13998_v11 = vld [vmem:[#allocation10_spill] sm:$0xff] }
0x1cc9   : > { %v5187_v51 = vadd.f32 %v5183_v45, %v5163_v38  ;;  %v5225_v12 = vsel %vm1267_vm11, %v13993_v30, %v13992_v13  ;;  %v5226_v14 = vsel %vm1267_vm11, %v13992_v13, %v13994_v6  ;;  %v13997_v38 = vld [vmem:[#allocation430_spill] sm:$0xff]  ;;  %v5269_v5 = vsel %vm1267_vm11, %v13999_v55, %v13998_v11  ;;  %v14000_v45 = vld [vmem:[#allocation11_spill] sm:$0xff]  ;;  %v14003_v6 = vld [vmem:[#allocation96_spill] sm:$0xff] }
0x1cca   : > { %v11852_v61 = vpop.permute.xlu0 %5477  ;;  %v11854_v49 = vpop.permute.xlu1 %5475  ;;  %v5189_v47 = vadd.f32 %v5185_v22, %v5165_v53  ;;  %v5190_v26 = vadd.f32 %v5186_v63, %v5166_v35  ;;  %v5188_v37 = vadd.f32 %v5184_v62, %v5164_v60  ;;  %v5224_v27 = vsel %vm1267_vm11, %v13995_v46, %v13997_v38  ;;  %v14001_v63 = vld [vmem:[#allocation176_spill] sm:$0xff]  ;;  %v14002_v62 = vld [vmem:[#allocation9_spill] sm:$0xff] }
0x1ccb   : > { %v5270_v13 = vsel %vm1267_vm11, %v13998_v11, %v14000_v45  ;;  %v5864_v53 = vmul.f32 %v11591_v16, %v14001_v63  ;;  %v5820_v60 = vmul.f32 %v11529_v40, %v13974_v8  ;;  %v14006_v45 = vld [vmem:[#allocation23_spill] sm:$0xff] }
0x1ccc   : > { %5829 = vrot.lane.b32.xlu1 %v5816_v57, %s7315_s17  ;;  %5873 = vrot.lane.b32.xlu0 %v5860_v28, %s7315_s17  ;;  %v13996_v57 = vld [vmem:[#allocation429_spill] sm:$0xff]  ;;  %v5233_v30 = vadd.f32 %v5225_v12, %v5189_v47  ;;  %v5234_v22 = vadd.f32 %v5226_v14, %v5190_v26  ;;  %v5314_v12 = vsel %vm1267_vm11, %v11635_v34, %v11631_v41  ;;  %v14005_v26 = vld [vmem:[#allocation27_spill] sm:$0xff] }
0x1ccd   : > { %7130 = vset.pattern.permute.xlu0 %v13990_v23  ;;  %v5223_v28 = vsel %vm1267_vm11, %v13996_v57, %v13995_v46  ;;  %v5267_v46 = vsel %vm1267_vm11, %v14003_v6, %v14002_v62  ;;  %v5313_v57 = vsel %vm1267_vm11, %v11593_v44, %v11635_v34  ;;  %v14004_v14 = vld [vmem:[#allocation97_spill] sm:$0xff]  ;;  %v5357_v44 = vsel %vm1267_vm11, %v11692_v19, %v11713_v25 }
0x1cce   : > { %v5482_v18 = vpop.permute.xlu0 %5481  ;;  %v11866_v56 = vpop.permute.xlu1 %5479  ;;  %v5268_v47 = vsel %vm1267_vm11, %v14002_v62, %v14004_v14  ;;  %v5277_v40 = vadd.f32 %v5269_v5, %v5233_v30  ;;  %v5278_v8 = vadd.f32 %v5270_v13, %v5234_v22  ;;  %v5358_v41 = vsel %vm1267_vm11, %v11713_v25, %v11711_v48 }
0x1ccf   : > { %v5312_v38 = vsel %vm1267_vm11, %v11011_v54, %v14005_v26  ;;  %v5401_v19 = vsel %vm1267_vm11, %v11753_v32, %v11775_v43  ;;  %v5402_v48 = vsel %vm1267_vm11, %v11775_v43, %v11773_v31  ;;  %v5445_v32 = vsel %vm1267_vm11, %v11810_v7, %v11833_v36 }
0x1cd0   : > { %5833 = vrot.lane.b32.xlu1 %v5818_v59, %s7315_s17  ;;  %5877 = vrot.lane.b32.xlu0 %v5862_v10, %s7315_s17  ;;  %v5231_v59 = vadd.f32 %v5223_v28, %v5187_v51  ;;  %v5232_v51 = vadd.f32 %v5224_v27, %v5188_v37  ;;  %v5311_v28 = vsel %vm1267_vm11, %v10993_v4, %v11011_v54  ;;  %v14007_v4 = vld [vmem:[#allocation24_spill] sm:$0xff] }
0x1cd1   : > { %v5321_v11 = vadd.f32 %v5313_v57, %v5277_v40  ;;  %v5322_v55 = vadd.f32 %v5314_v12, %v5278_v8  ;;  %v5355_v13 = vsel %vm1267_vm11, %v14007_v4, %v14006_v45  ;;  %v5446_v31 = vsel %vm1267_vm11, %v11833_v36, %v11831_v52  ;;  %v14009_v12 = vld [vmem:[#allocation15_spill] sm:$0xff] }
0x1cd2   : > { %v5486_v35 = vpop.permute.xlu0 %5485  ;;  %v5484_v10 = vpop.permute.xlu1 %5483  ;;  %v5275_v34 = vadd.f32 %v5267_v46, %v5231_v59  ;;  %v5276_v5 = vadd.f32 %v5268_v47, %v5232_v51  ;;  %v5859_v43 = vmul.f32 %v11558_v9, %v13991_v17  ;;  %v5443_v7 = vsel %vm1267_vm11, %v11794_v15, %v11792_v24 }
0x1cd3   : > { %v5365_v30 = vadd.f32 %v5357_v44, %v5321_v11  ;;  %v5366_v54 = vadd.f32 %v5358_v41, %v5322_v55  ;;  %v5489_v14 = vsel %vm1267_vm11, %v5482_v18, %v5484_v10  ;;  %v5490_v52 = vsel %vm1267_vm11, %v5484_v10, %v5486_v35 }
0x1cd4   : > { %5837 = vrot.lane.b32.xlu1 %v5820_v60, %s7315_s17  ;;  %5881 = vrot.lane.b32.xlu0 %v5864_v53, %s7315_s17  ;;  %v5319_v25 = vadd.f32 %v5311_v28, %v5275_v34  ;;  %v5320_v22 = vadd.f32 %v5312_v38, %v5276_v5  ;;  %v14008_v53 = vld [vmem:[#allocation21_spill] sm:$0xff]  ;;  %v14010_v40 = vmov 5   ;;  %v5861_v8 = vmul.f32 %v11558_v9, %v14001_v63 }
0x1cd5   : > { %v5399_v60 = vsel %vm1267_vm11, %v11737_v20, %v14008_v53  ;;  %v5409_v62 = vadd.f32 %v5401_v19, %v5365_v30  ;;  %v5410_v6 = vadd.f32 %v5402_v48, %v5366_v54  ;;  %v5356_v20 = vsel %vm1267_vm11, %v14006_v45, %v14009_v12  ;;  %v14015_v12 = vld [vmem:[#allocation113_spill] sm:$0xff] }
0x1cd6   : > { %v5522_v37 = vpop.permute.xlu0 %5521  ;;  %v5520_v27 = vpop.permute.xlu1 %5519  ;;  %v5363_v59 = vadd.f32 %v5355_v13, %v5319_v25  ;;  %v5400_v51 = vsel %vm1267_vm11, %v14008_v53, %v11755_v42  ;;  %v5487_v15 = vsel %vm1267_vm11, %v11854_v49, %v11852_v61  ;;  %v5364_v18 = vadd.f32 %v5356_v20, %v5320_v22 }
0x1cd7   : > { %v5453_v47 = vadd.f32 %v5445_v32, %v5409_v62  ;;  %v5454_v17 = vadd.f32 %v5446_v31, %v5410_v6  ;;  %v5444_v9 = vsel %vm1267_vm11, %v11792_v24, %v11812_v0  ;;  %v5531_v42 = vsel %vm1267_vm11, %v5520_v27, %v5522_v37 }
0x1cd8   : > { %5976 = vperm.xlu1 %7128, %v11682_v58   ;;  %6000 = vperm.xlu0 %7130, %v11682_v58   ;;  %v5407_v36 = vadd.f32 %v5399_v60, %v5363_v59  ;;  %v5408_v34 = vadd.f32 %v5400_v51, %v5364_v18  ;;  %v5488_v55 = vsel %vm1267_vm11, %v11852_v61, %v11866_v56  ;;  %v14011_v5 = vmov 6  }
0x1cd9   : > { %v5497_v10 = vadd.f32 %v5489_v14, %v5453_v47  ;;  %v5498_v28 = vadd.f32 %v5490_v52, %v5454_v17  ;;  %v5863_v24 = vmul.f32 %v11591_v16, %v13987_v2  ;;  %v14012_v30 = vmov 8  }
0x1cda   : > { %v5526_v46 = vpop.permute.xlu0 %5525  ;;  %v5524_v57 = vpop.permute.xlu1 %5523  ;;  %v5451_v35 = vadd.f32 %v5443_v7, %v5407_v36  ;;  %v5452_v0 = vadd.f32 %v5444_v9, %v5408_v34  ;;  %v14013_v32 = vmov 9   ;;  %v14014_v59 = vmov 4  }
0x1cdb   : > { %v5532_v13 = vsel %vm1267_vm11, %v5522_v37, %v5524_v57  ;;  %v14016_v20 = vmov 10  }
0x1cdc   : > { %7132 = vset.pattern.permute.xlu0 %v14010_v40  ;;  %5871 = vrot.lane.b32.xlu1 %v5859_v43, %s7315_s17  ;;  %v5495_v26 = vadd.f32 %v5487_v15, %v5451_v35  ;;  %v5496_v48 = vadd.f32 %v5488_v55, %v5452_v0  ;;  %v14017_v35 = vmov 12  }
0x1cdd   : > { %6044 = vperm.xlu0 %7132, %v11687_v1   ;;  %7129 = vset.pattern.permute.xlu1 %v13990_v23 }
0x1cde   : > { %v5530_v44 = vpop.permute.xlu0 %5529  ;;  %v5528_v41 = vpop.permute.xlu1 %5527  ;;  %v5539_v27 = vadd.f32 %v5531_v42, %v5495_v26  ;;  %v5540_v61 = vadd.f32 %v5532_v13, %v5496_v48 }
0x1cdf   : > { %v5533_v63 = vsel %vm1267_vm11, %v5526_v46, %v5528_v41  ;;  %v5534_v49 = vsel %vm1267_vm11, %v5528_v41, %v5530_v44  ;;  %v14018_v41 = vmov 13  }
0x1ce0   : > { %v5541_v38 = vadd.f32 %v5533_v63, %v5497_v10  ;;  %v5542_v11 = vadd.f32 %v5534_v49, %v5498_v28  ;;  %5875 = vrot.lane.b32.xlu1 %v5861_v8, %s7315_s17  ;;  %v14019_v49 = vmov 7  }
0x1ce1   : > { %7135 = vset.pattern.permute.xlu0 %v14011_v5 }
0x1ce2   : > { %v5566_v45 = vpop.permute.xlu0 %5565  ;;  %6072 = vperm.xlu0 %7135, %v11682_v58   ;;  %v5564_v4 = vpop.permute.xlu1 %5563 }
0x1ce3   : > { %v5575_v19 = vsel %vm1267_vm11, %v5564_v4, %v5566_v45 }
0x1ce4   : > { %v5583_v25 = vadd.f32 %v5575_v19, %v5539_v27  ;;  %5879 = vrot.lane.b32.xlu1 %v5863_v24, %s7315_s17  ;;  %v12017_v27 = vld [vmem:[%s12408_s3] sm:$0xff] }
0x1ce6   : > { %v5570_v56 = vpop.permute.xlu0 %5569  ;;  %7137 = vset.pattern.permute.xlu0 %v14012_v30  ;;  %v5568_v54 = vpop.permute.xlu1 %5567 }
0x1ce7   : > { %v5576_v16 = vsel %vm1267_vm11, %v5566_v45, %v5568_v54  ;;  %6116 = vperm.xlu0 %7137, %v11687_v1  }
0x1ce8   : > { %v5584_v2 = vadd.f32 %v5576_v16, %v5540_v61  ;;  %5996 = vperm.xlu1 %7129, %v11687_v1  }
0x1cea   : > { %v5574_v22 = vpop.permute.xlu0 %5573  ;;  %v5572_v37 = vpop.permute.xlu1 %5571 }
0x1ceb   : > { %v5577_v53 = vsel %vm1267_vm11, %v5570_v56, %v5572_v37  ;;  %v5578_v60 = vsel %vm1267_vm11, %v5572_v37, %v5574_v22  ;;  %7140 = vset.pattern.permute.xlu0 %v14013_v32  ;;  %v14021_v56 = vmov 14  }
0x1cec   : > { %v5585_v31 = vadd.f32 %v5577_v53, %v5541_v38  ;;  %v5586_v43 = vadd.f32 %v5578_v60, %v5542_v11  ;;  %6144 = vperm.xlu0 %7140, %v11682_v58   ;;  %7131 = vset.pattern.permute.xlu1 %v14014_v59  ;;  %v14020_v38 = vmov 1   ;;  %v14022_v60 = vmov 15  }
0x1ced   : > { %6020 = vperm.xlu1 %7131, %v11687_v1  }
0x1cee   : > { %v5610_v62 = vpop.permute.xlu0 %5609  ;;  %v5608_v6 = vpop.permute.xlu1 %5607 }
0x1cef   : > { %v5619_v46 = vsel %vm1267_vm11, %v5608_v6, %v5610_v62  ;;  %v12039_v6 = vld [vmem:[%s12408_s3 + $0x8] sm:$0xff] }
0x1cf0   : > { %v5627_v57 = vadd.f32 %v5619_v46, %v5583_v25  ;;  %5905 = vrot.lane.b32.xlu0 %v14015_v12, %s7319_s23 }
0x1cf1   : > { %6024 = vperm.xlu1 %7131, %v11682_v58   ;;  %7142 = vset.pattern.permute.xlu0 %v14016_v20 }
0x1cf2   : > { %v5614_v7 = vpop.permute.xlu0 %5613  ;;  %v5612_v14 = vpop.permute.xlu1 %5611 }
0x1cf3   : > { %v5620_v52 = vsel %vm1267_vm11, %v5610_v62, %v5612_v14 }
0x1cf4   : > { %v5628_v36 = vadd.f32 %v5620_v52, %v5584_v2  ;;  %6168 = vperm.xlu0 %7142, %v11682_v58  }
0x1cf5   : > { %7133 = vset.pattern.permute.xlu1 %v14010_v40 }
0x1cf6   : > { %v5618_v47 = vpop.permute.xlu0 %5617  ;;  %6048 = vperm.xlu1 %7133, %v11682_v58   ;;  %v5616_v17 = vpop.permute.xlu1 %5615 }
0x1cf7   : > { %v5621_v8 = vsel %vm1267_vm11, %v5614_v7, %v5616_v17  ;;  %v5622_v51 = vsel %vm1267_vm11, %v5616_v17, %v5618_v47  ;;  %v12053_v17 = vld [vmem:[%s12409_s4] sm:$0xff] }
0x1cf8   : > { %v5629_v15 = vadd.f32 %v5621_v8, %v5585_v31  ;;  %v5630_v18 = vadd.f32 %v5622_v51, %v5586_v43  ;;  %7144 = vset.pattern.permute.xlu0 %v14017_v35  ;;  %v14023_v43 = vld [vmem:[#allocation107_spill] sm:$0xff] }
0x1cf9   : > { %6212 = vperm.xlu0 %7144, %v11687_v1  }
0x1cfa   : > { %v5654_v10 = vpop.permute.xlu0 %5653  ;;  %7134 = vset.pattern.permute.xlu1 %v14011_v5  ;;  %v5652_v28 = vpop.permute.xlu1 %5651 }
0x1cfb   : > { %v5663_v40 = vsel %vm1267_vm11, %v5652_v28, %v5654_v10  ;;  %6068 = vperm.xlu1 %7134, %v11687_v1  }
0x1cfc   : > { %v5671_v44 = vadd.f32 %v5663_v40, %v5627_v57  ;;  %v14024_v57 = vld [vmem:[#allocation108_spill] sm:$0xff] }
0x1cfd   : > { %7147 = vset.pattern.permute.xlu0 %v14018_v41 }
0x1cfe   : > { %v5658_v9 = vpop.permute.xlu0 %5657  ;;  %6240 = vperm.xlu0 %7147, %v11682_v58   ;;  %v5656_v42 = vpop.permute.xlu1 %5655 }
0x1cff   : > { %v5664_v63 = vsel %vm1267_vm11, %v5654_v10, %v5656_v42  ;;  %7136 = vset.pattern.permute.xlu1 %v14019_v49 }
0x1d00   : > { %v5672_v34 = vadd.f32 %v5664_v63, %v5628_v36  ;;  %6092 = vperm.xlu1 %7136, %v11687_v1  }
0x1d02   : > { %v5662_v26 = vpop.permute.xlu0 %5661  ;;  %7148 = vset.pattern.permute.xlu0 %v14020_v38  ;;  %v5660_v11 = vpop.permute.xlu1 %5659 }
0x1d03   : > { %v5665_v55 = vsel %vm1267_vm11, %v5658_v9, %v5660_v11  ;;  %v5666_v5 = vsel %vm1267_vm11, %v5660_v11, %v5662_v26  ;;  %5948 = vperm.xlu0 %7148, %v11687_v1  }
0x1d04   : > { %v5673_v24 = vadd.f32 %v5665_v55, %v5629_v15  ;;  %v5674_v0 = vadd.f32 %v5666_v5, %v5630_v18  ;;  %6096 = vperm.xlu1 %7136, %v11682_v58   ;;  %v14025_v15 = vmov 11  }
0x1d06   : > { %v5698_v45 = vpop.permute.xlu0 %5697  ;;  %v5696_v4 = vpop.permute.xlu1 %5695 }
0x1d07   : > { %v5707_v13 = vsel %vm1267_vm11, %v5696_v4, %v5698_v45  ;;  %6358 = vperm.xlu0 %7148, %v12017_v27  }
0x1d08   : > { %v5715_v19 = vadd.f32 %v5707_v13, %v5671_v44  ;;  %7138 = vset.pattern.permute.xlu1 %v14012_v30  ;;  %v14026_v44 = vmov 0  }
0x1d09   : > { %6120 = vperm.xlu1 %7138, %v11682_v58  }
0x1d0a   : > { %v5702_v48 = vpop.permute.xlu0 %5701  ;;  %v5700_v25 = vpop.permute.xlu1 %5699 }
0x1d0b   : > { %v5708_v61 = vsel %vm1267_vm11, %v5698_v45, %v5700_v25  ;;  %7152 = vset.pattern.permute.xlu0 %v14021_v56 }
0x1d0c   : > { %v5716_v54 = vadd.f32 %v5708_v61, %v5672_v34  ;;  %6264 = vperm.xlu0 %7152, %v11682_v58  }
0x1d0d   : > { %7139 = vset.pattern.permute.xlu1 %v14013_v32 }
0x1d0e   : > { %v5706_v16 = vpop.permute.xlu0 %5705  ;;  %6140 = vperm.xlu1 %7139, %v11687_v1   ;;  %v5704_v2 = vpop.permute.xlu1 %5703 }
0x1d0f   : > { %v5709_v22 = vsel %vm1267_vm11, %v5702_v48, %v5704_v2  ;;  %v5710_v30 = vsel %vm1267_vm11, %v5704_v2, %v5706_v16 }
0x1d10   : > { %v5717_v37 = vadd.f32 %v5709_v22, %v5673_v24  ;;  %v5718_v53 = vadd.f32 %v5710_v30, %v5674_v0  ;;  %7154 = vset.pattern.permute.xlu0 %v14022_v60 }
0x1d11   : > { %6284 = vperm.xlu0 %7154, %v11687_v1  }
0x1d12   : > { %v5742_v31 = vpop.permute.xlu0 %5741  ;;  %5901 = vrot.lane.b32.xlu1 %v14023_v43, %s7319_s23  ;;  %v5740_v59 = vpop.permute.xlu1 %5739 }
0x1d13   : > { %v5751_v32 = vsel %vm1267_vm11, %v5740_v59, %v5742_v31  ;;  %7141 = vset.pattern.permute.xlu1 %v14016_v20 }
0x1d14   : > { %v5759_v62 = vadd.f32 %v5751_v32, %v5715_v19 }
0x1d15   : > { %7157 = vset.pattern.permute.xlu0 %v13990_v23 }
0x1d16   : > { %v5746_v46 = vpop.permute.xlu0 %5745  ;;  %5903 = vrot.lane.b32.xlu1 %v14024_v57, %s7319_s23  ;;  %v5744_v12 = vpop.permute.xlu1 %5743  ;;  %6430 = vperm.xlu0 %7157, %v12039_v6  }
0x1d17   : > { %v5752_v7 = vsel %vm1267_vm11, %v5742_v31, %v5744_v12 }
0x1d18   : > { %v5760_v14 = vadd.f32 %v5752_v7, %v5716_v54 }
0x1d1a   : > { %v5750_v52 = vpop.permute.xlu0 %5749  ;;  %6164 = vperm.xlu1 %7141, %v11687_v1   ;;  %v5748_v20 = vpop.permute.xlu1 %5747  ;;  %7159 = vset.pattern.permute.xlu0 %v13962_v21 }
0x1d1b   : > { %v5753_v36 = vsel %vm1267_vm11, %v5746_v46, %v5748_v20  ;;  %v5754_v47 = vsel %vm1267_vm11, %v5748_v20, %v5750_v52  ;;  %6460 = vperm.xlu0 %7159, %v12053_v17  }
0x1d1c   : > { %v5761_v8 = vadd.f32 %v5753_v36, %v5717_v37  ;;  %v5762_v51 = vadd.f32 %v5754_v47, %v5718_v53 }
0x1d1e   : > { %7143 = vset.pattern.permute.xlu1 %v14025_v15 }
0x1d1f   : > { %6188 = vperm.xlu1 %7143, %v11687_v1  }
0x1d23   : > { %6192 = vperm.xlu1 %7143, %v11682_v58  }
0x1d27   : > { %7145 = vset.pattern.permute.xlu1 %v14017_v35 }
0x1d28   : > { %6216 = vperm.xlu1 %7145, %v11682_v58  }
0x1d2b   : > { %v5929_v18 = vpop.permute.xlu0 %5928  ;;  %v5924_v10 = vpop.permute.xlu1 %5923 }
0x1d2c   : > { %7146 = vset.pattern.permute.xlu1 %v14018_v41 }
0x1d2d   : > { %6236 = vperm.xlu1 %7146, %v11687_v1  }
0x1d2f   : > { %v5788_v28 = vpop.permute.xlu0 %5787  ;;  %v5784_v40 = vpop.permute.xlu1 %5783 }
0x1d31   : > { %7149 = vset.pattern.permute.xlu1 %v14026_v44 }
0x1d32   : > { %6323 = vperm.xlu1 %7149, %v12017_v27  }
0x1d33   : > { %v5792_v9 = vpop.permute.xlu0 %5791  ;;  %v5786_v42 = vpop.permute.xlu1 %5785 }
0x1d34   : > { %v5795_v63 = vsel %vm1267_vm11, %v5784_v40, %v5786_v42  ;;  %v5796_v35 = vsel %vm1267_vm11, %v5786_v42, %v5788_v28 }
0x1d35   : > { %v5803_v49 = vadd.f32 %v5795_v63, %v5759_v62  ;;  %v5804_v34 = vadd.f32 %v5796_v35, %v5760_v14  ;;  %v12129_v35 = vld [vmem:[%s12409_s4 + $0x8] sm:$0xff] }
0x1d36   : > { %6328 = vperm.xlu1 %7149, %v12039_v6  }
0x1d37   : > { %v5898_v26 = vpop.permute.xlu0 %5897  ;;  %v5790_v41 = vpop.permute.xlu1 %5789 }
0x1d38   : > { %v5797_v11 = vsel %vm1267_vm11, %v5790_v41, %v5792_v9 }
0x1d39   : > { %v5805_v55 = vadd.f32 %v5797_v11, %v5761_v8 }
0x1d3a   : > { %7150 = vset.pattern.permute.xlu1 %v14020_v38 }
0x1d3b   : > { %v5828_v5 = vpop.permute.xlu0 %5827  ;;  %6362 = vperm.xlu1 %7150, %v12039_v6   ;;  %v5794_v24 = vpop.permute.xlu1 %5793 }
0x1d3c   : > { %v5798_v0 = vsel %vm1267_vm11, %v5792_v9, %v5794_v24 }
0x1d3d   : > { %v5806_v45 = vadd.f32 %v5798_v0, %v5762_v51 }
0x1d3f   : > { %v5832_v4 = vpop.permute.xlu0 %5831  ;;  %7151 = vset.pattern.permute.xlu1 %v14021_v56  ;;  %v5953_v13 = vpop.permute.xlu1 %5952 }
0x1d40   : > { %6260 = vperm.xlu1 %7151, %v11687_v1  }
0x1d43   : > { %v5836_v19 = vpop.permute.xlu0 %5835  ;;  %v5896_v48 = vpop.permute.xlu1 %5895 }
0x1d44   : > { %v5907_v25 = vsel %vm1418_vm12, %v5896_v48, %v5898_v26  ;;  %7153 = vset.pattern.permute.xlu1 %v13962_v21 }
0x1d45   : > { %v12078_v54 = vsel %vm8190_vm3, %v5907_v25, 0.0  ;;  %6392 = vperm.xlu1 %7153, %v12017_v27  }
0x1d46   : > { %v5934_v16 = vrot.slane %v12078_v54, %v13560_v33  ;;  %v12087_v1 = vrot.slane %v12078_v54, %v13559_v29 }
0x1d47   : > { %v12083_v2 = vpop.permute.xlu0 %5972  ;;  %v5900_v56 = vpop.permute.xlu1 %5899 }
0x1d48   : > { %v5908_v22 = vsel %vm1418_vm12, %v5898_v26, %v5900_v56  ;;  %v5939_v30 = vmul.f32 %v5934_v16, %v5924_v10  ;;  %v5941_v37 = vmul.f32 %v5934_v16, %v5929_v18  ;;  %v5965_v43 = vmul.f32 %v12087_v1, %v5953_v13 }
0x1d49   : > { %v12092_v31 = vsel %vm8219_vm6, %v5908_v22, 0.0  ;;  %6396 = vperm.xlu1 %7153, %v12039_v6  }
0x1d4a   : > { %v5938_v59 = vrot.slane %v12092_v31, %v13560_v33  ;;  %v12100_v46 = vrot.slane %v12092_v31, %v13559_v29 }
0x1d4b   : > { %v5874_v32 = vpop.permute.xlu0 %5873  ;;  %v5830_v62 = vpop.permute.xlu1 %5829 }
0x1d4c   : > { %v5839_v57 = vsel %vm1267_vm11, %v5828_v5, %v5830_v62  ;;  %v5840_v12 = vsel %vm1267_vm11, %v5830_v62, %v5832_v4  ;;  %v5940_v7 = vmul.f32 %v5938_v59, %v5924_v10  ;;  %v5942_v6 = vmul.f32 %v5938_v59, %v5929_v18  ;;  %v14030_v62 = vld [vmem:[#allocation63_spill] sm:$0xff] }
0x1d4d   : > { %v5847_v14 = vadd.f32 %v5839_v57, %v5803_v49  ;;  %v5848_v52 = vadd.f32 %v5840_v12, %v5804_v34  ;;  %7155 = vset.pattern.permute.xlu1 %v14022_v60  ;;  %v5966_v20 = vmul.f32 %v12100_v46, %v5953_v13  ;;  %v12113_v60 = vrot.slane %v12078_v54, %v13562_v39  ;;  %v14029_v13 = vld [vmem:[#allocation12_spill] sm:$0xff] }
0x1d4e   : > { %6288 = vperm.xlu1 %7155, %v11682_v58   ;;  %v12117_v58 = vrot.slane %v12092_v31, %v13562_v39  ;;  %v6010_v48 = vrot.slane %v12092_v31, %v14029_v13  ;;  %v6030_v57 = vrot.slane %v12078_v54, %v14030_v62  ;;  %v6034_v12 = vrot.slane %v12092_v31, %v14030_v62 }
0x1d4f   : > { %v5878_v36 = vpop.permute.xlu0 %5877  ;;  %v5834_v47 = vpop.permute.xlu1 %5833 }
0x1d50   : > { %v5841_v8 = vsel %vm1267_vm11, %v5834_v47, %v5836_v19 }
0x1d51   : > { %v5849_v51 = vadd.f32 %v5841_v8, %v5805_v55 }
0x1d52   : > { %7156 = vset.pattern.permute.xlu1 %v13990_v23 }
0x1d53   : > { %v5882_v15 = vpop.permute.xlu0 %5881  ;;  %6426 = vperm.xlu1 %7156, %v12017_v27   ;;  %v5838_v10 = vpop.permute.xlu1 %5837 }
0x1d54   : > { %v5842_v28 = vsel %vm1267_vm11, %v5836_v19, %v5838_v10  ;;  %v6006_v19 = vrot.slane %v12078_v54, %v14029_v13 }
0x1d55   : > { %v5850_v40 = vadd.f32 %v5842_v28, %v5806_v45 }
0x1d57   : > { %v6001_v18 = vpop.permute.xlu0 %6000  ;;  %7158 = vset.pattern.permute.xlu1 %v14020_v38  ;;  %v5977_v44 = vpop.permute.xlu1 %5976 }
0x1d58   : > { %v5989_v23 = vmul.f32 %v12113_v60, %v5977_v44  ;;  %v5990_v27 = vmul.f32 %v12117_v58, %v5977_v44  ;;  %6308 = vperm.xlu1 %7158, %v12053_v17  }
0x1d5b   : > { %v5872_v9 = vpop.permute.xlu1 %5871 }
0x1d5c   : > { %v5883_v42 = vsel %vm1267_vm11, %v5872_v9, %v5874_v32  ;;  %v12124_v63 = vpop.permute.xlu0 %6044  ;;  %6312 = vperm.xlu1 %7158, %v12129_v35  }
0x1d5d   : > { %v5891_v38 = vadd.f32 %v5883_v42, %v5847_v14  ;;  %v6014_v14 = vmul.f32 %v6010_v48, %v6001_v18  ;;  %v6078_v42 = vrot.slane %v12078_v54, %v13575_v50 }
0x1d5f   : > { %v12132_v49 = vadd.f32 %v5939_v30, %v5891_v38  ;;  %v5876_v34 = vpop.permute.xlu1 %5875  ;;  %v6082_v38 = vrot.slane %v12092_v31, %v13575_v50 }
0x1d60   : > { %v5884_v26 = vsel %vm1267_vm11, %v5874_v32, %v5876_v34  ;;  %7160 = vset.pattern.permute.xlu1 %v13962_v21 }
0x1d61   : > { %v5892_v41 = vadd.f32 %v5884_v26, %v5848_v52  ;;  %6464 = vperm.xlu1 %7160, %v12129_v35   ;;  %v6073_v11 = vpop.permute.xlu0 %6072 }
0x1d63   : > { %v12137_v55 = vadd.f32 %v5940_v7, %v5892_v41  ;;  %v5880_v5 = vpop.permute.xlu1 %5879  ;;  %v6013_v7 = vmul.f32 %v6006_v19, %v6001_v18  ;;  %v6054_v18 = vrot.slane %v12078_v54, %v13573_v3  ;;  %v6085_v41 = vmul.f32 %v6078_v42, %v6073_v11 }
0x1d64   : > { %v5885_v24 = vsel %vm1267_vm11, %v5878_v36, %v5880_v5  ;;  %v5886_v0 = vsel %vm1267_vm11, %v5880_v5, %v5882_v15  ;;  %v6086_v5 = vmul.f32 %v6082_v38, %v6073_v11 }
0x1d65   : > { %v5893_v45 = vadd.f32 %v5885_v24, %v5849_v51  ;;  %v5894_v4 = vadd.f32 %v5886_v0, %v5850_v40 }
0x1d66   : > { %v12145_v21 = vpop.permute.xlu0 %6116 }
0x1d67   : > { %v5945_v25 = vadd.f32 %v5941_v37, %v5893_v45  ;;  %v5946_v16 = vadd.f32 %v5942_v6, %v5894_v4  ;;  %v5997_v56 = vpop.permute.xlu1 %5996 }
0x1d68   : > { %v6011_v22 = vmul.f32 %v6006_v19, %v5997_v56  ;;  %v6012_v30 = vmul.f32 %v6010_v48, %v5997_v56  ;;  %v14031_v56 = vld [vmem:[#allocation95_spill] sm:$0xff] }
0x1d69   : > { %v5969_v59 = vadd.f32 %v5965_v43, %v5945_v25  ;;  %v5970_v32 = vadd.f32 %v5966_v20, %v5946_v16 }
0x1d6b   : > { %v12151_v52 = vpop.permute.xlu0 %6144  ;;  %v5993_v36 = vadd.f32 %v5989_v23, %v5969_v59  ;;  %v5994_v47 = vadd.f32 %v5990_v27, %v5970_v32  ;;  %v6058_v23 = vrot.slane %v12092_v31, %v13573_v3  ;;  %v6102_v59 = vrot.slane %v12078_v54, %v14031_v56 }
0x1d6c   : > { %v6021_v8 = vpop.permute.xlu1 %6020  ;;  %v6106_v32 = vrot.slane %v12092_v31, %v14031_v56 }
0x1d6d   : > { %v6035_v37 = vmul.f32 %v6030_v57, %v6021_v8  ;;  %v6036_v6 = vmul.f32 %v6034_v12, %v6021_v8  ;;  %v6017_v51 = vadd.f32 %v6013_v7, %v5993_v36  ;;  %v6018_v15 = vadd.f32 %v6014_v14, %v5994_v47 }
0x1d6e   : > { %v5987_v47 = vmul.f32 %v12113_v60, %v12083_v2  ;;  %v5988_v8 = vmul.f32 %v12117_v58, %v12083_v2  ;;  %v6060_v60 = vmul.f32 %v6058_v23, %v12124_v63 }
0x1d6f   : > { %v12153_v10 = vpop.permute.xlu0 %5905 }
0x1d70   : > { %v6025_v43 = vpop.permute.xlu1 %6024 }
0x1d71   : > { %v6037_v20 = vmul.f32 %v6030_v57, %v6025_v43  ;;  %v6038_v28 = vmul.f32 %v6034_v12, %v6025_v43 }
0x1d73   : > { %v6041_v40 = vadd.f32 %v6037_v20, %v6017_v51  ;;  %v6042_v44 = vadd.f32 %v6038_v28, %v6018_v15  ;;  %v12155_v9 = vpop.permute.xlu0 %6168 }
0x1d75   : > { %v6049_v27 = vpop.permute.xlu1 %6048 }
0x1d76   : > { %v6061_v34 = vmul.f32 %v6054_v18, %v6049_v27  ;;  %v6062_v26 = vmul.f32 %v6058_v23, %v6049_v27 }
0x1d78   : > { %v6065_v24 = vadd.f32 %v6061_v34, %v6041_v40  ;;  %v6066_v0 = vadd.f32 %v6062_v26, %v6042_v44  ;;  %v12165_v45 = vpop.permute.xlu0 %6212  ;;  %v6059_v40 = vmul.f32 %v6054_v18, %v12124_v63 }
0x1d7a   : > { %v6069_v4 = vpop.permute.xlu1 %6068  ;;  %v6089_v19 = vadd.f32 %v6085_v41, %v6065_v24  ;;  %v6090_v48 = vadd.f32 %v6086_v5, %v6066_v0 }
0x1d7b   : > { %v6083_v2 = vmul.f32 %v6078_v42, %v6069_v4  ;;  %v6084_v58 = vmul.f32 %v6082_v38, %v6069_v4 }
0x1d7d   : > { %v12167_v25 = vpop.permute.xlu0 %6240 }
0x1d7f   : > { %v6093_v16 = vpop.permute.xlu1 %6092 }
0x1d80   : > { %v6107_v26 = vmul.f32 %v6102_v59, %v6093_v16  ;;  %v6108_v41 = vmul.f32 %v6106_v32, %v6093_v16 }
0x1d82   : > { %v5949_v57 = vpop.permute.xlu0 %5948 }
0x1d83   : > { %v5963_v12 = vmul.f32 %v12087_v1, %v5949_v57  ;;  %v5964_v11 = vmul.f32 %v12100_v46, %v5949_v57  ;;  %v6097_v7 = vpop.permute.xlu1 %6096 }
0x1d84   : > { %v6109_v14 = vmul.f32 %v6102_v59, %v6097_v7  ;;  %v6110_v36 = vmul.f32 %v6106_v32, %v6097_v7  ;;  %v7178_v7 = vld [vmem:[%s7540_s9] sm:$0xff]  ;;  %s7415_s9 = smov 2  }
0x1d85   : > { %v5967_v51 = vadd.f32 %v5963_v12, %v12132_v49  ;;  %v5968_v54 = vadd.f32 %v5964_v11, %v12137_v55 }
0x1d86   : > { %v12181_v15 = vadd.f32 %v6109_v14, %v6089_v19  ;;  %v12183_v31 = vadd.f32 %v6110_v36, %v6090_v48  ;;  %v6368_v14 = vrot.slane %v7178_v7, %v13559_v29  ;;  %v6372_v36 = vrot.slane %v7178_v7, %v13573_v3 }
0x1d87   : > { %v5991_v1 = vadd.f32 %v5987_v47, %v5967_v51  ;;  %v5992_v43 = vadd.f32 %v5988_v8, %v5968_v54  ;;  %v6334_v51 = vrot.slane %v7178_v7, %v13560_v33  ;;  %v6338_v54 = vrot.slane %v7178_v7, %v14030_v62 }
0x1d88   : > { %v6121_v46 = vpop.permute.xlu1 %6120 }
0x1d89   : > { %v6015_v20 = vadd.f32 %v6011_v22, %v5991_v1  ;;  %v6016_v28 = vadd.f32 %v6012_v30, %v5992_v43  ;;  %v6359_v1 = vpop.permute.xlu0 %6358 }
0x1d8b   : > { %v6039_v44 = vadd.f32 %v6035_v37, %v6015_v20  ;;  %v6040_v27 = vadd.f32 %v6036_v6, %v6016_v28 }
0x1d8d   : > { %v6063_v49 = vadd.f32 %v6059_v40, %v6039_v44  ;;  %v6064_v34 = vadd.f32 %v6060_v60, %v6040_v27  ;;  %v6141_v55 = vpop.permute.xlu1 %6140  ;;  %v6402_v60 = vrot.slane %v7178_v7, %v13562_v39  ;;  %v6406_v44 = vrot.slane %v7178_v7, %v13575_v50 }
0x1d8e   : > { %v6436_v27 = vrot.slane %v7178_v7, %v14029_v13 }
0x1d8f   : > { %v6087_v5 = vadd.f32 %v6083_v2, %v6063_v49  ;;  %v6088_v24 = vadd.f32 %v6084_v58, %v6064_v34  ;;  %v6440_v2 = vrot.slane %v7178_v7, %v14031_v56  ;;  %v12236_v58 = vrot.slane %v6368_v14, %v13559_v29 }
0x1d90   : > { %v12239_v49 = vrot.slane %v6372_v36, %v13559_v29 }
0x1d91   : > { %v5902_v0 = vpop.permute.xlu1 %5901  ;;  %v6111_v19 = vadd.f32 %v6107_v26, %v6087_v5  ;;  %v6112_v48 = vadd.f32 %v6108_v41, %v6088_v24  ;;  %v12242_v5 = vrot.slane %v6334_v51, %v13560_v33  ;;  %v12245_v24 = vrot.slane %v6338_v54, %v13560_v33 }
0x1d95   : > { %v5904_v22 = vpop.permute.xlu1 %5903 }
0x1d96   : > { %v5909_v6 = vsel %vm1418_vm12, %v5902_v0, %v5904_v22  ;;  %v5910_v23 = vsel %vm1418_vm12, %v5904_v22, %v12153_v10 }
0x1d97   : > { %v12200_v38 = vsel %vm8190_vm3, %v5909_v6, 0.0  ;;  %v12204_v4 = vsel %vm8219_vm6, %v5910_v23, 0.0  ;;  %v12252_v6 = vrot.slane %v6402_v60, %v13562_v39  ;;  %v12258_v23 = vrot.slane %v6436_v27, %v14029_v13 }
0x1d98   : > { %v6126_v59 = vrot.slane %v12200_v38, %v13560_v33  ;;  %v6130_v32 = vrot.slane %v12204_v4, %v13560_v33  ;;  %v6150_v61 = vrot.slane %v12200_v38, %v13559_v29  ;;  %v6154_v53 = vrot.slane %v12204_v4, %v13559_v29 }
0x1d99   : > { %v6165_v30 = vpop.permute.xlu1 %6164  ;;  %v6174_v28 = vrot.slane %v12200_v38, %v13562_v39  ;;  %v6178_v40 = vrot.slane %v12204_v4, %v13562_v39  ;;  %v6202_v22 = vrot.slane %v12204_v4, %v14029_v13  ;;  %v12261_v33 = vrot.slane %v6440_v2, %v14029_v13 }
0x1d9a   : > { %v6131_v10 = vmul.f32 %v6126_v59, %v12145_v21  ;;  %v6132_v12 = vmul.f32 %v6130_v32, %v12145_v21  ;;  %v6155_v43 = vmul.f32 %v6150_v61, %v6141_v55  ;;  %v6156_v20 = vmul.f32 %v6154_v53, %v6141_v55 }
0x1d9b   : > { %v6133_v26 = vmul.f32 %v6126_v59, %v6121_v46  ;;  %v6134_v41 = vmul.f32 %v6130_v32, %v6121_v46  ;;  %v6179_v0 = vmul.f32 %v6174_v28, %v6165_v30  ;;  %v12255_v46 = vrot.slane %v6406_v44, %v13562_v39 }
0x1d9c   : > { %v6135_v47 = vadd.f32 %v6131_v10, %v6111_v19  ;;  %v6136_v8 = vadd.f32 %v6132_v12, %v6112_v48  ;;  %v6180_v19 = vmul.f32 %v6178_v40, %v6165_v30  ;;  %v6198_v48 = vrot.slane %v12200_v38, %v14029_v13  ;;  %v12263_v30 = vpop.permute.xlu0 %6264 }
0x1d9d   : > { %v6137_v7 = vadd.f32 %v6133_v26, %v12181_v15  ;;  %v6138_v14 = vadd.f32 %v6134_v41, %v12183_v31  ;;  %v6222_v39 = vrot.slane %v12200_v38, %v14030_v62  ;;  %v6226_v36 = vrot.slane %v12204_v4, %v14030_v62 }
0x1d9e   : > { %v6189_v57 = vpop.permute.xlu1 %6188  ;;  %v6159_v34 = vadd.f32 %v6155_v43, %v6135_v47  ;;  %v6160_v55 = vadd.f32 %v6156_v20, %v6136_v8  ;;  %v6383_v47 = vmul.f32 %v12236_v58, %v6359_v1  ;;  %v6384_v13 = vmul.f32 %v12239_v49, %v6359_v1 }
0x1d9f   : > { %v6203_v10 = vmul.f32 %v6198_v48, %v6189_v57  ;;  %v6204_v12 = vmul.f32 %v6202_v22, %v6189_v57  ;;  %v12275_v8 = vrot.slane %v12200_v38, %v14031_v56  ;;  %v12279_v57 = vrot.slane %v12204_v4, %v14031_v56 }
0x1da0   : > { %v6183_v59 = vadd.f32 %v6179_v0, %v6159_v34  ;;  %v6184_v32 = vadd.f32 %v6180_v19, %v6160_v55  ;;  %v6181_v31 = vmul.f32 %v6174_v28, %v12155_v9  ;;  %v6182_v51 = vmul.f32 %v6178_v40, %v12155_v9  ;;  %v6285_v2 = vpop.permute.xlu0 %6284 }
0x1da1   : > { %v6157_v62 = vmul.f32 %v6150_v61, %v12151_v52  ;;  %v6158_v54 = vmul.f32 %v6154_v53, %v12151_v52  ;;  %v6246_v20 = vrot.slane %v12200_v38, %v13573_v3  ;;  %v6250_v60 = vrot.slane %v12204_v4, %v13573_v3 }
0x1da2   : > { %v12187_v18 = vpop.permute.xlu1 %6192  ;;  %v6207_v43 = vadd.f32 %v6203_v10, %v6183_v59  ;;  %v6208_v1 = vadd.f32 %v6204_v12, %v6184_v32  ;;  %v6227_v27 = vmul.f32 %v6222_v39, %v12165_v45  ;;  %v6228_v28 = vmul.f32 %v6226_v36, %v12165_v45 }
0x1da3   : > { %v6161_v56 = vadd.f32 %v6157_v62, %v6137_v7  ;;  %v6162_v44 = vadd.f32 %v6158_v54, %v6138_v14  ;;  %v6270_v52 = vrot.slane %v12200_v38, %v13575_v50  ;;  %v6274_v53 = vrot.slane %v12204_v4, %v13575_v50 }
0x1da4   : > { %v6205_v40 = vmul.f32 %v6198_v48, %v12187_v18  ;;  %v6206_v3 = vmul.f32 %v6202_v22, %v12187_v18  ;;  %v6231_v26 = vadd.f32 %v6227_v27, %v6207_v43  ;;  %v6232_v41 = vadd.f32 %v6228_v28, %v6208_v1 }
0x1da5   : > { %v6185_v0 = vadd.f32 %v6181_v31, %v6161_v56  ;;  %v6186_v19 = vadd.f32 %v6182_v51, %v6162_v44  ;;  %v6299_v32 = vmul.f32 %v12275_v8, %v6285_v2  ;;  %v6300_v10 = vmul.f32 %v12279_v57, %v6285_v2 }
0x1da6   : > { %v6253_v1 = vmul.f32 %v6246_v20, %v12167_v25  ;;  %v6254_v56 = vmul.f32 %v6250_v60, %v12167_v25 }
0x1da7   : > { %v12189_v63 = vpop.permute.xlu1 %6216  ;;  %v6210_v14 = vadd.f32 %v6206_v3, %v6186_v19 }
0x1da8   : > { %v6229_v18 = vmul.f32 %v6222_v39, %v12189_v63  ;;  %v6230_v48 = vmul.f32 %v6226_v36, %v12189_v63 }
0x1daa   : > { %v6234_v43 = vadd.f32 %v6230_v48, %v6210_v14 }
0x1dac   : > { %v12191_v37 = vpop.permute.xlu1 %6236 }
0x1dad   : > { %v6251_v9 = vmul.f32 %v6246_v20, %v12191_v37  ;;  %v6252_v61 = vmul.f32 %v6250_v60, %v12191_v37 }
0x1daf   : > { %v6255_v22 = vadd.f32 %v6251_v9, %v6231_v26  ;;  %v6256_v59 = vadd.f32 %v6252_v61, %v6232_v41  ;;  %v6277_v41 = vmul.f32 %v6270_v52, %v12263_v30 }
0x1db1   : > { %v12196_v42 = vpop.permute.xlu1 %6323 }
0x1db2   : > { %v6349_v34 = vmul.f32 %v12242_v5, %v12196_v42  ;;  %v6350_v45 = vmul.f32 %v12245_v24, %v12196_v42  ;;  %v6431_v42 = vpop.permute.xlu0 %6430 }
0x1db4   : > { %v6387_v12 = vadd.f32 %v6383_v47, %v6349_v34  ;;  %v6388_v7 = vadd.f32 %v6384_v13, %v6350_v45 }
0x1db5   : > { %v12206_v16 = vpop.permute.xlu1 %6328 }
0x1db6   : > { %v6461_v44 = vpop.permute.xlu0 %6460  ;;  %v6351_v2 = vmul.f32 %v12242_v5, %v12206_v16  ;;  %v6352_v9 = vmul.f32 %v12245_v24, %v12206_v16  ;;  %v6258_v24 = vadd.f32 %v6254_v56, %v6234_v43 }
0x1dba   : > { %v12214_v11 = vpop.permute.xlu1 %6362 }
0x1dbb   : > { %v6385_v47 = vmul.f32 %v12236_v58, %v12214_v11  ;;  %v6386_v13 = vmul.f32 %v12239_v49, %v12214_v11  ;;  %v6453_v11 = vmul.f32 %v12258_v23, %v6431_v42  ;;  %v6454_v49 = vmul.f32 %v12261_v33, %v6431_v42 }
0x1dbd   : > { %v6389_v45 = vadd.f32 %v6385_v47, %v6351_v2  ;;  %v6390_v26 = vadd.f32 %v6386_v13, %v6352_v9 }
0x1dbf   : > { %v12225_v21 = vpop.permute.xlu1 %6260 }
0x1dc0   : > { %v6275_v37 = vmul.f32 %v6270_v52, %v12225_v21  ;;  %v6276_v38 = vmul.f32 %v6274_v53, %v12225_v21  ;;  %v6209_v21 = vadd.f32 %v6205_v40, %v6185_v0 }
0x1dc2   : > { %v6279_v31 = vadd.f32 %v6275_v37, %v6255_v22  ;;  %v6280_v51 = vadd.f32 %v6276_v38, %v6256_v59  ;;  %v6233_v36 = vadd.f32 %v6229_v18, %v6209_v21 }
0x1dc4   : > { %v6393_v29 = vpop.permute.xlu1 %6392  ;;  %v6303_v61 = vadd.f32 %v6299_v32, %v6279_v31  ;;  %v6304_v40 = vadd.f32 %v6300_v10, %v6280_v51  ;;  %v6257_v16 = vadd.f32 %v6253_v1, %v6233_v36 }
0x1dc5   : > { %v6417_v50 = vmul.f32 %v12252_v6, %v6393_v29  ;;  %v6418_v4 = vmul.f32 %v12255_v46, %v6393_v29 }
0x1dc7   : > { %v6421_v54 = vadd.f32 %v6417_v50, %v6387_v12  ;;  %v6422_v29 = vadd.f32 %v6418_v4, %v6388_v7  ;;  %v6281_v50 = vadd.f32 %v6277_v41, %v6257_v16 }
0x1dc8   : > { %v12281_v15 = vpop.permute.xlu1 %6396 }
0x1dc9   : > { %v6419_v25 = vmul.f32 %v12252_v6, %v12281_v15  ;;  %v6420_v20 = vmul.f32 %v12255_v46, %v12281_v15  ;;  %v6278_v6 = vmul.f32 %v6274_v53, %v12263_v30 }
0x1dcb   : > { %v6423_v15 = vadd.f32 %v6419_v25, %v6389_v45  ;;  %v6424_v38 = vadd.f32 %v6420_v20, %v6390_v26  ;;  %v6282_v4 = vadd.f32 %v6278_v6, %v6258_v24 }
0x1dcd   : > { %v6289_v55 = vpop.permute.xlu1 %6288  ;;  %v6457_v30 = vadd.f32 %v6453_v11, %v6423_v15  ;;  %v6458_v53 = vadd.f32 %v6454_v49, %v6424_v38 }
0x1dd2   : > { %v6427_v62 = vpop.permute.xlu1 %6426 }
0x1dd3   : > { %v6451_v39 = vmul.f32 %v12258_v23, %v6427_v62  ;;  %v6452_v63 = vmul.f32 %v12261_v33, %v6427_v62  ;;  %v6301_v23 = vmul.f32 %v12275_v8, %v6289_v55  ;;  %v6302_v33 = vmul.f32 %v12279_v57, %v6289_v55 }
0x1dd5   : > { %v6455_v27 = vadd.f32 %v6451_v39, %v6421_v54  ;;  %v6456_v28 = vadd.f32 %v6452_v63, %v6422_v29  ;;  %v6305_v52 = vadd.f32 %v6301_v23, %v6281_v50  ;;  %v6306_v18 = vadd.f32 %v6302_v33, %v6282_v4 }
0x1dd7   : > { %v6467_v58 = vadd.f32 %v6461_v44, %v6455_v27  ;;  %v6468_v60 = vadd.f32 %v6461_v44, %v6456_v28  ;;  %v6309_v3 = vpop.permute.xlu1 %6308 }
0x1dd8   : > { %v6315_v34 = vadd.f32 %v6309_v3, %v6303_v61  ;;  %v6316_v5 = vadd.f32 %v6309_v3, %v6304_v40 }
0x1dda   : > { %v12333_v37 = vadd.f32 %v6467_v58, %v6315_v34  ;;  %v12335_v46 = vadd.f32 %v6468_v60, %v6316_v5 }
0x1ddb   : > { %v6313_v0 = vpop.permute.xlu1 %6312 }
0x1ddc   : > { %v6475_v19 = vadd.f32 %v12335_v46, %v12333_v37  ;;  %v6317_v22 = vadd.f32 %v6313_v0, %v6305_v52  ;;  %v6318_v59 = vadd.f32 %v6313_v0, %v6306_v18 }
0x1dde   : > { %6476 = vadd.xlane.f32.xlu1 %v6475_v19 }
0x1de0   : > { %v6465_v48 = vpop.permute.xlu1 %6464 }
0x1de1   : > { %v6469_v42 = vadd.f32 %v6465_v48, %v6457_v30  ;;  %v6470_v32 = vadd.f32 %v6465_v48, %v6458_v53 }
0x1de3   : > { %v12341_v10 = vadd.f32 %v6469_v42, %v6317_v22  ;;  %v12343_v8 = vadd.f32 %v6470_v32, %v6318_v59 }
0x1de5   : > { %v6478_v57 = vadd.f32 %v12343_v8, %v12341_v10 }
0x1de7   : > { %6479 = vadd.xlane.f32.xlu0 %v6478_v57 }
0x1e6b   : > { %v6477_v55 = vpop.xlane.xlu1 %6476 }
0x1e6c   : > { %v6481_v12 = vmul.f32 0.00390625, %v6477_v55 }
0x1e6e   : > { %v6483_v21 = vmul.f32 %v12053_v17, %v6481_v12 }
0x1e70   : > { %v6486_v51 = vsel %vm6485_vm13, %v6483_v21, 0.0 }
0x1e74   : > { %v6480_v7 = vpop.xlane.xlu0 %6479 }
0x1e75   : > { %v6482_v14 = vmul.f32 0.00390625, %v6480_v7 }
0x1e77   : > { %v6484_v31 = vmul.f32 %v12129_v35, %v6482_v14 }
0x1e79   : > { %v6487_v62 = vsel %vm6485_vm13, %v6484_v31, 0.0 }
0x1e7a   : > { %v6488_v54 = vadd.f32 %v6487_v62, %v6486_v51 }
0x1e7c   : > { %v6489_v29 = vrot.slane %v6488_v54, 4 }
0x1e7e   : > { %v6490_v39 = vadd.f32 %v6489_v29, %v6488_v54 }
0x1e80   : > { %v6491_v63 = vrot.slane %v6490_v39, 2 }
0x1e82   : > { %v6492_v36 = vadd.f32 %v6491_v63, %v6490_v39 }
0x1e84   : > { %v6493_v43 = vrot.slane %v6492_v36, 1 }
0x1e86   : > { %v6494_v1 = vadd.f32 %v6493_v43, %v6492_v36 }
0x1e88   : > { %v6495_v56 = vmax.f32 %v6494_v1, 0.0 }
0x1e8a   : > { %6497 = vrot.lane.b32.xlu0 %v6495_v56, %s7415_s9 }
0x1efc   : > { %v6498_v44 = vpop.permute.xlu0 %6497 }
0x1efd   : > { %v6500_v47 = vmul.f32 %v12053_v17, %v6498_v44  ;;  %v6501_v13 = vmul.f32 %v12129_v35, %v6498_v44 }
0x1eff   : > { %6504 = vrot.lane.b32.xlu1 %v6500_v47, %s7416_s15 }
0x1f03   : > { %6506 = vrot.lane.b32.xlu1 %v6501_v13, %s7416_s15 }
0x1f71   : > { %v6505_v27 = vpop.permute.xlu1 %6504 }
0x1f72   : > { %v6511_v28 = vsel %vm6510_vm14, %v6505_v27, 0.0 }
0x1f73   : > { %6512 = vadd.xlane.f32.xlu0 %v6511_v28 }
0x1f75   : > { %v6507_v2 = vpop.permute.xlu1 %6506 }
0x1f76   : > { %v6514_v9 = vsel %vm6510_vm14, %v6507_v2, 0.0 }
0x1f77   : > { %6515 = vadd.xlane.f32.xlu1 %v6514_v9 }
0x2000   : > { %v6513_v61 = vpop.xlane.xlu0 %6512 }
0x2001   : > { %v6517_v40 = vsub.f32 0.0, %v6513_v61 }
0x2003   : > { %v6519_v25 = vmul.f32 1.442695, %v6517_v40 }
0x2004   : > { %v6516_v20 = vpop.xlane.xlu1 %6515 }
0x2005   : > { %7162 = vpow2.f32 %v6519_v25  ;;  %v6518_v17 = vsub.f32 0.0, %v6516_v20 }
0x2007   : > { %v6521_v58 = vmul.f32 1.442695, %v6518_v17 }
0x2009   : > { %7164 = vpow2.f32 %v6521_v58 }
0x200f   : > { %v7163_v60 = vpop.eup %7162 }
0x2010   : > { %v6523_v35 = vadd.f32 1.0, %v7163_v60 }
0x2012   : > { %7166 = vrcp.f32 %v6523_v35 }
0x2013   : > { %v7165_v3 = vpop.eup %7164 }
0x2014   : > { %v6524_v11 = vadd.f32 1.0, %v7165_v3 }
0x2016   : > { %7168 = vrcp.f32 %v6524_v11 }
0x201c   : > { %v7167_v49 = vpop.eup %7166 }
0x201d   : > { %v6529_v34 = vmul.f32 %v7167_v49, %v12333_v37  ;;  %v6530_v5 = vmul.f32 %v7167_v49, %v12335_v46 }
0x201f   : > { %6533 = vst [vmem:[%s232_s10] sm:$0xff] %v6529_v34  ;;  %6534 = vst [vmem:[%s232_s10 + $0x8] sm:$0xff] %v6530_v5 }
0x2020   : > { %v7169_v45 = vpop.eup %7168 }
0x2021   : > { %v6531_v26 = vmul.f32 %v7169_v45, %v12341_v10  ;;  %v6532_v16 = vmul.f32 %v7169_v45, %v12343_v8 }
0x2023   : > { %6535 = vst [vmem:[%s232_s10 + $0x10] sm:$0xff] %v6531_v26  ;;  %6536 = vst [vmem:[%s232_s10 + $0x18] sm:$0xff] %v6532_v16 }
0x2024   : > { %7220 = shalt.err (!%p7217_p7)
}
0x2025   : > { %s7221_s23 = scalar_lea.hbm %s12358_s7, 512  ;;  %s7225_s15 = scalar_lea.hbm %s12410_s5, 1024 }
0x2026   : > { %p7222_p8 = scmp.ne.s32.totalorder %s12358_s7, %s7221_s23  ;;  %p7226_p1 = scmp.lt.u32.totalorder %s12358_s7, %s12410_s5 }
0x2027   : > { %p7227_p0 = scmp.lt.u32.totalorder %s7225_s15, %s7221_s23  ;;  %p7229_p6 = scmp.lt.u32.totalorder %s7221_s23, %s12358_s7 }
0x2028   : > { %p7223_p11 = pnand %p7222_p8, %p14032_p9 }
0x2029   : > { %p7228_p5 = por %p7227_p0, %p7226_p1 }
0x202a   : > { %p7224_p13 = pneg %p7223_p11 }
0x202b   : > { %p7230_p10 = por %p7229_p6, %p7228_p5 }
0x202d   : > { %p7231_p12 = pnand %p7230_p10, %p7224_p13 }
0x202f   : > { %7234 = shalt.err (!%p7231_p12)
}
0x2030   : > { %s7418_s26 = smov 256   ;;  %s7419_s10 = smov 16  }
0x2031   : > { %6645 = dma.vmem_to_hbm [thread:$0]  (%p14032_p9), %s12360_s6, 512, %s12358_s7, %s12364_s22, %s7418_s26, %s7418_s26, %s7419_s10  }
0x2032 PF: > { %p6657_p2 = scmp.ge.s32.totalorder %s7273_s21, 2  ;;  %s6566_s13 = sand.u32 1, %s7261_s18  }
0x2033   : > { %p14033_p3 = scmp.ne.s32.totalorder %s12899_s29, 0  ;;  %s6567_s17 = scalar_lea.sflag [#allocation4], %s6566_s13 }
0x2035   : > { %p6652_p4 = pnand %p6657_p2, %p14033_p3 }
0x2037   : > { %7256 = dma.done.wait (!%p6652_p4), %s6567_s17, 512  }
0x2038   : > { %7258 = vsyncadd (!%p6652_p4), %s6567_s17, 4294966784  ;;  %p16_p7 = scmp.ge.s32.totalorder %s7475_s24, 4   ;;  %s14034_s18 = smov %s7265_s19 }
0x2039   : > { %s14035_s19 = smov %s7269_s20  ;;  %s14036_s20 = smov %s7486_s27 }
0x203a   : > { %s14037_s21 = smov %s7475_s24  ;;  %18 = sbr.rel (!%p16_p7) target bundleno = 4 (0x4), region = 80 }
0x2041   :  { %6572 = vsyncpa [#allocation3], 1 }
0x2042   :  { %6574 = vsyncpa [#allocation3 + $0x1], 1 }
0x2043   :  { %6575 = vsyncpa [#allocation4], 1 }
0x2044   :  { %6577 = vsyncpa [#allocation4 + $0x1], 1 }

</bundles_post_ra>
